<compile_context>
chip_gen: v7x
topology: tpu7x:2x2x1
jax: 0.10.0
libtpu: 0.0.40
codegen_flags: <defaults>
</compile_context>

<pallas_src>
import functools

import numpy as np
import jax
import jax.numpy as jnp
from jax.experimental import pallas as pl
from jax.experimental.pallas import tpu as pltpu

EMB = 64
LN_EPS = 1e-5
ROW_QUANTUM = 128        # row-tile granularity (multiple of f32/bf16 sublane tiles)
NODE_MAX_TILE = 1024
EDGE_MAX_TILE = 2048
HEAD_PAD = 128           # lane-dense padding of the 1-wide scoring-head output

_PARALLEL = pltpu.CompilerParams(dimension_semantics=("parallel",))


# ----------------------------------------------------------------------------
# small helpers
# ----------------------------------------------------------------------------
def _ln(x, g, b):
    """LayerNorm over the last axis in f32 (PyTorch semantics, eps=1e-5)."""
    mu = jnp.mean(x, axis=-1, keepdims=True)
    var = jnp.mean((x - mu) ** 2, axis=-1, keepdims=True)
    return (x - mu) * jax.lax.rsqrt(var + LN_EPS) * g + b


def _rep(shape):
    """BlockSpec for a parameter that stays resident across the row grid."""
    return pl.BlockSpec(shape, lambda i: (0,) * len(shape))


def _row_spec(tile, f):
    return pl.BlockSpec((tile, f), lambda i: (i, 0))


def _choose_tile(n, max_tile):
    """Row tile: multiple of ROW_QUANTUM, <= max_tile, >=2 grid steps when possible."""
    if n <= ROW_QUANTUM:
        return ROW_QUANTUM
    half = -(-n // 2)                         # aim for >=2 steps (v7x has 2 TCs)
    tile = -(-half // ROW_QUANTUM) * ROW_QUANTUM
    return min(tile, max_tile)


def _pad_rows(x, tile):
    n = x.shape[0]
    n_pad = -(-n // tile) * tile
    if n_pad == n:
        return x
    pad = [(0, n_pad - n)] + [(0, 0)] * (x.ndim - 1)
    return jnp.pad(x, pad)


# ----------------------------------------------------------------------------
# Pallas kernels
# ----------------------------------------------------------------------------
def embed_kernel(x_ref, g_ref, b_ref, w1_ref, b1_ref, w2_ref, b2_ref,
                 wp_ref, bp_ref, emb_ref, proj_ref):
    # LayerNorm -> Linear -> ReLU -> Linear -> ReLU, plus the stacked projections
    # (feature_module_left / feature_module_right of the following conv(s)).
    x = x_ref[...].astype(jnp.float32)
    h = _ln(x, g_ref[...], b_ref[...])
    h = jnp.maximum(jnp.dot(h.astype(jnp.bfloat16), w1_ref[...],
                            preferred_element_type=jnp.float32) + b1_ref[...], 0.0)
    h = jnp.maximum(jnp.dot(h.astype(jnp.bfloat16), w2_ref[...],
                            preferred_element_type=jnp.float32) + b2_ref[...], 0.0)
    emb = h.astype(jnp.bfloat16)
    emb_ref[...] = emb
    proj = (jnp.dot(emb, wp_ref[...], preferred_element_type=jnp.float32)
            + bp_ref[...])
    proj_ref[...] = proj.astype(jnp.bfloat16)


def message_kernel(slab_ref, econst_ref, g_ref, b_ref, wf_ref, bf_ref, msg_ref,
                   *, n_edges):
    # message = Linear( ReLU( LayerNorm( proj_j + edge_const + proj_i ) ) )
    # slab = lane-dense [proj_j | proj_i] (bf16, 128 wide); padded edge rows -> 0.
    tile = msg_ref.shape[0]
    slab = slab_ref[...].astype(jnp.float32)
    s = slab[:, :EMB] + slab[:, EMB:] + econst_ref[...]
    s = jnp.maximum(_ln(s, g_ref[...], b_ref[...]), 0.0)
    m = (jnp.dot(s.astype(jnp.bfloat16), wf_ref[...],
                 preferred_element_type=jnp.float32) + bf_ref[...])
    row = (pl.program_id(0) * tile
           + jax.lax.broadcasted_iota(jnp.int32, (tile, EMB), 0))
    m = jnp.where(row < n_edges, m, 0.0)       # mask padded edges in-kernel
    msg_ref[...] = m.astype(jnp.bfloat16)


def conv_out_kernel(agg_ref, right_ref, g_ref, b_ref, w1_ref, b1_ref,
                    w2_ref, b2_ref, wp_ref, bp_ref, y_ref, proj_ref):
    # Linear(concat([LN(agg), right])) -> ReLU -> Linear, plus the projections the
    # next conv needs of this (updated) node set.
    a = _ln(agg_ref[...], g_ref[...], b_ref[...]).astype(jnp.bfloat16)
    w1 = w1_ref[...]
    h = (jnp.dot(a, w1[:EMB, :], preferred_element_type=jnp.float32)
         + jnp.dot(right_ref[...], w1[EMB:, :], preferred_element_type=jnp.float32)
         + b1_ref[...])
    h = jnp.maximum(h, 0.0).astype(jnp.bfloat16)
    y = jnp.dot(h, w2_ref[...], preferred_element_type=jnp.float32) + b2_ref[...]
    y_bf = y.astype(jnp.bfloat16)
    y_ref[...] = y_bf
    proj = (jnp.dot(y_bf, wp_ref[...], preferred_element_type=jnp.float32)
            + bp_ref[...])
    proj_ref[...] = proj.astype(jnp.bfloat16)


def conv_out_head_kernel(agg_ref, right_ref, g_ref, b_ref, w1_ref, b1_ref,
                         w2_ref, b2_ref, wh1_ref, bh1_ref, wh2_ref, score_ref):
    # Last conv's output module fused with the scoring head:
    #   y  = Linear(ReLU(Linear(cat[LN(agg), right])))
    #   sc = Linear(ReLU(Linear(y)))  with final Linear(EMB, 1, bias=False) zero-padded
    #        to 128 lanes so stores are unmasked; column 0 holds the score.
    a = _ln(agg_ref[...], g_ref[...], b_ref[...]).astype(jnp.bfloat16)
    w1 = w1_ref[...]
    h = (jnp.dot(a, w1[:EMB, :], preferred_element_type=jnp.float32)
         + jnp.dot(right_ref[...], w1[EMB:, :], preferred_element_type=jnp.float32)
         + b1_ref[...])
    h = jnp.maximum(h, 0.0).astype(jnp.bfloat16)
    y = jnp.dot(h, w2_ref[...], preferred_element_type=jnp.float32) + b2_ref[...]
    h2 = jnp.maximum(jnp.dot(y.astype(jnp.bfloat16), wh1_ref[...],
                             preferred_element_type=jnp.float32) + bh1_ref[...], 0.0)
    score_ref[...] = jnp.dot(h2.astype(jnp.bfloat16), wh2_ref[...],
                             preferred_element_type=jnp.float32)


# ----------------------------------------------------------------------------
# pallas_call wrappers
# ----------------------------------------------------------------------------
def _embed(x, p, tile):
    n, f = x.shape
    pcols = p["wp"].shape[1]
    return pl.pallas_call(
        embed_kernel,
        grid=(n // tile,),
        in_specs=[_row_spec(tile, f), _rep((1, f)), _rep((1, f)),
                  _rep((f, EMB)), _rep((1, EMB)),
                  _rep((EMB, EMB)), _rep((1, EMB)),
                  _rep((EMB, pcols)), _rep((1, pcols))],
        out_specs=(_row_spec(tile, EMB), _row_spec(tile, pcols)),
        out_shape=(jax.ShapeDtypeStruct((n, EMB), jnp.bfloat16),
                   jax.ShapeDtypeStruct((n, pcols), jnp.bfloat16)),
        compiler_params=_PARALLEL,
    )(x, p["ln_g"], p["ln_b"], p["w1"], p["b1"], p["w2"], p["b2"],
      p["wp"], p["bp"])


def _messages(slab, p, tile, n_edges):
    n = slab.shape[0]
    kern = functools.partial(message_kernel, n_edges=n_edges)
    return pl.pallas_call(
        kern,
        grid=(n // tile,),
        in_specs=[_row_spec(tile, 2 * EMB),
                  _rep((1, EMB)), _rep((1, EMB)), _rep((1, EMB)),
                  _rep((EMB, EMB)), _rep((1, EMB))],
        out_specs=_row_spec(tile, EMB),
        out_shape=jax.ShapeDtypeStruct((n, EMB), jnp.bfloat16),
        compiler_params=_PARALLEL,
    )(slab, p["econst"], p["ln_g"], p["ln_b"], p["wf"], p["bf"])


def _conv_out(agg, right, p, tile):
    n = agg.shape[0]
    pcols = p["wp"].shape[1]
    return pl.pallas_call(
        conv_out_kernel,
        grid=(n // tile,),
        in_specs=[_row_spec(tile, EMB), _row_spec(tile, EMB),
                  _rep((1, EMB)), _rep((1, EMB)),
                  _rep((2 * EMB, EMB)), _rep((1, EMB)),
                  _rep((EMB, EMB)), _rep((1, EMB)),
                  _rep((EMB, pcols)), _rep((1, pcols))],
        out_specs=(_row_spec(tile, EMB), _row_spec(tile, pcols)),
        out_shape=(jax.ShapeDtypeStruct((n, EMB), jnp.bfloat16),
                   jax.ShapeDtypeStruct((n, pcols), jnp.bfloat16)),
        compiler_params=_PARALLEL,
    )(agg, right, p["ln_g"], p["ln_b"], p["w1"], p["b1"], p["w2"], p["b2"],
      p["wp"], p["bp"])


def _conv_out_head(agg, right, p, tile):
    n = agg.shape[0]
    return pl.pallas_call(
        conv_out_head_kernel,
        grid=(n // tile,),
        in_specs=[_row_spec(tile, EMB), _row_spec(tile, EMB),
                  _rep((1, EMB)), _rep((1, EMB)),
                  _rep((2 * EMB, EMB)), _rep((1, EMB)),
                  _rep((EMB, EMB)), _rep((1, EMB)),
                  _rep((EMB, EMB)), _rep((1, EMB)),
                  _rep((EMB, HEAD_PAD))],
        out_specs=_row_spec(tile, HEAD_PAD),
        out_shape=jax.ShapeDtypeStruct((n, HEAD_PAD), jnp.float32),
        compiler_params=_PARALLEL,
    )(agg, right, p["ln_g"], p["ln_b"], p["w1"], p["b1"], p["w2"], p["b2"],
      p["wh1"], p["bh1"], p["wh2"])


# ----------------------------------------------------------------------------
# forward pass (JAX glue around the kernels)
# ----------------------------------------------------------------------------
def gnn_policy_forward(pp, constraint_features, edge_indices, edge_features,
                       variable_features):
    # edge_embedding = LayerNorm over a size-1 feature axis: the normalized value is
    # identically 0, so its output is edge_ln_b regardless of edge values (exact
    # PyTorch semantics).  The per-conv edge contribution is the constant row
    # edge_ln_b * w_edge, prefolded into pp[*]['econst']; edge values never stream.
    del edge_features

    n_cons = constraint_features.shape[0]
    n_vars = variable_features.shape[0]
    n_edges = edge_indices.shape[1]

    cons_tile = _choose_tile(n_cons, NODE_MAX_TILE)
    var_tile = _choose_tile(n_vars, NODE_MAX_TILE)
    edge_tile = _choose_tile(n_edges, EDGE_MAX_TILE)

    cons_x = _pad_rows(constraint_features.astype(jnp.float32), cons_tile)
    var_x = _pad_rows(variable_features.astype(jnp.float32), var_tile)
    n_cons_pad, n_vars_pad = cons_x.shape[0], var_x.shape[0]

    cons_idx = _pad_rows(edge_indices[0].astype(jnp.int32), edge_tile)
    var_idx = _pad_rows(edge_indices[1].astype(jnp.int32), edge_tile)

    # Embeddings fused with the next convs' node projections:
    #   cons_proj           = feature_module_left(cons_emb)   of conv_v_to_c  (+bias)
    #   var_proj[:, :EMB]   = feature_module_right(var_emb)   of conv_v_to_c
    #   var_proj[:, EMB:]   = feature_module_left(var_emb)    of conv_c_to_v  (+bias)
    cons_emb, cons_proj = _embed(cons_x, pp["cons_embedding"], cons_tile)
    var_emb, var_proj = _embed(var_x, pp["var_embedding"], var_tile)

    def bipartite_conv(msg_p, out_p, src_proj, tgt_proj, src_idx, tgt_idx,
                       right, n_tgt_pad, tgt_tile, out_fn):
        # Per-edge gather of pre-projected node rows into one lane-dense
        # (n_edges_pad, 128) bf16 slab: [proj_j | proj_i].
        # TODO(synk): fuse this gather into the message kernel (scalar-prefetched edge
        # indices + VMEM-resident projection tables) to drop one edge-stream round trip.
        slab = jnp.concatenate([src_proj[src_idx], tgt_proj[tgt_idx]], axis=-1)
        msg = _messages(slab, msg_p, edge_tile, n_edges)
        # 'add' aggregation onto target nodes; accumulate in f32 for accuracy.
        # TODO(synk): replace the XLA scatter-add with a sorted-by-target Pallas
        # segment sum fused with the message kernel output.
        agg = jnp.zeros((n_tgt_pad, EMB), jnp.float32).at[tgt_idx].add(
            msg.astype(jnp.float32))
        return out_fn(agg, right, out_p, tgt_tile)

    # conv_v_to_c : src = variables, tgt = constraints
    cons1, cons1_proj = bipartite_conv(
        pp["conv1_msg"], pp["conv1_out"], var_proj[:, :EMB], cons_proj,
        var_idx, cons_idx, cons_emb, n_cons_pad, cons_tile, _conv_out)
    # conv_c_to_v : src = constraints (updated), tgt = variables
    var1, var1_proj = bipartite_conv(
        pp["conv2_msg"], pp["conv2_out"], cons1_proj[:, :EMB], var_proj[:, EMB:],
        cons_idx, var_idx, var_emb, n_vars_pad, var_tile, _conv_out)
    # conv_v_to_c2
    cons2, cons2_proj = bipartite_conv(
        pp["conv3_msg"], pp["conv3_out"], var1_proj[:, :EMB], cons1_proj[:, EMB:],
        var_idx, cons_idx, cons1, n_cons_pad, cons_tile, _conv_out)
    # conv_c_to_v2 with the scoring head fused into the output kernel
    score = bipartite_conv(
        pp["conv4_msg"], pp["conv4_head"], cons2_proj, var1_proj[:, EMB:],
        cons_idx, var_idx, var1, n_vars_pad, var_tile, _conv_out_head)
    del cons2  # final constraint features are not consumed downstream

    return score[:n_vars, 0]   # drop row + lane padding; == .squeeze(-1)


# ----------------------------------------------------------------------------
# parameter initialization (PyTorch-style shapes & defaults) + kernel-ready prep
# ----------------------------------------------------------------------------
def init_linear(key, fan_in, fan_out, bias=True):
    k1, k2 = jax.random.split(key)
    bound = 1.0 / np.sqrt(fan_in)
    w = jax.random.uniform(k1, (fan_in, fan_out), jnp.float32, -bound, bound)
    b = (jax.random.uniform(k2, (fan_out,), jnp.float32, -bound, bound)
         if bias else jnp.zeros((fan_out,), jnp.float32))
    return w, b


def init_embedding(key, in_feats):
    k1, k2 = jax.random.split(key)
    w1, b1 = init_linear(k1, in_feats, EMB)
    w2, b2 = init_linear(k2, EMB, EMB)
    return dict(g=jnp.ones((in_feats,), jnp.float32),
                b=jnp.zeros((in_feats,), jnp.float32),
                w1=w1, b1=b1, w2=w2, b2=b2)


def init_conv(key):
    ks = jax.random.split(key, 6)
    w_left, b_left = init_linear(ks[0], EMB, EMB)            # feature_module_left
    w_edge, _ = init_linear(ks[1], 1, EMB, bias=False)       # feature_module_edge
    w_right, _ = init_linear(ks[2], EMB, EMB, bias=False)    # feature_module_right
    w_fin, b_fin = init_linear(ks[3], EMB, EMB)              # feature_module_final[2]
    w_o1, b_o1 = init_linear(ks[4], 2 * EMB, EMB)            # output_module[0]
    w_o2, b_o2 = init_linear(ks[5], EMB, EMB)                # output_module[2]
    return dict(
        w_left=w_left, b_left=b_left, w_edge=w_edge.reshape(1, EMB), w_right=w_right,
        ln_fin_g=jnp.ones((EMB,), jnp.float32), ln_fin_b=jnp.zeros((EMB,), jnp.float32),
        w_fin=w_fin, b_fin=b_fin,
        ln_post_g=jnp.ones((EMB,), jnp.float32), ln_post_b=jnp.zeros((EMB,), jnp.float32),
        w_o1=w_o1, b_o1=b_o1, w_o2=w_o2, b_o2=b_o2)


def init_params(key, cons_nfeats=4, var_nfeats=6):
    ks = jax.random.split(key, 8)
    out_w1, out_b1 = init_linear(ks[6], EMB, EMB)
    out_w2, _ = init_linear(ks[7], EMB, 1, bias=False)        # bias=False per the spec
    return dict(
        cons_embedding=init_embedding(ks[0], cons_nfeats),
        var_embedding=init_embedding(ks[1], var_nfeats),
        edge_ln_g=jnp.ones((1,), jnp.float32),
        edge_ln_b=jnp.zeros((1,), jnp.float32),
        conv_v_to_c=init_conv(ks[2]), conv_c_to_v=init_conv(ks[3]),
        conv_v_to_c2=init_conv(ks[4]), conv_c_to_v2=init_conv(ks[5]),
        out_w1=out_w1, out_b1=out_b1, out_w2=out_w2)


def prepare_params(raw):
    """One-time, outside-the-hot-path conversion to kernel-ready layout (bf16 weights,
    f32 biases/LN params, stacked projection weights, folded edge constant)."""
    bf16, f32 = jnp.bfloat16, jnp.float32

    def row(v):
        return v.reshape(1, -1).astype(f32)

    def emb_block(e, wp, bp):
        return dict(ln_g=row(e["g"]), ln_b=row(e["b"]),
                    w1=e["w1"].astype(bf16), b1=row(e["b1"]),
                    w2=e["w2"].astype(bf16), b2=row(e["b2"]),
                    wp=wp.astype(bf16), bp=row(bp))

    def msg_block(c):
        econst = (raw["edge_ln_b"].reshape(1, 1) * c["w_edge"]).astype(f32)
        return dict(econst=econst, ln_g=row(c["ln_fin_g"]), ln_b=row(c["ln_fin_b"]),
                    wf=c["w_fin"].astype(bf16), bf=row(c["b_fin"]))

    def out_block(c, wp, bp):
        return dict(ln_g=row(c["ln_post_g"]), ln_b=row(c["ln_post_b"]),
                    w1=c["w_o1"].astype(bf16), b1=row(c["b_o1"]),
                    w2=c["w_o2"].astype(bf16), b2=row(c["b_o2"]),
                    wp=wp.astype(bf16), bp=row(bp))

    c1, c2 = raw["conv_v_to_c"], raw["conv_c_to_v"]
    c3, c4 = raw["conv_v_to_c2"], raw["conv_c_to_v2"]
    z = jnp.zeros((EMB,), f32)

    return dict(
        cons_embedding=emb_block(raw["cons_embedding"], c1["w_left"], c1["b_left"]),
        var_embedding=emb_block(raw["var_embedding"],
                                jnp.concatenate([c1["w_right"], c2["w_left"]], axis=1),
                                jnp.concatenate([z, c2["b_left"]])),
        conv1_msg=msg_block(c1),
        conv1_out=out_block(c1, jnp.concatenate([c2["w_right"], c3["w_left"]], axis=1),
                            jnp.concatenate([z, c3["b_left"]])),
        conv2_msg=msg_block(c2),
        conv2_out=out_block(c2, jnp.concatenate([c3["w_right"], c4["w_left"]], axis=1),
                            jnp.concatenate([z, c4["b_left"]])),
        conv3_msg=msg_block(c3),
        conv3_out=out_block(c3, c4["w_right"], z),
        conv4_msg=msg_block(c4),
        conv4_head=dict(ln_g=row(c4["ln_post_g"]), ln_b=row(c4["ln_post_b"]),
                        w1=c4["w_o1"].astype(bf16), b1=row(c4["b_o1"]),
                        w2=c4["w_o2"].astype(bf16), b2=row(c4["b_o2"]),
                        wh1=raw["out_w1"].astype(bf16), bh1=row(raw["out_b1"]),
                        wh2=jnp.pad(raw["out_w2"],
                                    ((0, 0), (0, HEAD_PAD - 1))).astype(bf16)),
    )


# ----------------------------------------------------------------------------
if __name__ == "__main__":
    key = jax.random.PRNGKey(0)
    kp, k1, k2, k3, k4, k5 = jax.random.split(key, 6)

    # deliberately not multiples of the row tile: exercises padding + masking paths
    n_cons, n_vars, n_edges = 20, 30, 75
    cons_nfeats, var_nfeats = 4, 6

    raw_params = init_params(kp, cons_nfeats, var_nfeats)
    params = prepare_params(raw_params)       # hoisted out of the jitted hot path

    constraint_features = jax.random.normal(k1, (n_cons, cons_nfeats), jnp.float32)
    variable_features = jax.random.normal(k2, (n_vars, var_nfeats), jnp.float32)
    edge_features = jax.random.normal(k3, (n_edges, 1), jnp.float32)
    edge_indices = jnp.stack([
        jax.random.randint(k4, (n_edges,), 0, n_cons, dtype=jnp.int32),
        jax.random.randint(k5, (n_edges,), 0, n_vars, dtype=jnp.int32),
    ], axis=0)

    fwd = jax.jit(gnn_policy_forward)
    out = fwd(params, constraint_features, edge_indices,
              edge_features, variable_features)
    out = jax.block_until_ready(out)
    assert out.shape == (n_vars,), out.shape
    assert bool(jnp.all(jnp.isfinite(out)))
    print("KERNEL_OK")
</pallas_src>

<mosaic_0001>
module attributes {stable_mosaic.version = 11 : i64} {
  func.func @embed_kernel(%arg0: i32, %arg1: memref<128x6xf32, #tpu.memory_space<vmem>>, %arg2: memref<1x6xf32, #tpu.memory_space<vmem>>, %arg3: memref<1x6xf32, #tpu.memory_space<vmem>>, %arg4: memref<6x64xbf16, #tpu.memory_space<vmem>>, %arg5: memref<1x64xf32, #tpu.memory_space<vmem>>, %arg6: memref<64x64xbf16, #tpu.memory_space<vmem>>, %arg7: memref<1x64xf32, #tpu.memory_space<vmem>>, %arg8: memref<64x128xbf16, #tpu.memory_space<vmem>>, %arg9: memref<1x128xf32, #tpu.memory_space<vmem>>, %arg10: memref<128x64xbf16, #tpu.memory_space<vmem>>, %arg11: memref<128x128xbf16, #tpu.memory_space<vmem>>) attributes {dimension_semantics = [#tpu.dimension_semantics<parallel>], iteration_bounds = array<i64: 1>, scalar_prefetch = 0 : i64, scratch_operands = 0 : i64, tpu.core_type = #tpu.core_type<tc>, window_params = [{transform_indices = @transform_0, window_bounds = array<i64: 128, 6>}, {pipeline_mode = #tpu.pipeline_mode<synchronous>, transform_indices = @transform_1, window_bounds = array<i64: 1, 6>}, {pipeline_mode = #tpu.pipeline_mode<synchronous>, transform_indices = @transform_2, window_bounds = array<i64: 1, 6>}, {pipeline_mode = #tpu.pipeline_mode<synchronous>, transform_indices = @transform_3, window_bounds = array<i64: 6, 64>}, {pipeline_mode = #tpu.pipeline_mode<synchronous>, transform_indices = @transform_4, window_bounds = array<i64: 1, 64>}, {pipeline_mode = #tpu.pipeline_mode<synchronous>, transform_indices = @transform_5, window_bounds = array<i64: 64, 64>}, {pipeline_mode = #tpu.pipeline_mode<synchronous>, transform_indices = @transform_6, window_bounds = array<i64: 1, 64>}, {pipeline_mode = #tpu.pipeline_mode<synchronous>, transform_indices = @transform_7, window_bounds = array<i64: 64, 128>}, {pipeline_mode = #tpu.pipeline_mode<synchronous>, transform_indices = @transform_8, window_bounds = array<i64: 1, 128>}, {transform_indices = @transform_9, window_bounds = array<i64: 128, 64>}, {transform_indices = @transform_10, window_bounds = array<i64: 128, 128>}]} {
    %c0 = arith.constant 0 : index
    %c0_0 = arith.constant 0 : index
    %0 = vector.load %arg1[%c0, %c0_0] : memref<128x6xf32, #tpu.memory_space<vmem>>, vector<128x6xf32>
    %c0_1 = arith.constant 0 : index
    %c0_2 = arith.constant 0 : index
    %1 = vector.load %arg2[%c0_1, %c0_2] : memref<1x6xf32, #tpu.memory_space<vmem>>, vector<1x6xf32>
    %c0_3 = arith.constant 0 : index
    %c0_4 = arith.constant 0 : index
    %2 = vector.load %arg3[%c0_3, %c0_4] : memref<1x6xf32, #tpu.memory_space<vmem>>, vector<1x6xf32>
    %cst = arith.constant dense<0.000000e+00> : vector<128xf32>
    %3 = vector.multi_reduction <add>, %0, %cst [1] : vector<128x6xf32> to vector<128xf32>
    %4 = vector.shape_cast %3 : vector<128xf32> to vector<128x1xf32>
    %cst_5 = arith.constant 6.000000e+00 : f32
    %5 = vector.broadcast %cst_5 : f32 to vector<128x1xf32>
    %6 = arith.divf %4, %5 : vector<128x1xf32>
    %7 = vector.broadcast %6 : vector<128x1xf32> to vector<128x6xf32>
    %8 = arith.subf %0, %7 : vector<128x6xf32>
    %9 = arith.mulf %8, %8 : vector<128x6xf32>
    %cst_6 = arith.constant dense<0.000000e+00> : vector<128xf32>
    %10 = vector.multi_reduction <add>, %9, %cst_6 [1] : vector<128x6xf32> to vector<128xf32>
    %11 = vector.shape_cast %10 : vector<128xf32> to vector<128x1xf32>
    %cst_7 = arith.constant 6.000000e+00 : f32
    %12 = vector.broadcast %cst_7 : f32 to vector<128x1xf32>
    %13 = arith.divf %11, %12 : vector<128x1xf32>
    %14 = vector.broadcast %6 : vector<128x1xf32> to vector<128x6xf32>
    %15 = arith.subf %0, %14 : vector<128x6xf32>
    %cst_8 = arith.constant 9.99999974E-6 : f32
    %16 = vector.broadcast %cst_8 : f32 to vector<128x1xf32>
    %17 = arith.addf %13, %16 : vector<128x1xf32>
    %18 = math.rsqrt %17 : vector<128x1xf32>
    %19 = vector.broadcast %18 : vector<128x1xf32> to vector<128x6xf32>
    %20 = arith.mulf %15, %19 : vector<128x6xf32>
    %21 = vector.broadcast %1 : vector<1x6xf32> to vector<128x6xf32>
    %22 = arith.mulf %20, %21 : vector<128x6xf32>
    %23 = vector.broadcast %2 : vector<1x6xf32> to vector<128x6xf32>
    %24 = arith.addf %22, %23 : vector<128x6xf32>
    %25 = arith.truncf %24 : vector<128x6xf32> to vector<128x6xbf16>
    %c0_9 = arith.constant 0 : index
    %c0_10 = arith.constant 0 : index
    %26 = vector.load %arg4[%c0_9, %c0_10] : memref<6x64xbf16, #tpu.memory_space<vmem>>, vector<6x64xbf16>
    %cst_11 = arith.constant dense<0.000000e+00> : vector<128x64xf32>
    %27 = tpu.matmul %25, %26, %cst_11 {dimension_numbers = #tpu.dot_dimension_numbers<[1], [0], [0], [1], [0, 0, 1, 1], [], []>} : vector<128x6xbf16>, vector<6x64xbf16>, vector<128x64xf32> -> vector<128x64xf32>
    %c0_12 = arith.constant 0 : index
    %c0_13 = arith.constant 0 : index
    %28 = vector.load %arg5[%c0_12, %c0_13] : memref<1x64xf32, #tpu.memory_space<vmem>>, vector<1x64xf32>
    %29 = vector.broadcast %28 : vector<1x64xf32> to vector<128x64xf32>
    %30 = arith.addf %27, %29 : vector<128x64xf32>
    %cst_14 = arith.constant 0.000000e+00 : f32
    %31 = vector.broadcast %cst_14 : f32 to vector<128x64xf32>
    %32 = arith.maximumf %30, %31 : vector<128x64xf32>
    %33 = arith.truncf %32 : vector<128x64xf32> to vector<128x64xbf16>
    %c0_15 = arith.constant 0 : index
    %c0_16 = arith.constant 0 : index
    %34 = vector.load %arg6[%c0_15, %c0_16] : memref<64x64xbf16, #tpu.memory_space<vmem>>, vector<64x64xbf16>
    %cst_17 = arith.constant dense<0.000000e+00> : vector<128x64xf32>
    %35 = tpu.matmul %33, %34, %cst_17 {dimension_numbers = #tpu.dot_dimension_numbers<[1], [0], [0], [1], [0, 0, 1, 1], [], []>} : vector<128x64xbf16>, vector<64x64xbf16>, vector<128x64xf32> -> vector<128x64xf32>
    %c0_18 = arith.constant 0 : index
    %c0_19 = arith.constant 0 : index
    %36 = vector.load %arg7[%c0_18, %c0_19] : memref<1x64xf32, #tpu.memory_space<vmem>>, vector<1x64xf32>
    %37 = vector.broadcast %36 : vector<1x64xf32> to vector<128x64xf32>
    %38 = arith.addf %35, %37 : vector<128x64xf32>
    %cst_20 = arith.constant 0.000000e+00 : f32
    %39 = vector.broadcast %cst_20 : f32 to vector<128x64xf32>
    %40 = arith.maximumf %38, %39 : vector<128x64xf32>
    %41 = arith.truncf %40 : vector<128x64xf32> to vector<128x64xbf16>
    %c0_21 = arith.constant 0 : index
    %c0_22 = arith.constant 0 : index
    %42 = vector.load %arg10[%c0_21, %c0_22] : memref<128x64xbf16, #tpu.memory_space<vmem>>, vector<128x64xbf16>
    tpu.vector_store %arg10[%c0_21, %c0_22], %41 {strides = array<i32>} : memref<128x64xbf16, #tpu.memory_space<vmem>>, vector<128x64xbf16>,
    %c0_23 = arith.constant 0 : index
    %c0_24 = arith.constant 0 : index
    %43 = vector.load %arg8[%c0_23, %c0_24] : memref<64x128xbf16, #tpu.memory_space<vmem>>, vector<64x128xbf16>
    %cst_25 = arith.constant dense<0.000000e+00> : vector<128x128xf32>
    %44 = tpu.matmul %41, %43, %cst_25 {dimension_numbers = #tpu.dot_dimension_numbers<[1], [0], [0], [1], [0, 0, 1, 1], [], []>} : vector<128x64xbf16>, vector<64x128xbf16>, vector<128x128xf32> -> vector<128x128xf32>
    %c0_26 = arith.constant 0 : index
    %c0_27 = arith.constant 0 : index
    %45 = vector.load %arg9[%c0_26, %c0_27] : memref<1x128xf32, #tpu.memory_space<vmem>>, vector<1x128xf32>
    %46 = vector.broadcast %45 : vector<1x128xf32> to vector<128x128xf32>
    %47 = arith.addf %44, %46 : vector<128x128xf32>
    %48 = arith.truncf %47 : vector<128x128xf32> to vector<128x128xbf16>
    %c0_28 = arith.constant 0 : index
    %c0_29 = arith.constant 0 : index
    %49 = vector.load %arg11[%c0_28, %c0_29] : memref<128x128xbf16, #tpu.memory_space<vmem>>, vector<128x128xbf16>
    tpu.vector_store %arg11[%c0_28, %c0_29], %48 {strides = array<i32>} : memref<128x128xbf16, #tpu.memory_space<vmem>>, vector<128x128xbf16>,
    return
  }
  func.func @transform_0(%arg0: i32) -> (i32, i32) {
    %c0_i32 = arith.constant 0 : i32
    %c0_i32_0 = arith.constant 0 : i32
    return %arg0, %c0_i32 : i32, i32
  }
  func.func @transform_1(%arg0: i32) -> (i32, i32) {
    %c0_i32 = arith.constant 0 : i32
    %c0_i32_0 = arith.constant 0 : i32
    %c0_i32_1 = arith.constant 0 : i32
    return %c0_i32, %c0_i32_0 : i32, i32
  }
  func.func @transform_2(%arg0: i32) -> (i32, i32) {
    %c0_i32 = arith.constant 0 : i32
    %c0_i32_0 = arith.constant 0 : i32
    %c0_i32_1 = arith.constant 0 : i32
    return %c0_i32, %c0_i32_0 : i32, i32
  }
  func.func @transform_3(%arg0: i32) -> (i32, i32) {
    %c0_i32 = arith.constant 0 : i32
    %c0_i32_0 = arith.constant 0 : i32
    %c0_i32_1 = arith.constant 0 : i32
    return %c0_i32, %c0_i32_0 : i32, i32
  }
  func.func @transform_4(%arg0: i32) -> (i32, i32) {
    %c0_i32 = arith.constant 0 : i32
    %c0_i32_0 = arith.constant 0 : i32
    %c0_i32_1 = arith.constant 0 : i32
    return %c0_i32, %c0_i32_0 : i32, i32
  }
  func.func @transform_5(%arg0: i32) -> (i32, i32) {
    %c0_i32 = arith.constant 0 : i32
    %c0_i32_0 = arith.constant 0 : i32
    %c0_i32_1 = arith.constant 0 : i32
    return %c0_i32, %c0_i32_0 : i32, i32
  }
  func.func @transform_6(%arg0: i32) -> (i32, i32) {
    %c0_i32 = arith.constant 0 : i32
    %c0_i32_0 = arith.constant 0 : i32
    %c0_i32_1 = arith.constant 0 : i32
    return %c0_i32, %c0_i32_0 : i32, i32
  }
  func.func @transform_7(%arg0: i32) -> (i32, i32) {
    %c0_i32 = arith.constant 0 : i32
    %c0_i32_0 = arith.constant 0 : i32
    %c0_i32_1 = arith.constant 0 : i32
    return %c0_i32, %c0_i32_0 : i32, i32
  }
  func.func @transform_8(%arg0: i32) -> (i32, i32) {
    %c0_i32 = arith.constant 0 : i32
    %c0_i32_0 = arith.constant 0 : i32
    %c0_i32_1 = arith.constant 0 : i32
    return %c0_i32, %c0_i32_0 : i32, i32
  }
  func.func @transform_9(%arg0: i32) -> (i32, i32) {
    %c0_i32 = arith.constant 0 : i32
    %c0_i32_0 = arith.constant 0 : i32
    return %arg0, %c0_i32 : i32, i32
  }
  func.func @transform_10(%arg0: i32) -> (i32, i32) {
    %c0_i32 = arith.constant 0 : i32
    %c0_i32_0 = arith.constant 0 : i32
    return %arg0, %c0_i32 : i32, i32
  }
}

module attributes {stable_mosaic.version = 11 : i64} {
  func.func @embed_kernel(%arg0: i32, %arg1: memref<128x4xf32, #tpu.memory_space<vmem>>, %arg2: memref<1x4xf32, #tpu.memory_space<vmem>>, %arg3: memref<1x4xf32, #tpu.memory_space<vmem>>, %arg4: memref<4x64xbf16, #tpu.memory_space<vmem>>, %arg5: memref<1x64xf32, #tpu.memory_space<vmem>>, %arg6: memref<64x64xbf16, #tpu.memory_space<vmem>>, %arg7: memref<1x64xf32, #tpu.memory_space<vmem>>, %arg8: memref<64x64xbf16, #tpu.memory_space<vmem>>, %arg9: memref<1x64xf32, #tpu.memory_space<vmem>>, %arg10: memref<128x64xbf16, #tpu.memory_space<vmem>>, %arg11: memref<128x64xbf16, #tpu.memory_space<vmem>>) attributes {dimension_semantics = [#tpu.dimension_semantics<parallel>], iteration_bounds = array<i64: 1>, scalar_prefetch = 0 : i64, scratch_operands = 0 : i64, tpu.core_type = #tpu.core_type<tc>, window_params = [{transform_indices = @transform_0, window_bounds = array<i64: 128, 4>}, {pipeline_mode = #tpu.pipeline_mode<synchronous>, transform_indices = @transform_1, window_bounds = array<i64: 1, 4>}, {pipeline_mode = #tpu.pipeline_mode<synchronous>, transform_indices = @transform_2, window_bounds = array<i64: 1, 4>}, {pipeline_mode = #tpu.pipeline_mode<synchronous>, transform_indices = @transform_3, window_bounds = array<i64: 4, 64>}, {pipeline_mode = #tpu.pipeline_mode<synchronous>, transform_indices = @transform_4, window_bounds = array<i64: 1, 64>}, {pipeline_mode = #tpu.pipeline_mode<synchronous>, transform_indices = @transform_5, window_bounds = array<i64: 64, 64>}, {pipeline_mode = #tpu.pipeline_mode<synchronous>, transform_indices = @transform_6, window_bounds = array<i64: 1, 64>}, {pipeline_mode = #tpu.pipeline_mode<synchronous>, transform_indices = @transform_7, window_bounds = array<i64: 64, 64>}, {pipeline_mode = #tpu.pipeline_mode<synchronous>, transform_indices = @transform_8, window_bounds = array<i64: 1, 64>}, {transform_indices = @transform_9, window_bounds = array<i64: 128, 64>}, {transform_indices = @transform_10, window_bounds = array<i64: 128, 64>}]} {
    %c0 = arith.constant 0 : index
    %c0_0 = arith.constant 0 : index
    %0 = vector.load %arg1[%c0, %c0_0] : memref<128x4xf32, #tpu.memory_space<vmem>>, vector<128x4xf32>
    %c0_1 = arith.constant 0 : index
    %c0_2 = arith.constant 0 : index
    %1 = vector.load %arg2[%c0_1, %c0_2] : memref<1x4xf32, #tpu.memory_space<vmem>>, vector<1x4xf32>
    %c0_3 = arith.constant 0 : index
    %c0_4 = arith.constant 0 : index
    %2 = vector.load %arg3[%c0_3, %c0_4] : memref<1x4xf32, #tpu.memory_space<vmem>>, vector<1x4xf32>
    %cst = arith.constant dense<0.000000e+00> : vector<128xf32>
    %3 = vector.multi_reduction <add>, %0, %cst [1] : vector<128x4xf32> to vector<128xf32>
    %4 = vector.shape_cast %3 : vector<128xf32> to vector<128x1xf32>
    %cst_5 = arith.constant 4.000000e+00 : f32
    %5 = vector.broadcast %cst_5 : f32 to vector<128x1xf32>
    %6 = arith.divf %4, %5 : vector<128x1xf32>
    %7 = vector.broadcast %6 : vector<128x1xf32> to vector<128x4xf32>
    %8 = arith.subf %0, %7 : vector<128x4xf32>
    %9 = arith.mulf %8, %8 : vector<128x4xf32>
    %cst_6 = arith.constant dense<0.000000e+00> : vector<128xf32>
    %10 = vector.multi_reduction <add>, %9, %cst_6 [1] : vector<128x4xf32> to vector<128xf32>
    %11 = vector.shape_cast %10 : vector<128xf32> to vector<128x1xf32>
    %cst_7 = arith.constant 4.000000e+00 : f32
    %12 = vector.broadcast %cst_7 : f32 to vector<128x1xf32>
    %13 = arith.divf %11, %12 : vector<128x1xf32>
    %14 = vector.broadcast %6 : vector<128x1xf32> to vector<128x4xf32>
    %15 = arith.subf %0, %14 : vector<128x4xf32>
    %cst_8 = arith.constant 9.99999974E-6 : f32
    %16 = vector.broadcast %cst_8 : f32 to vector<128x1xf32>
    %17 = arith.addf %13, %16 : vector<128x1xf32>
    %18 = math.rsqrt %17 : vector<128x1xf32>
    %19 = vector.broadcast %18 : vector<128x1xf32> to vector<128x4xf32>
    %20 = arith.mulf %15, %19 : vector<128x4xf32>
    %21 = vector.broadcast %1 : vector<1x4xf32> to vector<128x4xf32>
    %22 = arith.mulf %20, %21 : vector<128x4xf32>
    %23 = vector.broadcast %2 : vector<1x4xf32> to vector<128x4xf32>
    %24 = arith.addf %22, %23 : vector<128x4xf32>
    %25 = arith.truncf %24 : vector<128x4xf32> to vector<128x4xbf16>
    %c0_9 = arith.constant 0 : index
    %c0_10 = arith.constant 0 : index
    %26 = vector.load %arg4[%c0_9, %c0_10] : memref<4x64xbf16, #tpu.memory_space<vmem>>, vector<4x64xbf16>
    %cst_11 = arith.constant dense<0.000000e+00> : vector<128x64xf32>
    %27 = tpu.matmul %25, %26, %cst_11 {dimension_numbers = #tpu.dot_dimension_numbers<[1], [0], [0], [1], [0, 0, 1, 1], [], []>} : vector<128x4xbf16>, vector<4x64xbf16>, vector<128x64xf32> -> vector<128x64xf32>
    %c0_12 = arith.constant 0 : index
    %c0_13 = arith.constant 0 : index
    %28 = vector.load %arg5[%c0_12, %c0_13] : memref<1x64xf32, #tpu.memory_space<vmem>>, vector<1x64xf32>
    %29 = vector.broadcast %28 : vector<1x64xf32> to vector<128x64xf32>
    %30 = arith.addf %27, %29 : vector<128x64xf32>
    %cst_14 = arith.constant 0.000000e+00 : f32
    %31 = vector.broadcast %cst_14 : f32 to vector<128x64xf32>
    %32 = arith.maximumf %30, %31 : vector<128x64xf32>
    %33 = arith.truncf %32 : vector<128x64xf32> to vector<128x64xbf16>
    %c0_15 = arith.constant 0 : index
    %c0_16 = arith.constant 0 : index
    %34 = vector.load %arg6[%c0_15, %c0_16] : memref<64x64xbf16, #tpu.memory_space<vmem>>, vector<64x64xbf16>
    %cst_17 = arith.constant dense<0.000000e+00> : vector<128x64xf32>
    %35 = tpu.matmul %33, %34, %cst_17 {dimension_numbers = #tpu.dot_dimension_numbers<[1], [0], [0], [1], [0, 0, 1, 1], [], []>} : vector<128x64xbf16>, vector<64x64xbf16>, vector<128x64xf32> -> vector<128x64xf32>
    %c0_18 = arith.constant 0 : index
    %c0_19 = arith.constant 0 : index
    %36 = vector.load %arg7[%c0_18, %c0_19] : memref<1x64xf32, #tpu.memory_space<vmem>>, vector<1x64xf32>
    %37 = vector.broadcast %36 : vector<1x64xf32> to vector<128x64xf32>
    %38 = arith.addf %35, %37 : vector<128x64xf32>
    %cst_20 = arith.constant 0.000000e+00 : f32
    %39 = vector.broadcast %cst_20 : f32 to vector<128x64xf32>
    %40 = arith.maximumf %38, %39 : vector<128x64xf32>
    %41 = arith.truncf %40 : vector<128x64xf32> to vector<128x64xbf16>
    %c0_21 = arith.constant 0 : index
    %c0_22 = arith.constant 0 : index
    %42 = vector.load %arg10[%c0_21, %c0_22] : memref<128x64xbf16, #tpu.memory_space<vmem>>, vector<128x64xbf16>
    tpu.vector_store %arg10[%c0_21, %c0_22], %41 {strides = array<i32>} : memref<128x64xbf16, #tpu.memory_space<vmem>>, vector<128x64xbf16>,
    %c0_23 = arith.constant 0 : index
    %c0_24 = arith.constant 0 : index
    %43 = vector.load %arg8[%c0_23, %c0_24] : memref<64x64xbf16, #tpu.memory_space<vmem>>, vector<64x64xbf16>
    %cst_25 = arith.constant dense<0.000000e+00> : vector<128x64xf32>
    %44 = tpu.matmul %41, %43, %cst_25 {dimension_numbers = #tpu.dot_dimension_numbers<[1], [0], [0], [1], [0, 0, 1, 1], [], []>} : vector<128x64xbf16>, vector<64x64xbf16>, vector<128x64xf32> -> vector<128x64xf32>
    %c0_26 = arith.constant 0 : index
    %c0_27 = arith.constant 0 : index
    %45 = vector.load %arg9[%c0_26, %c0_27] : memref<1x64xf32, #tpu.memory_space<vmem>>, vector<1x64xf32>
    %46 = vector.broadcast %45 : vector<1x64xf32> to vector<128x64xf32>
    %47 = arith.addf %44, %46 : vector<128x64xf32>
    %48 = arith.truncf %47 : vector<128x64xf32> to vector<128x64xbf16>
    %c0_28 = arith.constant 0 : index
    %c0_29 = arith.constant 0 : index
    %49 = vector.load %arg11[%c0_28, %c0_29] : memref<128x64xbf16, #tpu.memory_space<vmem>>, vector<128x64xbf16>
    tpu.vector_store %arg11[%c0_28, %c0_29], %48 {strides = array<i32>} : memref<128x64xbf16, #tpu.memory_space<vmem>>, vector<128x64xbf16>,
    return
  }
  func.func @transform_0(%arg0: i32) -> (i32, i32) {
    %c0_i32 = arith.constant 0 : i32
    %c0_i32_0 = arith.constant 0 : i32
    return %arg0, %c0_i32 : i32, i32
  }
  func.func @transform_1(%arg0: i32) -> (i32, i32) {
    %c0_i32 = arith.constant 0 : i32
    %c0_i32_0 = arith.constant 0 : i32
    %c0_i32_1 = arith.constant 0 : i32
    return %c0_i32, %c0_i32_0 : i32, i32
  }
  func.func @transform_2(%arg0: i32) -> (i32, i32) {
    %c0_i32 = arith.constant 0 : i32
    %c0_i32_0 = arith.constant 0 : i32
    %c0_i32_1 = arith.constant 0 : i32
    return %c0_i32, %c0_i32_0 : i32, i32
  }
  func.func @transform_3(%arg0: i32) -> (i32, i32) {
    %c0_i32 = arith.constant 0 : i32
    %c0_i32_0 = arith.constant 0 : i32
    %c0_i32_1 = arith.constant 0 : i32
    return %c0_i32, %c0_i32_0 : i32, i32
  }
  func.func @transform_4(%arg0: i32) -> (i32, i32) {
    %c0_i32 = arith.constant 0 : i32
    %c0_i32_0 = arith.constant 0 : i32
    %c0_i32_1 = arith.constant 0 : i32
    return %c0_i32, %c0_i32_0 : i32, i32
  }
  func.func @transform_5(%arg0: i32) -> (i32, i32) {
    %c0_i32 = arith.constant 0 : i32
    %c0_i32_0 = arith.constant 0 : i32
    %c0_i32_1 = arith.constant 0 : i32
    return %c0_i32, %c0_i32_0 : i32, i32
  }
  func.func @transform_6(%arg0: i32) -> (i32, i32) {
    %c0_i32 = arith.constant 0 : i32
    %c0_i32_0 = arith.constant 0 : i32
    %c0_i32_1 = arith.constant 0 : i32
    return %c0_i32, %c0_i32_0 : i32, i32
  }
  func.func @transform_7(%arg0: i32) -> (i32, i32) {
    %c0_i32 = arith.constant 0 : i32
    %c0_i32_0 = arith.constant 0 : i32
    %c0_i32_1 = arith.constant 0 : i32
    return %c0_i32, %c0_i32_0 : i32, i32
  }
  func.func @transform_8(%arg0: i32) -> (i32, i32) {
    %c0_i32 = arith.constant 0 : i32
    %c0_i32_0 = arith.constant 0 : i32
    %c0_i32_1 = arith.constant 0 : i32
    return %c0_i32, %c0_i32_0 : i32, i32
  }
  func.func @transform_9(%arg0: i32) -> (i32, i32) {
    %c0_i32 = arith.constant 0 : i32
    %c0_i32_0 = arith.constant 0 : i32
    return %arg0, %c0_i32 : i32, i32
  }
  func.func @transform_10(%arg0: i32) -> (i32, i32) {
    %c0_i32 = arith.constant 0 : i32
    %c0_i32_0 = arith.constant 0 : i32
    return %arg0, %c0_i32 : i32, i32
  }
}

module attributes {stable_mosaic.version = 11 : i64} {
  func.func @message_kernel(%arg0: i32, %arg1: memref<128x128xbf16, #tpu.memory_space<vmem>>, %arg2: memref<1x64xf32, #tpu.memory_space<vmem>>, %arg3: memref<1x64xf32, #tpu.memory_space<vmem>>, %arg4: memref<1x64xf32, #tpu.memory_space<vmem>>, %arg5: memref<64x64xbf16, #tpu.memory_space<vmem>>, %arg6: memref<1x64xf32, #tpu.memory_space<vmem>>, %arg7: memref<128x64xbf16, #tpu.memory_space<vmem>>) attributes {dimension_semantics = [#tpu.dimension_semantics<parallel>], iteration_bounds = array<i64: 1>, scalar_prefetch = 0 : i64, scratch_operands = 0 : i64, tpu.core_type = #tpu.core_type<tc>, window_params = [{transform_indices = @transform_0, window_bounds = array<i64: 128, 128>}, {pipeline_mode = #tpu.pipeline_mode<synchronous>, transform_indices = @transform_1, window_bounds = array<i64: 1, 64>}, {pipeline_mode = #tpu.pipeline_mode<synchronous>, transform_indices = @transform_2, window_bounds = array<i64: 1, 64>}, {pipeline_mode = #tpu.pipeline_mode<synchronous>, transform_indices = @transform_3, window_bounds = array<i64: 1, 64>}, {pipeline_mode = #tpu.pipeline_mode<synchronous>, transform_indices = @transform_4, window_bounds = array<i64: 64, 64>}, {pipeline_mode = #tpu.pipeline_mode<synchronous>, transform_indices = @transform_5, window_bounds = array<i64: 1, 64>}, {transform_indices = @transform_6, window_bounds = array<i64: 128, 64>}]} {
    %c0 = arith.constant 0 : index
    %c0_0 = arith.constant 0 : index
    %0 = vector.load %arg1[%c0, %c0_0] : memref<128x128xbf16, #tpu.memory_space<vmem>>, vector<128x128xbf16>
    %1 = arith.extf %0 : vector<128x128xbf16> to vector<128x128xf32>
    %2 = vector.extract_strided_slice %1 {offsets = [0, 0], sizes = [128, 64], strides = [1, 1]} : vector<128x128xf32> to vector<128x64xf32>
    %3 = vector.extract_strided_slice %1 {offsets = [0, 64], sizes = [128, 64], strides = [1, 1]} : vector<128x128xf32> to vector<128x64xf32>
    %4 = arith.addf %2, %3 : vector<128x64xf32>
    %c0_1 = arith.constant 0 : index
    %c0_2 = arith.constant 0 : index
    %5 = vector.load %arg2[%c0_1, %c0_2] : memref<1x64xf32, #tpu.memory_space<vmem>>, vector<1x64xf32>
    %6 = vector.broadcast %5 : vector<1x64xf32> to vector<128x64xf32>
    %7 = arith.addf %4, %6 : vector<128x64xf32>
    %c0_3 = arith.constant 0 : index
    %c0_4 = arith.constant 0 : index
    %8 = vector.load %arg3[%c0_3, %c0_4] : memref<1x64xf32, #tpu.memory_space<vmem>>, vector<1x64xf32>
    %c0_5 = arith.constant 0 : index
    %c0_6 = arith.constant 0 : index
    %9 = vector.load %arg4[%c0_5, %c0_6] : memref<1x64xf32, #tpu.memory_space<vmem>>, vector<1x64xf32>
    %cst = arith.constant dense<0.000000e+00> : vector<128xf32>
    %10 = vector.multi_reduction <add>, %7, %cst [1] : vector<128x64xf32> to vector<128xf32>
    %11 = vector.shape_cast %10 : vector<128xf32> to vector<128x1xf32>
    %cst_7 = arith.constant 6.400000e+01 : f32
    %12 = vector.broadcast %cst_7 : f32 to vector<128x1xf32>
    %13 = arith.divf %11, %12 : vector<128x1xf32>
    %14 = vector.broadcast %13 : vector<128x1xf32> to vector<128x64xf32>
    %15 = arith.subf %7, %14 : vector<128x64xf32>
    %16 = arith.mulf %15, %15 : vector<128x64xf32>
    %cst_8 = arith.constant dense<0.000000e+00> : vector<128xf32>
    %17 = vector.multi_reduction <add>, %16, %cst_8 [1] : vector<128x64xf32> to vector<128xf32>
    %18 = vector.shape_cast %17 : vector<128xf32> to vector<128x1xf32>
    %cst_9 = arith.constant 6.400000e+01 : f32
    %19 = vector.broadcast %cst_9 : f32 to vector<128x1xf32>
    %20 = arith.divf %18, %19 : vector<128x1xf32>
    %21 = vector.broadcast %13 : vector<128x1xf32> to vector<128x64xf32>
    %22 = arith.subf %7, %21 : vector<128x64xf32>
    %cst_10 = arith.constant 9.99999974E-6 : f32
    %23 = vector.broadcast %cst_10 : f32 to vector<128x1xf32>
    %24 = arith.addf %20, %23 : vector<128x1xf32>
    %25 = math.rsqrt %24 : vector<128x1xf32>
    %26 = vector.broadcast %25 : vector<128x1xf32> to vector<128x64xf32>
    %27 = arith.mulf %22, %26 : vector<128x64xf32>
    %28 = vector.broadcast %8 : vector<1x64xf32> to vector<128x64xf32>
    %29 = arith.mulf %27, %28 : vector<128x64xf32>
    %30 = vector.broadcast %9 : vector<1x64xf32> to vector<128x64xf32>
    %31 = arith.addf %29, %30 : vector<128x64xf32>
    %cst_11 = arith.constant 0.000000e+00 : f32
    %32 = vector.broadcast %cst_11 : f32 to vector<128x64xf32>
    %33 = arith.maximumf %31, %32 : vector<128x64xf32>
    %34 = arith.truncf %33 : vector<128x64xf32> to vector<128x64xbf16>
    %c0_12 = arith.constant 0 : index
    %c0_13 = arith.constant 0 : index
    %35 = vector.load %arg5[%c0_12, %c0_13] : memref<64x64xbf16, #tpu.memory_space<vmem>>, vector<64x64xbf16>
    %cst_14 = arith.constant dense<0.000000e+00> : vector<128x64xf32>
    %36 = tpu.matmul %34, %35, %cst_14 {dimension_numbers = #tpu.dot_dimension_numbers<[1], [0], [0], [1], [0, 0, 1, 1], [], []>} : vector<128x64xbf16>, vector<64x64xbf16>, vector<128x64xf32> -> vector<128x64xf32>
    %c0_15 = arith.constant 0 : index
    %c0_16 = arith.constant 0 : index
    %37 = vector.load %arg6[%c0_15, %c0_16] : memref<1x64xf32, #tpu.memory_space<vmem>>, vector<1x64xf32>
    %38 = vector.broadcast %37 : vector<1x64xf32> to vector<128x64xf32>
    %39 = arith.addf %36, %38 : vector<128x64xf32>
    %c128_i32 = arith.constant 128 : i32
    %40 = arith.muli %arg0, %c128_i32 : i32
    %41 = tpu.iota {dimensions = array<i32: 0>} : vector<128x64xi32>
    %42 = vector.broadcast %40 : i32 to vector<128x64xi32>
    %43 = arith.addi %42, %41 : vector<128x64xi32>
    %c75_i32 = arith.constant 75 : i32
    %44 = vector.broadcast %c75_i32 : i32 to vector<128x64xi32>
    %45 = arith.cmpi slt, %43, %44 : vector<128x64xi32>
    %cst_17 = arith.constant 0.000000e+00 : f32
    %46 = vector.broadcast %cst_17 : f32 to vector<128x64xf32>
    %47 = arith.select %45, %39, %46 : vector<128x64xi1>, vector<128x64xf32>
    %48 = arith.truncf %47 : vector<128x64xf32> to vector<128x64xbf16>
    %c0_18 = arith.constant 0 : index
    %c0_19 = arith.constant 0 : index
    %49 = vector.load %arg7[%c0_18, %c0_19] : memref<128x64xbf16, #tpu.memory_space<vmem>>, vector<128x64xbf16>
    tpu.vector_store %arg7[%c0_18, %c0_19], %48 {strides = array<i32>} : memref<128x64xbf16, #tpu.memory_space<vmem>>, vector<128x64xbf16>,
    return
  }
  func.func @transform_0(%arg0: i32) -> (i32, i32) {
    %c0_i32 = arith.constant 0 : i32
    %c0_i32_0 = arith.constant 0 : i32
    return %arg0, %c0_i32 : i32, i32
  }
  func.func @transform_1(%arg0: i32) -> (i32, i32) {
    %c0_i32 = arith.constant 0 : i32
    %c0_i32_0 = arith.constant 0 : i32
    %c0_i32_1 = arith.constant 0 : i32
    return %c0_i32, %c0_i32_0 : i32, i32
  }
  func.func @transform_2(%arg0: i32) -> (i32, i32) {
    %c0_i32 = arith.constant 0 : i32
    %c0_i32_0 = arith.constant 0 : i32
    %c0_i32_1 = arith.constant 0 : i32
    return %c0_i32, %c0_i32_0 : i32, i32
  }
  func.func @transform_3(%arg0: i32) -> (i32, i32) {
    %c0_i32 = arith.constant 0 : i32
    %c0_i32_0 = arith.constant 0 : i32
    %c0_i32_1 = arith.constant 0 : i32
    return %c0_i32, %c0_i32_0 : i32, i32
  }
  func.func @transform_4(%arg0: i32) -> (i32, i32) {
    %c0_i32 = arith.constant 0 : i32
    %c0_i32_0 = arith.constant 0 : i32
    %c0_i32_1 = arith.constant 0 : i32
    return %c0_i32, %c0_i32_0 : i32, i32
  }
  func.func @transform_5(%arg0: i32) -> (i32, i32) {
    %c0_i32 = arith.constant 0 : i32
    %c0_i32_0 = arith.constant 0 : i32
    %c0_i32_1 = arith.constant 0 : i32
    return %c0_i32, %c0_i32_0 : i32, i32
  }
  func.func @transform_6(%arg0: i32) -> (i32, i32) {
    %c0_i32 = arith.constant 0 : i32
    %c0_i32_0 = arith.constant 0 : i32
    return %arg0, %c0_i32 : i32, i32
  }
}

module attributes {stable_mosaic.version = 11 : i64} {
  func.func @conv_out_kernel(%arg0: i32, %arg1: memref<128x64xf32, #tpu.memory_space<vmem>>, %arg2: memref<128x64xbf16, #tpu.memory_space<vmem>>, %arg3: memref<1x64xf32, #tpu.memory_space<vmem>>, %arg4: memref<1x64xf32, #tpu.memory_space<vmem>>, %arg5: memref<128x64xbf16, #tpu.memory_space<vmem>>, %arg6: memref<1x64xf32, #tpu.memory_space<vmem>>, %arg7: memref<64x64xbf16, #tpu.memory_space<vmem>>, %arg8: memref<1x64xf32, #tpu.memory_space<vmem>>, %arg9: memref<64x128xbf16, #tpu.memory_space<vmem>>, %arg10: memref<1x128xf32, #tpu.memory_space<vmem>>, %arg11: memref<128x64xbf16, #tpu.memory_space<vmem>>, %arg12: memref<128x128xbf16, #tpu.memory_space<vmem>>) attributes {dimension_semantics = [#tpu.dimension_semantics<parallel>], iteration_bounds = array<i64: 1>, scalar_prefetch = 0 : i64, scratch_operands = 0 : i64, tpu.core_type = #tpu.core_type<tc>, window_params = [{transform_indices = @transform_0, window_bounds = array<i64: 128, 64>}, {transform_indices = @transform_1, window_bounds = array<i64: 128, 64>}, {pipeline_mode = #tpu.pipeline_mode<synchronous>, transform_indices = @transform_2, window_bounds = array<i64: 1, 64>}, {pipeline_mode = #tpu.pipeline_mode<synchronous>, transform_indices = @transform_3, window_bounds = array<i64: 1, 64>}, {pipeline_mode = #tpu.pipeline_mode<synchronous>, transform_indices = @transform_4, window_bounds = array<i64: 128, 64>}, {pipeline_mode = #tpu.pipeline_mode<synchronous>, transform_indices = @transform_5, window_bounds = array<i64: 1, 64>}, {pipeline_mode = #tpu.pipeline_mode<synchronous>, transform_indices = @transform_6, window_bounds = array<i64: 64, 64>}, {pipeline_mode = #tpu.pipeline_mode<synchronous>, transform_indices = @transform_7, window_bounds = array<i64: 1, 64>}, {pipeline_mode = #tpu.pipeline_mode<synchronous>, transform_indices = @transform_8, window_bounds = array<i64: 64, 128>}, {pipeline_mode = #tpu.pipeline_mode<synchronous>, transform_indices = @transform_9, window_bounds = array<i64: 1, 128>}, {transform_indices = @transform_10, window_bounds = array<i64: 128, 64>}, {transform_indices = @transform_11, window_bounds = array<i64: 128, 128>}]} {
    %c0 = arith.constant 0 : index
    %c0_0 = arith.constant 0 : index
    %0 = vector.load %arg1[%c0, %c0_0] : memref<128x64xf32, #tpu.memory_space<vmem>>, vector<128x64xf32>
    %c0_1 = arith.constant 0 : index
    %c0_2 = arith.constant 0 : index
    %1 = vector.load %arg3[%c0_1, %c0_2] : memref<1x64xf32, #tpu.memory_space<vmem>>, vector<1x64xf32>
    %c0_3 = arith.constant 0 : index
    %c0_4 = arith.constant 0 : index
    %2 = vector.load %arg4[%c0_3, %c0_4] : memref<1x64xf32, #tpu.memory_space<vmem>>, vector<1x64xf32>
    %cst = arith.constant dense<0.000000e+00> : vector<128xf32>
    %3 = vector.multi_reduction <add>, %0, %cst [1] : vector<128x64xf32> to vector<128xf32>
    %4 = vector.shape_cast %3 : vector<128xf32> to vector<128x1xf32>
    %cst_5 = arith.constant 6.400000e+01 : f32
    %5 = vector.broadcast %cst_5 : f32 to vector<128x1xf32>
    %6 = arith.divf %4, %5 : vector<128x1xf32>
    %7 = vector.broadcast %6 : vector<128x1xf32> to vector<128x64xf32>
    %8 = arith.subf %0, %7 : vector<128x64xf32>
    %9 = arith.mulf %8, %8 : vector<128x64xf32>
    %cst_6 = arith.constant dense<0.000000e+00> : vector<128xf32>
    %10 = vector.multi_reduction <add>, %9, %cst_6 [1] : vector<128x64xf32> to vector<128xf32>
    %11 = vector.shape_cast %10 : vector<128xf32> to vector<128x1xf32>
    %cst_7 = arith.constant 6.400000e+01 : f32
    %12 = vector.broadcast %cst_7 : f32 to vector<128x1xf32>
    %13 = arith.divf %11, %12 : vector<128x1xf32>
    %14 = vector.broadcast %6 : vector<128x1xf32> to vector<128x64xf32>
    %15 = arith.subf %0, %14 : vector<128x64xf32>
    %cst_8 = arith.constant 9.99999974E-6 : f32
    %16 = vector.broadcast %cst_8 : f32 to vector<128x1xf32>
    %17 = arith.addf %13, %16 : vector<128x1xf32>
    %18 = math.rsqrt %17 : vector<128x1xf32>
    %19 = vector.broadcast %18 : vector<128x1xf32> to vector<128x64xf32>
    %20 = arith.mulf %15, %19 : vector<128x64xf32>
    %21 = vector.broadcast %1 : vector<1x64xf32> to vector<128x64xf32>
    %22 = arith.mulf %20, %21 : vector<128x64xf32>
    %23 = vector.broadcast %2 : vector<1x64xf32> to vector<128x64xf32>
    %24 = arith.addf %22, %23 : vector<128x64xf32>
    %25 = arith.truncf %24 : vector<128x64xf32> to vector<128x64xbf16>
    %c0_9 = arith.constant 0 : index
    %c0_10 = arith.constant 0 : index
    %26 = vector.load %arg5[%c0_9, %c0_10] : memref<128x64xbf16, #tpu.memory_space<vmem>>, vector<128x64xbf16>
    %27 = vector.extract_strided_slice %26 {offsets = [0, 0], sizes = [64, 64], strides = [1, 1]} : vector<128x64xbf16> to vector<64x64xbf16>
    %cst_11 = arith.constant dense<0.000000e+00> : vector<128x64xf32>
    %28 = tpu.matmul %25, %27, %cst_11 {dimension_numbers = #tpu.dot_dimension_numbers<[1], [0], [0], [1], [0, 0, 1, 1], [], []>} : vector<128x64xbf16>, vector<64x64xbf16>, vector<128x64xf32> -> vector<128x64xf32>
    %c0_12 = arith.constant 0 : index
    %c0_13 = arith.constant 0 : index
    %29 = vector.load %arg2[%c0_12, %c0_13] : memref<128x64xbf16, #tpu.memory_space<vmem>>, vector<128x64xbf16>
    %30 = vector.extract_strided_slice %26 {offsets = [64, 0], sizes = [64, 64], strides = [1, 1]} : vector<128x64xbf16> to vector<64x64xbf16>
    %cst_14 = arith.constant dense<0.000000e+00> : vector<128x64xf32>
    %31 = tpu.matmul %29, %30, %cst_14 {dimension_numbers = #tpu.dot_dimension_numbers<[1], [0], [0], [1], [0, 0, 1, 1], [], []>} : vector<128x64xbf16>, vector<64x64xbf16>, vector<128x64xf32> -> vector<128x64xf32>
    %32 = arith.addf %28, %31 : vector<128x64xf32>
    %c0_15 = arith.constant 0 : index
    %c0_16 = arith.constant 0 : index
    %33 = vector.load %arg6[%c0_15, %c0_16] : memref<1x64xf32, #tpu.memory_space<vmem>>, vector<1x64xf32>
    %34 = vector.broadcast %33 : vector<1x64xf32> to vector<128x64xf32>
    %35 = arith.addf %32, %34 : vector<128x64xf32>
    %cst_17 = arith.constant 0.000000e+00 : f32
    %36 = vector.broadcast %cst_17 : f32 to vector<128x64xf32>
    %37 = arith.maximumf %35, %36 : vector<128x64xf32>
    %38 = arith.truncf %37 : vector<128x64xf32> to vector<128x64xbf16>
    %c0_18 = arith.constant 0 : index
    %c0_19 = arith.constant 0 : index
    %39 = vector.load %arg7[%c0_18, %c0_19] : memref<64x64xbf16, #tpu.memory_space<vmem>>, vector<64x64xbf16>
    %cst_20 = arith.constant dense<0.000000e+00> : vector<128x64xf32>
    %40 = tpu.matmul %38, %39, %cst_20 {dimension_numbers = #tpu.dot_dimension_numbers<[1], [0], [0], [1], [0, 0, 1, 1], [], []>} : vector<128x64xbf16>, vector<64x64xbf16>, vector<128x64xf32> -> vector<128x64xf32>
    %c0_21 = arith.constant 0 : index
    %c0_22 = arith.constant 0 : index
    %41 = vector.load %arg8[%c0_21, %c0_22] : memref<1x64xf32, #tpu.memory_space<vmem>>, vector<1x64xf32>
    %42 = vector.broadcast %41 : vector<1x64xf32> to vector<128x64xf32>
    %43 = arith.addf %40, %42 : vector<128x64xf32>
    %44 = arith.truncf %43 : vector<128x64xf32> to vector<128x64xbf16>
    %c0_23 = arith.constant 0 : index
    %c0_24 = arith.constant 0 : index
    %45 = vector.load %arg11[%c0_23, %c0_24] : memref<128x64xbf16, #tpu.memory_space<vmem>>, vector<128x64xbf16>
    tpu.vector_store %arg11[%c0_23, %c0_24], %44 {strides = array<i32>} : memref<128x64xbf16, #tpu.memory_space<vmem>>, vector<128x64xbf16>,
    %c0_25 = arith.constant 0 : index
    %c0_26 = arith.constant 0 : index
    %46 = vector.load %arg9[%c0_25, %c0_26] : memref<64x128xbf16, #tpu.memory_space<vmem>>, vector<64x128xbf16>
    %cst_27 = arith.constant dense<0.000000e+00> : vector<128x128xf32>
    %47 = tpu.matmul %44, %46, %cst_27 {dimension_numbers = #tpu.dot_dimension_numbers<[1], [0], [0], [1], [0, 0, 1, 1], [], []>} : vector<128x64xbf16>, vector<64x128xbf16>, vector<128x128xf32> -> vector<128x128xf32>
    %c0_28 = arith.constant 0 : index
    %c0_29 = arith.constant 0 : index
    %48 = vector.load %arg10[%c0_28, %c0_29] : memref<1x128xf32, #tpu.memory_space<vmem>>, vector<1x128xf32>
    %49 = vector.broadcast %48 : vector<1x128xf32> to vector<128x128xf32>
    %50 = arith.addf %47, %49 : vector<128x128xf32>
    %51 = arith.truncf %50 : vector<128x128xf32> to vector<128x128xbf16>
    %c0_30 = arith.constant 0 : index
    %c0_31 = arith.constant 0 : index
    %52 = vector.load %arg12[%c0_30, %c0_31] : memref<128x128xbf16, #tpu.memory_space<vmem>>, vector<128x128xbf16>
    tpu.vector_store %arg12[%c0_30, %c0_31], %51 {strides = array<i32>} : memref<128x128xbf16, #tpu.memory_space<vmem>>, vector<128x128xbf16>,
    return
  }
  func.func @transform_0(%arg0: i32) -> (i32, i32) {
    %c0_i32 = arith.constant 0 : i32
    %c0_i32_0 = arith.constant 0 : i32
    return %arg0, %c0_i32 : i32, i32
  }
  func.func @transform_1(%arg0: i32) -> (i32, i32) {
    %c0_i32 = arith.constant 0 : i32
    %c0_i32_0 = arith.constant 0 : i32
    return %arg0, %c0_i32 : i32, i32
  }
  func.func @transform_2(%arg0: i32) -> (i32, i32) {
    %c0_i32 = arith.constant 0 : i32
    %c0_i32_0 = arith.constant 0 : i32
    %c0_i32_1 = arith.constant 0 : i32
    return %c0_i32, %c0_i32_0 : i32, i32
  }
  func.func @transform_3(%arg0: i32) -> (i32, i32) {
    %c0_i32 = arith.constant 0 : i32
    %c0_i32_0 = arith.constant 0 : i32
    %c0_i32_1 = arith.constant 0 : i32
    return %c0_i32, %c0_i32_0 : i32, i32
  }
  func.func @transform_4(%arg0: i32) -> (i32, i32) {
    %c0_i32 = arith.constant 0 : i32
    %c0_i32_0 = arith.constant 0 : i32
    %c0_i32_1 = arith.constant 0 : i32
    return %c0_i32, %c0_i32_0 : i32, i32
  }
  func.func @transform_5(%arg0: i32) -> (i32, i32) {
    %c0_i32 = arith.constant 0 : i32
    %c0_i32_0 = arith.constant 0 : i32
    %c0_i32_1 = arith.constant 0 : i32
    return %c0_i32, %c0_i32_0 : i32, i32
  }
  func.func @transform_6(%arg0: i32) -> (i32, i32) {
    %c0_i32 = arith.constant 0 : i32
    %c0_i32_0 = arith.constant 0 : i32
    %c0_i32_1 = arith.constant 0 : i32
    return %c0_i32, %c0_i32_0 : i32, i32
  }
  func.func @transform_7(%arg0: i32) -> (i32, i32) {
    %c0_i32 = arith.constant 0 : i32
    %c0_i32_0 = arith.constant 0 : i32
    %c0_i32_1 = arith.constant 0 : i32
    return %c0_i32, %c0_i32_0 : i32, i32
  }
  func.func @transform_8(%arg0: i32) -> (i32, i32) {
    %c0_i32 = arith.constant 0 : i32
    %c0_i32_0 = arith.constant 0 : i32
    %c0_i32_1 = arith.constant 0 : i32
    return %c0_i32, %c0_i32_0 : i32, i32
  }
  func.func @transform_9(%arg0: i32) -> (i32, i32) {
    %c0_i32 = arith.constant 0 : i32
    %c0_i32_0 = arith.constant 0 : i32
    %c0_i32_1 = arith.constant 0 : i32
    return %c0_i32, %c0_i32_0 : i32, i32
  }
  func.func @transform_10(%arg0: i32) -> (i32, i32) {
    %c0_i32 = arith.constant 0 : i32
    %c0_i32_0 = arith.constant 0 : i32
    return %arg0, %c0_i32 : i32, i32
  }
  func.func @transform_11(%arg0: i32) -> (i32, i32) {
    %c0_i32 = arith.constant 0 : i32
    %c0_i32_0 = arith.constant 0 : i32
    return %arg0, %c0_i32 : i32, i32
  }
}

module attributes {stable_mosaic.version = 11 : i64} {
  func.func @conv_out_kernel(%arg0: i32, %arg1: memref<128x64xf32, #tpu.memory_space<vmem>>, %arg2: memref<128x64xbf16, #tpu.memory_space<vmem>>, %arg3: memref<1x64xf32, #tpu.memory_space<vmem>>, %arg4: memref<1x64xf32, #tpu.memory_space<vmem>>, %arg5: memref<128x64xbf16, #tpu.memory_space<vmem>>, %arg6: memref<1x64xf32, #tpu.memory_space<vmem>>, %arg7: memref<64x64xbf16, #tpu.memory_space<vmem>>, %arg8: memref<1x64xf32, #tpu.memory_space<vmem>>, %arg9: memref<64x64xbf16, #tpu.memory_space<vmem>>, %arg10: memref<1x64xf32, #tpu.memory_space<vmem>>, %arg11: memref<128x64xbf16, #tpu.memory_space<vmem>>, %arg12: memref<128x64xbf16, #tpu.memory_space<vmem>>) attributes {dimension_semantics = [#tpu.dimension_semantics<parallel>], iteration_bounds = array<i64: 1>, scalar_prefetch = 0 : i64, scratch_operands = 0 : i64, tpu.core_type = #tpu.core_type<tc>, window_params = [{transform_indices = @transform_0, window_bounds = array<i64: 128, 64>}, {transform_indices = @transform_1, window_bounds = array<i64: 128, 64>}, {pipeline_mode = #tpu.pipeline_mode<synchronous>, transform_indices = @transform_2, window_bounds = array<i64: 1, 64>}, {pipeline_mode = #tpu.pipeline_mode<synchronous>, transform_indices = @transform_3, window_bounds = array<i64: 1, 64>}, {pipeline_mode = #tpu.pipeline_mode<synchronous>, transform_indices = @transform_4, window_bounds = array<i64: 128, 64>}, {pipeline_mode = #tpu.pipeline_mode<synchronous>, transform_indices = @transform_5, window_bounds = array<i64: 1, 64>}, {pipeline_mode = #tpu.pipeline_mode<synchronous>, transform_indices = @transform_6, window_bounds = array<i64: 64, 64>}, {pipeline_mode = #tpu.pipeline_mode<synchronous>, transform_indices = @transform_7, window_bounds = array<i64: 1, 64>}, {pipeline_mode = #tpu.pipeline_mode<synchronous>, transform_indices = @transform_8, window_bounds = array<i64: 64, 64>}, {pipeline_mode = #tpu.pipeline_mode<synchronous>, transform_indices = @transform_9, window_bounds = array<i64: 1, 64>}, {transform_indices = @transform_10, window_bounds = array<i64: 128, 64>}, {transform_indices = @transform_11, window_bounds = array<i64: 128, 64>}]} {
    %c0 = arith.constant 0 : index
    %c0_0 = arith.constant 0 : index
    %0 = vector.load %arg1[%c0, %c0_0] : memref<128x64xf32, #tpu.memory_space<vmem>>, vector<128x64xf32>
    %c0_1 = arith.constant 0 : index
    %c0_2 = arith.constant 0 : index
    %1 = vector.load %arg3[%c0_1, %c0_2] : memref<1x64xf32, #tpu.memory_space<vmem>>, vector<1x64xf32>
    %c0_3 = arith.constant 0 : index
    %c0_4 = arith.constant 0 : index
    %2 = vector.load %arg4[%c0_3, %c0_4] : memref<1x64xf32, #tpu.memory_space<vmem>>, vector<1x64xf32>
    %cst = arith.constant dense<0.000000e+00> : vector<128xf32>
    %3 = vector.multi_reduction <add>, %0, %cst [1] : vector<128x64xf32> to vector<128xf32>
    %4 = vector.shape_cast %3 : vector<128xf32> to vector<128x1xf32>
    %cst_5 = arith.constant 6.400000e+01 : f32
    %5 = vector.broadcast %cst_5 : f32 to vector<128x1xf32>
    %6 = arith.divf %4, %5 : vector<128x1xf32>
    %7 = vector.broadcast %6 : vector<128x1xf32> to vector<128x64xf32>
    %8 = arith.subf %0, %7 : vector<128x64xf32>
    %9 = arith.mulf %8, %8 : vector<128x64xf32>
    %cst_6 = arith.constant dense<0.000000e+00> : vector<128xf32>
    %10 = vector.multi_reduction <add>, %9, %cst_6 [1] : vector<128x64xf32> to vector<128xf32>
    %11 = vector.shape_cast %10 : vector<128xf32> to vector<128x1xf32>
    %cst_7 = arith.constant 6.400000e+01 : f32
    %12 = vector.broadcast %cst_7 : f32 to vector<128x1xf32>
    %13 = arith.divf %11, %12 : vector<128x1xf32>
    %14 = vector.broadcast %6 : vector<128x1xf32> to vector<128x64xf32>
    %15 = arith.subf %0, %14 : vector<128x64xf32>
    %cst_8 = arith.constant 9.99999974E-6 : f32
    %16 = vector.broadcast %cst_8 : f32 to vector<128x1xf32>
    %17 = arith.addf %13, %16 : vector<128x1xf32>
    %18 = math.rsqrt %17 : vector<128x1xf32>
    %19 = vector.broadcast %18 : vector<128x1xf32> to vector<128x64xf32>
    %20 = arith.mulf %15, %19 : vector<128x64xf32>
    %21 = vector.broadcast %1 : vector<1x64xf32> to vector<128x64xf32>
    %22 = arith.mulf %20, %21 : vector<128x64xf32>
    %23 = vector.broadcast %2 : vector<1x64xf32> to vector<128x64xf32>
    %24 = arith.addf %22, %23 : vector<128x64xf32>
    %25 = arith.truncf %24 : vector<128x64xf32> to vector<128x64xbf16>
    %c0_9 = arith.constant 0 : index
    %c0_10 = arith.constant 0 : index
    %26 = vector.load %arg5[%c0_9, %c0_10] : memref<128x64xbf16, #tpu.memory_space<vmem>>, vector<128x64xbf16>
    %27 = vector.extract_strided_slice %26 {offsets = [0, 0], sizes = [64, 64], strides = [1, 1]} : vector<128x64xbf16> to vector<64x64xbf16>
    %cst_11 = arith.constant dense<0.000000e+00> : vector<128x64xf32>
    %28 = tpu.matmul %25, %27, %cst_11 {dimension_numbers = #tpu.dot_dimension_numbers<[1], [0], [0], [1], [0, 0, 1, 1], [], []>} : vector<128x64xbf16>, vector<64x64xbf16>, vector<128x64xf32> -> vector<128x64xf32>
    %c0_12 = arith.constant 0 : index
    %c0_13 = arith.constant 0 : index
    %29 = vector.load %arg2[%c0_12, %c0_13] : memref<128x64xbf16, #tpu.memory_space<vmem>>, vector<128x64xbf16>
    %30 = vector.extract_strided_slice %26 {offsets = [64, 0], sizes = [64, 64], strides = [1, 1]} : vector<128x64xbf16> to vector<64x64xbf16>
    %cst_14 = arith.constant dense<0.000000e+00> : vector<128x64xf32>
    %31 = tpu.matmul %29, %30, %cst_14 {dimension_numbers = #tpu.dot_dimension_numbers<[1], [0], [0], [1], [0, 0, 1, 1], [], []>} : vector<128x64xbf16>, vector<64x64xbf16>, vector<128x64xf32> -> vector<128x64xf32>
    %32 = arith.addf %28, %31 : vector<128x64xf32>
    %c0_15 = arith.constant 0 : index
    %c0_16 = arith.constant 0 : index
    %33 = vector.load %arg6[%c0_15, %c0_16] : memref<1x64xf32, #tpu.memory_space<vmem>>, vector<1x64xf32>
    %34 = vector.broadcast %33 : vector<1x64xf32> to vector<128x64xf32>
    %35 = arith.addf %32, %34 : vector<128x64xf32>
    %cst_17 = arith.constant 0.000000e+00 : f32
    %36 = vector.broadcast %cst_17 : f32 to vector<128x64xf32>
    %37 = arith.maximumf %35, %36 : vector<128x64xf32>
    %38 = arith.truncf %37 : vector<128x64xf32> to vector<128x64xbf16>
    %c0_18 = arith.constant 0 : index
    %c0_19 = arith.constant 0 : index
    %39 = vector.load %arg7[%c0_18, %c0_19] : memref<64x64xbf16, #tpu.memory_space<vmem>>, vector<64x64xbf16>
    %cst_20 = arith.constant dense<0.000000e+00> : vector<128x64xf32>
    %40 = tpu.matmul %38, %39, %cst_20 {dimension_numbers = #tpu.dot_dimension_numbers<[1], [0], [0], [1], [0, 0, 1, 1], [], []>} : vector<128x64xbf16>, vector<64x64xbf16>, vector<128x64xf32> -> vector<128x64xf32>
    %c0_21 = arith.constant 0 : index
    %c0_22 = arith.constant 0 : index
    %41 = vector.load %arg8[%c0_21, %c0_22] : memref<1x64xf32, #tpu.memory_space<vmem>>, vector<1x64xf32>
    %42 = vector.broadcast %41 : vector<1x64xf32> to vector<128x64xf32>
    %43 = arith.addf %40, %42 : vector<128x64xf32>
    %44 = arith.truncf %43 : vector<128x64xf32> to vector<128x64xbf16>
    %c0_23 = arith.constant 0 : index
    %c0_24 = arith.constant 0 : index
    %45 = vector.load %arg11[%c0_23, %c0_24] : memref<128x64xbf16, #tpu.memory_space<vmem>>, vector<128x64xbf16>
    tpu.vector_store %arg11[%c0_23, %c0_24], %44 {strides = array<i32>} : memref<128x64xbf16, #tpu.memory_space<vmem>>, vector<128x64xbf16>,
    %c0_25 = arith.constant 0 : index
    %c0_26 = arith.constant 0 : index
    %46 = vector.load %arg9[%c0_25, %c0_26] : memref<64x64xbf16, #tpu.memory_space<vmem>>, vector<64x64xbf16>
    %cst_27 = arith.constant dense<0.000000e+00> : vector<128x64xf32>
    %47 = tpu.matmul %44, %46, %cst_27 {dimension_numbers = #tpu.dot_dimension_numbers<[1], [0], [0], [1], [0, 0, 1, 1], [], []>} : vector<128x64xbf16>, vector<64x64xbf16>, vector<128x64xf32> -> vector<128x64xf32>
    %c0_28 = arith.constant 0 : index
    %c0_29 = arith.constant 0 : index
    %48 = vector.load %arg10[%c0_28, %c0_29] : memref<1x64xf32, #tpu.memory_space<vmem>>, vector<1x64xf32>
    %49 = vector.broadcast %48 : vector<1x64xf32> to vector<128x64xf32>
    %50 = arith.addf %47, %49 : vector<128x64xf32>
    %51 = arith.truncf %50 : vector<128x64xf32> to vector<128x64xbf16>
    %c0_30 = arith.constant 0 : index
    %c0_31 = arith.constant 0 : index
    %52 = vector.load %arg12[%c0_30, %c0_31] : memref<128x64xbf16, #tpu.memory_space<vmem>>, vector<128x64xbf16>
    tpu.vector_store %arg12[%c0_30, %c0_31], %51 {strides = array<i32>} : memref<128x64xbf16, #tpu.memory_space<vmem>>, vector<128x64xbf16>,
    return
  }
  func.func @transform_0(%arg0: i32) -> (i32, i32) {
    %c0_i32 = arith.constant 0 : i32
    %c0_i32_0 = arith.constant 0 : i32
    return %arg0, %c0_i32 : i32, i32
  }
  func.func @transform_1(%arg0: i32) -> (i32, i32) {
    %c0_i32 = arith.constant 0 : i32
    %c0_i32_0 = arith.constant 0 : i32
    return %arg0, %c0_i32 : i32, i32
  }
  func.func @transform_2(%arg0: i32) -> (i32, i32) {
    %c0_i32 = arith.constant 0 : i32
    %c0_i32_0 = arith.constant 0 : i32
    %c0_i32_1 = arith.constant 0 : i32
    return %c0_i32, %c0_i32_0 : i32, i32
  }
  func.func @transform_3(%arg0: i32) -> (i32, i32) {
    %c0_i32 = arith.constant 0 : i32
    %c0_i32_0 = arith.constant 0 : i32
    %c0_i32_1 = arith.constant 0 : i32
    return %c0_i32, %c0_i32_0 : i32, i32
  }
  func.func @transform_4(%arg0: i32) -> (i32, i32) {
    %c0_i32 = arith.constant 0 : i32
    %c0_i32_0 = arith.constant 0 : i32
    %c0_i32_1 = arith.constant 0 : i32
    return %c0_i32, %c0_i32_0 : i32, i32
  }
  func.func @transform_5(%arg0: i32) -> (i32, i32) {
    %c0_i32 = arith.constant 0 : i32
    %c0_i32_0 = arith.constant 0 : i32
    %c0_i32_1 = arith.constant 0 : i32
    return %c0_i32, %c0_i32_0 : i32, i32
  }
  func.func @transform_6(%arg0: i32) -> (i32, i32) {
    %c0_i32 = arith.constant 0 : i32
    %c0_i32_0 = arith.constant 0 : i32
    %c0_i32_1 = arith.constant 0 : i32
    return %c0_i32, %c0_i32_0 : i32, i32
  }
  func.func @transform_7(%arg0: i32) -> (i32, i32) {
    %c0_i32 = arith.constant 0 : i32
    %c0_i32_0 = arith.constant 0 : i32
    %c0_i32_1 = arith.constant 0 : i32
    return %c0_i32, %c0_i32_0 : i32, i32
  }
  func.func @transform_8(%arg0: i32) -> (i32, i32) {
    %c0_i32 = arith.constant 0 : i32
    %c0_i32_0 = arith.constant 0 : i32
    %c0_i32_1 = arith.constant 0 : i32
    return %c0_i32, %c0_i32_0 : i32, i32
  }
  func.func @transform_9(%arg0: i32) -> (i32, i32) {
    %c0_i32 = arith.constant 0 : i32
    %c0_i32_0 = arith.constant 0 : i32
    %c0_i32_1 = arith.constant 0 : i32
    return %c0_i32, %c0_i32_0 : i32, i32
  }
  func.func @transform_10(%arg0: i32) -> (i32, i32) {
    %c0_i32 = arith.constant 0 : i32
    %c0_i32_0 = arith.constant 0 : i32
    return %arg0, %c0_i32 : i32, i32
  }
  func.func @transform_11(%arg0: i32) -> (i32, i32) {
    %c0_i32 = arith.constant 0 : i32
    %c0_i32_0 = arith.constant 0 : i32
    return %arg0, %c0_i32 : i32, i32
  }
}

module attributes {stable_mosaic.version = 11 : i64} {
  func.func @conv_out_head_kernel(%arg0: i32, %arg1: memref<128x64xf32, #tpu.memory_space<vmem>>, %arg2: memref<128x64xbf16, #tpu.memory_space<vmem>>, %arg3: memref<1x64xf32, #tpu.memory_space<vmem>>, %arg4: memref<1x64xf32, #tpu.memory_space<vmem>>, %arg5: memref<128x64xbf16, #tpu.memory_space<vmem>>, %arg6: memref<1x64xf32, #tpu.memory_space<vmem>>, %arg7: memref<64x64xbf16, #tpu.memory_space<vmem>>, %arg8: memref<1x64xf32, #tpu.memory_space<vmem>>, %arg9: memref<64x64xbf16, #tpu.memory_space<vmem>>, %arg10: memref<1x64xf32, #tpu.memory_space<vmem>>, %arg11: memref<64x128xbf16, #tpu.memory_space<vmem>>, %arg12: memref<128x128xf32, #tpu.memory_space<vmem>>) attributes {dimension_semantics = [#tpu.dimension_semantics<parallel>], iteration_bounds = array<i64: 1>, scalar_prefetch = 0 : i64, scratch_operands = 0 : i64, tpu.core_type = #tpu.core_type<tc>, window_params = [{transform_indices = @transform_0, window_bounds = array<i64: 128, 64>}, {transform_indices = @transform_1, window_bounds = array<i64: 128, 64>}, {pipeline_mode = #tpu.pipeline_mode<synchronous>, transform_indices = @transform_2, window_bounds = array<i64: 1, 64>}, {pipeline_mode = #tpu.pipeline_mode<synchronous>, transform_indices = @transform_3, window_bounds = array<i64: 1, 64>}, {pipeline_mode = #tpu.pipeline_mode<synchronous>, transform_indices = @transform_4, window_bounds = array<i64: 128, 64>}, {pipeline_mode = #tpu.pipeline_mode<synchronous>, transform_indices = @transform_5, window_bounds = array<i64: 1, 64>}, {pipeline_mode = #tpu.pipeline_mode<synchronous>, transform_indices = @transform_6, window_bounds = array<i64: 64, 64>}, {pipeline_mode = #tpu.pipeline_mode<synchronous>, transform_indices = @transform_7, window_bounds = array<i64: 1, 64>}, {pipeline_mode = #tpu.pipeline_mode<synchronous>, transform_indices = @transform_8, window_bounds = array<i64: 64, 64>}, {pipeline_mode = #tpu.pipeline_mode<synchronous>, transform_indices = @transform_9, window_bounds = array<i64: 1, 64>}, {pipeline_mode = #tpu.pipeline_mode<synchronous>, transform_indices = @transform_10, window_bounds = array<i64: 64, 128>}, {transform_indices = @transform_11, window_bounds = array<i64: 128, 128>}]} {
    %c0 = arith.constant 0 : index
    %c0_0 = arith.constant 0 : index
    %0 = vector.load %arg1[%c0, %c0_0] : memref<128x64xf32, #tpu.memory_space<vmem>>, vector<128x64xf32>
    %c0_1 = arith.constant 0 : index
    %c0_2 = arith.constant 0 : index
    %1 = vector.load %arg3[%c0_1, %c0_2] : memref<1x64xf32, #tpu.memory_space<vmem>>, vector<1x64xf32>
    %c0_3 = arith.constant 0 : index
    %c0_4 = arith.constant 0 : index
    %2 = vector.load %arg4[%c0_3, %c0_4] : memref<1x64xf32, #tpu.memory_space<vmem>>, vector<1x64xf32>
    %cst = arith.constant dense<0.000000e+00> : vector<128xf32>
    %3 = vector.multi_reduction <add>, %0, %cst [1] : vector<128x64xf32> to vector<128xf32>
    %4 = vector.shape_cast %3 : vector<128xf32> to vector<128x1xf32>
    %cst_5 = arith.constant 6.400000e+01 : f32
    %5 = vector.broadcast %cst_5 : f32 to vector<128x1xf32>
    %6 = arith.divf %4, %5 : vector<128x1xf32>
    %7 = vector.broadcast %6 : vector<128x1xf32> to vector<128x64xf32>
    %8 = arith.subf %0, %7 : vector<128x64xf32>
    %9 = arith.mulf %8, %8 : vector<128x64xf32>
    %cst_6 = arith.constant dense<0.000000e+00> : vector<128xf32>
    %10 = vector.multi_reduction <add>, %9, %cst_6 [1] : vector<128x64xf32> to vector<128xf32>
    %11 = vector.shape_cast %10 : vector<128xf32> to vector<128x1xf32>
    %cst_7 = arith.constant 6.400000e+01 : f32
    %12 = vector.broadcast %cst_7 : f32 to vector<128x1xf32>
    %13 = arith.divf %11, %12 : vector<128x1xf32>
    %14 = vector.broadcast %6 : vector<128x1xf32> to vector<128x64xf32>
    %15 = arith.subf %0, %14 : vector<128x64xf32>
    %cst_8 = arith.constant 9.99999974E-6 : f32
    %16 = vector.broadcast %cst_8 : f32 to vector<128x1xf32>
    %17 = arith.addf %13, %16 : vector<128x1xf32>
    %18 = math.rsqrt %17 : vector<128x1xf32>
    %19 = vector.broadcast %18 : vector<128x1xf32> to vector<128x64xf32>
    %20 = arith.mulf %15, %19 : vector<128x64xf32>
    %21 = vector.broadcast %1 : vector<1x64xf32> to vector<128x64xf32>
    %22 = arith.mulf %20, %21 : vector<128x64xf32>
    %23 = vector.broadcast %2 : vector<1x64xf32> to vector<128x64xf32>
    %24 = arith.addf %22, %23 : vector<128x64xf32>
    %25 = arith.truncf %24 : vector<128x64xf32> to vector<128x64xbf16>
    %c0_9 = arith.constant 0 : index
    %c0_10 = arith.constant 0 : index
    %26 = vector.load %arg5[%c0_9, %c0_10] : memref<128x64xbf16, #tpu.memory_space<vmem>>, vector<128x64xbf16>
    %27 = vector.extract_strided_slice %26 {offsets = [0, 0], sizes = [64, 64], strides = [1, 1]} : vector<128x64xbf16> to vector<64x64xbf16>
    %cst_11 = arith.constant dense<0.000000e+00> : vector<128x64xf32>
    %28 = tpu.matmul %25, %27, %cst_11 {dimension_numbers = #tpu.dot_dimension_numbers<[1], [0], [0], [1], [0, 0, 1, 1], [], []>} : vector<128x64xbf16>, vector<64x64xbf16>, vector<128x64xf32> -> vector<128x64xf32>
    %c0_12 = arith.constant 0 : index
    %c0_13 = arith.constant 0 : index
    %29 = vector.load %arg2[%c0_12, %c0_13] : memref<128x64xbf16, #tpu.memory_space<vmem>>, vector<128x64xbf16>
    %30 = vector.extract_strided_slice %26 {offsets = [64, 0], sizes = [64, 64], strides = [1, 1]} : vector<128x64xbf16> to vector<64x64xbf16>
    %cst_14 = arith.constant dense<0.000000e+00> : vector<128x64xf32>
    %31 = tpu.matmul %29, %30, %cst_14 {dimension_numbers = #tpu.dot_dimension_numbers<[1], [0], [0], [1], [0, 0, 1, 1], [], []>} : vector<128x64xbf16>, vector<64x64xbf16>, vector<128x64xf32> -> vector<128x64xf32>
    %32 = arith.addf %28, %31 : vector<128x64xf32>
    %c0_15 = arith.constant 0 : index
    %c0_16 = arith.constant 0 : index
    %33 = vector.load %arg6[%c0_15, %c0_16] : memref<1x64xf32, #tpu.memory_space<vmem>>, vector<1x64xf32>
    %34 = vector.broadcast %33 : vector<1x64xf32> to vector<128x64xf32>
    %35 = arith.addf %32, %34 : vector<128x64xf32>
    %cst_17 = arith.constant 0.000000e+00 : f32
    %36 = vector.broadcast %cst_17 : f32 to vector<128x64xf32>
    %37 = arith.maximumf %35, %36 : vector<128x64xf32>
    %38 = arith.truncf %37 : vector<128x64xf32> to vector<128x64xbf16>
    %c0_18 = arith.constant 0 : index
    %c0_19 = arith.constant 0 : index
    %39 = vector.load %arg7[%c0_18, %c0_19] : memref<64x64xbf16, #tpu.memory_space<vmem>>, vector<64x64xbf16>
    %cst_20 = arith.constant dense<0.000000e+00> : vector<128x64xf32>
    %40 = tpu.matmul %38, %39, %cst_20 {dimension_numbers = #tpu.dot_dimension_numbers<[1], [0], [0], [1], [0, 0, 1, 1], [], []>} : vector<128x64xbf16>, vector<64x64xbf16>, vector<128x64xf32> -> vector<128x64xf32>
    %c0_21 = arith.constant 0 : index
    %c0_22 = arith.constant 0 : index
    %41 = vector.load %arg8[%c0_21, %c0_22] : memref<1x64xf32, #tpu.memory_space<vmem>>, vector<1x64xf32>
    %42 = vector.broadcast %41 : vector<1x64xf32> to vector<128x64xf32>
    %43 = arith.addf %40, %42 : vector<128x64xf32>
    %44 = arith.truncf %43 : vector<128x64xf32> to vector<128x64xbf16>
    %c0_23 = arith.constant 0 : index
    %c0_24 = arith.constant 0 : index
    %45 = vector.load %arg9[%c0_23, %c0_24] : memref<64x64xbf16, #tpu.memory_space<vmem>>, vector<64x64xbf16>
    %cst_25 = arith.constant dense<0.000000e+00> : vector<128x64xf32>
    %46 = tpu.matmul %44, %45, %cst_25 {dimension_numbers = #tpu.dot_dimension_numbers<[1], [0], [0], [1], [0, 0, 1, 1], [], []>} : vector<128x64xbf16>, vector<64x64xbf16>, vector<128x64xf32> -> vector<128x64xf32>
    %c0_26 = arith.constant 0 : index
    %c0_27 = arith.constant 0 : index
    %47 = vector.load %arg10[%c0_26, %c0_27] : memref<1x64xf32, #tpu.memory_space<vmem>>, vector<1x64xf32>
    %48 = vector.broadcast %47 : vector<1x64xf32> to vector<128x64xf32>
    %49 = arith.addf %46, %48 : vector<128x64xf32>
    %cst_28 = arith.constant 0.000000e+00 : f32
    %50 = vector.broadcast %cst_28 : f32 to vector<128x64xf32>
    %51 = arith.maximumf %49, %50 : vector<128x64xf32>
    %52 = arith.truncf %51 : vector<128x64xf32> to vector<128x64xbf16>
    %c0_29 = arith.constant 0 : index
    %c0_30 = arith.constant 0 : index
    %53 = vector.load %arg11[%c0_29, %c0_30] : memref<64x128xbf16, #tpu.memory_space<vmem>>, vector<64x128xbf16>
    %cst_31 = arith.constant dense<0.000000e+00> : vector<128x128xf32>
    %54 = tpu.matmul %52, %53, %cst_31 {dimension_numbers = #tpu.dot_dimension_numbers<[1], [0], [0], [1], [0, 0, 1, 1], [], []>} : vector<128x64xbf16>, vector<64x128xbf16>, vector<128x128xf32> -> vector<128x128xf32>
    %c0_32 = arith.constant 0 : index
    %c0_33 = arith.constant 0 : index
    %55 = vector.load %arg12[%c0_32, %c0_33] : memref<128x128xf32, #tpu.memory_space<vmem>>, vector<128x128xf32>
    tpu.vector_store %arg12[%c0_32, %c0_33], %54 {strides = array<i32>} : memref<128x128xf32, #tpu.memory_space<vmem>>, vector<128x128xf32>,
    return
  }
  func.func @transform_0(%arg0: i32) -> (i32, i32) {
    %c0_i32 = arith.constant 0 : i32
    %c0_i32_0 = arith.constant 0 : i32
    return %arg0, %c0_i32 : i32, i32
  }
  func.func @transform_1(%arg0: i32) -> (i32, i32) {
    %c0_i32 = arith.constant 0 : i32
    %c0_i32_0 = arith.constant 0 : i32
    return %arg0, %c0_i32 : i32, i32
  }
  func.func @transform_2(%arg0: i32) -> (i32, i32) {
    %c0_i32 = arith.constant 0 : i32
    %c0_i32_0 = arith.constant 0 : i32
    %c0_i32_1 = arith.constant 0 : i32
    return %c0_i32, %c0_i32_0 : i32, i32
  }
  func.func @transform_3(%arg0: i32) -> (i32, i32) {
    %c0_i32 = arith.constant 0 : i32
    %c0_i32_0 = arith.constant 0 : i32
    %c0_i32_1 = arith.constant 0 : i32
    return %c0_i32, %c0_i32_0 : i32, i32
  }
  func.func @transform_4(%arg0: i32) -> (i32, i32) {
    %c0_i32 = arith.constant 0 : i32
    %c0_i32_0 = arith.constant 0 : i32
    %c0_i32_1 = arith.constant 0 : i32
    return %c0_i32, %c0_i32_0 : i32, i32
  }
  func.func @transform_5(%arg0: i32) -> (i32, i32) {
    %c0_i32 = arith.constant 0 : i32
    %c0_i32_0 = arith.constant 0 : i32
    %c0_i32_1 = arith.constant 0 : i32
    return %c0_i32, %c0_i32_0 : i32, i32
  }
  func.func @transform_6(%arg0: i32) -> (i32, i32) {
    %c0_i32 = arith.constant 0 : i32
    %c0_i32_0 = arith.constant 0 : i32
    %c0_i32_1 = arith.constant 0 : i32
    return %c0_i32, %c0_i32_0 : i32, i32
  }
  func.func @transform_7(%arg0: i32) -> (i32, i32) {
    %c0_i32 = arith.constant 0 : i32
    %c0_i32_0 = arith.constant 0 : i32
    %c0_i32_1 = arith.constant 0 : i32
    return %c0_i32, %c0_i32_0 : i32, i32
  }
  func.func @transform_8(%arg0: i32) -> (i32, i32) {
    %c0_i32 = arith.constant 0 : i32
    %c0_i32_0 = arith.constant 0 : i32
    %c0_i32_1 = arith.constant 0 : i32
    return %c0_i32, %c0_i32_0 : i32, i32
  }
  func.func @transform_9(%arg0: i32) -> (i32, i32) {
    %c0_i32 = arith.constant 0 : i32
    %c0_i32_0 = arith.constant 0 : i32
    %c0_i32_1 = arith.constant 0 : i32
    return %c0_i32, %c0_i32_0 : i32, i32
  }
  func.func @transform_10(%arg0: i32) -> (i32, i32) {
    %c0_i32 = arith.constant 0 : i32
    %c0_i32_0 = arith.constant 0 : i32
    %c0_i32_1 = arith.constant 0 : i32
    return %c0_i32, %c0_i32_0 : i32, i32
  }
  func.func @transform_11(%arg0: i32) -> (i32, i32) {
    %c0_i32 = arith.constant 0 : i32
    %c0_i32_0 = arith.constant 0 : i32
    return %arg0, %c0_i32 : i32, i32
  }
}

</mosaic_0001>

<bundles_post_ra>
// kernel: gnn_policy_forward.11
= control target key start
LH: loop header
LB: loop body
LE: loop exit
PB: predicated region body
PF: predicated region fallthrough
CT: control target
= control target key end

     0   :  { %vm53_vm0 = vcmask 48128   ;;  %vm347_vm1 = vcmask 1042432   ;;  %vm511_vm2 = vcmask 523264   ;;  %vm713_vm3 = vcmask 519168   ;;  %s1736_s0 = inlined_call_operand.vmem [shape: f32[128,6], index: 0, kind: input, shape index: {}]   ;;  %s1737_s3 = inlined_call_operand.vmem [shape: bf16[6,64], index: 3, kind: input, shape index: {}]   ;;  %s1738_s5 = inlined_call_operand.vmem [shape: bf16[64,64], index: 5, kind: input, shape index: {}]   ;;  %s1739_s1 = inlined_call_operand.vmem [shape: f32[1,6], index: 1, kind: input, shape index: {}]   ;;  %s1740_s2 = inlined_call_operand.vmem [shape: f32[1,6], index: 2, kind: input, shape index: {}]   ;;  %s1741_s7 = inlined_call_operand.vmem [shape: bf16[64,128], index: 7, kind: input, shape index: {}]   ;;  %s1742_s4 = inlined_call_operand.vmem [shape: f32[1,64], index: 4, kind: input, shape index: {}]   ;;  %s1743_s6 = inlined_call_operand.vmem [shape: f32[1,64], index: 6, kind: input, shape index: {}]   ;;  %s1744_s9 = inlined_call_operand.vmem [shape: bf16[128,64], index: 9, kind: output, shape index: {0}]   ;;  %s1745_s8 = inlined_call_operand.vmem [shape: f32[1,128], index: 8, kind: input, shape index: {}]   ;;  %s1746_s10 = inlined_call_operand.vmem [shape: bf16[128,128], index: 10, kind: output, shape index: {1}]  }
   0x1   :  { %v35_v0 = vld [vmem:[%s1736_s0] sm:$0xff]  ;;  %v37_v1 = vld [vmem:[%s1736_s0 + $0x10] sm:$0xff]  ;;  %v36_v2 = vld [vmem:[%s1736_s0 + $0x8] sm:$0xff] }
   0x2   :  { %v54_v3 = vsel %vm53_vm0, %v35_v0, 0.0  ;;  %v60_v4 = vsel %vm53_vm0, %v37_v1, 0.0  ;;  %v38_v5 = vld [vmem:[%s1736_s0 + $0x18] sm:$0xff]  ;;  %v57_v6 = vsel %vm53_vm0, %v36_v2, 0.0  ;;  %v39_v8 = vld [vmem:[%s1736_s0 + $0x20] sm:$0xff]  ;;  %v40_v9 = vld [vmem:[%s1736_s0 + $0x28] sm:$0xff] }
   0x3   :  { %55 = vadd.xlane.f32.xlu0 %v54_v3  ;;  %61 = vadd.xlane.f32.xlu1 %v60_v4  ;;  %v63_v7 = vsel %vm53_vm0, %v38_v5, 0.0  ;;  %v66_v10 = vsel %vm53_vm0, %v39_v8, 0.0  ;;  %v69_v11 = vsel %vm53_vm0, %v40_v9, 0.0  ;;  %v1351_v12 = vld [vmem:[%s1736_s0 + $0x30] sm:$0xff]  ;;  %v1356_v13 = vld [vmem:[%s1736_s0 + $0x38] sm:$0xff]  ;;  %v1365_v16 = vld [vmem:[%s1736_s0 + $0x40] sm:$0xff] }
   0x4   :  { %v72_v14 = vsel %vm53_vm0, %v1351_v12, 0.0  ;;  %v75_v15 = vsel %vm53_vm0, %v1356_v13, 0.0  ;;  %v1370_v17 = vld [vmem:[%s1736_s0 + $0x48] sm:$0xff]  ;;  %v78_v18 = vsel %vm53_vm0, %v1365_v16, 0.0  ;;  %v1379_v20 = vld [vmem:[%s1736_s0 + $0x50] sm:$0xff]  ;;  %v1384_v21 = vld [vmem:[%s1736_s0 + $0x58] sm:$0xff] }
   0x5   :  { %v81_v19 = vsel %vm53_vm0, %v1370_v17, 0.0  ;;  %v84_v22 = vsel %vm53_vm0, %v1379_v20, 0.0  ;;  %v87_v23 = vsel %vm53_vm0, %v1384_v21, 0.0  ;;  %v1393_v24 = vld [vmem:[%s1736_s0 + $0x60] sm:$0xff]  ;;  %v1398_v25 = vld [vmem:[%s1736_s0 + $0x68] sm:$0xff]  ;;  %v1407_v28 = vld [vmem:[%s1736_s0 + $0x70] sm:$0xff] }
   0x6   :  { %v90_v26 = vsel %vm53_vm0, %v1393_v24, 0.0  ;;  %v93_v27 = vsel %vm53_vm0, %v1398_v25, 0.0  ;;  %v1412_v29 = vld [vmem:[%s1736_s0 + $0x78] sm:$0xff]  ;;  %v96_v30 = vsel %vm53_vm0, %v1407_v28, 0.0 }
   0x7   :  { %58 = vadd.xlane.f32.xlu0 %v57_v6  ;;  %64 = vadd.xlane.f32.xlu1 %v63_v7  ;;  %v99_v31 = vsel %vm53_vm0, %v1412_v29, 0.0 }
   0xb   :  { %67 = vadd.xlane.f32.xlu0 %v66_v10  ;;  %70 = vadd.xlane.f32.xlu1 %v69_v11 }
   0xf   :  { %73 = vadd.xlane.f32.xlu0 %v72_v14  ;;  %76 = vadd.xlane.f32.xlu1 %v75_v15 }
  0x13   :  { %79 = vadd.xlane.f32.xlu0 %v78_v18  ;;  %82 = vadd.xlane.f32.xlu1 %v81_v19 }
  0x17   :  { %85 = vadd.xlane.f32.xlu0 %v84_v22  ;;  %88 = vadd.xlane.f32.xlu1 %v87_v23 }
  0x1b   :  { %91 = vadd.xlane.f32.xlu0 %v90_v26  ;;  %94 = vadd.xlane.f32.xlu1 %v93_v27 }
  0x1f   :  { %97 = vadd.xlane.f32.xlu0 %v96_v30  ;;  %100 = vadd.xlane.f32.xlu1 %v99_v31 }
  0x90   :  { %v56_v32 = vpop.xlane.xlu0 %55  ;;  %v62_v33 = vpop.xlane.xlu1 %61 }
  0x91   :  { %v103_v34 = vmul.f32 0.16666667, %v56_v32  ;;  %v105_v35 = vmul.f32 0.16666667, %v62_v33 }
  0x93   :  { %v1418_v36 = vsub.f32 %v35_v0, %v103_v34  ;;  %v1420_v37 = vsub.f32 %v37_v1, %v105_v35 }
  0x94   :  { %v59_v38 = vpop.xlane.xlu0 %58  ;;  %v65_v39 = vpop.xlane.xlu1 %64 }
  0x95   :  { %v104_v40 = vmul.f32 0.16666667, %v59_v38  ;;  %v106_v41 = vmul.f32 0.16666667, %v65_v39  ;;  %v135_v42 = vmul.f32 %v1418_v36, %v1418_v36  ;;  %v137_v43 = vmul.f32 %v1420_v37, %v1420_v37 }
  0x97   :  { %v1426_v44 = vsub.f32 %v36_v2, %v104_v40  ;;  %v1428_v45 = vsub.f32 %v38_v5, %v106_v41  ;;  %v151_v46 = vsel %vm53_vm0, %v135_v42, 0.0  ;;  %v157_v49 = vsel %vm53_vm0, %v137_v43, 0.0 }
  0x98   :  { %152 = vadd.xlane.f32.xlu0 %v151_v46  ;;  %v68_v47 = vpop.xlane.xlu0 %67  ;;  %v71_v48 = vpop.xlane.xlu1 %70 }
  0x99   :  { %v107_v50 = vmul.f32 0.16666667, %v68_v47  ;;  %v108_v51 = vmul.f32 0.16666667, %v71_v48  ;;  %v136_v52 = vmul.f32 %v1426_v44, %v1426_v44  ;;  %v138_v53 = vmul.f32 %v1428_v45, %v1428_v45 }
  0x9b   :  { %v1436_v54 = vsub.f32 %v39_v8, %v107_v50  ;;  %v1438_v55 = vsub.f32 %v40_v9, %v108_v51  ;;  %v154_v56 = vsel %vm53_vm0, %v136_v52, 0.0  ;;  %v160_v59 = vsel %vm53_vm0, %v138_v53, 0.0 }
  0x9c   :  { %158 = vadd.xlane.f32.xlu0 %v157_v49  ;;  %155 = vadd.xlane.f32.xlu1 %v154_v56  ;;  %v74_v57 = vpop.xlane.xlu0 %73  ;;  %v77_v58 = vpop.xlane.xlu1 %76  ;;  %v1514_v56 = vld [vmem:[%s1738_s5] sm:$0xff]  }
  0x9d   :  { %v109_v60 = vmul.f32 0.16666667, %v74_v57  ;;  %v110_v61 = vmul.f32 0.16666667, %v77_v58  ;;  %v139_v62 = vmul.f32 %v1436_v54, %v1436_v54  ;;  %v140_v63 = vmul.f32 %v1438_v55, %v1438_v55 }
  0x9f   :  { %v1447_v0 = vsub.f32 %v1351_v12, %v109_v60  ;;  %v1450_v1 = vsub.f32 %v1356_v13, %v110_v61  ;;  %v163_v2 = vsel %vm53_vm0, %v139_v62, 0.0  ;;  %v166_v5 = vsel %vm53_vm0, %v140_v63, 0.0 }
  0xa0   :  { %161 = vadd.xlane.f32.xlu1 %v160_v59  ;;  %164 = vadd.xlane.f32.xlu0 %v163_v2  ;;  %v80_v3 = vpop.xlane.xlu0 %79  ;;  %v83_v4 = vpop.xlane.xlu1 %82 }
  0xa1   :  { %v111_v6 = vmul.f32 0.16666667, %v80_v3  ;;  %v112_v7 = vmul.f32 0.16666667, %v83_v4  ;;  %v141_v8 = vmul.f32 %v1447_v0, %v1447_v0  ;;  %v142_v9 = vmul.f32 %v1450_v1, %v1450_v1 }
  0xa3   :  { %v1459_v10 = vsub.f32 %v1365_v16, %v111_v6  ;;  %v1462_v11 = vsub.f32 %v1370_v17, %v112_v7  ;;  %v169_v12 = vsel %vm53_vm0, %v141_v8, 0.0  ;;  %v172_v15 = vsel %vm53_vm0, %v142_v9, 0.0 }
  0xa4   :  { %167 = vadd.xlane.f32.xlu1 %v166_v5  ;;  %170 = vadd.xlane.f32.xlu0 %v169_v12  ;;  %v86_v13 = vpop.xlane.xlu0 %85  ;;  %v89_v14 = vpop.xlane.xlu1 %88 }
  0xa5   :  { %v113_v18 = vmul.f32 0.16666667, %v86_v13  ;;  %v114_v19 = vmul.f32 0.16666667, %v89_v14  ;;  %v143_v22 = vmul.f32 %v1459_v10, %v1459_v10  ;;  %v144_v16 = vmul.f32 %v1462_v11, %v1462_v11 }
  0xa7   :  { %v1471_v23 = vsub.f32 %v1379_v20, %v113_v18  ;;  %v1474_v17 = vsub.f32 %v1384_v21, %v114_v19  ;;  %v175_v26 = vsel %vm53_vm0, %v143_v22, 0.0  ;;  %v178_v31 = vsel %vm53_vm0, %v144_v16, 0.0 }
  0xa8   :  { %173 = vadd.xlane.f32.xlu1 %v172_v15  ;;  %176 = vadd.xlane.f32.xlu0 %v175_v26  ;;  %v92_v27 = vpop.xlane.xlu0 %91  ;;  %v95_v30 = vpop.xlane.xlu1 %94 }
  0xa9   :  { %v115_v32 = vmul.f32 0.16666667, %v92_v27  ;;  %v116_v33 = vmul.f32 0.16666667, %v95_v30  ;;  %v145_v34 = vmul.f32 %v1471_v23, %v1471_v23  ;;  %v146_v20 = vmul.f32 %v1474_v17, %v1474_v17 }
  0xab   :  { %v1483_v35 = vsub.f32 %v1393_v24, %v115_v32  ;;  %v1486_v21 = vsub.f32 %v1398_v25, %v116_v33  ;;  %v181_v38 = vsel %vm53_vm0, %v145_v34, 0.0  ;;  %v184_v41 = vsel %vm53_vm0, %v146_v20, 0.0  ;;  %v1521_v32 = vld [vmem:[%s1739_s1] ss:$0 sm:$0xff] }
  0xac   :  { %179 = vadd.xlane.f32.xlu1 %v178_v31  ;;  %182 = vadd.xlane.f32.xlu0 %v181_v38  ;;  %v98_v39 = vpop.xlane.xlu0 %97  ;;  %v101_v40 = vpop.xlane.xlu1 %100 }
  0xad   :  { %v117_v42 = vmul.f32 0.16666667, %v98_v39  ;;  %v118_v43 = vmul.f32 0.16666667, %v101_v40  ;;  %v147_v46 = vmul.f32 %v1483_v35, %v1483_v35  ;;  %v148_v24 = vmul.f32 %v1486_v21, %v1486_v21 }
  0xaf   :  { %v1495_v47 = vsub.f32 %v1407_v28, %v117_v42  ;;  %v1498_v25 = vsub.f32 %v1412_v29, %v118_v43  ;;  %v187_v48 = vsel %vm53_vm0, %v147_v46, 0.0  ;;  %v190_v49 = vsel %vm53_vm0, %v148_v24, 0.0  ;;  %v315_v29 = vld [vmem:[%s1737_s3] sm:$0x7] }
  0xb0   :  { %185 = vadd.xlane.f32.xlu1 %v184_v41  ;;  %188 = vadd.xlane.f32.xlu0 %v187_v48  ;;  %v349_v53 = vsel %vm347_vm1, %v315_v29, 0  ;;  %v1529_v24 = vld [vmem:[%s1740_s2] ss:$0 sm:$0xff] }
  0xb1   :  { %v149_v50 = vmul.f32 %v1495_v47, %v1495_v47  ;;  %v150_v51 = vmul.f32 %v1498_v25, %v1498_v25  ;;  %1227 = vmatprep.subr.msk.bf16.mxu0 %vm347_vm1, %v315_v29  ;;  %1228 = vmatprep.subr.msk.bf16.mxu1 %vm347_vm1, %v315_v29 }
  0xb2   :  { %1160 = vmatpush3.bf16.msra.mxu0 %v349_v53  ;;  %1226 = vmatpush3.bf16.msra.mxu1 %v349_v53 }
  0xb3   :  { %v193_v52 = vsel %vm53_vm0, %v149_v50, 0.0  ;;  %v196_v28 = vsel %vm53_vm0, %v150_v51, 0.0  ;;  %1177 = vmatprep.subr.bf16.mxu1 %v1514_v56 }
  0xb4   :  { %191 = vadd.xlane.f32.xlu1 %v190_v49  ;;  %194 = vadd.xlane.f32.xlu0 %v193_v52 }
  0xb8   :  { %197 = vadd.xlane.f32.xlu1 %v196_v28 }
 0x125   :  { %v153_v57 = vpop.xlane.xlu0 %152 }
 0x126   :  { %v199_v58 = vmul.f32 0.16666667, %v153_v57 }
 0x128   :  { %v215_v59 = vadd.f32 1e-05, %v199_v58 }
 0x129   :  { %v156_v60 = vpop.xlane.xlu1 %155  ;;  %v159_v61 = vpop.xlane.xlu0 %158 }
 0x12a   :  { %1237 = vrsqrt.f32 %v215_v59  ;;  %v200_v62 = vmul.f32 0.16666667, %v156_v60  ;;  %v201_v63 = vmul.f32 0.16666667, %v159_v61 }
 0x12c   :  { %v216_v2 = vadd.f32 1e-05, %v200_v62  ;;  %v217_v3 = vadd.f32 1e-05, %v201_v63 }
 0x12d   :  { %v162_v4 = vpop.xlane.xlu1 %161  ;;  %v165_v5 = vpop.xlane.xlu0 %164 }
 0x12e   :  { %1239 = vrsqrt.f32 %v216_v2  ;;  %v202_v6 = vmul.f32 0.16666667, %v162_v4  ;;  %v203_v7 = vmul.f32 0.16666667, %v165_v5 }
 0x12f   :  { %1241 = vrsqrt.f32 %v217_v3 }
 0x130   :  { %v218_v8 = vadd.f32 1e-05, %v202_v6  ;;  %v219_v9 = vadd.f32 1e-05, %v203_v7 }
 0x131   :  { %v168_v12 = vpop.xlane.xlu1 %167  ;;  %v171_v13 = vpop.xlane.xlu0 %170 }
 0x132   :  { %1243 = vrsqrt.f32 %v218_v8  ;;  %v204_v14 = vmul.f32 0.16666667, %v168_v12  ;;  %v205_v15 = vmul.f32 0.16666667, %v171_v13 }
 0x133   :  { %1245 = vrsqrt.f32 %v219_v9 }
 0x134   :  { %v1238_v18 = vpop.eup %1237  ;;  %v220_v19 = vadd.f32 1e-05, %v204_v14  ;;  %v221_v22 = vadd.f32 1e-05, %v205_v15 }
 0x135   :  { %v174_v16 = vpop.xlane.xlu1 %173  ;;  %v177_v26 = vpop.xlane.xlu0 %176  ;;  %v247_v27 = vmul.f32 %v1238_v18, %v1418_v36 }
 0x136   :  { %1247 = vrsqrt.f32 %v220_v19  ;;  %v206_v30 = vmul.f32 0.16666667, %v174_v16  ;;  %v207_v31 = vmul.f32 0.16666667, %v177_v26 }
 0x137   :  { %1249 = vrsqrt.f32 %v221_v22  ;;  %v269_v42 = vmul.f32 %v1521_v32, %v247_v27 }
 0x138   :  { %v1240_v33 = vpop.eup %1239  ;;  %v222_v34 = vadd.f32 1e-05, %v206_v30  ;;  %v223_v20 = vadd.f32 1e-05, %v207_v31 }
 0x139   :  { %v1242_v38 = vpop.eup %1241  ;;  %v180_v39 = vpop.xlane.xlu1 %179  ;;  %v248_v41 = vmul.f32 %v1240_v33, %v1426_v44 }
 0x13a   :  { %v183_v40 = vpop.xlane.xlu0 %182  ;;  %v249_v36 = vmul.f32 %v1242_v38, %v1420_v37  ;;  %1251 = vrsqrt.f32 %v222_v34  ;;  %v208_v43 = vmul.f32 0.16666667, %v180_v39  ;;  %v291_v37 = vadd.f32 %v1529_v24, %v269_v42 }
 0x13b   :  { %v209_v46 = vmul.f32 0.16666667, %v183_v40  ;;  %1253 = vrsqrt.f32 %v223_v20  ;;  %v270_v48 = vmul.f32 %v1521_v32, %v248_v41 }
 0x13c   :  { %v1244_v49 = vpop.eup %1243  ;;  %v224_v50 = vadd.f32 1e-05, %v208_v43  ;;  %v271_v57 = vmul.f32 %v1521_v32, %v249_v36 }
 0x13d   :  { %v225_v51 = vadd.f32 1e-05, %v209_v46  ;;  %v1246_v52 = vpop.eup %1245  ;;  %v250_v44 = vmul.f32 %v1244_v49, %v1428_v45  ;;  %v186_v28 = vpop.xlane.xlu1 %185  ;;  %v292_v53 = vadd.f32 %v1529_v24, %v270_v48 }
 0x13e   :  { %v189_v29 = vpop.xlane.xlu0 %188  ;;  %v251_v58 = vmul.f32 %v1246_v52, %v1436_v54  ;;  %1255 = vrsqrt.f32 %v224_v50  ;;  %v210_v59 = vmul.f32 0.16666667, %v186_v28  ;;  %v293_v7 = vadd.f32 %v1529_v24, %v271_v57 }
 0x13f   :  { %v211_v60 = vmul.f32 0.16666667, %v189_v29  ;;  %1257 = vrsqrt.f32 %v225_v51  ;;  %v307_v61 = vpack.c.bf16 %v292_v53, %v291_v37  ;;  %v272_v62 = vmul.f32 %v1521_v32, %v250_v44 }
 0x140   :  { %v1248_v63 = vpop.eup %1247  ;;  %v226_v2 = vadd.f32 1e-05, %v210_v59  ;;  %v273_v8 = vmul.f32 %v1521_v32, %v251_v58 }
 0x141   :  { %v227_v45 = vadd.f32 1e-05, %v211_v60  ;;  %v1250_v3 = vpop.eup %1249  ;;  %v252_v4 = vmul.f32 %v1248_v63, %v1438_v55  ;;  %v192_v5 = vpop.xlane.xlu1 %191  ;;  %1161 = vmatprep.mubr.msk.bf16.mxu0 %vm53_vm0, %v307_v61  ;;  %v294_v54 = vadd.f32 %v1529_v24, %v272_v62  ;;  %v1230_v61 = vld [vmem:[%s1738_s5 + $0x8] sm:$0xff]  }
 0x142   :  { %v195_v6 = vpop.xlane.xlu0 %194  ;;  %v253_v9 = vmul.f32 %v1250_v3, %v1447_v0  ;;  %1259 = vrsqrt.f32 %v226_v2  ;;  %v212_v12 = vmul.f32 0.16666667, %v192_v5  ;;  %v295_v27 = vadd.f32 %v1529_v24, %v273_v8 }
 0x143   :  { %v213_v13 = vmul.f32 0.16666667, %v195_v6  ;;  %1261 = vrsqrt.f32 %v227_v45  ;;  %v308_v14 = vpack.c.bf16 %v294_v54, %v293_v7  ;;  %v274_v15 = vmul.f32 %v1521_v32, %v252_v4  ;;  %v1231_v6 = vld [vmem:[%s1738_s5 + $0x10] sm:$0xff]   ;;  %v980_v7 = vld [vmem:[%s1742_s4] ss:$0 sm:$0xff] }
 0x144   :  { %v1252_v55 = vpop.eup %1251  ;;  %v228_v18 = vadd.f32 1e-05, %v212_v12  ;;  %v275_v30 = vmul.f32 %v1521_v32, %v253_v9 }
 0x145   :  { %v229_v19 = vadd.f32 1e-05, %v213_v13  ;;  %v1254_v22 = vpop.eup %1253  ;;  %v254_v16 = vmul.f32 %v1252_v55, %v1450_v1  ;;  %v198_v26 = vpop.xlane.xlu1 %197  ;;  %1162 = vmatmul.mubr.msk.bf16.vlgmr.msra.gmra.mrb[0].mxu0 %vm53_vm0, %v308_v14  ;;  %v296_v0 = vadd.f32 %v1529_v24, %v274_v15 }
 0x146   :  { %1263 = vrsqrt.f32 %v228_v18  ;;  %v214_v31 = vmul.f32 0.16666667, %v198_v26  ;;  %v255_v33 = vmul.f32 %v1254_v22, %v1459_v10  ;;  %v297_v40 = vadd.f32 %v1529_v24, %v275_v30 }
 0x147   :  { %1265 = vrsqrt.f32 %v229_v19  ;;  %v309_v34 = vpack.c.bf16 %v296_v0, %v295_v27  ;;  %v276_v20 = vmul.f32 %v1521_v32, %v254_v16 }
 0x148   :  { %v1256_v38 = vpop.eup %1255  ;;  %v230_v39 = vadd.f32 1e-05, %v214_v31  ;;  %v277_v36 = vmul.f32 %v1521_v32, %v255_v33 }
 0x149   :  { %v1258_v1 = vpop.eup %1257  ;;  %1165 = vmatprep.mubr.msk.bf16.mxu0 %vm53_vm0, %v309_v34  ;;  %v298_v41 = vadd.f32 %v1529_v24, %v276_v20  ;;  %v256_v42 = vmul.f32 %v1256_v38, %v1462_v11 }
 0x14a   :  { %v257_v43 = vmul.f32 %v1258_v1, %v1471_v23  ;;  %1267 = vrsqrt.f32 %v230_v39  ;;  %v299_v51 = vadd.f32 %v1529_v24, %v277_v36 }
 0x14b   :  { %v310_v10 = vpack.c.bf16 %v298_v41, %v297_v40  ;;  %v278_v46 = vmul.f32 %v1521_v32, %v256_v42 }
 0x14c   :  { %v1260_v48 = vpop.eup %1259  ;;  %v279_v11 = vmul.f32 %v1521_v32, %v257_v43 }
 0x14d   :  { %v1262_v49 = vpop.eup %1261  ;;  %v258_v50 = vmul.f32 %v1260_v48, %v1474_v17  ;;  %1166 = vmatmul.mubr.msk.bf16.gmra.mrb[4].mxu0 %vm53_vm0, %v310_v10  ;;  %v300_v52 = vadd.f32 %v1529_v24, %v278_v46 }
 0x14e   :  { %v259_v44 = vmul.f32 %v1262_v49, %v1483_v35  ;;  %v301_v17 = vadd.f32 %v1529_v24, %v279_v11 }
 0x14f   :  { %v311_v28 = vpack.c.bf16 %v300_v52, %v299_v51  ;;  %v280_v23 = vmul.f32 %v1521_v32, %v258_v50 }
 0x150   :  { %v1264_v29 = vpop.eup %1263  ;;  %v281_v58 = vmul.f32 %v1521_v32, %v259_v44 }
 0x151   :  { %v1266_v37 = vpop.eup %1265  ;;  %v260_v53 = vmul.f32 %v1264_v29, %v1486_v21  ;;  %1169 = vmatprep.mubr.msk.bf16.mxu1 %vm53_vm0, %v311_v28  ;;  %v302_v57 = vadd.f32 %v1529_v24, %v280_v23 }
 0x152   :  { %v261_v59 = vmul.f32 %v1266_v37, %v1495_v47  ;;  %v303_v63 = vadd.f32 %v1529_v24, %v281_v58 }
 0x153   :  { %v312_v60 = vpack.c.bf16 %v302_v57, %v301_v17  ;;  %v282_v35 = vmul.f32 %v1521_v32, %v260_v53 }
 0x154   :  { %v1268_v62 = vpop.eup %1267  ;;  %v283_v45 = vmul.f32 %v1521_v32, %v261_v59 }
 0x155   :  { %v262_v21 = vmul.f32 %v1268_v62, %v1498_v25  ;;  %1170 = vmatmul.mubr.msk.bf16.vlgmr.msra.gmra.mrb[0].mxu1 %vm53_vm0, %v312_v60  ;;  %v304_v2 = vadd.f32 %v1529_v24, %v282_v35 }
 0x156   :  { %1178 = vmatpush3.bf16.msra.mxu1 %v1514_v56  ;;  %v305_v4 = vadd.f32 %v1529_v24, %v283_v45  ;;  %v1232_v56 = vld [vmem:[%s1738_s5 + $0x18] sm:$0xff]  }
 0x157   :  { %v313_v47 = vpack.c.bf16 %v304_v2, %v303_v63  ;;  %v284_v3 = vmul.f32 %v1521_v32, %v262_v21  ;;  %1179 = vmatprep.subr.bf16.mxu1 %v1230_v61  ;;  %v1233_v32 = vld [vmem:[%s1741_s7] sm:$0xff]  }
 0x158   :  { %1201 = vmatprep.subr.bf16.mxu0 %v1233_v32 }
 0x159   :  { %1173 = vmatprep.mubr.msk.bf16.mxu1 %vm53_vm0, %v313_v47  ;;  %v306_v25 = vadd.f32 %v1529_v24, %v284_v3  ;;  %v1234_v24 = vld [vmem:[%s1741_s7 + $0x8] sm:$0xff]   ;;  %1202 = vmatpush3.bf16.msra.mxu0 %v1233_v32 }
 0x15a   :  { %1180 = vmatpush3.bf16.msra.mxu1 %v1230_v61  ;;  %1203 = vmatprep.subr.bf16.mxu0 %v1234_v24 }
 0x15b   :  { %v314_v5 = vpack.c.bf16 %v306_v25, %v305_v4  ;;  %1181 = vmatprep.subr.bf16.mxu1 %v1231_v6  ;;  %v1235_v4 = vld [vmem:[%s1741_s7 + $0x10] sm:$0xff]   ;;  %v1236_v25 = vld [vmem:[%s1741_s7 + $0x18] sm:$0xff]  }
 0x15d   :  { %1174 = vmatmul.mubr.msk.bf16.gmra.mrb[4].mxu1 %vm53_vm0, %v314_v5  ;;  %1204 = vmatpush3.bf16.msra.mxu0 %v1234_v24  ;;  %v1619_v5 = vld [vmem:[%s1743_s6] ss:$0 sm:$0xff] }
 0x15e   :  { %1182 = vmatpush3.bf16.msra.mxu1 %v1231_v6  ;;  %1205 = vmatprep.subr.bf16.mxu0 %v1235_v4 }
 0x15f   :  { %1183 = vmatprep.subr.bf16.mxu1 %v1232_v56 }
 0x161   :  { %1206 = vmatpush3.bf16.msra.mxu0 %v1235_v4 }
 0x162   :  { %1184 = vmatpush3.bf16.msra.mxu1 %v1232_v56  ;;  %1207 = vmatprep.subr.bf16.mxu0 %v1236_v25 }
 0x165   :  { %1208 = vmatpush3.bf16.msra.mxu0 %v1236_v25 }
 0x218   :  { %v1163_v54 = vpop.f32.mrb[0].mxu0 }
 0x219   :  { %v394_v8 = vadd.f32 %v1163_v54, %v980_v7  ;;  %v385_v9 = vpop.f32.mrb[1].mxu0 }
 0x21a   :  { %v386_v12 = vadd.f32 %v980_v7, %v385_v9  ;;  %v1164_v13 = vpop.f32.mrb[2].mxu0 }
 0x21b   :  { %v397_v14 = vadd.f32 %v1164_v13, %v980_v7  ;;  %v388_v15 = vpop.f32.mrb[3].mxu0  ;;  %v450_v18 = vmax.f32 %v394_v8, 0.0 }
 0x21c   :  { %v389_v55 = vadd.f32 %v980_v7, %v388_v15  ;;  %v448_v22 = vmax.f32 %v386_v12, 0.0 }
 0x21d   :  { %v451_v19 = vmax.f32 %v397_v14, 0.0 }
 0x21e   :  { %v449_v16 = vmax.f32 %v389_v55, 0.0 }
 0x21f   :  { %v465_v26 = vpack.c.bf16 %v451_v19, %v450_v18 }
 0x220   :  { %v464_v27 = vpack.c.bf16 %v449_v16, %v448_v22  ;;  %v1167_v0 = vpop.f32.mrb[4].mxu0 }
 0x221   :  { %v410_v30 = vadd.f32 %v1167_v0, %v980_v7  ;;  %v401_v31 = vpop.f32.mrb[5].mxu0 }
 0x222   :  { %v402_v33 = vadd.f32 %v980_v7, %v401_v31  ;;  %v1168_v34 = vpop.f32.mrb[6].mxu0  ;;  %1185 = vmatprep.mubr.msk.bf16.mxu1 %vm511_vm2, %v464_v27 }
 0x223   :  { %v413_v20 = vadd.f32 %v1168_v34, %v980_v7  ;;  %v404_v38 = vpop.f32.mrb[7].mxu0  ;;  %1186 = vmatmul.mubr.msk.bf16.vlgmr.msra.gmra.mrb[8].mxu1 %vm511_vm2, %v465_v26  ;;  %v454_v1 = vmax.f32 %v410_v30, 0.0 }
 0x224   :  { %v405_v39 = vadd.f32 %v980_v7, %v404_v38  ;;  %v452_v41 = vmax.f32 %v402_v33, 0.0 }
 0x225   :  { %v455_v40 = vmax.f32 %v413_v20, 0.0 }
 0x226   :  { %v453_v42 = vmax.f32 %v405_v39, 0.0 }
 0x227   :  { %v467_v36 = vpack.c.bf16 %v455_v40, %v454_v1 }
 0x228   :  { %v466_v43 = vpack.c.bf16 %v453_v42, %v452_v41  ;;  %v1171_v10 = vpop.f32.mrb[0].mxu1 }
 0x229   :  { %v426_v46 = vadd.f32 %v1171_v10, %v980_v7  ;;  %v417_v48 = vpop.f32.mrb[1].mxu1 }
 0x22a   :  { %v418_v49 = vadd.f32 %v980_v7, %v417_v48  ;;  %v1172_v50 = vpop.f32.mrb[2].mxu1  ;;  %1189 = vmatprep.mubr.msk.bf16.mxu1 %vm511_vm2, %v466_v43 }
 0x22b   :  { %v429_v51 = vadd.f32 %v1172_v50, %v980_v7  ;;  %v420_v52 = vpop.f32.mrb[3].mxu1  ;;  %1190 = vmatmul.mubr.msk.bf16.gmra.mrb[12].mxu1 %vm511_vm2, %v467_v36  ;;  %v458_v44 = vmax.f32 %v426_v46, 0.0 }
 0x22c   :  { %v421_v11 = vadd.f32 %v980_v7, %v420_v52  ;;  %v456_v23 = vmax.f32 %v418_v49, 0.0 }
 0x22d   :  { %v459_v28 = vmax.f32 %v429_v51, 0.0 }
 0x22e   :  { %v457_v29 = vmax.f32 %v421_v11, 0.0 }
 0x22f   :  { %v469_v37 = vpack.c.bf16 %v459_v28, %v458_v44 }
 0x230   :  { %v468_v53 = vpack.c.bf16 %v457_v29, %v456_v23  ;;  %v1175_v17 = vpop.f32.mrb[4].mxu1 }
 0x231   :  { %v442_v57 = vadd.f32 %v1175_v17, %v980_v7  ;;  %v433_v58 = vpop.f32.mrb[5].mxu1 }
 0x232   :  { %v434_v59 = vadd.f32 %v980_v7, %v433_v58  ;;  %v1176_v60 = vpop.f32.mrb[6].mxu1  ;;  %1193 = vmatprep.mubr.msk.bf16.mxu1 %vm511_vm2, %v468_v53 }
 0x233   :  { %v445_v35 = vadd.f32 %v1176_v60, %v980_v7  ;;  %v436_v61 = vpop.f32.mrb[7].mxu1  ;;  %1194 = vmatmul.mubr.msk.bf16.gmra.mrb[16].mxu1 %vm511_vm2, %v469_v37  ;;  %v462_v21 = vmax.f32 %v442_v57, 0.0 }
 0x234   :  { %v437_v62 = vadd.f32 %v980_v7, %v436_v61  ;;  %v460_v2 = vmax.f32 %v434_v59, 0.0 }
 0x235   :  { %v463_v63 = vmax.f32 %v445_v35, 0.0 }
 0x236   :  { %v461_v45 = vmax.f32 %v437_v62, 0.0 }
 0x237   :  { %v471_v47 = vpack.c.bf16 %v463_v63, %v462_v21 }
 0x238   :  { %v470_v3 = vpack.c.bf16 %v461_v45, %v460_v2 }
 0x23a   :  { %1197 = vmatprep.mubr.msk.bf16.mxu1 %vm511_vm2, %v470_v3 }
 0x23b   :  { %1198 = vmatmul.mubr.msk.bf16.gmra.mrb[20].mxu1 %vm511_vm2, %v471_v47 }
 0x2f6   :  { %v1187_v6 = vpop.f32.mrb[8].mxu1 }
 0x2f7   :  { %v579_v56 = vadd.f32 %v1187_v6, %v1619_v5  ;;  %v570_v32 = vpop.f32.mrb[9].mxu1 }
 0x2f8   :  { %v571_v24 = vadd.f32 %v1619_v5, %v570_v32  ;;  %v1188_v7 = vpop.f32.mrb[10].mxu1 }
 0x2f9   :  { %v635_v54 = vmax.f32 %v579_v56, 0.0  ;;  %v582_v8 = vadd.f32 %v1188_v7, %v1619_v5  ;;  %v573_v9 = vpop.f32.mrb[11].mxu1 }
 0x2fa   :  { %v633_v12 = vmax.f32 %v571_v24, 0.0  ;;  %v574_v13 = vadd.f32 %v1619_v5, %v573_v9 }
 0x2fb   :  { %v1049_v14 = vpack.c.bf16 %v635_v54, %v635_v54  ;;  %v636_v15 = vmax.f32 %v582_v8, 0.0 }
 0x2fc   :  { %v1047_v55 = vpack.c.bf16 %v633_v12, %v633_v12  ;;  %v634_v18 = vmax.f32 %v574_v13, 0.0  ;;  %v1018_v13 = vld [vmem:[%s1745_s8] ss:$0 sm:$0xff] }
 0x2fd   :  { %716 = vst.msk [vmem:[%s1744_s9 + $0x8] sm:$0xf] %vm713_vm3, %v1049_v14  ;;  %v650_v19 = vpack.c.bf16 %v636_v15, %v635_v54  ;;  %v1050_v22 = vpack.c.bf16 %v636_v15, %v636_v15 }
 0x2fe   :  { %714 = vst.msk [vmem:[%s1744_s9] sm:$0xf] %vm713_vm3, %v1047_v55  ;;  %v649_v16 = vpack.c.bf16 %v634_v18, %v633_v12  ;;  %v1048_v26 = vpack.c.bf16 %v634_v18, %v634_v18  ;;  %v1191_v27 = vpop.f32.mrb[12].mxu1 }
 0x2ff   :  { %717 = vst.msk [vmem:[%s1744_s9 + $0xc] sm:$0xf] %vm713_vm3, %v1050_v22  ;;  %v595_v0 = vadd.f32 %v1191_v27, %v1619_v5  ;;  %v586_v30 = vpop.f32.mrb[13].mxu1 }
 0x300   :  { %715 = vst.msk [vmem:[%s1744_s9 + $0x4] sm:$0xf] %vm713_vm3, %v1048_v26  ;;  %v587_v31 = vadd.f32 %v1619_v5, %v586_v30  ;;  %v1192_v33 = vpop.f32.mrb[14].mxu1  ;;  %1209 = vmatprep.mubr.msk.bf16.mxu0 %vm511_vm2, %v649_v16 }
 0x301   :  { %v639_v34 = vmax.f32 %v595_v0, 0.0  ;;  %v598_v20 = vadd.f32 %v1192_v33, %v1619_v5  ;;  %v589_v38 = vpop.f32.mrb[15].mxu1  ;;  %1210 = vmatmul.mubr.msk.bf16.vlgmr.msra.gmra.mrb[8].mxu0 %vm511_vm2, %v650_v19 }
 0x302   :  { %v637_v39 = vmax.f32 %v587_v31, 0.0  ;;  %v590_v1 = vadd.f32 %v1619_v5, %v589_v38 }
 0x303   :  { %v1053_v40 = vpack.c.bf16 %v639_v34, %v639_v34  ;;  %v640_v41 = vmax.f32 %v598_v20, 0.0 }
 0x304   :  { %v1051_v42 = vpack.c.bf16 %v637_v39, %v637_v39  ;;  %v638_v36 = vmax.f32 %v590_v1, 0.0 }
 0x305   :  { %720 = vst.msk [vmem:[%s1744_s9 + $0x18] sm:$0xf] %vm713_vm3, %v1053_v40  ;;  %v652_v43 = vpack.c.bf16 %v640_v41, %v639_v34  ;;  %v1054_v10 = vpack.c.bf16 %v640_v41, %v640_v41 }
 0x306   :  { %718 = vst.msk [vmem:[%s1744_s9 + $0x10] sm:$0xf] %vm713_vm3, %v1051_v42  ;;  %v651_v46 = vpack.c.bf16 %v638_v36, %v637_v39  ;;  %v1052_v48 = vpack.c.bf16 %v638_v36, %v638_v36  ;;  %v1195_v49 = vpop.f32.mrb[16].mxu1 }
 0x307   :  { %721 = vst.msk [vmem:[%s1744_s9 + $0x1c] sm:$0xf] %vm713_vm3, %v1054_v10  ;;  %v611_v50 = vadd.f32 %v1195_v49, %v1619_v5  ;;  %v602_v51 = vpop.f32.mrb[17].mxu1 }
 0x308   :  { %719 = vst.msk [vmem:[%s1744_s9 + $0x14] sm:$0xf] %vm713_vm3, %v1052_v48  ;;  %v603_v52 = vadd.f32 %v1619_v5, %v602_v51  ;;  %v1196_v11 = vpop.f32.mrb[18].mxu1  ;;  %1213 = vmatprep.mubr.msk.bf16.mxu0 %vm511_vm2, %v651_v46 }
 0x309   :  { %v643_v44 = vmax.f32 %v611_v50, 0.0  ;;  %v614_v28 = vadd.f32 %v1196_v11, %v1619_v5  ;;  %v605_v23 = vpop.f32.mrb[19].mxu1  ;;  %1214 = vmatmul.mubr.msk.bf16.gmra.mrb[12].mxu0 %vm511_vm2, %v652_v43 }
 0x30a   :  { %v641_v29 = vmax.f32 %v603_v52, 0.0  ;;  %v606_v37 = vadd.f32 %v1619_v5, %v605_v23 }
 0x30b   :  { %v1057_v53 = vpack.c.bf16 %v643_v44, %v643_v44  ;;  %v644_v17 = vmax.f32 %v614_v28, 0.0 }
 0x30c   :  { %v1055_v57 = vpack.c.bf16 %v641_v29, %v641_v29  ;;  %v642_v58 = vmax.f32 %v606_v37, 0.0 }
 0x30d   :  { %724 = vst.msk [vmem:[%s1744_s9 + $0x28] sm:$0xf] %vm713_vm3, %v1057_v53  ;;  %v654_v59 = vpack.c.bf16 %v644_v17, %v643_v44  ;;  %v1058_v60 = vpack.c.bf16 %v644_v17, %v644_v17 }
 0x30e   :  { %722 = vst.msk [vmem:[%s1744_s9 + $0x20] sm:$0xf] %vm713_vm3, %v1055_v57  ;;  %v653_v35 = vpack.c.bf16 %v642_v58, %v641_v29  ;;  %v1056_v61 = vpack.c.bf16 %v642_v58, %v642_v58  ;;  %v1199_v62 = vpop.f32.mrb[20].mxu1 }
 0x30f   :  { %725 = vst.msk [vmem:[%s1744_s9 + $0x2c] sm:$0xf] %vm713_vm3, %v1058_v60  ;;  %v627_v21 = vadd.f32 %v1199_v62, %v1619_v5  ;;  %v618_v63 = vpop.f32.mrb[21].mxu1 }
 0x310   :  { %723 = vst.msk [vmem:[%s1744_s9 + $0x24] sm:$0xf] %vm713_vm3, %v1056_v61  ;;  %v619_v2 = vadd.f32 %v1619_v5, %v618_v63  ;;  %v1200_v45 = vpop.f32.mrb[22].mxu1  ;;  %1217 = vmatprep.mubr.msk.bf16.mxu0 %vm511_vm2, %v653_v35 }
 0x311   :  { %v647_v47 = vmax.f32 %v627_v21, 0.0  ;;  %v630_v3 = vadd.f32 %v1200_v45, %v1619_v5  ;;  %v621_v4 = vpop.f32.mrb[23].mxu1  ;;  %1218 = vmatmul.mubr.msk.bf16.gmra.mrb[16].mxu0 %vm511_vm2, %v654_v59 }
 0x312   :  { %v645_v25 = vmax.f32 %v619_v2, 0.0  ;;  %v622_v6 = vadd.f32 %v1619_v5, %v621_v4 }
 0x313   :  { %v1061_v56 = vpack.c.bf16 %v647_v47, %v647_v47  ;;  %v648_v32 = vmax.f32 %v630_v3, 0.0 }
 0x314   :  { %v1059_v24 = vpack.c.bf16 %v645_v25, %v645_v25  ;;  %v646_v7 = vmax.f32 %v622_v6, 0.0 }
 0x315   :  { %728 = vst.msk [vmem:[%s1744_s9 + $0x38] sm:$0xf] %vm713_vm3, %v1061_v56  ;;  %v656_v54 = vpack.c.bf16 %v648_v32, %v647_v47  ;;  %v1062_v8 = vpack.c.bf16 %v648_v32, %v648_v32 }
 0x316   :  { %726 = vst.msk [vmem:[%s1744_s9 + $0x30] sm:$0xf] %vm713_vm3, %v1059_v24  ;;  %v655_v9 = vpack.c.bf16 %v646_v7, %v645_v25  ;;  %v1060_v12 = vpack.c.bf16 %v646_v7, %v646_v7 }
 0x317   :  { %729 = vst.msk [vmem:[%s1744_s9 + $0x3c] sm:$0xf] %vm713_vm3, %v1062_v8 }
 0x318   :  { %727 = vst.msk [vmem:[%s1744_s9 + $0x34] sm:$0xf] %vm713_vm3, %v1060_v12  ;;  %1221 = vmatprep.mubr.msk.bf16.mxu0 %vm511_vm2, %v655_v9 }
 0x319   :  { %1222 = vmatmul.mubr.msk.bf16.gmra.mrb[20].mxu0 %vm511_vm2, %v656_v54 }
 0x3d4   :  { %v1211_v5 = vpop.f32.mrb[8].mxu0 }
 0x3d5   :  { %v827_v14 = vpop.f32.mrb[9].mxu0  ;;  %v836_v55 = vadd.f32 %v1211_v5, %v1018_v13 }
 0x3d6   :  { %v1212_v15 = vpop.f32.mrb[10].mxu0  ;;  %v828_v22 = vadd.f32 %v1018_v13, %v827_v14 }
 0x3d7   :  { %v839_v18 = vadd.f32 %v1212_v15, %v1018_v13  ;;  %v830_v19 = vpop.f32.mrb[11].mxu0 }
 0x3d8   :  { %v831_v16 = vadd.f32 %v1018_v13, %v830_v19 }
 0x3d9   :  { %v1087_v26 = vpack.c.bf16 %v839_v18, %v836_v55 }
 0x3da   :  { %v1082_v27 = vpack.c.bf16 %v831_v16, %v828_v22 }
 0x3db   :  { %1119 = vst [vmem:[%s1746_s10 + $0x8] sm:$0xff] %v1087_v26  }
 0x3dc   :  { %1083 = vst [vmem:[%s1746_s10] sm:$0xff] %v1082_v27   ;;  %v1215_v0 = vpop.f32.mrb[12].mxu0 }
 0x3dd   :  { %v843_v30 = vpop.f32.mrb[13].mxu0  ;;  %v852_v33 = vadd.f32 %v1215_v0, %v1018_v13 }
 0x3de   :  { %v1216_v31 = vpop.f32.mrb[14].mxu0  ;;  %v844_v38 = vadd.f32 %v1018_v13, %v843_v30 }
 0x3df   :  { %v855_v34 = vadd.f32 %v1216_v31, %v1018_v13  ;;  %v846_v20 = vpop.f32.mrb[15].mxu0 }
 0x3e0   :  { %v847_v39 = vadd.f32 %v1018_v13, %v846_v20 }
 0x3e1   :  { %v1097_v1 = vpack.c.bf16 %v855_v34, %v852_v33 }
 0x3e2   :  { %v1092_v40 = vpack.c.bf16 %v847_v39, %v844_v38 }
 0x3e3   :  { %1121 = vst [vmem:[%s1746_s10 + $0x18] sm:$0xff] %v1097_v1  }
 0x3e4   :  { %1120 = vst [vmem:[%s1746_s10 + $0x10] sm:$0xff] %v1092_v40   ;;  %v1219_v41 = vpop.f32.mrb[16].mxu0 }
 0x3e5   :  { %v859_v42 = vpop.f32.mrb[17].mxu0  ;;  %v868_v43 = vadd.f32 %v1219_v41, %v1018_v13 }
 0x3e6   :  { %v1220_v36 = vpop.f32.mrb[18].mxu0  ;;  %v860_v48 = vadd.f32 %v1018_v13, %v859_v42 }
 0x3e7   :  { %v871_v10 = vadd.f32 %v1220_v36, %v1018_v13  ;;  %v862_v46 = vpop.f32.mrb[19].mxu0 }
 0x3e8   :  { %v863_v49 = vadd.f32 %v1018_v13, %v862_v46 }
 0x3e9   :  { %v1107_v50 = vpack.c.bf16 %v871_v10, %v868_v43 }
 0x3ea   :  { %v1102_v51 = vpack.c.bf16 %v863_v49, %v860_v48 }
 0x3eb   :  { %1123 = vst [vmem:[%s1746_s10 + $0x28] sm:$0xff] %v1107_v50  }
 0x3ec   :  { %1122 = vst [vmem:[%s1746_s10 + $0x20] sm:$0xff] %v1102_v51   ;;  %v1223_v52 = vpop.f32.mrb[20].mxu0 }
 0x3ed   :  { %v875_v11 = vpop.f32.mrb[21].mxu0  ;;  %v884_v28 = vadd.f32 %v1223_v52, %v1018_v13 }
 0x3ee   :  { %v1224_v44 = vpop.f32.mrb[22].mxu0  ;;  %v876_v37 = vadd.f32 %v1018_v13, %v875_v11 }
 0x3ef   :  { %v887_v23 = vadd.f32 %v1224_v44, %v1018_v13  ;;  %v878_v29 = vpop.f32.mrb[23].mxu0 }
 0x3f0   :  { %v879_v53 = vadd.f32 %v1018_v13, %v878_v29 }
 0x3f1   :  { %v1117_v17 = vpack.c.bf16 %v887_v23, %v884_v28 }
 0x3f2   :  { %v1112_v57 = vpack.c.bf16 %v879_v53, %v876_v37 }
 0x3f3   :  { %1125 = vst [vmem:[%s1746_s10 + $0x38] sm:$0xff] %v1117_v17  }
 0x3f4   :  { %1124 = vst [vmem:[%s1746_s10 + $0x30] sm:$0xff] %v1112_v57  }

// kernel: gnn_policy_forward.10
= control target key start
LH: loop header
LB: loop body
LE: loop exit
PB: predicated region body
PF: predicated region fallthrough
CT: control target
= control target key end

     0   :  { %vm53_vm0 = vcmask 31744   ;;  %vm347_vm1 = vcmask 1041408   ;;  %vm511_vm2 = vcmask 523264   ;;  %vm713_vm3 = vcmask 519168   ;;  %s1729_s0 = inlined_call_operand.vmem [shape: f32[128,4], index: 0, kind: input, shape index: {}]   ;;  %s1730_s3 = inlined_call_operand.vmem [shape: bf16[4,64], index: 3, kind: input, shape index: {}]   ;;  %s1731_s5 = inlined_call_operand.vmem [shape: bf16[64,64], index: 5, kind: input, shape index: {}]   ;;  %s1732_s1 = inlined_call_operand.vmem [shape: f32[1,4], index: 1, kind: input, shape index: {}]   ;;  %s1733_s2 = inlined_call_operand.vmem [shape: f32[1,4], index: 2, kind: input, shape index: {}]   ;;  %s1734_s7 = inlined_call_operand.vmem [shape: bf16[64,64], index: 7, kind: input, shape index: {}]   ;;  %s1735_s4 = inlined_call_operand.vmem [shape: f32[1,64], index: 4, kind: input, shape index: {}]   ;;  %s1736_s6 = inlined_call_operand.vmem [shape: f32[1,64], index: 6, kind: input, shape index: {}]   ;;  %s1737_s9 = inlined_call_operand.vmem [shape: bf16[128,64], index: 9, kind: output, shape index: {0}]   ;;  %s1738_s8 = inlined_call_operand.vmem [shape: f32[1,64], index: 8, kind: input, shape index: {}]   ;;  %s1739_s10 = inlined_call_operand.vmem [shape: bf16[128,64], index: 10, kind: output, shape index: {1}]  }
   0x1   :  { %v35_v0 = vld [vmem:[%s1729_s0] sm:$0xff]  ;;  %v37_v1 = vld [vmem:[%s1729_s0 + $0x10] sm:$0xff]  ;;  %v36_v2 = vld [vmem:[%s1729_s0 + $0x8] sm:$0xff] }
   0x2   :  { %v54_v3 = vsel %vm53_vm0, %v35_v0, 0.0  ;;  %v60_v4 = vsel %vm53_vm0, %v37_v1, 0.0  ;;  %v38_v5 = vld [vmem:[%s1729_s0 + $0x18] sm:$0xff]  ;;  %v57_v6 = vsel %vm53_vm0, %v36_v2, 0.0  ;;  %v39_v8 = vld [vmem:[%s1729_s0 + $0x20] sm:$0xff]  ;;  %v40_v9 = vld [vmem:[%s1729_s0 + $0x28] sm:$0xff] }
   0x3   :  { %55 = vadd.xlane.f32.xlu0 %v54_v3  ;;  %61 = vadd.xlane.f32.xlu1 %v60_v4  ;;  %v63_v7 = vsel %vm53_vm0, %v38_v5, 0.0  ;;  %v66_v10 = vsel %vm53_vm0, %v39_v8, 0.0  ;;  %v69_v11 = vsel %vm53_vm0, %v40_v9, 0.0  ;;  %v1304_v12 = vld [vmem:[%s1729_s0 + $0x30] sm:$0xff]  ;;  %v1309_v13 = vld [vmem:[%s1729_s0 + $0x38] sm:$0xff]  ;;  %v1318_v16 = vld [vmem:[%s1729_s0 + $0x40] sm:$0xff] }
   0x4   :  { %v72_v14 = vsel %vm53_vm0, %v1304_v12, 0.0  ;;  %v75_v15 = vsel %vm53_vm0, %v1309_v13, 0.0  ;;  %v1323_v17 = vld [vmem:[%s1729_s0 + $0x48] sm:$0xff]  ;;  %v78_v18 = vsel %vm53_vm0, %v1318_v16, 0.0  ;;  %v1332_v20 = vld [vmem:[%s1729_s0 + $0x50] sm:$0xff]  ;;  %v1337_v21 = vld [vmem:[%s1729_s0 + $0x58] sm:$0xff] }
   0x5   :  { %v81_v19 = vsel %vm53_vm0, %v1323_v17, 0.0  ;;  %v84_v22 = vsel %vm53_vm0, %v1332_v20, 0.0  ;;  %v87_v23 = vsel %vm53_vm0, %v1337_v21, 0.0  ;;  %v1346_v24 = vld [vmem:[%s1729_s0 + $0x60] sm:$0xff]  ;;  %v1351_v25 = vld [vmem:[%s1729_s0 + $0x68] sm:$0xff]  ;;  %v1360_v28 = vld [vmem:[%s1729_s0 + $0x70] sm:$0xff] }
   0x6   :  { %v90_v26 = vsel %vm53_vm0, %v1346_v24, 0.0  ;;  %v93_v27 = vsel %vm53_vm0, %v1351_v25, 0.0  ;;  %v1365_v29 = vld [vmem:[%s1729_s0 + $0x78] sm:$0xff]  ;;  %v96_v30 = vsel %vm53_vm0, %v1360_v28, 0.0 }
   0x7   :  { %58 = vadd.xlane.f32.xlu0 %v57_v6  ;;  %64 = vadd.xlane.f32.xlu1 %v63_v7  ;;  %v99_v31 = vsel %vm53_vm0, %v1365_v29, 0.0 }
   0xb   :  { %67 = vadd.xlane.f32.xlu0 %v66_v10  ;;  %70 = vadd.xlane.f32.xlu1 %v69_v11 }
   0xf   :  { %73 = vadd.xlane.f32.xlu0 %v72_v14  ;;  %76 = vadd.xlane.f32.xlu1 %v75_v15 }
  0x13   :  { %79 = vadd.xlane.f32.xlu0 %v78_v18  ;;  %82 = vadd.xlane.f32.xlu1 %v81_v19 }
  0x17   :  { %85 = vadd.xlane.f32.xlu0 %v84_v22  ;;  %88 = vadd.xlane.f32.xlu1 %v87_v23 }
  0x1b   :  { %91 = vadd.xlane.f32.xlu0 %v90_v26  ;;  %94 = vadd.xlane.f32.xlu1 %v93_v27 }
  0x1f   :  { %97 = vadd.xlane.f32.xlu0 %v96_v30  ;;  %100 = vadd.xlane.f32.xlu1 %v99_v31 }
  0x90   :  { %v56_v32 = vpop.xlane.xlu0 %55  ;;  %v62_v33 = vpop.xlane.xlu1 %61 }
  0x91   :  { %v103_v34 = vmul.f32 0.25, %v56_v32  ;;  %v105_v35 = vmul.f32 0.25, %v62_v33 }
  0x93   :  { %v1371_v36 = vsub.f32 %v35_v0, %v103_v34  ;;  %v1373_v37 = vsub.f32 %v37_v1, %v105_v35 }
  0x94   :  { %v59_v38 = vpop.xlane.xlu0 %58  ;;  %v65_v39 = vpop.xlane.xlu1 %64 }
  0x95   :  { %v104_v40 = vmul.f32 0.25, %v59_v38  ;;  %v106_v41 = vmul.f32 0.25, %v65_v39  ;;  %v135_v42 = vmul.f32 %v1371_v36, %v1371_v36  ;;  %v137_v43 = vmul.f32 %v1373_v37, %v1373_v37 }
  0x97   :  { %v1379_v44 = vsub.f32 %v36_v2, %v104_v40  ;;  %v1381_v45 = vsub.f32 %v38_v5, %v106_v41  ;;  %v151_v46 = vsel %vm53_vm0, %v135_v42, 0.0  ;;  %v157_v49 = vsel %vm53_vm0, %v137_v43, 0.0 }
  0x98   :  { %152 = vadd.xlane.f32.xlu0 %v151_v46  ;;  %v68_v47 = vpop.xlane.xlu0 %67  ;;  %v71_v48 = vpop.xlane.xlu1 %70 }
  0x99   :  { %v107_v50 = vmul.f32 0.25, %v68_v47  ;;  %v108_v51 = vmul.f32 0.25, %v71_v48  ;;  %v136_v52 = vmul.f32 %v1379_v44, %v1379_v44  ;;  %v138_v53 = vmul.f32 %v1381_v45, %v1381_v45 }
  0x9b   :  { %v1389_v54 = vsub.f32 %v39_v8, %v107_v50  ;;  %v1391_v55 = vsub.f32 %v40_v9, %v108_v51  ;;  %v154_v56 = vsel %vm53_vm0, %v136_v52, 0.0  ;;  %v160_v59 = vsel %vm53_vm0, %v138_v53, 0.0 }
  0x9c   :  { %158 = vadd.xlane.f32.xlu0 %v157_v49  ;;  %155 = vadd.xlane.f32.xlu1 %v154_v56  ;;  %v74_v57 = vpop.xlane.xlu0 %73  ;;  %v77_v58 = vpop.xlane.xlu1 %76  ;;  %v1467_v56 = vld [vmem:[%s1731_s5] sm:$0xff]  }
  0x9d   :  { %v109_v60 = vmul.f32 0.25, %v74_v57  ;;  %v110_v61 = vmul.f32 0.25, %v77_v58  ;;  %v139_v62 = vmul.f32 %v1389_v54, %v1389_v54  ;;  %v140_v63 = vmul.f32 %v1391_v55, %v1391_v55 }
  0x9f   :  { %v1400_v0 = vsub.f32 %v1304_v12, %v109_v60  ;;  %v1403_v1 = vsub.f32 %v1309_v13, %v110_v61  ;;  %v163_v2 = vsel %vm53_vm0, %v139_v62, 0.0  ;;  %v166_v5 = vsel %vm53_vm0, %v140_v63, 0.0 }
  0xa0   :  { %161 = vadd.xlane.f32.xlu1 %v160_v59  ;;  %164 = vadd.xlane.f32.xlu0 %v163_v2  ;;  %v80_v3 = vpop.xlane.xlu0 %79  ;;  %v83_v4 = vpop.xlane.xlu1 %82 }
  0xa1   :  { %v111_v6 = vmul.f32 0.25, %v80_v3  ;;  %v112_v7 = vmul.f32 0.25, %v83_v4  ;;  %v141_v8 = vmul.f32 %v1400_v0, %v1400_v0  ;;  %v142_v9 = vmul.f32 %v1403_v1, %v1403_v1 }
  0xa3   :  { %v1412_v10 = vsub.f32 %v1318_v16, %v111_v6  ;;  %v1415_v11 = vsub.f32 %v1323_v17, %v112_v7  ;;  %v169_v12 = vsel %vm53_vm0, %v141_v8, 0.0  ;;  %v172_v15 = vsel %vm53_vm0, %v142_v9, 0.0 }
  0xa4   :  { %167 = vadd.xlane.f32.xlu1 %v166_v5  ;;  %170 = vadd.xlane.f32.xlu0 %v169_v12  ;;  %v86_v13 = vpop.xlane.xlu0 %85  ;;  %v89_v14 = vpop.xlane.xlu1 %88 }
  0xa5   :  { %v113_v18 = vmul.f32 0.25, %v86_v13  ;;  %v114_v19 = vmul.f32 0.25, %v89_v14  ;;  %v143_v22 = vmul.f32 %v1412_v10, %v1412_v10  ;;  %v144_v16 = vmul.f32 %v1415_v11, %v1415_v11 }
  0xa7   :  { %v1424_v23 = vsub.f32 %v1332_v20, %v113_v18  ;;  %v1427_v17 = vsub.f32 %v1337_v21, %v114_v19  ;;  %v175_v26 = vsel %vm53_vm0, %v143_v22, 0.0  ;;  %v178_v31 = vsel %vm53_vm0, %v144_v16, 0.0 }
  0xa8   :  { %173 = vadd.xlane.f32.xlu1 %v172_v15  ;;  %176 = vadd.xlane.f32.xlu0 %v175_v26  ;;  %v92_v27 = vpop.xlane.xlu0 %91  ;;  %v95_v30 = vpop.xlane.xlu1 %94 }
  0xa9   :  { %v115_v32 = vmul.f32 0.25, %v92_v27  ;;  %v116_v33 = vmul.f32 0.25, %v95_v30  ;;  %v145_v34 = vmul.f32 %v1424_v23, %v1424_v23  ;;  %v146_v20 = vmul.f32 %v1427_v17, %v1427_v17 }
  0xab   :  { %v1436_v35 = vsub.f32 %v1346_v24, %v115_v32  ;;  %v1439_v21 = vsub.f32 %v1351_v25, %v116_v33  ;;  %v181_v38 = vsel %vm53_vm0, %v145_v34, 0.0  ;;  %v184_v41 = vsel %vm53_vm0, %v146_v20, 0.0  ;;  %v1474_v32 = vld [vmem:[%s1732_s1] ss:$0 sm:$0xff] }
  0xac   :  { %179 = vadd.xlane.f32.xlu1 %v178_v31  ;;  %182 = vadd.xlane.f32.xlu0 %v181_v38  ;;  %v98_v39 = vpop.xlane.xlu0 %97  ;;  %v101_v40 = vpop.xlane.xlu1 %100 }
  0xad   :  { %v117_v42 = vmul.f32 0.25, %v98_v39  ;;  %v118_v43 = vmul.f32 0.25, %v101_v40  ;;  %v147_v46 = vmul.f32 %v1436_v35, %v1436_v35  ;;  %v148_v24 = vmul.f32 %v1439_v21, %v1439_v21 }
  0xaf   :  { %v1448_v47 = vsub.f32 %v1360_v28, %v117_v42  ;;  %v1451_v25 = vsub.f32 %v1365_v29, %v118_v43  ;;  %v187_v48 = vsel %vm53_vm0, %v147_v46, 0.0  ;;  %v190_v49 = vsel %vm53_vm0, %v148_v24, 0.0  ;;  %v315_v29 = vld [vmem:[%s1730_s3] sm:$0x3] }
  0xb0   :  { %185 = vadd.xlane.f32.xlu1 %v184_v41  ;;  %188 = vadd.xlane.f32.xlu0 %v187_v48  ;;  %v349_v53 = vsel %vm347_vm1, %v315_v29, 0  ;;  %v1482_v24 = vld [vmem:[%s1733_s2] ss:$0 sm:$0xff] }
  0xb1   :  { %v149_v50 = vmul.f32 %v1448_v47, %v1448_v47  ;;  %v150_v51 = vmul.f32 %v1451_v25, %v1451_v25  ;;  %1180 = vmatprep.subr.msk.bf16.mxu0 %vm347_vm1, %v315_v29  ;;  %1181 = vmatprep.subr.msk.bf16.mxu1 %vm347_vm1, %v315_v29 }
  0xb2   :  { %1113 = vmatpush3.bf16.msra.mxu0 %v349_v53  ;;  %1179 = vmatpush3.bf16.msra.mxu1 %v349_v53 }
  0xb3   :  { %v193_v52 = vsel %vm53_vm0, %v149_v50, 0.0  ;;  %v196_v28 = vsel %vm53_vm0, %v150_v51, 0.0  ;;  %1130 = vmatprep.subr.bf16.mxu1 %v1467_v56 }
  0xb4   :  { %191 = vadd.xlane.f32.xlu1 %v190_v49  ;;  %194 = vadd.xlane.f32.xlu0 %v193_v52 }
  0xb8   :  { %197 = vadd.xlane.f32.xlu1 %v196_v28 }
 0x125   :  { %v153_v57 = vpop.xlane.xlu0 %152 }
 0x126   :  { %v199_v58 = vmul.f32 0.25, %v153_v57 }
 0x128   :  { %v215_v59 = vadd.f32 1e-05, %v199_v58 }
 0x129   :  { %v156_v60 = vpop.xlane.xlu1 %155  ;;  %v159_v61 = vpop.xlane.xlu0 %158 }
 0x12a   :  { %1190 = vrsqrt.f32 %v215_v59  ;;  %v200_v62 = vmul.f32 0.25, %v156_v60  ;;  %v201_v63 = vmul.f32 0.25, %v159_v61 }
 0x12c   :  { %v216_v2 = vadd.f32 1e-05, %v200_v62  ;;  %v217_v3 = vadd.f32 1e-05, %v201_v63 }
 0x12d   :  { %v162_v4 = vpop.xlane.xlu1 %161  ;;  %v165_v5 = vpop.xlane.xlu0 %164 }
 0x12e   :  { %1192 = vrsqrt.f32 %v216_v2  ;;  %v202_v6 = vmul.f32 0.25, %v162_v4  ;;  %v203_v7 = vmul.f32 0.25, %v165_v5 }
 0x12f   :  { %1194 = vrsqrt.f32 %v217_v3 }
 0x130   :  { %v218_v8 = vadd.f32 1e-05, %v202_v6  ;;  %v219_v9 = vadd.f32 1e-05, %v203_v7 }
 0x131   :  { %v168_v12 = vpop.xlane.xlu1 %167  ;;  %v171_v13 = vpop.xlane.xlu0 %170 }
 0x132   :  { %1196 = vrsqrt.f32 %v218_v8  ;;  %v204_v14 = vmul.f32 0.25, %v168_v12  ;;  %v205_v15 = vmul.f32 0.25, %v171_v13 }
 0x133   :  { %1198 = vrsqrt.f32 %v219_v9 }
 0x134   :  { %v1191_v18 = vpop.eup %1190  ;;  %v220_v19 = vadd.f32 1e-05, %v204_v14  ;;  %v221_v22 = vadd.f32 1e-05, %v205_v15 }
 0x135   :  { %v174_v16 = vpop.xlane.xlu1 %173  ;;  %v177_v26 = vpop.xlane.xlu0 %176  ;;  %v247_v27 = vmul.f32 %v1191_v18, %v1371_v36 }
 0x136   :  { %1200 = vrsqrt.f32 %v220_v19  ;;  %v206_v30 = vmul.f32 0.25, %v174_v16  ;;  %v207_v31 = vmul.f32 0.25, %v177_v26 }
 0x137   :  { %1202 = vrsqrt.f32 %v221_v22  ;;  %v269_v42 = vmul.f32 %v1474_v32, %v247_v27 }
 0x138   :  { %v1193_v33 = vpop.eup %1192  ;;  %v222_v34 = vadd.f32 1e-05, %v206_v30  ;;  %v223_v20 = vadd.f32 1e-05, %v207_v31 }
 0x139   :  { %v1195_v38 = vpop.eup %1194  ;;  %v180_v39 = vpop.xlane.xlu1 %179  ;;  %v248_v41 = vmul.f32 %v1193_v33, %v1379_v44 }
 0x13a   :  { %v183_v40 = vpop.xlane.xlu0 %182  ;;  %v249_v36 = vmul.f32 %v1195_v38, %v1373_v37  ;;  %1204 = vrsqrt.f32 %v222_v34  ;;  %v208_v43 = vmul.f32 0.25, %v180_v39  ;;  %v291_v37 = vadd.f32 %v1482_v24, %v269_v42 }
 0x13b   :  { %v209_v46 = vmul.f32 0.25, %v183_v40  ;;  %1206 = vrsqrt.f32 %v223_v20  ;;  %v270_v48 = vmul.f32 %v1474_v32, %v248_v41 }
 0x13c   :  { %v1197_v49 = vpop.eup %1196  ;;  %v224_v50 = vadd.f32 1e-05, %v208_v43  ;;  %v271_v57 = vmul.f32 %v1474_v32, %v249_v36 }
 0x13d   :  { %v225_v51 = vadd.f32 1e-05, %v209_v46  ;;  %v1199_v52 = vpop.eup %1198  ;;  %v250_v44 = vmul.f32 %v1197_v49, %v1381_v45  ;;  %v186_v28 = vpop.xlane.xlu1 %185  ;;  %v292_v53 = vadd.f32 %v1482_v24, %v270_v48 }
 0x13e   :  { %v189_v29 = vpop.xlane.xlu0 %188  ;;  %v251_v58 = vmul.f32 %v1199_v52, %v1389_v54  ;;  %1208 = vrsqrt.f32 %v224_v50  ;;  %v210_v59 = vmul.f32 0.25, %v186_v28  ;;  %v293_v7 = vadd.f32 %v1482_v24, %v271_v57 }
 0x13f   :  { %v211_v60 = vmul.f32 0.25, %v189_v29  ;;  %1210 = vrsqrt.f32 %v225_v51  ;;  %v307_v61 = vpack.c.bf16 %v292_v53, %v291_v37  ;;  %v272_v62 = vmul.f32 %v1474_v32, %v250_v44 }
 0x140   :  { %v1201_v63 = vpop.eup %1200  ;;  %v226_v2 = vadd.f32 1e-05, %v210_v59  ;;  %v273_v8 = vmul.f32 %v1474_v32, %v251_v58 }
 0x141   :  { %v227_v45 = vadd.f32 1e-05, %v211_v60  ;;  %v1203_v3 = vpop.eup %1202  ;;  %v252_v4 = vmul.f32 %v1201_v63, %v1391_v55  ;;  %v192_v5 = vpop.xlane.xlu1 %191  ;;  %1114 = vmatprep.mubr.msk.bf16.mxu0 %vm53_vm0, %v307_v61  ;;  %v294_v54 = vadd.f32 %v1482_v24, %v272_v62  ;;  %v1183_v61 = vld [vmem:[%s1731_s5 + $0x8] sm:$0xff]  }
 0x142   :  { %v195_v6 = vpop.xlane.xlu0 %194  ;;  %v253_v9 = vmul.f32 %v1203_v3, %v1400_v0  ;;  %1212 = vrsqrt.f32 %v226_v2  ;;  %v212_v12 = vmul.f32 0.25, %v192_v5  ;;  %v295_v27 = vadd.f32 %v1482_v24, %v273_v8 }
 0x143   :  { %v213_v13 = vmul.f32 0.25, %v195_v6  ;;  %1214 = vrsqrt.f32 %v227_v45  ;;  %v308_v14 = vpack.c.bf16 %v294_v54, %v293_v7  ;;  %v274_v15 = vmul.f32 %v1474_v32, %v252_v4  ;;  %v1184_v6 = vld [vmem:[%s1731_s5 + $0x10] sm:$0xff]   ;;  %v980_v7 = vld [vmem:[%s1735_s4] ss:$0 sm:$0xff] }
 0x144   :  { %v1205_v55 = vpop.eup %1204  ;;  %v228_v18 = vadd.f32 1e-05, %v212_v12  ;;  %v275_v30 = vmul.f32 %v1474_v32, %v253_v9 }
 0x145   :  { %v229_v19 = vadd.f32 1e-05, %v213_v13  ;;  %v1207_v22 = vpop.eup %1206  ;;  %v254_v16 = vmul.f32 %v1205_v55, %v1403_v1  ;;  %v198_v26 = vpop.xlane.xlu1 %197  ;;  %1115 = vmatmul.mubr.msk.bf16.vlgmr.msra.gmra.mrb[0].mxu0 %vm53_vm0, %v308_v14  ;;  %v296_v0 = vadd.f32 %v1482_v24, %v274_v15 }
 0x146   :  { %1216 = vrsqrt.f32 %v228_v18  ;;  %v214_v31 = vmul.f32 0.25, %v198_v26  ;;  %v255_v33 = vmul.f32 %v1207_v22, %v1412_v10  ;;  %v297_v40 = vadd.f32 %v1482_v24, %v275_v30 }
 0x147   :  { %1218 = vrsqrt.f32 %v229_v19  ;;  %v309_v34 = vpack.c.bf16 %v296_v0, %v295_v27  ;;  %v276_v20 = vmul.f32 %v1474_v32, %v254_v16 }
 0x148   :  { %v1209_v38 = vpop.eup %1208  ;;  %v230_v39 = vadd.f32 1e-05, %v214_v31  ;;  %v277_v36 = vmul.f32 %v1474_v32, %v255_v33 }
 0x149   :  { %v1211_v1 = vpop.eup %1210  ;;  %1118 = vmatprep.mubr.msk.bf16.mxu0 %vm53_vm0, %v309_v34  ;;  %v298_v41 = vadd.f32 %v1482_v24, %v276_v20  ;;  %v256_v42 = vmul.f32 %v1209_v38, %v1415_v11 }
 0x14a   :  { %v257_v43 = vmul.f32 %v1211_v1, %v1424_v23  ;;  %1220 = vrsqrt.f32 %v230_v39  ;;  %v299_v51 = vadd.f32 %v1482_v24, %v277_v36 }
 0x14b   :  { %v310_v10 = vpack.c.bf16 %v298_v41, %v297_v40  ;;  %v278_v46 = vmul.f32 %v1474_v32, %v256_v42 }
 0x14c   :  { %v1213_v48 = vpop.eup %1212  ;;  %v279_v11 = vmul.f32 %v1474_v32, %v257_v43 }
 0x14d   :  { %v1215_v49 = vpop.eup %1214  ;;  %v258_v50 = vmul.f32 %v1213_v48, %v1427_v17  ;;  %1119 = vmatmul.mubr.msk.bf16.gmra.mrb[4].mxu0 %vm53_vm0, %v310_v10  ;;  %v300_v52 = vadd.f32 %v1482_v24, %v278_v46 }
 0x14e   :  { %v259_v44 = vmul.f32 %v1215_v49, %v1436_v35  ;;  %v301_v17 = vadd.f32 %v1482_v24, %v279_v11 }
 0x14f   :  { %v311_v28 = vpack.c.bf16 %v300_v52, %v299_v51  ;;  %v280_v23 = vmul.f32 %v1474_v32, %v258_v50 }
 0x150   :  { %v1217_v29 = vpop.eup %1216  ;;  %v281_v58 = vmul.f32 %v1474_v32, %v259_v44 }
 0x151   :  { %v1219_v37 = vpop.eup %1218  ;;  %v260_v53 = vmul.f32 %v1217_v29, %v1439_v21  ;;  %1122 = vmatprep.mubr.msk.bf16.mxu1 %vm53_vm0, %v311_v28  ;;  %v302_v57 = vadd.f32 %v1482_v24, %v280_v23 }
 0x152   :  { %v261_v59 = vmul.f32 %v1219_v37, %v1448_v47  ;;  %v303_v63 = vadd.f32 %v1482_v24, %v281_v58 }
 0x153   :  { %v312_v60 = vpack.c.bf16 %v302_v57, %v301_v17  ;;  %v282_v35 = vmul.f32 %v1474_v32, %v260_v53 }
 0x154   :  { %v1221_v62 = vpop.eup %1220  ;;  %v283_v45 = vmul.f32 %v1474_v32, %v261_v59 }
 0x155   :  { %v262_v21 = vmul.f32 %v1221_v62, %v1451_v25  ;;  %1123 = vmatmul.mubr.msk.bf16.vlgmr.msra.gmra.mrb[0].mxu1 %vm53_vm0, %v312_v60  ;;  %v304_v2 = vadd.f32 %v1482_v24, %v282_v35 }
 0x156   :  { %1131 = vmatpush3.bf16.msra.mxu1 %v1467_v56  ;;  %v305_v4 = vadd.f32 %v1482_v24, %v283_v45  ;;  %v1185_v56 = vld [vmem:[%s1731_s5 + $0x18] sm:$0xff]  }
 0x157   :  { %v313_v47 = vpack.c.bf16 %v304_v2, %v303_v63  ;;  %v284_v3 = vmul.f32 %v1474_v32, %v262_v21  ;;  %1132 = vmatprep.subr.bf16.mxu1 %v1183_v61  ;;  %v1186_v32 = vld [vmem:[%s1734_s7] sm:$0xff]  }
 0x158   :  { %1154 = vmatprep.subr.bf16.mxu0 %v1186_v32 }
 0x159   :  { %1126 = vmatprep.mubr.msk.bf16.mxu1 %vm53_vm0, %v313_v47  ;;  %v306_v25 = vadd.f32 %v1482_v24, %v284_v3  ;;  %v1187_v24 = vld [vmem:[%s1734_s7 + $0x8] sm:$0xff]   ;;  %1155 = vmatpush3.bf16.msra.mxu0 %v1186_v32 }
 0x15a   :  { %1133 = vmatpush3.bf16.msra.mxu1 %v1183_v61  ;;  %1156 = vmatprep.subr.bf16.mxu0 %v1187_v24 }
 0x15b   :  { %v314_v5 = vpack.c.bf16 %v306_v25, %v305_v4  ;;  %1134 = vmatprep.subr.bf16.mxu1 %v1184_v6  ;;  %v1188_v4 = vld [vmem:[%s1734_s7 + $0x10] sm:$0xff]   ;;  %v1189_v25 = vld [vmem:[%s1734_s7 + $0x18] sm:$0xff]  }
 0x15d   :  { %1127 = vmatmul.mubr.msk.bf16.gmra.mrb[4].mxu1 %vm53_vm0, %v314_v5  ;;  %1157 = vmatpush3.bf16.msra.mxu0 %v1187_v24  ;;  %v1572_v5 = vld [vmem:[%s1736_s6] ss:$0 sm:$0xff] }
 0x15e   :  { %1135 = vmatpush3.bf16.msra.mxu1 %v1184_v6  ;;  %1158 = vmatprep.subr.bf16.mxu0 %v1188_v4 }
 0x15f   :  { %1136 = vmatprep.subr.bf16.mxu1 %v1185_v56 }
 0x161   :  { %1159 = vmatpush3.bf16.msra.mxu0 %v1188_v4 }
 0x162   :  { %1137 = vmatpush3.bf16.msra.mxu1 %v1185_v56  ;;  %1160 = vmatprep.subr.bf16.mxu0 %v1189_v25 }
 0x165   :  { %1161 = vmatpush3.bf16.msra.mxu0 %v1189_v25 }
 0x218   :  { %v1116_v54 = vpop.f32.mrb[0].mxu0 }
 0x219   :  { %v394_v8 = vadd.f32 %v1116_v54, %v980_v7  ;;  %v385_v9 = vpop.f32.mrb[1].mxu0 }
 0x21a   :  { %v386_v12 = vadd.f32 %v980_v7, %v385_v9  ;;  %v1117_v13 = vpop.f32.mrb[2].mxu0 }
 0x21b   :  { %v397_v14 = vadd.f32 %v1117_v13, %v980_v7  ;;  %v388_v15 = vpop.f32.mrb[3].mxu0  ;;  %v450_v18 = vmax.f32 %v394_v8, 0.0 }
 0x21c   :  { %v389_v55 = vadd.f32 %v980_v7, %v388_v15  ;;  %v448_v22 = vmax.f32 %v386_v12, 0.0 }
 0x21d   :  { %v451_v19 = vmax.f32 %v397_v14, 0.0 }
 0x21e   :  { %v449_v16 = vmax.f32 %v389_v55, 0.0 }
 0x21f   :  { %v465_v26 = vpack.c.bf16 %v451_v19, %v450_v18 }
 0x220   :  { %v464_v27 = vpack.c.bf16 %v449_v16, %v448_v22  ;;  %v1120_v0 = vpop.f32.mrb[4].mxu0 }
 0x221   :  { %v410_v30 = vadd.f32 %v1120_v0, %v980_v7  ;;  %v401_v31 = vpop.f32.mrb[5].mxu0 }
 0x222   :  { %v402_v33 = vadd.f32 %v980_v7, %v401_v31  ;;  %v1121_v34 = vpop.f32.mrb[6].mxu0  ;;  %1138 = vmatprep.mubr.msk.bf16.mxu1 %vm511_vm2, %v464_v27 }
 0x223   :  { %v413_v20 = vadd.f32 %v1121_v34, %v980_v7  ;;  %v404_v38 = vpop.f32.mrb[7].mxu0  ;;  %1139 = vmatmul.mubr.msk.bf16.vlgmr.msra.gmra.mrb[8].mxu1 %vm511_vm2, %v465_v26  ;;  %v454_v1 = vmax.f32 %v410_v30, 0.0 }
 0x224   :  { %v405_v39 = vadd.f32 %v980_v7, %v404_v38  ;;  %v452_v41 = vmax.f32 %v402_v33, 0.0 }
 0x225   :  { %v455_v40 = vmax.f32 %v413_v20, 0.0 }
 0x226   :  { %v453_v42 = vmax.f32 %v405_v39, 0.0 }
 0x227   :  { %v467_v36 = vpack.c.bf16 %v455_v40, %v454_v1 }
 0x228   :  { %v466_v43 = vpack.c.bf16 %v453_v42, %v452_v41  ;;  %v1124_v10 = vpop.f32.mrb[0].mxu1 }
 0x229   :  { %v426_v46 = vadd.f32 %v1124_v10, %v980_v7  ;;  %v417_v48 = vpop.f32.mrb[1].mxu1 }
 0x22a   :  { %v418_v49 = vadd.f32 %v980_v7, %v417_v48  ;;  %v1125_v50 = vpop.f32.mrb[2].mxu1  ;;  %1142 = vmatprep.mubr.msk.bf16.mxu1 %vm511_vm2, %v466_v43 }
 0x22b   :  { %v429_v51 = vadd.f32 %v1125_v50, %v980_v7  ;;  %v420_v52 = vpop.f32.mrb[3].mxu1  ;;  %1143 = vmatmul.mubr.msk.bf16.gmra.mrb[12].mxu1 %vm511_vm2, %v467_v36  ;;  %v458_v44 = vmax.f32 %v426_v46, 0.0 }
 0x22c   :  { %v421_v11 = vadd.f32 %v980_v7, %v420_v52  ;;  %v456_v23 = vmax.f32 %v418_v49, 0.0 }
 0x22d   :  { %v459_v28 = vmax.f32 %v429_v51, 0.0 }
 0x22e   :  { %v457_v29 = vmax.f32 %v421_v11, 0.0 }
 0x22f   :  { %v469_v37 = vpack.c.bf16 %v459_v28, %v458_v44 }
 0x230   :  { %v468_v53 = vpack.c.bf16 %v457_v29, %v456_v23  ;;  %v1128_v17 = vpop.f32.mrb[4].mxu1 }
 0x231   :  { %v442_v57 = vadd.f32 %v1128_v17, %v980_v7  ;;  %v433_v58 = vpop.f32.mrb[5].mxu1 }
 0x232   :  { %v434_v59 = vadd.f32 %v980_v7, %v433_v58  ;;  %v1129_v60 = vpop.f32.mrb[6].mxu1  ;;  %1146 = vmatprep.mubr.msk.bf16.mxu1 %vm511_vm2, %v468_v53 }
 0x233   :  { %v445_v35 = vadd.f32 %v1129_v60, %v980_v7  ;;  %v436_v61 = vpop.f32.mrb[7].mxu1  ;;  %1147 = vmatmul.mubr.msk.bf16.gmra.mrb[16].mxu1 %vm511_vm2, %v469_v37  ;;  %v462_v21 = vmax.f32 %v442_v57, 0.0 }
 0x234   :  { %v437_v62 = vadd.f32 %v980_v7, %v436_v61  ;;  %v460_v2 = vmax.f32 %v434_v59, 0.0 }
 0x235   :  { %v463_v63 = vmax.f32 %v445_v35, 0.0 }
 0x236   :  { %v461_v45 = vmax.f32 %v437_v62, 0.0 }
 0x237   :  { %v471_v47 = vpack.c.bf16 %v463_v63, %v462_v21 }
 0x238   :  { %v470_v3 = vpack.c.bf16 %v461_v45, %v460_v2 }
 0x23a   :  { %1150 = vmatprep.mubr.msk.bf16.mxu1 %vm511_vm2, %v470_v3 }
 0x23b   :  { %1151 = vmatmul.mubr.msk.bf16.gmra.mrb[20].mxu1 %vm511_vm2, %v471_v47 }
 0x2f6   :  { %v1140_v6 = vpop.f32.mrb[8].mxu1 }
 0x2f7   :  { %v579_v56 = vadd.f32 %v1140_v6, %v1572_v5  ;;  %v570_v32 = vpop.f32.mrb[9].mxu1 }
 0x2f8   :  { %v571_v24 = vadd.f32 %v1572_v5, %v570_v32  ;;  %v1141_v7 = vpop.f32.mrb[10].mxu1 }
 0x2f9   :  { %v635_v54 = vmax.f32 %v579_v56, 0.0  ;;  %v582_v8 = vadd.f32 %v1141_v7, %v1572_v5  ;;  %v573_v9 = vpop.f32.mrb[11].mxu1 }
 0x2fa   :  { %v633_v12 = vmax.f32 %v571_v24, 0.0  ;;  %v574_v13 = vadd.f32 %v1572_v5, %v573_v9 }
 0x2fb   :  { %v1049_v14 = vpack.c.bf16 %v635_v54, %v635_v54  ;;  %v636_v15 = vmax.f32 %v582_v8, 0.0 }
 0x2fc   :  { %v1047_v55 = vpack.c.bf16 %v633_v12, %v633_v12  ;;  %v634_v18 = vmax.f32 %v574_v13, 0.0 }
 0x2fd   :  { %716 = vst.msk [vmem:[%s1737_s9 + $0x8] sm:$0xf] %vm713_vm3, %v1049_v14  ;;  %v650_v19 = vpack.c.bf16 %v636_v15, %v635_v54  ;;  %v1050_v22 = vpack.c.bf16 %v636_v15, %v636_v15 }
 0x2fe   :  { %714 = vst.msk [vmem:[%s1737_s9] sm:$0xf] %vm713_vm3, %v1047_v55  ;;  %v649_v16 = vpack.c.bf16 %v634_v18, %v633_v12  ;;  %v1048_v26 = vpack.c.bf16 %v634_v18, %v634_v18  ;;  %v1144_v27 = vpop.f32.mrb[12].mxu1 }
 0x2ff   :  { %717 = vst.msk [vmem:[%s1737_s9 + $0xc] sm:$0xf] %vm713_vm3, %v1050_v22  ;;  %v595_v0 = vadd.f32 %v1144_v27, %v1572_v5  ;;  %v586_v30 = vpop.f32.mrb[13].mxu1 }
 0x300   :  { %715 = vst.msk [vmem:[%s1737_s9 + $0x4] sm:$0xf] %vm713_vm3, %v1048_v26  ;;  %v587_v31 = vadd.f32 %v1572_v5, %v586_v30  ;;  %v1145_v33 = vpop.f32.mrb[14].mxu1  ;;  %1162 = vmatprep.mubr.msk.bf16.mxu0 %vm511_vm2, %v649_v16 }
 0x301   :  { %v639_v34 = vmax.f32 %v595_v0, 0.0  ;;  %v598_v20 = vadd.f32 %v1145_v33, %v1572_v5  ;;  %v589_v38 = vpop.f32.mrb[15].mxu1  ;;  %1163 = vmatmul.mubr.msk.bf16.vlgmr.msra.gmra.mrb[8].mxu0 %vm511_vm2, %v650_v19 }
 0x302   :  { %v637_v39 = vmax.f32 %v587_v31, 0.0  ;;  %v590_v1 = vadd.f32 %v1572_v5, %v589_v38 }
 0x303   :  { %v1053_v40 = vpack.c.bf16 %v639_v34, %v639_v34  ;;  %v640_v41 = vmax.f32 %v598_v20, 0.0 }
 0x304   :  { %v1051_v42 = vpack.c.bf16 %v637_v39, %v637_v39  ;;  %v638_v36 = vmax.f32 %v590_v1, 0.0 }
 0x305   :  { %720 = vst.msk [vmem:[%s1737_s9 + $0x18] sm:$0xf] %vm713_vm3, %v1053_v40  ;;  %v652_v43 = vpack.c.bf16 %v640_v41, %v639_v34  ;;  %v1054_v10 = vpack.c.bf16 %v640_v41, %v640_v41 }
 0x306   :  { %718 = vst.msk [vmem:[%s1737_s9 + $0x10] sm:$0xf] %vm713_vm3, %v1051_v42  ;;  %v651_v46 = vpack.c.bf16 %v638_v36, %v637_v39  ;;  %v1052_v48 = vpack.c.bf16 %v638_v36, %v638_v36  ;;  %v1148_v49 = vpop.f32.mrb[16].mxu1 }
 0x307   :  { %721 = vst.msk [vmem:[%s1737_s9 + $0x1c] sm:$0xf] %vm713_vm3, %v1054_v10  ;;  %v611_v50 = vadd.f32 %v1148_v49, %v1572_v5  ;;  %v602_v51 = vpop.f32.mrb[17].mxu1 }
 0x308   :  { %719 = vst.msk [vmem:[%s1737_s9 + $0x14] sm:$0xf] %vm713_vm3, %v1052_v48  ;;  %v603_v52 = vadd.f32 %v1572_v5, %v602_v51  ;;  %v1149_v11 = vpop.f32.mrb[18].mxu1  ;;  %1166 = vmatprep.mubr.msk.bf16.mxu0 %vm511_vm2, %v651_v46 }
 0x309   :  { %v643_v44 = vmax.f32 %v611_v50, 0.0  ;;  %v614_v28 = vadd.f32 %v1149_v11, %v1572_v5  ;;  %v605_v23 = vpop.f32.mrb[19].mxu1  ;;  %1167 = vmatmul.mubr.msk.bf16.gmra.mrb[12].mxu0 %vm511_vm2, %v652_v43 }
 0x30a   :  { %v641_v29 = vmax.f32 %v603_v52, 0.0  ;;  %v606_v37 = vadd.f32 %v1572_v5, %v605_v23 }
 0x30b   :  { %v1057_v53 = vpack.c.bf16 %v643_v44, %v643_v44  ;;  %v644_v17 = vmax.f32 %v614_v28, 0.0 }
 0x30c   :  { %v1055_v57 = vpack.c.bf16 %v641_v29, %v641_v29  ;;  %v642_v58 = vmax.f32 %v606_v37, 0.0 }
 0x30d   :  { %724 = vst.msk [vmem:[%s1737_s9 + $0x28] sm:$0xf] %vm713_vm3, %v1057_v53  ;;  %v654_v59 = vpack.c.bf16 %v644_v17, %v643_v44  ;;  %v1058_v60 = vpack.c.bf16 %v644_v17, %v644_v17 }
 0x30e   :  { %722 = vst.msk [vmem:[%s1737_s9 + $0x20] sm:$0xf] %vm713_vm3, %v1055_v57  ;;  %v653_v35 = vpack.c.bf16 %v642_v58, %v641_v29  ;;  %v1056_v61 = vpack.c.bf16 %v642_v58, %v642_v58  ;;  %v1152_v62 = vpop.f32.mrb[20].mxu1 }
 0x30f   :  { %725 = vst.msk [vmem:[%s1737_s9 + $0x2c] sm:$0xf] %vm713_vm3, %v1058_v60  ;;  %v627_v21 = vadd.f32 %v1152_v62, %v1572_v5  ;;  %v618_v63 = vpop.f32.mrb[21].mxu1 }
 0x310   :  { %723 = vst.msk [vmem:[%s1737_s9 + $0x24] sm:$0xf] %vm713_vm3, %v1056_v61  ;;  %v619_v2 = vadd.f32 %v1572_v5, %v618_v63  ;;  %v1153_v45 = vpop.f32.mrb[22].mxu1  ;;  %1170 = vmatprep.mubr.msk.bf16.mxu0 %vm511_vm2, %v653_v35 }
 0x311   :  { %v647_v47 = vmax.f32 %v627_v21, 0.0  ;;  %v630_v3 = vadd.f32 %v1153_v45, %v1572_v5  ;;  %v621_v4 = vpop.f32.mrb[23].mxu1  ;;  %1171 = vmatmul.mubr.msk.bf16.gmra.mrb[16].mxu0 %vm511_vm2, %v654_v59 }
 0x312   :  { %v645_v25 = vmax.f32 %v619_v2, 0.0  ;;  %v622_v6 = vadd.f32 %v1572_v5, %v621_v4  ;;  %v1018_v5 = vld [vmem:[%s1738_s8] ss:$0 sm:$0xff] }
 0x313   :  { %v1061_v56 = vpack.c.bf16 %v647_v47, %v647_v47  ;;  %v648_v32 = vmax.f32 %v630_v3, 0.0 }
 0x314   :  { %v1059_v24 = vpack.c.bf16 %v645_v25, %v645_v25  ;;  %v646_v7 = vmax.f32 %v622_v6, 0.0 }
 0x315   :  { %728 = vst.msk [vmem:[%s1737_s9 + $0x38] sm:$0xf] %vm713_vm3, %v1061_v56  ;;  %v656_v54 = vpack.c.bf16 %v648_v32, %v647_v47  ;;  %v1062_v8 = vpack.c.bf16 %v648_v32, %v648_v32 }
 0x316   :  { %726 = vst.msk [vmem:[%s1737_s9 + $0x30] sm:$0xf] %vm713_vm3, %v1059_v24  ;;  %v655_v9 = vpack.c.bf16 %v646_v7, %v645_v25  ;;  %v1060_v12 = vpack.c.bf16 %v646_v7, %v646_v7 }
 0x317   :  { %729 = vst.msk [vmem:[%s1737_s9 + $0x3c] sm:$0xf] %vm713_vm3, %v1062_v8 }
 0x318   :  { %727 = vst.msk [vmem:[%s1737_s9 + $0x34] sm:$0xf] %vm713_vm3, %v1060_v12  ;;  %1174 = vmatprep.mubr.msk.bf16.mxu0 %vm511_vm2, %v655_v9 }
 0x319   :  { %1175 = vmatmul.mubr.msk.bf16.gmra.mrb[20].mxu0 %vm511_vm2, %v656_v54 }
 0x3d4   :  { %v1164_v13 = vpop.f32.mrb[8].mxu0 }
 0x3d5   :  { %v836_v14 = vadd.f32 %v1164_v13, %v1018_v5  ;;  %v827_v15 = vpop.f32.mrb[9].mxu0 }
 0x3d6   :  { %v828_v55 = vadd.f32 %v1018_v5, %v827_v15  ;;  %v1165_v18 = vpop.f32.mrb[10].mxu0 }
 0x3d7   :  { %v1065_v19 = vpack.c.bf16 %v836_v14, %v836_v14  ;;  %v839_v22 = vadd.f32 %v1165_v18, %v1018_v5  ;;  %v830_v16 = vpop.f32.mrb[11].mxu0 }
 0x3d8   :  { %v1063_v26 = vpack.c.bf16 %v828_v55, %v828_v55  ;;  %v831_v27 = vadd.f32 %v1018_v5, %v830_v16 }
 0x3d9   :  { %956 = vst.msk [vmem:[%s1739_s10 + $0x8] sm:$0xf] %vm713_vm3, %v1065_v19  ;;  %v1066_v0 = vpack.c.bf16 %v839_v22, %v839_v22 }
 0x3da   :  { %954 = vst.msk [vmem:[%s1739_s10] sm:$0xf] %vm713_vm3, %v1063_v26  ;;  %v1064_v30 = vpack.c.bf16 %v831_v27, %v831_v27 }
 0x3db   :  { %957 = vst.msk [vmem:[%s1739_s10 + $0xc] sm:$0xf] %vm713_vm3, %v1066_v0 }
 0x3dc   :  { %955 = vst.msk [vmem:[%s1739_s10 + $0x4] sm:$0xf] %vm713_vm3, %v1064_v30  ;;  %v1168_v31 = vpop.f32.mrb[12].mxu0 }
 0x3dd   :  { %v852_v33 = vadd.f32 %v1168_v31, %v1018_v5  ;;  %v843_v34 = vpop.f32.mrb[13].mxu0 }
 0x3de   :  { %v844_v20 = vadd.f32 %v1018_v5, %v843_v34  ;;  %v1169_v38 = vpop.f32.mrb[14].mxu0 }
 0x3df   :  { %v1069_v39 = vpack.c.bf16 %v852_v33, %v852_v33  ;;  %v855_v1 = vadd.f32 %v1169_v38, %v1018_v5  ;;  %v846_v40 = vpop.f32.mrb[15].mxu0 }
 0x3e0   :  { %v1067_v41 = vpack.c.bf16 %v844_v20, %v844_v20  ;;  %v847_v42 = vadd.f32 %v1018_v5, %v846_v40 }
 0x3e1   :  { %960 = vst.msk [vmem:[%s1739_s10 + $0x18] sm:$0xf] %vm713_vm3, %v1069_v39  ;;  %v1070_v36 = vpack.c.bf16 %v855_v1, %v855_v1 }
 0x3e2   :  { %958 = vst.msk [vmem:[%s1739_s10 + $0x10] sm:$0xf] %vm713_vm3, %v1067_v41  ;;  %v1068_v43 = vpack.c.bf16 %v847_v42, %v847_v42 }
 0x3e3   :  { %961 = vst.msk [vmem:[%s1739_s10 + $0x1c] sm:$0xf] %vm713_vm3, %v1070_v36 }
 0x3e4   :  { %959 = vst.msk [vmem:[%s1739_s10 + $0x14] sm:$0xf] %vm713_vm3, %v1068_v43  ;;  %v1172_v10 = vpop.f32.mrb[16].mxu0 }
 0x3e5   :  { %v868_v46 = vadd.f32 %v1172_v10, %v1018_v5  ;;  %v859_v48 = vpop.f32.mrb[17].mxu0 }
 0x3e6   :  { %v860_v49 = vadd.f32 %v1018_v5, %v859_v48  ;;  %v1173_v50 = vpop.f32.mrb[18].mxu0 }
 0x3e7   :  { %v1073_v51 = vpack.c.bf16 %v868_v46, %v868_v46  ;;  %v871_v52 = vadd.f32 %v1173_v50, %v1018_v5  ;;  %v862_v11 = vpop.f32.mrb[19].mxu0 }
 0x3e8   :  { %v1071_v44 = vpack.c.bf16 %v860_v49, %v860_v49  ;;  %v863_v28 = vadd.f32 %v1018_v5, %v862_v11 }
 0x3e9   :  { %964 = vst.msk [vmem:[%s1739_s10 + $0x28] sm:$0xf] %vm713_vm3, %v1073_v51  ;;  %v1074_v23 = vpack.c.bf16 %v871_v52, %v871_v52 }
 0x3ea   :  { %962 = vst.msk [vmem:[%s1739_s10 + $0x20] sm:$0xf] %vm713_vm3, %v1071_v44  ;;  %v1072_v29 = vpack.c.bf16 %v863_v28, %v863_v28 }
 0x3eb   :  { %965 = vst.msk [vmem:[%s1739_s10 + $0x2c] sm:$0xf] %vm713_vm3, %v1074_v23 }
 0x3ec   :  { %963 = vst.msk [vmem:[%s1739_s10 + $0x24] sm:$0xf] %vm713_vm3, %v1072_v29  ;;  %v1176_v37 = vpop.f32.mrb[20].mxu0 }
 0x3ed   :  { %v884_v53 = vadd.f32 %v1176_v37, %v1018_v5  ;;  %v875_v17 = vpop.f32.mrb[21].mxu0 }
 0x3ee   :  { %v876_v57 = vadd.f32 %v1018_v5, %v875_v17  ;;  %v1177_v58 = vpop.f32.mrb[22].mxu0 }
 0x3ef   :  { %v1077_v59 = vpack.c.bf16 %v884_v53, %v884_v53  ;;  %v887_v60 = vadd.f32 %v1177_v58, %v1018_v5  ;;  %v878_v35 = vpop.f32.mrb[23].mxu0 }
 0x3f0   :  { %v1075_v61 = vpack.c.bf16 %v876_v57, %v876_v57  ;;  %v879_v62 = vadd.f32 %v1018_v5, %v878_v35 }
 0x3f1   :  { %968 = vst.msk [vmem:[%s1739_s10 + $0x38] sm:$0xf] %vm713_vm3, %v1077_v59  ;;  %v1078_v21 = vpack.c.bf16 %v887_v60, %v887_v60 }
 0x3f2   :  { %966 = vst.msk [vmem:[%s1739_s10 + $0x30] sm:$0xf] %vm713_vm3, %v1075_v61  ;;  %v1076_v63 = vpack.c.bf16 %v879_v62, %v879_v62 }
 0x3f3   :  { %969 = vst.msk [vmem:[%s1739_s10 + $0x3c] sm:$0xf] %vm713_vm3, %v1078_v21 }
 0x3f4   :  { %967 = vst.msk [vmem:[%s1739_s10 + $0x34] sm:$0xf] %vm713_vm3, %v1076_v63 }

// kernel: gnn_policy_forward.12
= control target key start
LH: loop header
LB: loop body
LE: loop exit
PB: predicated region body
PF: predicated region fallthrough
CT: control target
= control target key end

     0   :  { %s970_s9 = smov 64   ;;  %vm161_vm0 = vcmask 523264   ;;  %vm730_vm1 = vcmask 519168   ;;  %s1393_s0 = inlined_call_operand.vmem [shape: bf16[128,128], index: 0, kind: input, shape index: {}]   ;;  %s1394_s1 = inlined_call_operand.vmem [shape: f32[1,64], index: 1, kind: input, shape index: {}]   ;;  %s1395_s4 = inlined_call_operand.vmem [shape: bf16[64,64], index: 4, kind: input, shape index: {}]   ;;  %s1396_s2 = inlined_call_operand.vmem [shape: f32[1,64], index: 2, kind: input, shape index: {}]   ;;  %s1397_s3 = inlined_call_operand.vmem [shape: f32[1,64], index: 3, kind: input, shape index: {}]   ;;  %s1398_s6 = inlined_call_operand.vmem [shape: bf16[128,64], index: 6, kind: output, shape index: {}]   ;;  %s1399_s5 = inlined_call_operand.vmem [shape: f32[1,64], index: 5, kind: input, shape index: {}]  }
   0x1   :  { %v794_v0 = vld [vmem:[%s1393_s0] sm:$0xff]   ;;  %v825_v2 = vld [vmem:[%s1393_s0 + $0x8] sm:$0xff]   ;;  %v1024_v8 = vld [vmem:[%s1393_s0 + $0x10] sm:$0xff]  }
   0x2   :  { %v828_v1 = vld [vmem:[%s1393_s0 + $0x20] sm:$0xff]   ;;  %v795_v3 = vunpack.c.l.bf16 %v794_v0  ;;  %v796_v4 = vunpack.c.h.bf16 %v794_v0  ;;  %v1019_v7 = vld [vmem:[%s1393_s0 + $0x28] sm:$0xff]   ;;  %v799_v9 = vunpack.c.l.bf16 %v825_v2  ;;  %v800_v10 = vunpack.c.h.bf16 %v825_v2  ;;  %v1031_v13 = vld [vmem:[%s1393_s0 + $0x18] sm:$0xff]  }
   0x3   :  { %v811_v5 = vunpack.c.l.bf16 %v828_v1  ;;  %v812_v6 = vunpack.c.h.bf16 %v828_v1  ;;  %v815_v11 = vunpack.c.l.bf16 %v1019_v7  ;;  %v816_v12 = vunpack.c.h.bf16 %v1019_v7  ;;  %v1040_v22 = vld [vmem:[%s1393_s0 + $0x30] sm:$0xff]   ;;  %v1045_v23 = vld [vmem:[%s1393_s0 + $0x38] sm:$0xff]   ;;  %v1062_v37 = vld [vmem:[%s1394_s1] ss:$0 sm:$0xff] }
   0x4   :  { %v878_v14 = vpack.i.bf16 %v796_v4, %v795_v3  ;;  %v803_v16 = vunpack.c.l.bf16 %v1024_v8  ;;  %v804_v17 = vunpack.c.h.bf16 %v1024_v8  ;;  %v883_v18 = vpack.i.bf16 %v800_v10, %v799_v9 }
   0x5   :  { %v888_v15 = vpack.i.bf16 %v812_v6, %v811_v5  ;;  %v893_v19 = vpack.i.bf16 %v816_v12, %v815_v11  ;;  %v807_v20 = vunpack.c.l.bf16 %v1031_v13  ;;  %v808_v21 = vunpack.c.h.bf16 %v1031_v13 }
   0x6   :  { %879 = vrot.lane.b32.xlu0 %v878_v14, %s970_s9  ;;  %v898_v24 = vpack.i.bf16 %v804_v17, %v803_v16  ;;  %v819_v25 = vunpack.c.l.bf16 %v1040_v22  ;;  %v820_v27 = vunpack.c.h.bf16 %v1040_v22  ;;  %v823_v28 = vunpack.c.l.bf16 %v1045_v23 }
   0x7   :  { %889 = vrot.lane.b32.xlu1 %v888_v15, %s970_s9  ;;  %v903_v26 = vpack.i.bf16 %v808_v21, %v807_v20  ;;  %v824_v29 = vunpack.c.h.bf16 %v1045_v23 }
   0x8   :  { %v908_v30 = vpack.i.bf16 %v820_v27, %v819_v25 }
   0x9   :  { %v913_v31 = vpack.i.bf16 %v824_v29, %v823_v28 }
   0xa   :  { %884 = vrot.lane.b32.xlu0 %v883_v18, %s970_s9 }
   0xb   :  { %894 = vrot.lane.b32.xlu1 %v893_v19, %s970_s9 }
   0xe   :  { %899 = vrot.lane.b32.xlu0 %v898_v24, %s970_s9 }
   0xf   :  { %904 = vrot.lane.b32.xlu1 %v903_v26, %s970_s9 }
  0x12   :  { %909 = vrot.lane.b32.xlu0 %v908_v30, %s970_s9 }
  0x13   :  { %914 = vrot.lane.b32.xlu1 %v913_v31, %s970_s9 }
  0x78   :  { %v880_v32 = vpop.permute.xlu0 %879 }
  0x79   :  { %v890_v33 = vpop.permute.xlu1 %889  ;;  %v954_v34 = vadd.high.f32.bf16 %v796_v4, %v880_v32  ;;  %v955_v35 = vadd.low.f32.bf16 %v795_v3, %v880_v32 }
  0x7a   :  { %v956_v36 = vadd.low.f32.bf16 %v811_v5, %v890_v33  ;;  %v960_v50 = vadd.high.f32.bf16 %v812_v6, %v890_v33 }
  0x7b   :  { %v1065_v40 = vadd.f32 %v954_v34, %v1062_v37  ;;  %v1068_v41 = vadd.f32 %v955_v35, %v1062_v37 }
  0x7c   :  { %v885_v38 = vpop.permute.xlu0 %884  ;;  %v1071_v42 = vadd.f32 %v956_v36, %v1062_v37  ;;  %v1091_v59 = vadd.f32 %v960_v50, %v1062_v37 }
  0x7d   :  { %v895_v39 = vpop.permute.xlu1 %894  ;;  %v957_v43 = vadd.low.f32.bf16 %v799_v9, %v885_v38  ;;  %v959_v45 = vadd.high.f32.bf16 %v800_v10, %v885_v38  ;;  %v165_v46 = vsel %vm161_vm0, %v1065_v40, 0.0  ;;  %v162_v47 = vsel %vm161_vm0, %v1068_v41, 0.0 }
  0x7e   :  { %v958_v44 = vadd.low.f32.bf16 %v815_v11, %v895_v39  ;;  %166 = vadd.xlane.f32.xlu1 %v165_v46  ;;  %163 = vadd.xlane.f32.xlu0 %v162_v47  ;;  %v186_v52 = vsel %vm161_vm0, %v1071_v42, 0.0  ;;  %v962_v58 = vadd.high.f32.bf16 %v816_v12, %v895_v39  ;;  %v189_v2 = vsel %vm161_vm0, %v1091_v59, 0.0 }
  0x7f   :  { %v1078_v51 = vadd.f32 %v957_v43, %v1062_v37  ;;  %v1088_v56 = vadd.f32 %v959_v45, %v1062_v37 }
  0x80   :  { %v900_v48 = vpop.permute.xlu0 %899  ;;  %v1083_v53 = vadd.f32 %v958_v44, %v1062_v37  ;;  %v1105_v3 = vadd.f32 %v962_v58, %v1062_v37 }
  0x81   :  { %v905_v49 = vpop.permute.xlu1 %904  ;;  %v961_v54 = vadd.low.f32.bf16 %v803_v16, %v900_v48  ;;  %v168_v55 = vsel %vm161_vm0, %v1078_v51, 0.0  ;;  %v171_v0 = vsel %vm161_vm0, %v1088_v56, 0.0  ;;  %v964_v1 = vadd.high.f32.bf16 %v804_v17, %v900_v48 }
  0x82   :  { %187 = vadd.xlane.f32.xlu1 %v186_v52  ;;  %169 = vadd.xlane.f32.xlu0 %v168_v55  ;;  %v963_v60 = vadd.low.f32.bf16 %v807_v20, %v905_v49  ;;  %v192_v61 = vsel %vm161_vm0, %v1083_v53, 0.0  ;;  %v966_v7 = vadd.high.f32.bf16 %v808_v21, %v905_v49  ;;  %v195_v8 = vsel %vm161_vm0, %v1105_v3, 0.0 }
  0x83   :  { %v1096_v62 = vadd.f32 %v961_v54, %v1062_v37  ;;  %v1122_v12 = vadd.f32 %v964_v1, %v1062_v37 }
  0x84   :  { %v910_v57 = vpop.permute.xlu0 %909  ;;  %v1110_v6 = vadd.f32 %v963_v60, %v1062_v37  ;;  %v1125_v13 = vadd.f32 %v966_v7, %v1062_v37 }
  0x85   :  { %v915_v63 = vpop.permute.xlu1 %914  ;;  %v965_v4 = vadd.low.f32.bf16 %v819_v25, %v910_v57  ;;  %v174_v5 = vsel %vm161_vm0, %v1096_v62, 0.0  ;;  %v968_v14 = vadd.high.f32.bf16 %v820_v27, %v910_v57  ;;  %v177_v16 = vsel %vm161_vm0, %v1122_v12, 0.0 }
  0x86   :  { %193 = vadd.xlane.f32.xlu1 %v192_v61  ;;  %172 = vadd.xlane.f32.xlu0 %v171_v0  ;;  %v967_v9 = vadd.low.f32.bf16 %v823_v28, %v915_v63  ;;  %v180_v10 = vsel %vm161_vm0, %v1110_v6, 0.0  ;;  %v969_v18 = vadd.high.f32.bf16 %v824_v29, %v915_v63  ;;  %v183_v20 = vsel %vm161_vm0, %v1125_v13, 0.0 }
  0x87   :  { %v1119_v11 = vadd.f32 %v965_v4, %v1062_v37  ;;  %v1143_v21 = vadd.f32 %v968_v14, %v1062_v37 }
  0x88   :  { %v1134_v17 = vadd.f32 %v967_v9, %v1062_v37  ;;  %v1148_v24 = vadd.f32 %v969_v18, %v1062_v37 }
  0x89   :  { %v198_v15 = vsel %vm161_vm0, %v1119_v11, 0.0  ;;  %v201_v22 = vsel %vm161_vm0, %v1143_v21, 0.0 }
  0x8a   :  { %175 = vadd.xlane.f32.xlu1 %v174_v5  ;;  %190 = vadd.xlane.f32.xlu0 %v189_v2  ;;  %v204_v19 = vsel %vm161_vm0, %v1134_v17, 0.0  ;;  %v207_v23 = vsel %vm161_vm0, %v1148_v24, 0.0 }
  0x8e   :  { %181 = vadd.xlane.f32.xlu1 %v180_v10  ;;  %196 = vadd.xlane.f32.xlu0 %v195_v8 }
  0x92   :  { %199 = vadd.xlane.f32.xlu1 %v198_v15  ;;  %178 = vadd.xlane.f32.xlu0 %v177_v16 }
  0x96   :  { %205 = vadd.xlane.f32.xlu1 %v204_v19  ;;  %184 = vadd.xlane.f32.xlu0 %v183_v20 }
  0x9a   :  { %202 = vadd.xlane.f32.xlu0 %v201_v22 }
  0x9e   :  { %208 = vadd.xlane.f32.xlu0 %v207_v23 }
 0x10b   :  { %v167_v25 = vpop.xlane.xlu1 %166  ;;  %v164_v26 = vpop.xlane.xlu0 %163 }
 0x10c   :  { %v212_v27 = vmul.f32 0.015625, %v167_v25  ;;  %v211_v28 = vmul.f32 0.015625, %v164_v26 }
 0x10e   :  { %v1153_v29 = vsub.f32 %v1065_v40, %v212_v27  ;;  %v1156_v30 = vsub.f32 %v1068_v41, %v211_v28 }
 0x10f   :  { %v188_v31 = vpop.xlane.xlu1 %187  ;;  %v170_v32 = vpop.xlane.xlu0 %169 }
 0x110   :  { %v219_v33 = vmul.f32 0.015625, %v188_v31  ;;  %v213_v34 = vmul.f32 0.015625, %v170_v32  ;;  %v244_v35 = vmul.f32 %v1153_v29, %v1153_v29  ;;  %v243_v36 = vmul.f32 %v1156_v30, %v1156_v30 }
 0x112   :  { %v1163_v37 = vsub.f32 %v1071_v42, %v219_v33  ;;  %v1166_v38 = vsub.f32 %v1078_v51, %v213_v34  ;;  %v262_v39 = vsel %vm161_vm0, %v244_v35, 0.0  ;;  %v259_v40 = vsel %vm161_vm0, %v243_v36, 0.0 }
 0x113   :  { %v194_v41 = vpop.xlane.xlu1 %193  ;;  %263 = vadd.xlane.f32.xlu0 %v262_v39  ;;  %260 = vadd.xlane.f32.xlu1 %v259_v40  ;;  %v173_v43 = vpop.xlane.xlu0 %172 }
 0x114   :  { %v221_v44 = vmul.f32 0.015625, %v194_v41  ;;  %v214_v45 = vmul.f32 0.015625, %v173_v43  ;;  %v245_v46 = vmul.f32 %v1166_v38, %v1166_v38  ;;  %v251_v49 = vmul.f32 %v1163_v37, %v1163_v37 }
 0x116   :  { %v1173_v47 = vsub.f32 %v1083_v53, %v221_v44  ;;  %v1176_v42 = vsub.f32 %v1088_v56, %v214_v45  ;;  %v265_v48 = vsel %vm161_vm0, %v245_v46, 0.0  ;;  %v283_v58 = vsel %vm161_vm0, %v251_v49, 0.0  ;;  %v918_v46 = vld [vmem:[%s1395_s4] sm:$0xff]   ;;  %v920_v49 = vld [vmem:[%s1395_s4 + $0x10] sm:$0xff]  }
 0x117   :  { %v176_v50 = vpop.xlane.xlu1 %175  ;;  %266 = vadd.xlane.f32.xlu1 %v265_v48  ;;  %v191_v51 = vpop.xlane.xlu0 %190  ;;  %844 = vmatprep.subr.bf16.mxu0 %v918_v46 }
 0x118   :  { %v215_v52 = vmul.f32 0.015625, %v176_v50  ;;  %v220_v54 = vmul.f32 0.015625, %v191_v51  ;;  %v246_v55 = vmul.f32 %v1176_v42, %v1176_v42  ;;  %v253_v53 = vmul.f32 %v1173_v47, %v1173_v47  ;;  %845 = vmatpush3.bf16.msra.mxu0 %v918_v46  ;;  %868 = vmatprep.subr.bf16.mxu1 %v918_v46  ;;  %v921_v50 = vld [vmem:[%s1395_s4 + $0x18] sm:$0xff]  }
 0x119   :  { %872 = vmatpush3.bf16.msra.mxu1 %v918_v46 }
 0x11a   :  { %v1186_v57 = vsub.f32 %v1096_v62, %v215_v52  ;;  %v1189_v56 = vsub.f32 %v1091_v59, %v220_v54  ;;  %v268_v60 = vsel %vm161_vm0, %v246_v55, 0.0  ;;  %v289_v4 = vsel %vm161_vm0, %v253_v53, 0.0 }
 0x11b   :  { %v182_v61 = vpop.xlane.xlu1 %181  ;;  %284 = vadd.xlane.f32.xlu1 %v283_v58  ;;  %269 = vadd.xlane.f32.xlu0 %v268_v60  ;;  %v197_v63 = vpop.xlane.xlu0 %196 }
 0x11c   :  { %v217_v0 = vmul.f32 0.015625, %v182_v61  ;;  %v222_v1 = vmul.f32 0.015625, %v197_v63  ;;  %v252_v2 = vmul.f32 %v1189_v56, %v1189_v56  ;;  %v247_v7 = vmul.f32 %v1186_v57, %v1186_v57 }
 0x11e   :  { %v1197_v62 = vsub.f32 %v1110_v6, %v217_v0  ;;  %v1200_v59 = vsub.f32 %v1105_v3, %v222_v1  ;;  %v286_v5 = vsel %vm161_vm0, %v252_v2, 0.0  ;;  %v271_v18 = vsel %vm161_vm0, %v247_v7, 0.0 }
 0x11f   :  { %v200_v8 = vpop.xlane.xlu1 %199  ;;  %290 = vadd.xlane.f32.xlu1 %v289_v4  ;;  %287 = vadd.xlane.f32.xlu0 %v286_v5  ;;  %v179_v9 = vpop.xlane.xlu0 %178 }
 0x120   :  { %v223_v10 = vmul.f32 0.015625, %v200_v8  ;;  %v216_v14 = vmul.f32 0.015625, %v179_v9  ;;  %v254_v15 = vmul.f32 %v1200_v59, %v1200_v59  ;;  %v249_v6 = vmul.f32 %v1197_v62, %v1197_v62 }
 0x122   :  { %v1210_v3 = vsub.f32 %v1119_v11, %v223_v10  ;;  %v1213_v16 = vsub.f32 %v1122_v12, %v216_v14  ;;  %v292_v19 = vsel %vm161_vm0, %v254_v15, 0.0  ;;  %v277_v27 = vsel %vm161_vm0, %v249_v6, 0.0 }
 0x123   :  { %v206_v20 = vpop.xlane.xlu1 %205  ;;  %272 = vadd.xlane.f32.xlu1 %v271_v18  ;;  %293 = vadd.xlane.f32.xlu0 %v292_v19  ;;  %v185_v22 = vpop.xlane.xlu0 %184  ;;  %v1263_v19 = vld [vmem:[%s1396_s2] ss:$0 sm:$0xff] }
 0x124   :  { %v225_v23 = vmul.f32 0.015625, %v206_v20  ;;  %v218_v25 = vmul.f32 0.015625, %v185_v22  ;;  %v248_v26 = vmul.f32 %v1213_v16, %v1213_v16  ;;  %v255_v31 = vmul.f32 %v1210_v3, %v1210_v3 }
 0x126   :  { %v1221_v11 = vsub.f32 %v1134_v17, %v225_v23  ;;  %v1224_v12 = vsub.f32 %v1125_v13, %v218_v25  ;;  %v274_v28 = vsel %vm161_vm0, %v248_v26, 0.0  ;;  %v295_v17 = vsel %vm161_vm0, %v255_v31, 0.0 }
 0x127   :  { %278 = vadd.xlane.f32.xlu1 %v277_v27  ;;  %275 = vadd.xlane.f32.xlu0 %v274_v28  ;;  %v203_v32 = vpop.xlane.xlu0 %202  ;;  %v1269_v28 = vld [vmem:[%s1397_s3] ss:$0 sm:$0xff] }
 0x128   :  { %v224_v33 = vmul.f32 0.015625, %v203_v32  ;;  %v250_v34 = vmul.f32 %v1224_v12, %v1224_v12  ;;  %v257_v36 = vmul.f32 %v1221_v11, %v1221_v11 }
 0x12a   :  { %v1232_v35 = vsub.f32 %v1143_v21, %v224_v33  ;;  %v280_v13 = vsel %vm161_vm0, %v250_v34, 0.0  ;;  %v301_v21 = vsel %vm161_vm0, %v257_v36, 0.0 }
 0x12b   :  { %296 = vadd.xlane.f32.xlu1 %v295_v17  ;;  %281 = vadd.xlane.f32.xlu0 %v280_v13  ;;  %v209_v39 = vpop.xlane.xlu0 %208 }
 0x12c   :  { %v226_v40 = vmul.f32 0.015625, %v209_v39  ;;  %v256_v41 = vmul.f32 %v1232_v35, %v1232_v35 }
 0x12e   :  { %v1241_v43 = vsub.f32 %v1148_v24, %v226_v40  ;;  %v298_v44 = vsel %vm161_vm0, %v256_v41, 0.0  ;;  %v919_v24 = vld [vmem:[%s1395_s4 + $0x8] sm:$0xff]  }
 0x12f   :  { %302 = vadd.xlane.f32.xlu1 %v301_v21  ;;  %299 = vadd.xlane.f32.xlu0 %v298_v44 }
 0x130   :  { %v258_v45 = vmul.f32 %v1241_v43, %v1241_v43  ;;  %846 = vmatprep.subr.bf16.mxu0 %v919_v24  ;;  %869 = vmatprep.subr.bf16.mxu1 %v919_v24 }
 0x131   :  { %847 = vmatpush3.bf16.msra.mxu0 %v919_v24  ;;  %873 = vmatpush3.bf16.msra.mxu1 %v919_v24 }
 0x132   :  { %v304_v48 = vsel %vm161_vm0, %v258_v45, 0.0  ;;  %848 = vmatprep.subr.bf16.mxu0 %v920_v49  ;;  %870 = vmatprep.subr.bf16.mxu1 %v920_v49 }
 0x133   :  { %305 = vadd.xlane.f32.xlu0 %v304_v48 }
 0x135   :  { %849 = vmatpush3.bf16.msra.mxu0 %v920_v49  ;;  %874 = vmatpush3.bf16.msra.mxu1 %v920_v49 }
 0x136   :  { %850 = vmatprep.subr.bf16.mxu0 %v921_v50  ;;  %871 = vmatprep.subr.bf16.mxu1 %v921_v50 }
 0x139   :  { %851 = vmatpush3.bf16.msra.mxu0 %v921_v50  ;;  %875 = vmatpush3.bf16.msra.mxu1 %v921_v50 }
 0x1a0   :  { %v261_v51 = vpop.xlane.xlu1 %260  ;;  %v264_v52 = vpop.xlane.xlu0 %263 }
 0x1a1   :  { %v307_v54 = vmul.f32 0.015625, %v261_v51  ;;  %v308_v55 = vmul.f32 0.015625, %v264_v52 }
 0x1a3   :  { %v323_v53 = vadd.f32 1e-05, %v307_v54  ;;  %v324_v58 = vadd.f32 1e-05, %v308_v55 }
 0x1a4   :  { %v267_v60 = vpop.xlane.xlu1 %266 }
 0x1a5   :  { %922 = vrsqrt.f32 %v323_v53  ;;  %v309_v61 = vmul.f32 0.015625, %v267_v60 }
 0x1a6   :  { %924 = vrsqrt.f32 %v324_v58 }
 0x1a7   :  { %v325_v63 = vadd.f32 1e-05, %v309_v61 }
 0x1a8   :  { %v285_v0 = vpop.xlane.xlu1 %284  ;;  %v270_v1 = vpop.xlane.xlu0 %269 }
 0x1a9   :  { %926 = vrsqrt.f32 %v325_v63  ;;  %v315_v2 = vmul.f32 0.015625, %v285_v0  ;;  %v310_v4 = vmul.f32 0.015625, %v270_v1 }
 0x1ab   :  { %v331_v5 = vadd.f32 1e-05, %v315_v2  ;;  %v326_v7 = vadd.f32 1e-05, %v310_v4 }
 0x1ac   :  { %v291_v8 = vpop.xlane.xlu1 %290  ;;  %v288_v9 = vpop.xlane.xlu0 %287 }
 0x1ad   :  { %928 = vrsqrt.f32 %v331_v5  ;;  %v317_v10 = vmul.f32 0.015625, %v291_v8  ;;  %v316_v14 = vmul.f32 0.015625, %v288_v9 }
 0x1ae   :  { %930 = vrsqrt.f32 %v326_v7 }
 0x1af   :  { %v923_v15 = vpop.eup %922  ;;  %v333_v6 = vadd.f32 1e-05, %v317_v10  ;;  %v332_v18 = vadd.f32 1e-05, %v316_v14 }
 0x1b0   :  { %v925_v20 = vpop.eup %924  ;;  %v273_v22 = vpop.xlane.xlu1 %272  ;;  %v355_v25 = vmul.f32 %v923_v15, %v1156_v30 }
 0x1b1   :  { %v294_v23 = vpop.xlane.xlu0 %293  ;;  %932 = vrsqrt.f32 %v333_v6  ;;  %v311_v26 = vmul.f32 0.015625, %v273_v22  ;;  %v356_v31 = vmul.f32 %v925_v20, %v1153_v29 }
 0x1b2   :  { %v318_v27 = vmul.f32 0.015625, %v294_v23  ;;  %934 = vrsqrt.f32 %v332_v18  ;;  %v377_v32 = vmul.f32 %v1263_v19, %v355_v25 }
 0x1b3   :  { %v927_v33 = vpop.eup %926  ;;  %v327_v34 = vadd.f32 1e-05, %v311_v26  ;;  %v378_v13 = vmul.f32 %v1263_v19, %v356_v31 }
 0x1b4   :  { %v334_v17 = vadd.f32 1e-05, %v318_v27  ;;  %v357_v30 = vmul.f32 %v927_v33, %v1166_v38  ;;  %v279_v36 = vpop.xlane.xlu1 %278  ;;  %v399_v40 = vadd.f32 %v1269_v28, %v377_v32 }
 0x1b5   :  { %v276_v39 = vpop.xlane.xlu0 %275  ;;  %936 = vrsqrt.f32 %v327_v34  ;;  %v313_v41 = vmul.f32 0.015625, %v279_v36  ;;  %v400_v44 = vadd.f32 %v1269_v28, %v378_v13 }
 0x1b6   :  { %v312_v21 = vmul.f32 0.015625, %v276_v39  ;;  %938 = vrsqrt.f32 %v334_v17  ;;  %v415_v29 = vmax.f32 %v399_v40, 0.0  ;;  %v379_v45 = vmul.f32 %v1263_v19, %v357_v30 }
 0x1b7   :  { %v929_v46 = vpop.eup %928  ;;  %v329_v48 = vadd.f32 1e-05, %v313_v41  ;;  %v416_v49 = vmax.f32 %v400_v44, 0.0 }
 0x1b8   :  { %v328_v24 = vadd.f32 1e-05, %v312_v21  ;;  %v931_v50 = vpop.eup %930  ;;  %v297_v51 = vpop.xlane.xlu1 %296  ;;  %v363_v52 = vmul.f32 %v929_v46, %v1163_v37  ;;  %v401_v60 = vadd.f32 %v1269_v28, %v379_v45 }
 0x1b9   :  { %v282_v38 = vpop.xlane.xlu0 %281  ;;  %v358_v54 = vmul.f32 %v931_v50, %v1176_v42  ;;  %940 = vrsqrt.f32 %v329_v48  ;;  %v319_v55 = vmul.f32 0.015625, %v297_v51  ;;  %v431_v58 = vpack.c.bf16 %v416_v49, %v415_v29 }
 0x1ba   :  { %v314_v53 = vmul.f32 0.015625, %v282_v38  ;;  %942 = vrsqrt.f32 %v328_v24  ;;  %v385_v42 = vmul.f32 %v1263_v19, %v363_v52  ;;  %v417_v10 = vmax.f32 %v401_v60, 0.0 }
 0x1bb   :  { %v933_v61 = vpop.eup %932  ;;  %v335_v63 = vadd.f32 1e-05, %v319_v55  ;;  %v380_v1 = vmul.f32 %v1263_v19, %v358_v54  ;;  %852 = vmatprep.mubr.msk.bf16.mxu0 %vm161_vm0, %v431_v58 }
 0x1bc   :  { %v330_v0 = vadd.f32 1e-05, %v314_v53  ;;  %v935_v2 = vpop.eup %934  ;;  %v365_v4 = vmul.f32 %v933_v61, %v1173_v47  ;;  %v303_v37 = vpop.xlane.xlu1 %302  ;;  %v407_v27 = vadd.f32 %v1269_v28, %v385_v42 }
 0x1bd   :  { %v300_v5 = vpop.xlane.xlu0 %299  ;;  %944 = vrsqrt.f32 %v335_v63  ;;  %v321_v7 = vmul.f32 0.015625, %v303_v37  ;;  %v402_v9 = vadd.f32 %v1269_v28, %v380_v1  ;;  %v364_v14 = vmul.f32 %v935_v2, %v1189_v56 }
 0x1be   :  { %v320_v8 = vmul.f32 0.015625, %v300_v5  ;;  %946 = vrsqrt.f32 %v330_v0  ;;  %v387_v47 = vmul.f32 %v1263_v19, %v365_v4 }
 0x1bf   :  { %v937_v15 = vpop.eup %936  ;;  %v337_v6 = vadd.f32 1e-05, %v321_v7  ;;  %v418_v20 = vmax.f32 %v402_v9, 0.0  ;;  %v386_v26 = vmul.f32 %v1263_v19, %v364_v14 }
 0x1c0   :  { %v336_v18 = vadd.f32 1e-05, %v320_v8  ;;  %v939_v22 = vpop.eup %938  ;;  %v359_v23 = vmul.f32 %v937_v15, %v1186_v57  ;;  %v409_v30 = vadd.f32 %v1269_v28, %v387_v47 }
 0x1c1   :  { %v306_v25 = vpop.xlane.xlu0 %305  ;;  %v366_v31 = vmul.f32 %v939_v22, %v1200_v59  ;;  %948 = vrsqrt.f32 %v337_v6  ;;  %v432_v33 = vpack.c.bf16 %v418_v20, %v417_v10  ;;  %v408_v56 = vadd.f32 %v1269_v28, %v386_v26 }
 0x1c2   :  { %v322_v32 = vmul.f32 0.015625, %v306_v25  ;;  %950 = vrsqrt.f32 %v336_v18  ;;  %v381_v34 = vmul.f32 %v1263_v19, %v359_v23  ;;  %v423_v59 = vmax.f32 %v407_v27, 0.0 }
 0x1c3   :  { %v941_v17 = vpop.eup %940  ;;  %853 = vmatmul.mubr.msk.bf16.vlgmr.msra.gmra.mrb[0].mxu0 %vm161_vm0, %v432_v33  ;;  %v388_v57 = vmul.f32 %v1263_v19, %v366_v31  ;;  %v424_v40 = vmax.f32 %v408_v56, 0.0  ;;  %v425_v46 = vmax.f32 %v409_v30, 0.0 }
 0x1c4   :  { %v338_v13 = vadd.f32 1e-05, %v322_v32  ;;  %v943_v36 = vpop.eup %942  ;;  %v361_v39 = vmul.f32 %v941_v17, %v1197_v62  ;;  %v403_v29 = vadd.f32 %v1269_v28, %v381_v34 }
 0x1c5   :  { %v360_v41 = vmul.f32 %v943_v36, %v1213_v16  ;;  %v410_v21 = vadd.f32 %v1269_v28, %v388_v57  ;;  %v435_v44 = vpack.c.bf16 %v424_v40, %v423_v59 }
 0x1c6   :  { %952 = vrsqrt.f32 %v338_v13  ;;  %v383_v49 = vmul.f32 %v1263_v19, %v361_v39  ;;  %v419_v52 = vmax.f32 %v403_v29, 0.0 }
 0x1c7   :  { %v945_v45 = vpop.eup %944  ;;  %v426_v48 = vmax.f32 %v410_v21, 0.0  ;;  %v382_v24 = vmul.f32 %v1263_v19, %v360_v41  ;;  %860 = vmatprep.mubr.msk.bf16.mxu1 %vm161_vm0, %v435_v44 }
 0x1c8   :  { %v947_v50 = vpop.eup %946  ;;  %v367_v62 = vmul.f32 %v945_v45, %v1210_v3  ;;  %v405_v58 = vadd.f32 %v1269_v28, %v383_v49 }
 0x1c9   :  { %v362_v16 = vmul.f32 %v947_v50, %v1224_v12  ;;  %v436_v51 = vpack.c.bf16 %v426_v48, %v425_v46  ;;  %v404_v38 = vadd.f32 %v1269_v28, %v382_v24 }
 0x1ca   :  { %v389_v60 = vmul.f32 %v1263_v19, %v367_v62  ;;  %v421_v4 = vmax.f32 %v405_v58, 0.0 }
 0x1cb   :  { %v949_v54 = vpop.eup %948  ;;  %861 = vmatmul.mubr.msk.bf16.vlgmr.msra.gmra.mrb[0].mxu1 %vm161_vm0, %v436_v51  ;;  %v420_v55 = vmax.f32 %v404_v38, 0.0  ;;  %v384_v53 = vmul.f32 %v1263_v19, %v362_v16 }
 0x1cc   :  { %v951_v61 = vpop.eup %950  ;;  %v369_v3 = vmul.f32 %v949_v54, %v1221_v11  ;;  %v411_v42 = vadd.f32 %v1269_v28, %v389_v60 }
 0x1cd   :  { %v368_v63 = vmul.f32 %v951_v61, %v1232_v35  ;;  %v433_v12 = vpack.c.bf16 %v420_v55, %v419_v52  ;;  %v406_v0 = vadd.f32 %v1269_v28, %v384_v53 }
 0x1ce   :  { %v391_v1 = vmul.f32 %v1263_v19, %v369_v3  ;;  %v427_v10 = vmax.f32 %v411_v42, 0.0 }
 0x1cf   :  { %856 = vmatprep.mubr.msk.bf16.mxu0 %vm161_vm0, %v433_v12  ;;  %v422_v37 = vmax.f32 %v406_v0, 0.0  ;;  %v390_v5 = vmul.f32 %v1263_v19, %v368_v63 }
 0x1d0   :  { %v953_v2 = vpop.eup %952  ;;  %v413_v9 = vadd.f32 %v1269_v28, %v391_v1 }
 0x1d1   :  { %v370_v7 = vmul.f32 %v953_v2, %v1241_v43  ;;  %v434_v8 = vpack.c.bf16 %v422_v37, %v421_v4  ;;  %v412_v11 = vadd.f32 %v1269_v28, %v390_v5  ;;  %v971_v43 = vmov 0.0|0.0  }
 0x1d2   :  { %v429_v18 = vmax.f32 %v413_v9, 0.0  ;;  %v777_v22 = vcombine.low %v971_v43, %v971_v43  ;;  %v778_v23 = vcombine.high %v971_v43, %v971_v43 }
 0x1d3   :  { %v392_v35 = vmul.f32 %v1263_v19, %v370_v7  ;;  %857 = vmatmul.mubr.msk.bf16.gmra.mrb[4].mxu0 %vm161_vm0, %v434_v8  ;;  %v428_v14 = vmax.f32 %v412_v11, 0.0  ;;  %v754_v19 = vld [vmem:[%s1399_s5] ss:$0 sm:$0xff] }
 0x1d4   :  { %741 = vst.msk [vmem:[%s1398_s6 + $0x28] sm:$0xf] %vm730_vm1, %v777_v22  ;;  %742 = vst.msk [vmem:[%s1398_s6 + $0x2c] sm:$0xf] %vm730_vm1, %v778_v23 }
 0x1d5   :  { %v414_v15 = vadd.f32 %v1269_v28, %v392_v35  ;;  %v437_v6 = vpack.c.bf16 %v428_v14, %v427_v10  ;;  %743 = vst.msk [vmem:[%s1398_s6 + $0x30] sm:$0xf] %vm730_vm1, %v777_v22  ;;  %744 = vst.msk [vmem:[%s1398_s6 + $0x34] sm:$0xf] %vm730_vm1, %v778_v23  ;;  %v600_v28 = vlaneseq }
 0x1d6   :  { %745 = vst.msk [vmem:[%s1398_s6 + $0x38] sm:$0xf] %vm730_vm1, %v777_v22  ;;  %746 = vst.msk [vmem:[%s1398_s6 + $0x3c] sm:$0xf] %vm730_vm1, %v778_v23 }
 0x1d7   :  { %v430_v20 = vmax.f32 %v414_v15, 0.0  ;;  %864 = vmatprep.mubr.msk.bf16.mxu1 %vm161_vm0, %v437_v6  ;;  %v601_v17 = vshrl.u32 %v600_v28, 7 }
 0x1d9   :  { %v438_v47 = vpack.c.bf16 %v430_v20, %v429_v18  ;;  %v610_v39 = vadd.s32 72, %v601_v17 }
 0x1db   :  { %865 = vmatmul.mubr.msk.bf16.gmra.mrb[4].mxu1 %vm161_vm0, %v438_v47  ;;  %vm643_vm2 = vcmp.lt.s32.totalorder %v610_v39, 75 }
 0x296   :  { %v854_v25 = vpop.f32.mrb[0].mxu0 }
 0x297   :  { %v545_v26 = vadd.f32 %v854_v25, %v754_v19  ;;  %v536_v27 = vpop.f32.mrb[1].mxu0 }
 0x298   :  { %v537_v31 = vadd.f32 %v754_v19, %v536_v27  ;;  %v855_v32 = vpop.f32.mrb[2].mxu0 }
 0x299   :  { %v785_v33 = vpack.c.bf16 %v545_v26, %v545_v26  ;;  %v548_v56 = vadd.f32 %v855_v32, %v754_v19  ;;  %v539_v34 = vpop.f32.mrb[3].mxu0 }
 0x29a   :  { %v783_v13 = vpack.c.bf16 %v537_v31, %v537_v31  ;;  %v540_v57 = vadd.f32 %v754_v19, %v539_v34 }
 0x29b   :  { %733 = vst.msk [vmem:[%s1398_s6 + $0x8] sm:$0xf] %vm730_vm1, %v785_v33  ;;  %v786_v30 = vpack.c.bf16 %v548_v56, %v548_v56 }
 0x29c   :  { %731 = vst.msk [vmem:[%s1398_s6] sm:$0xf] %vm730_vm1, %v783_v13  ;;  %v784_v36 = vpack.c.bf16 %v540_v57, %v540_v57 }
 0x29d   :  { %734 = vst.msk [vmem:[%s1398_s6 + $0xc] sm:$0xf] %vm730_vm1, %v786_v30 }
 0x29e   :  { %732 = vst.msk [vmem:[%s1398_s6 + $0x4] sm:$0xf] %vm730_vm1, %v784_v36  ;;  %v862_v59 = vpop.f32.mrb[0].mxu1 }
 0x29f   :  { %v568_v40 = vpop.f32.mrb[1].mxu1 }
 0x2a0   :  { %v569_v41 = vadd.f32 %v754_v19, %v568_v40  ;;  %v863_v21 = vpop.f32.mrb[2].mxu1 }
 0x2a1   :  { %v571_v44 = vpop.f32.mrb[3].mxu1 }
 0x2a2   :  { %v791_v29 = vpack.c.bf16 %v569_v41, %v569_v41  ;;  %v572_v45 = vadd.f32 %v754_v19, %v571_v44 }
 0x2a4   :  { %739 = vst.msk [vmem:[%s1398_s6 + $0x20] sm:$0xf] %vm730_vm1, %v791_v29  ;;  %v659_v46 = vsel %vm643_vm2, %v572_v45, 0.0 }
 0x2a5   :  { %v792_v48 = vpack.c.bf16 %v659_v46, %v659_v46 }
 0x2a6   :  { %v858_v24 = vpop.f32.mrb[4].mxu0 }
 0x2a7   :  { %740 = vst.msk [vmem:[%s1398_s6 + $0x24] sm:$0xf] %vm730_vm1, %v792_v48  ;;  %v561_v49 = vadd.f32 %v858_v24, %v754_v19  ;;  %v552_v50 = vpop.f32.mrb[5].mxu0 }
 0x2a8   :  { %v553_v62 = vadd.f32 %v754_v19, %v552_v50  ;;  %v859_v16 = vpop.f32.mrb[6].mxu0 }
 0x2a9   :  { %v789_v51 = vpack.c.bf16 %v561_v49, %v561_v49  ;;  %v564_v38 = vadd.f32 %v859_v16, %v754_v19  ;;  %v555_v52 = vpop.f32.mrb[7].mxu0 }
 0x2aa   :  { %v787_v54 = vpack.c.bf16 %v553_v62, %v553_v62  ;;  %v556_v55 = vadd.f32 %v754_v19, %v555_v52 }
 0x2ab   :  { %737 = vst.msk [vmem:[%s1398_s6 + $0x18] sm:$0xf] %vm730_vm1, %v789_v51  ;;  %v790_v53 = vpack.c.bf16 %v564_v38, %v564_v38 }
 0x2ac   :  { %735 = vst.msk [vmem:[%s1398_s6 + $0x10] sm:$0xf] %vm730_vm1, %v787_v54  ;;  %v788_v58 = vpack.c.bf16 %v556_v55, %v556_v55 }
 0x2ad   :  { %738 = vst.msk [vmem:[%s1398_s6 + $0x1c] sm:$0xf] %vm730_vm1, %v790_v53 }
 0x2ae   :  { %v866_v60 = vpop.f32.mrb[4].mxu1  ;;  %736 = vst.msk [vmem:[%s1398_s6 + $0x14] sm:$0xf] %vm730_vm1, %v788_v58 }
 0x2af   :  { %v584_v61 = vpop.f32.mrb[5].mxu1 }
 0x2b0   :  { %v867_v3 = vpop.f32.mrb[6].mxu1 }
 0x2b1   :  { %v587_v63 = vpop.f32.mrb[7].mxu1 }

// kernel: gnn_policy_forward.13
= control target key start
LH: loop header
LB: loop body
LE: loop exit
PB: predicated region body
PF: predicated region fallthrough
CT: control target
= control target key end

     0   :  { %vm56_vm0 = vcmask 523264   ;;  %vm951_vm1 = vcmask 519168   ;;  %s2167_s0 = inlined_call_operand.vmem [shape: f32[128,64], index: 0, kind: input, shape index: {}]   ;;  %s2168_s4 = inlined_call_operand.vmem [shape: bf16[128,64], index: 4, kind: input, shape index: {}]   ;;  %s2169_s1 = inlined_call_operand.vmem [shape: bf16[128,64], index: 1, kind: input, shape index: {}]   ;;  %s2170_s6 = inlined_call_operand.vmem [shape: bf16[64,64], index: 6, kind: input, shape index: {}]   ;;  %s2171_s2 = inlined_call_operand.vmem [shape: f32[1,64], index: 2, kind: input, shape index: {}]   ;;  %s2172_s3 = inlined_call_operand.vmem [shape: f32[1,64], index: 3, kind: input, shape index: {}]   ;;  %s2173_s8 = inlined_call_operand.vmem [shape: bf16[64,128], index: 8, kind: input, shape index: {}]   ;;  %s2174_s5 = inlined_call_operand.vmem [shape: f32[1,64], index: 5, kind: input, shape index: {}]   ;;  %s2175_s7 = inlined_call_operand.vmem [shape: f32[1,64], index: 7, kind: input, shape index: {}]   ;;  %s2176_s10 = inlined_call_operand.vmem [shape: bf16[128,64], index: 10, kind: output, shape index: {0}]   ;;  %s2177_s9 = inlined_call_operand.vmem [shape: f32[1,128], index: 9, kind: input, shape index: {}]   ;;  %s2178_s11 = inlined_call_operand.vmem [shape: bf16[128,128], index: 11, kind: output, shape index: {1}]  }
   0x1   :  { %v1667_v0 = vld [vmem:[%s2167_s0] sm:$0xff]  ;;  %v1672_v1 = vld [vmem:[%s2167_s0 + $0x10] sm:$0xff]  ;;  %v1677_v2 = vld [vmem:[%s2167_s0 + $0x8] sm:$0xff] }
   0x2   :  { %v57_v3 = vsel %vm56_vm0, %v1667_v0, 0.0  ;;  %v63_v4 = vsel %vm56_vm0, %v1672_v1, 0.0  ;;  %v1686_v5 = vld [vmem:[%s2167_s0 + $0x18] sm:$0xff]  ;;  %v60_v6 = vsel %vm56_vm0, %v1677_v2, 0.0  ;;  %v1695_v8 = vld [vmem:[%s2167_s0 + $0x20] sm:$0xff]  ;;  %v1700_v9 = vld [vmem:[%s2167_s0 + $0x28] sm:$0xff] }
   0x3   :  { %58 = vadd.xlane.f32.xlu0 %v57_v3  ;;  %64 = vadd.xlane.f32.xlu1 %v63_v4  ;;  %v66_v7 = vsel %vm56_vm0, %v1686_v5, 0.0  ;;  %v69_v10 = vsel %vm56_vm0, %v1695_v8, 0.0  ;;  %v72_v11 = vsel %vm56_vm0, %v1700_v9, 0.0  ;;  %v1709_v12 = vld [vmem:[%s2167_s0 + $0x30] sm:$0xff]  ;;  %v1714_v13 = vld [vmem:[%s2167_s0 + $0x38] sm:$0xff]  ;;  %v1723_v16 = vld [vmem:[%s2167_s0 + $0x40] sm:$0xff] }
   0x4   :  { %v75_v14 = vsel %vm56_vm0, %v1709_v12, 0.0  ;;  %v78_v15 = vsel %vm56_vm0, %v1714_v13, 0.0  ;;  %v1728_v17 = vld [vmem:[%s2167_s0 + $0x48] sm:$0xff]  ;;  %v81_v18 = vsel %vm56_vm0, %v1723_v16, 0.0  ;;  %v1737_v20 = vld [vmem:[%s2167_s0 + $0x50] sm:$0xff]  ;;  %v1742_v21 = vld [vmem:[%s2167_s0 + $0x58] sm:$0xff] }
   0x5   :  { %v84_v19 = vsel %vm56_vm0, %v1728_v17, 0.0  ;;  %v87_v22 = vsel %vm56_vm0, %v1737_v20, 0.0  ;;  %v90_v23 = vsel %vm56_vm0, %v1742_v21, 0.0  ;;  %v1751_v24 = vld [vmem:[%s2167_s0 + $0x60] sm:$0xff]  ;;  %v1756_v25 = vld [vmem:[%s2167_s0 + $0x68] sm:$0xff]  ;;  %v1765_v28 = vld [vmem:[%s2167_s0 + $0x70] sm:$0xff] }
   0x6   :  { %v93_v26 = vsel %vm56_vm0, %v1751_v24, 0.0  ;;  %v96_v27 = vsel %vm56_vm0, %v1756_v25, 0.0  ;;  %v1770_v29 = vld [vmem:[%s2167_s0 + $0x78] sm:$0xff]  ;;  %v99_v30 = vsel %vm56_vm0, %v1765_v28, 0.0  ;;  %v1548_v32 = vld [vmem:[%s2168_s4 + $0x20] sm:$0xff]   ;;  %v1549_v33 = vld [vmem:[%s2168_s4 + $0x28] sm:$0xff]  }
   0x7   :  { %61 = vadd.xlane.f32.xlu0 %v60_v6  ;;  %67 = vadd.xlane.f32.xlu1 %v66_v7  ;;  %v102_v31 = vsel %vm56_vm0, %v1770_v29, 0.0  ;;  %v1550_v34 = vld [vmem:[%s2168_s4 + $0x30] sm:$0xff]   ;;  %v1552_v35 = vld [vmem:[%s2169_s1] sm:$0xff]   ;;  %v1551_v36 = vld [vmem:[%s2168_s4 + $0x38] sm:$0xff]  }
   0x8   :  { %1436 = vmatprep.subr.bf16.mxu0 %v1548_v32  ;;  %1444 = vmatprep.mubr.msk.bf16.mxu0 %vm56_vm0, %v1552_v35  ;;  %v1553_v37 = vld [vmem:[%s2168_s4] sm:$0xff]   ;;  %v1554_v38 = vld [vmem:[%s2169_s1 + $0x8] sm:$0xff]  }
   0x9   :  { %1437 = vmatpush3.bf16.msra.mxu0 %v1548_v32 }
   0xa   :  { %1438 = vmatprep.subr.bf16.mxu0 %v1549_v33 }
   0xb   :  { %70 = vadd.xlane.f32.xlu0 %v69_v10  ;;  %73 = vadd.xlane.f32.xlu1 %v72_v11 }
   0xd   :  { %1439 = vmatpush3.bf16.msra.mxu0 %v1549_v33 }
   0xe   :  { %1440 = vmatprep.subr.bf16.mxu0 %v1550_v34 }
   0xf   :  { %76 = vadd.xlane.f32.xlu0 %v75_v14  ;;  %79 = vadd.xlane.f32.xlu1 %v78_v15 }
  0x11   :  { %1441 = vmatpush3.bf16.msra.mxu0 %v1550_v34 }
  0x12   :  { %1442 = vmatprep.subr.bf16.mxu0 %v1551_v36 }
  0x13   :  { %82 = vadd.xlane.f32.xlu0 %v81_v18  ;;  %85 = vadd.xlane.f32.xlu1 %v84_v19 }
  0x15   :  { %1443 = vmatpush3.bf16.msra.mxu0 %v1551_v36 }
  0x16   :  { %1460 = vmatprep.subr.bf16.mxu0 %v1553_v37 }
  0x17   :  { %88 = vadd.xlane.f32.xlu0 %v87_v22  ;;  %91 = vadd.xlane.f32.xlu1 %v90_v23 }
  0x18   :  { %1445 = vmatmul.mubr.msk.bf16.vlgmr.msra.gmra.mrb[0].mxu0 %vm56_vm0, %v1554_v38 }
  0x19   :  { %1461 = vmatpush3.bf16.msra.mxu0 %v1553_v37 }
  0x1b   :  { %94 = vadd.xlane.f32.xlu0 %v93_v26  ;;  %97 = vadd.xlane.f32.xlu1 %v96_v27 }
  0x1f   :  { %100 = vadd.xlane.f32.xlu0 %v99_v30  ;;  %103 = vadd.xlane.f32.xlu1 %v102_v31 }
  0x90   :  { %v59_v39 = vpop.xlane.xlu0 %58  ;;  %v65_v40 = vpop.xlane.xlu1 %64 }
  0x91   :  { %v106_v41 = vmul.f32 0.015625, %v59_v39  ;;  %v108_v42 = vmul.f32 0.015625, %v65_v40 }
  0x93   :  { %v1800_v43 = vsub.f32 %v1667_v0, %v106_v41  ;;  %v1803_v44 = vsub.f32 %v1672_v1, %v108_v42 }
  0x94   :  { %v62_v45 = vpop.xlane.xlu0 %61  ;;  %v68_v46 = vpop.xlane.xlu1 %67 }
  0x95   :  { %v107_v47 = vmul.f32 0.015625, %v62_v45  ;;  %v109_v48 = vmul.f32 0.015625, %v68_v46  ;;  %v138_v49 = vmul.f32 %v1800_v43, %v1800_v43  ;;  %v140_v50 = vmul.f32 %v1803_v44, %v1803_v44  ;;  %v1555_v46 = vld [vmem:[%s2169_s1 + $0x10] sm:$0xff]  }
  0x96   :  { %1448 = vmatprep.mubr.msk.bf16.mxu0 %vm56_vm0, %v1555_v46 }
  0x97   :  { %v1810_v51 = vsub.f32 %v1677_v2, %v107_v47  ;;  %v1813_v52 = vsub.f32 %v1686_v5, %v109_v48  ;;  %v154_v53 = vsel %vm56_vm0, %v138_v49, 0.0  ;;  %v160_v56 = vsel %vm56_vm0, %v140_v50, 0.0 }
  0x98   :  { %155 = vadd.xlane.f32.xlu0 %v154_v53  ;;  %v71_v54 = vpop.xlane.xlu0 %70  ;;  %v74_v55 = vpop.xlane.xlu1 %73 }
  0x99   :  { %v110_v57 = vmul.f32 0.015625, %v71_v54  ;;  %v111_v58 = vmul.f32 0.015625, %v74_v55  ;;  %v139_v59 = vmul.f32 %v1810_v51, %v1810_v51  ;;  %v141_v60 = vmul.f32 %v1813_v52, %v1813_v52 }
  0x9b   :  { %v1822_v61 = vsub.f32 %v1695_v8, %v110_v57  ;;  %v1825_v62 = vsub.f32 %v1700_v9, %v111_v58  ;;  %v157_v63 = vsel %vm56_vm0, %v139_v59, 0.0  ;;  %v163_v2 = vsel %vm56_vm0, %v141_v60, 0.0 }
  0x9c   :  { %161 = vadd.xlane.f32.xlu0 %v160_v56  ;;  %158 = vadd.xlane.f32.xlu1 %v157_v63  ;;  %v77_v0 = vpop.xlane.xlu0 %76  ;;  %v80_v1 = vpop.xlane.xlu1 %79 }
  0x9d   :  { %v112_v3 = vmul.f32 0.015625, %v77_v0  ;;  %v113_v4 = vmul.f32 0.015625, %v80_v1  ;;  %v142_v5 = vmul.f32 %v1822_v61, %v1822_v61  ;;  %v143_v6 = vmul.f32 %v1825_v62, %v1825_v62  ;;  %v1556_v1 = vld [vmem:[%s2168_s4 + $0x8] sm:$0xff]  }
  0x9e   :  { %1462 = vmatprep.subr.bf16.mxu0 %v1556_v1 }
  0x9f   :  { %v1834_v7 = vsub.f32 %v1709_v12, %v112_v3  ;;  %v1837_v8 = vsub.f32 %v1714_v13, %v113_v4  ;;  %v166_v9 = vsel %vm56_vm0, %v142_v5, 0.0  ;;  %v169_v14 = vsel %vm56_vm0, %v143_v6, 0.0  ;;  %1463 = vmatpush3.bf16.msra.mxu0 %v1556_v1  ;;  %v1559_v3 = vld [vmem:[%s2168_s4 + $0x10] sm:$0xff]   ;;  %v1563_v4 = vld [vmem:[%s2169_s1 + $0x38] sm:$0xff]   ;;  %v1564_v6 = vld [vmem:[%s2170_s6] sm:$0xff]  }
  0xa0   :  { %164 = vadd.xlane.f32.xlu1 %v163_v2  ;;  %167 = vadd.xlane.f32.xlu0 %v166_v9  ;;  %v83_v10 = vpop.xlane.xlu0 %82  ;;  %v86_v11 = vpop.xlane.xlu1 %85  ;;  %v1561_v2 = vld [vmem:[%s2169_s1 + $0x30] sm:$0xff]   ;;  %v1562_v5 = vld [vmem:[%s2168_s4 + $0x18] sm:$0xff]   ;;  %v1565_v9 = vld [vmem:[%s2170_s6 + $0x8] sm:$0xff]  }
  0xa1   :  { %v114_v15 = vmul.f32 0.015625, %v83_v10  ;;  %v115_v18 = vmul.f32 0.015625, %v86_v11  ;;  %v144_v19 = vmul.f32 %v1834_v7, %v1834_v7  ;;  %v145_v12 = vmul.f32 %v1837_v8, %v1837_v8  ;;  %1464 = vmatprep.subr.bf16.mxu0 %v1559_v3  ;;  %1484 = vmatprep.subr.bf16.mxu1 %v1564_v6 }
  0xa2   :  { %1485 = vmatpush3.bf16.msra.mxu1 %v1564_v6 }
  0xa3   :  { %v1846_v22 = vsub.f32 %v1723_v16, %v114_v15  ;;  %v1849_v13 = vsub.f32 %v1728_v17, %v115_v18  ;;  %v172_v23 = vsel %vm56_vm0, %v144_v19, 0.0  ;;  %v175_v30 = vsel %vm56_vm0, %v145_v12, 0.0  ;;  %1465 = vmatpush3.bf16.msra.mxu0 %v1559_v3  ;;  %1486 = vmatprep.subr.bf16.mxu1 %v1565_v9 }
  0xa4   :  { %170 = vadd.xlane.f32.xlu1 %v169_v14  ;;  %173 = vadd.xlane.f32.xlu0 %v172_v23  ;;  %v89_v26 = vpop.xlane.xlu0 %88  ;;  %v92_v27 = vpop.xlane.xlu1 %91 }
  0xa5   :  { %v116_v31 = vmul.f32 0.015625, %v89_v26  ;;  %v117_v32 = vmul.f32 0.015625, %v92_v27  ;;  %v146_v33 = vmul.f32 %v1846_v22, %v1846_v22  ;;  %v147_v16 = vmul.f32 %v1849_v13, %v1849_v13  ;;  %1466 = vmatprep.subr.bf16.mxu0 %v1562_v5 }
  0xa6   :  { %1487 = vmatpush3.bf16.msra.mxu1 %v1565_v9 }
  0xa7   :  { %v1858_v34 = vsub.f32 %v1737_v20, %v116_v31  ;;  %v1861_v17 = vsub.f32 %v1742_v21, %v117_v32  ;;  %v178_v35 = vsel %vm56_vm0, %v146_v33, 0.0  ;;  %v181_v38 = vsel %vm56_vm0, %v147_v16, 0.0  ;;  %1467 = vmatpush3.bf16.msra.mxu0 %v1562_v5 }
  0xa8   :  { %176 = vadd.xlane.f32.xlu1 %v175_v30  ;;  %179 = vadd.xlane.f32.xlu0 %v178_v35  ;;  %v95_v36 = vpop.xlane.xlu0 %94  ;;  %v98_v37 = vpop.xlane.xlu1 %97 }
  0xa9   :  { %v118_v39 = vmul.f32 0.015625, %v95_v36  ;;  %v119_v40 = vmul.f32 0.015625, %v98_v37  ;;  %v148_v41 = vmul.f32 %v1858_v34, %v1858_v34  ;;  %v149_v20 = vmul.f32 %v1861_v17, %v1861_v17 }
  0xab   :  { %v1870_v42 = vsub.f32 %v1751_v24, %v118_v39  ;;  %v1873_v21 = vsub.f32 %v1756_v25, %v119_v40  ;;  %v184_v45 = vsel %vm56_vm0, %v148_v41, 0.0  ;;  %v187_v49 = vsel %vm56_vm0, %v149_v20, 0.0  ;;  %v1557_v24 = vld [vmem:[%s2169_s1 + $0x18] sm:$0xff]  }
  0xac   :  { %182 = vadd.xlane.f32.xlu1 %v181_v38  ;;  %185 = vadd.xlane.f32.xlu0 %v184_v45  ;;  %v101_v47 = vpop.xlane.xlu0 %100  ;;  %v104_v48 = vpop.xlane.xlu1 %103 }
  0xad   :  { %v120_v50 = vmul.f32 0.015625, %v101_v47  ;;  %v121_v53 = vmul.f32 0.015625, %v104_v48  ;;  %v150_v25 = vmul.f32 %v1870_v42, %v1870_v42  ;;  %v151_v54 = vmul.f32 %v1873_v21, %v1873_v21  ;;  %1449 = vmatmul.mubr.msk.bf16.gmra.mrb[4].mxu0 %vm56_vm0, %v1557_v24  ;;  %v1938_v47 = vld [vmem:[%s2171_s2] ss:$0 sm:$0xff] }
  0xaf   :  { %v1890_v55 = vsub.f32 %v1765_v28, %v120_v50  ;;  %v1893_v56 = vsub.f32 %v1770_v29, %v121_v53  ;;  %v190_v57 = vsel %vm56_vm0, %v150_v25, 0.0  ;;  %v193_v58 = vsel %vm56_vm0, %v151_v54, 0.0  ;;  %v1558_v28 = vld [vmem:[%s2169_s1 + $0x20] sm:$0xff]   ;;  %v1560_v29 = vld [vmem:[%s2169_s1 + $0x28] sm:$0xff]  }
  0xb0   :  { %188 = vadd.xlane.f32.xlu1 %v187_v49  ;;  %191 = vadd.xlane.f32.xlu0 %v190_v57 }
  0xb1   :  { %v152_v59 = vmul.f32 %v1890_v55, %v1890_v55  ;;  %v153_v60 = vmul.f32 %v1893_v56, %v1893_v56  ;;  %1452 = vmatprep.mubr.msk.bf16.mxu0 %vm56_vm0, %v1558_v28 }
  0xb3   :  { %v196_v63 = vsel %vm56_vm0, %v152_v59, 0.0  ;;  %v199_v0 = vsel %vm56_vm0, %v153_v60, 0.0  ;;  %v1945_v59 = vld [vmem:[%s2172_s3] ss:$0 sm:$0xff] }
  0xb4   :  { %194 = vadd.xlane.f32.xlu1 %v193_v58  ;;  %197 = vadd.xlane.f32.xlu0 %v196_v63 }
  0xb5   :  { %1453 = vmatmul.mubr.msk.bf16.gmra.mrb[8].mxu0 %vm56_vm0, %v1560_v29 }
  0xb6   :  { %1456 = vmatprep.mubr.msk.bf16.mxu0 %vm56_vm0, %v1561_v2 }
  0xb8   :  { %200 = vadd.xlane.f32.xlu1 %v199_v0 }
  0xbd   :  { %1457 = vmatmul.mubr.msk.bf16.gmra.mrb[12].mxu0 %vm56_vm0, %v1563_v4 }
 0x125   :  { %v156_v10 = vpop.xlane.xlu0 %155 }
 0x126   :  { %v202_v11 = vmul.f32 0.015625, %v156_v10 }
 0x128   :  { %v218_v14 = vadd.f32 1e-05, %v202_v11 }
 0x129   :  { %v159_v15 = vpop.xlane.xlu1 %158  ;;  %v162_v18 = vpop.xlane.xlu0 %161 }
 0x12a   :  { %1572 = vrsqrt.f32 %v218_v14  ;;  %v203_v19 = vmul.f32 0.015625, %v159_v15  ;;  %v204_v12 = vmul.f32 0.015625, %v162_v18 }
 0x12c   :  { %v219_v23 = vadd.f32 1e-05, %v203_v19  ;;  %v220_v26 = vadd.f32 1e-05, %v204_v12 }
 0x12d   :  { %v165_v27 = vpop.xlane.xlu1 %164  ;;  %v168_v30 = vpop.xlane.xlu0 %167 }
 0x12e   :  { %1574 = vrsqrt.f32 %v219_v23  ;;  %v205_v31 = vmul.f32 0.015625, %v165_v27  ;;  %v206_v32 = vmul.f32 0.015625, %v168_v30 }
 0x12f   :  { %1576 = vrsqrt.f32 %v220_v26 }
 0x130   :  { %v221_v33 = vadd.f32 1e-05, %v205_v31  ;;  %v222_v16 = vadd.f32 1e-05, %v206_v32 }
 0x131   :  { %v171_v35 = vpop.xlane.xlu1 %170  ;;  %v174_v36 = vpop.xlane.xlu0 %173 }
 0x132   :  { %1578 = vrsqrt.f32 %v221_v33  ;;  %v207_v37 = vmul.f32 0.015625, %v171_v35  ;;  %v208_v38 = vmul.f32 0.015625, %v174_v36 }
 0x133   :  { %1580 = vrsqrt.f32 %v222_v16 }
 0x134   :  { %v1573_v39 = vpop.eup %1572  ;;  %v223_v40 = vadd.f32 1e-05, %v207_v37  ;;  %v224_v41 = vadd.f32 1e-05, %v208_v38 }
 0x135   :  { %v250_v20 = vmul.f32 %v1573_v39, %v1800_v43  ;;  %v177_v45 = vpop.xlane.xlu1 %176  ;;  %v180_v46 = vpop.xlane.xlu0 %179 }
 0x136   :  { %1582 = vrsqrt.f32 %v223_v40  ;;  %v209_v48 = vmul.f32 0.015625, %v177_v45  ;;  %v210_v49 = vmul.f32 0.015625, %v180_v46 }
 0x137   :  { %1584 = vrsqrt.f32 %v224_v41  ;;  %v272_v43 = vmul.f32 %v1938_v47, %v250_v20 }
 0x138   :  { %v1575_v24 = vpop.eup %1574  ;;  %v225_v50 = vadd.f32 1e-05, %v209_v48  ;;  %v226_v53 = vadd.f32 1e-05, %v210_v49 }
 0x139   :  { %v1577_v25 = vpop.eup %1576  ;;  %v251_v54 = vmul.f32 %v1575_v24, %v1810_v51  ;;  %v183_v57 = vpop.xlane.xlu1 %182  ;;  %v294_v9 = vadd.f32 %v1945_v59, %v272_v43 }
 0x13a   :  { %v186_v58 = vpop.xlane.xlu0 %185  ;;  %v252_v60 = vmul.f32 %v1577_v25, %v1803_v44  ;;  %1586 = vrsqrt.f32 %v225_v50  ;;  %v211_v63 = vmul.f32 0.015625, %v183_v57 }
 0x13b   :  { %v212_v28 = vmul.f32 0.015625, %v186_v58  ;;  %1588 = vrsqrt.f32 %v226_v53  ;;  %v273_v29 = vmul.f32 %v1938_v47, %v251_v54 }
 0x13c   :  { %v1579_v0 = vpop.eup %1578  ;;  %v274_v51 = vmul.f32 %v1938_v47, %v252_v60  ;;  %v227_v1 = vadd.f32 1e-05, %v211_v63 }
 0x13d   :  { %v228_v2 = vadd.f32 1e-05, %v212_v28  ;;  %v1581_v3 = vpop.eup %1580  ;;  %v253_v4 = vmul.f32 %v1579_v0, %v1813_v52  ;;  %v189_v5 = vpop.xlane.xlu1 %188  ;;  %v295_v44 = vadd.f32 %v1945_v59, %v273_v29 }
 0x13e   :  { %v192_v6 = vpop.xlane.xlu0 %191  ;;  %v254_v10 = vmul.f32 %v1581_v3, %v1822_v61  ;;  %1590 = vrsqrt.f32 %v227_v1  ;;  %v213_v11 = vmul.f32 0.015625, %v189_v5  ;;  %v296_v12 = vadd.f32 %v1945_v59, %v274_v51 }
 0x13f   :  { %v275_v14 = vmul.f32 %v1938_v47, %v253_v4  ;;  %1592 = vrsqrt.f32 %v228_v2  ;;  %v214_v15 = vmul.f32 0.015625, %v192_v6  ;;  %v310_v18 = vpack.c.bf16 %v295_v44, %v294_v9 }
 0x140   :  { %v1583_v19 = vpop.eup %1582  ;;  %v229_v23 = vadd.f32 1e-05, %v213_v11  ;;  %v276_v32 = vmul.f32 %v1938_v47, %v254_v10 }
 0x141   :  { %v1585_v52 = vpop.eup %1584  ;;  %v297_v26 = vadd.f32 %v1945_v59, %v275_v14  ;;  %v255_v27 = vmul.f32 %v1583_v19, %v1825_v62  ;;  %v230_v30 = vadd.f32 1e-05, %v214_v15  ;;  %v195_v31 = vpop.xlane.xlu1 %194  ;;  %1468 = vmatprep.mubr.msk.bf16.mxu0 %vm56_vm0, %v310_v18 }
 0x142   :  { %v198_v61 = vpop.xlane.xlu0 %197  ;;  %v256_v33 = vmul.f32 %v1585_v52, %v1834_v7  ;;  %1594 = vrsqrt.f32 %v229_v23  ;;  %v215_v16 = vmul.f32 0.015625, %v195_v31  ;;  %v298_v45 = vadd.f32 %v1945_v59, %v276_v32 }
 0x143   :  { %v216_v35 = vmul.f32 0.015625, %v198_v61  ;;  %1596 = vrsqrt.f32 %v230_v30  ;;  %v311_v36 = vpack.c.bf16 %v297_v26, %v296_v12  ;;  %v277_v37 = vmul.f32 %v1938_v47, %v255_v27  ;;  %v1567_v27 = vld [vmem:[%s2170_s6 + $0x18] sm:$0xff]  }
 0x144   :  { %v1587_v38 = vpop.eup %1586  ;;  %v231_v39 = vadd.f32 1e-05, %v215_v16  ;;  %v278_v46 = vmul.f32 %v1938_v47, %v256_v33 }
 0x145   :  { %v232_v40 = vadd.f32 1e-05, %v216_v35  ;;  %v1589_v62 = vpop.eup %1588  ;;  %v257_v41 = vmul.f32 %v1587_v38, %v1837_v8  ;;  %v201_v20 = vpop.xlane.xlu1 %200  ;;  %1469 = vmatmul.mubr.msk.bf16.vlgmr.msra.gmra.mrb[0].mxu0 %vm56_vm0, %v311_v36  ;;  %v299_v7 = vadd.f32 %v1945_v59, %v277_v37 }
 0x146   :  { %v258_v48 = vmul.f32 %v1589_v62, %v1846_v22  ;;  %1598 = vrsqrt.f32 %v231_v39  ;;  %v217_v49 = vmul.f32 0.015625, %v201_v20  ;;  %v300_v57 = vadd.f32 %v1945_v59, %v278_v46  ;;  %v1569_v46 = vld [vmem:[%s2173_s8 + $0x8] sm:$0xff]  }
 0x147   :  { %1600 = vrsqrt.f32 %v232_v40  ;;  %v312_v24 = vpack.c.bf16 %v299_v7, %v298_v45  ;;  %v279_v50 = vmul.f32 %v1938_v47, %v257_v41 }
 0x148   :  { %v1591_v53 = vpop.eup %1590  ;;  %v233_v25 = vadd.f32 1e-05, %v217_v49  ;;  %v280_v43 = vmul.f32 %v1938_v47, %v258_v48 }
 0x149   :  { %v1593_v8 = vpop.eup %1592  ;;  %v259_v54 = vmul.f32 %v1591_v53, %v1849_v13  ;;  %1472 = vmatprep.mubr.msk.bf16.mxu0 %vm56_vm0, %v312_v24  ;;  %v301_v58 = vadd.f32 %v1945_v59, %v279_v50 }
 0x14a   :  { %v260_v22 = vmul.f32 %v1593_v8, %v1858_v34  ;;  %1602 = vrsqrt.f32 %v233_v25  ;;  %v302_v13 = vadd.f32 %v1945_v59, %v280_v43 }
 0x14b   :  { %v313_v60 = vpack.c.bf16 %v301_v58, %v300_v57  ;;  %v281_v63 = vmul.f32 %v1938_v47, %v259_v54  ;;  %v1570_v54 = vld [vmem:[%s2173_s8 + $0x10] sm:$0xff]  }
 0x14c   :  { %v1595_v28 = vpop.eup %1594  ;;  %v282_v1 = vmul.f32 %v1938_v47, %v260_v22 }
 0x14d   :  { %v1597_v29 = vpop.eup %1596  ;;  %v261_v0 = vmul.f32 %v1595_v28, %v1861_v17  ;;  %1473 = vmatmul.mubr.msk.bf16.gmra.mrb[4].mxu0 %vm56_vm0, %v313_v60  ;;  %v303_v51 = vadd.f32 %v1945_v59, %v281_v63 }
 0x14e   :  { %v262_v2 = vmul.f32 %v1597_v29, %v1870_v42  ;;  %v304_v17 = vadd.f32 %v1945_v59, %v282_v1 }
 0x14f   :  { %v314_v3 = vpack.c.bf16 %v303_v51, %v302_v13  ;;  %v283_v34 = vmul.f32 %v1938_v47, %v261_v0 }
 0x150   :  { %v1599_v4 = vpop.eup %1598  ;;  %v284_v44 = vmul.f32 %v1938_v47, %v262_v2 }
 0x151   :  { %v1601_v5 = vpop.eup %1600  ;;  %v263_v6 = vmul.f32 %v1599_v4, %v1873_v21  ;;  %1476 = vmatprep.mubr.msk.bf16.mxu0 %vm56_vm0, %v314_v3  ;;  %v305_v9 = vadd.f32 %v1945_v59, %v283_v34 }
 0x152   :  { %v264_v10 = vmul.f32 %v1601_v5, %v1890_v55  ;;  %v306_v21 = vadd.f32 %v1945_v59, %v284_v44 }
 0x153   :  { %v315_v11 = vpack.c.bf16 %v305_v9, %v304_v17  ;;  %v285_v42 = vmul.f32 %v1938_v47, %v263_v6 }
 0x154   :  { %v1603_v14 = vpop.eup %1602  ;;  %v286_v19 = vmul.f32 %v1938_v47, %v264_v10 }
 0x155   :  { %v265_v15 = vmul.f32 %v1603_v14, %v1893_v56  ;;  %1477 = vmatmul.mubr.msk.bf16.gmra.mrb[8].mxu0 %vm56_vm0, %v315_v11  ;;  %v307_v18 = vadd.f32 %v1945_v59, %v285_v42  ;;  %v1566_v56 = vld [vmem:[%s2170_s6 + $0x10] sm:$0xff]  }
 0x156   :  { %v308_v55 = vadd.f32 %v1945_v59, %v286_v19  ;;  %1488 = vmatprep.subr.bf16.mxu1 %v1566_v56 }
 0x157   :  { %v316_v12 = vpack.c.bf16 %v307_v18, %v306_v21  ;;  %v287_v23 = vmul.f32 %v1938_v47, %v265_v15  ;;  %1489 = vmatpush3.bf16.msra.mxu1 %v1566_v56  ;;  %v1568_v47 = vld [vmem:[%s2173_s8] sm:$0xff]  }
 0x158   :  { %1490 = vmatprep.subr.bf16.mxu1 %v1567_v27 }
 0x159   :  { %1480 = vmatprep.mubr.msk.bf16.mxu0 %vm56_vm0, %v316_v12  ;;  %v309_v52 = vadd.f32 %v1945_v59, %v287_v23  ;;  %v2012_v59 = vld [vmem:[%s2174_s5] ss:$0 sm:$0xff] }
 0x15b   :  { %v317_v26 = vpack.c.bf16 %v309_v52, %v308_v55  ;;  %1491 = vmatpush3.bf16.msra.mxu1 %v1567_v27  ;;  %v1571_v52 = vld [vmem:[%s2173_s8 + $0x18] sm:$0xff]  }
 0x15c   :  { %1508 = vmatprep.subr.bf16.mxu1 %v1568_v47 }
 0x15d   :  { %1481 = vmatmul.mubr.msk.bf16.gmra.mrb[12].mxu0 %vm56_vm0, %v317_v26  ;;  %v2050_v26 = vld [vmem:[%s2175_s7] ss:$0 sm:$0xff] }
 0x218   :  { %v1470_v30 = vpop.f32.mrb[0].mxu0 }
 0x219   :  { %v689_v31 = vadd.f32 %v1470_v30, %v2012_v59  ;;  %v617_v61 = vpop.f32.mrb[1].mxu0 }
 0x21a   :  { %v687_v32 = vadd.f32 %v2012_v59, %v617_v61  ;;  %v1471_v33 = vpop.f32.mrb[2].mxu0 }
 0x21b   :  { %v690_v16 = vadd.f32 %v1471_v33, %v2012_v59  ;;  %v620_v35 = vpop.f32.mrb[3].mxu0  ;;  %v705_v37 = vmax.f32 %v689_v31, 0.0 }
 0x21c   :  { %v688_v36 = vadd.f32 %v2012_v59, %v620_v35  ;;  %v703_v39 = vmax.f32 %v687_v32, 0.0 }
 0x21d   :  { %v706_v38 = vmax.f32 %v690_v16, 0.0 }
 0x21e   :  { %v704_v40 = vmax.f32 %v688_v36, 0.0 }
 0x21f   :  { %v720_v62 = vpack.c.bf16 %v706_v38, %v705_v37 }
 0x220   :  { %v1474_v41 = vpop.f32.mrb[4].mxu0  ;;  %v719_v20 = vpack.c.bf16 %v704_v40, %v703_v39 }
 0x221   :  { %v693_v45 = vadd.f32 %v1474_v41, %v2012_v59  ;;  %v633_v7 = vpop.f32.mrb[5].mxu0 }
 0x222   :  { %v691_v48 = vadd.f32 %v2012_v59, %v633_v7  ;;  %v1475_v49 = vpop.f32.mrb[6].mxu0  ;;  %1492 = vmatprep.mubr.msk.bf16.mxu1 %vm56_vm0, %v719_v20 }
 0x223   :  { %v694_v24 = vadd.f32 %v1475_v49, %v2012_v59  ;;  %v636_v50 = vpop.f32.mrb[7].mxu0  ;;  %1493 = vmatmul.mubr.msk.bf16.vlgmr.msra.gmra.mrb[0].mxu1 %vm56_vm0, %v720_v62  ;;  %v709_v25 = vmax.f32 %v693_v45, 0.0 }
 0x224   :  { %v692_v53 = vadd.f32 %v2012_v59, %v636_v50  ;;  %1509 = vmatpush3.bf16.msra.mxu1 %v1568_v47  ;;  %v707_v57 = vmax.f32 %v691_v48, 0.0 }
 0x225   :  { %v710_v8 = vmax.f32 %v694_v24, 0.0  ;;  %1510 = vmatprep.subr.bf16.mxu1 %v1569_v46 }
 0x226   :  { %v708_v58 = vmax.f32 %v692_v53, 0.0 }
 0x227   :  { %v722_v43 = vpack.c.bf16 %v710_v8, %v709_v25 }
 0x228   :  { %v721_v22 = vpack.c.bf16 %v708_v58, %v707_v57  ;;  %v1478_v60 = vpop.f32.mrb[8].mxu0  ;;  %1511 = vmatpush3.bf16.msra.mxu1 %v1569_v46 }
 0x229   :  { %v697_v63 = vadd.f32 %v1478_v60, %v2012_v59  ;;  %v649_v28 = vpop.f32.mrb[9].mxu0  ;;  %1512 = vmatprep.subr.bf16.mxu1 %v1570_v54 }
 0x22a   :  { %v695_v29 = vadd.f32 %v2012_v59, %v649_v28  ;;  %v1479_v0 = vpop.f32.mrb[10].mxu0  ;;  %1496 = vmatprep.mubr.msk.bf16.mxu1 %vm56_vm0, %v721_v22 }
 0x22b   :  { %v698_v13 = vadd.f32 %v1479_v0, %v2012_v59  ;;  %v652_v51 = vpop.f32.mrb[11].mxu0  ;;  %1497 = vmatmul.mubr.msk.bf16.gmra.mrb[4].mxu1 %vm56_vm0, %v722_v43  ;;  %v713_v2 = vmax.f32 %v697_v63, 0.0 }
 0x22c   :  { %v696_v1 = vadd.f32 %v2012_v59, %v652_v51  ;;  %1513 = vmatpush3.bf16.msra.mxu1 %v1570_v54  ;;  %v711_v34 = vmax.f32 %v695_v29, 0.0 }
 0x22d   :  { %v714_v3 = vmax.f32 %v698_v13, 0.0  ;;  %1514 = vmatprep.subr.bf16.mxu1 %v1571_v52 }
 0x22e   :  { %v712_v4 = vmax.f32 %v696_v1, 0.0 }
 0x22f   :  { %v724_v5 = vpack.c.bf16 %v714_v3, %v713_v2 }
 0x230   :  { %v723_v6 = vpack.c.bf16 %v712_v4, %v711_v34  ;;  %v1482_v17 = vpop.f32.mrb[12].mxu0  ;;  %1515 = vmatpush3.bf16.msra.mxu1 %v1571_v52 }
 0x231   :  { %v701_v9 = vadd.f32 %v1482_v17, %v2012_v59  ;;  %v665_v44 = vpop.f32.mrb[13].mxu0 }
 0x232   :  { %v699_v10 = vadd.f32 %v2012_v59, %v665_v44  ;;  %v1483_v11 = vpop.f32.mrb[14].mxu0  ;;  %1500 = vmatprep.mubr.msk.bf16.mxu1 %vm56_vm0, %v723_v6 }
 0x233   :  { %v702_v42 = vadd.f32 %v1483_v11, %v2012_v59  ;;  %v668_v14 = vpop.f32.mrb[15].mxu0  ;;  %1501 = vmatmul.mubr.msk.bf16.gmra.mrb[8].mxu1 %vm56_vm0, %v724_v5  ;;  %v717_v21 = vmax.f32 %v701_v9, 0.0 }
 0x234   :  { %v700_v15 = vadd.f32 %v2012_v59, %v668_v14  ;;  %v715_v19 = vmax.f32 %v699_v10, 0.0 }
 0x235   :  { %v718_v18 = vmax.f32 %v702_v42, 0.0 }
 0x236   :  { %v716_v12 = vmax.f32 %v700_v15, 0.0 }
 0x237   :  { %v726_v23 = vpack.c.bf16 %v718_v18, %v717_v21  ;;  %v1280_v18 = vld [vmem:[%s2177_s9] ss:$0 sm:$0xff] }
 0x238   :  { %v725_v55 = vpack.c.bf16 %v716_v12, %v715_v19 }
 0x23a   :  { %1504 = vmatprep.mubr.msk.bf16.mxu1 %vm56_vm0, %v725_v55 }
 0x23b   :  { %1505 = vmatmul.mubr.msk.bf16.gmra.mrb[12].mxu1 %vm56_vm0, %v726_v23 }
 0x2f6   :  { %v1494_v56 = vpop.f32.mrb[0].mxu1 }
 0x2f7   :  { %v833_v27 = vadd.f32 %v1494_v56, %v2050_v26  ;;  %v824_v47 = vpop.f32.mrb[1].mxu1 }
 0x2f8   :  { %v825_v59 = vadd.f32 %v2050_v26, %v824_v47  ;;  %v1495_v30 = vpop.f32.mrb[2].mxu1 }
 0x2f9   :  { %v1311_v31 = vpack.c.bf16 %v833_v27, %v833_v27  ;;  %v836_v61 = vadd.f32 %v1495_v30, %v2050_v26  ;;  %v827_v32 = vpop.f32.mrb[3].mxu1 }
 0x2fa   :  { %v1309_v33 = vpack.c.bf16 %v825_v59, %v825_v59  ;;  %v828_v16 = vadd.f32 %v2050_v26, %v827_v32 }
 0x2fb   :  { %954 = vst.msk [vmem:[%s2176_s10 + $0x8] sm:$0xf] %vm951_vm1, %v1311_v31  ;;  %v888_v35 = vpack.c.bf16 %v836_v61, %v833_v27  ;;  %v1312_v36 = vpack.c.bf16 %v836_v61, %v836_v61 }
 0x2fc   :  { %952 = vst.msk [vmem:[%s2176_s10] sm:$0xf] %vm951_vm1, %v1309_v33  ;;  %v887_v37 = vpack.c.bf16 %v828_v16, %v825_v59  ;;  %v1310_v38 = vpack.c.bf16 %v828_v16, %v828_v16 }
 0x2fd   :  { %955 = vst.msk [vmem:[%s2176_s10 + $0xc] sm:$0xf] %vm951_vm1, %v1312_v36 }
 0x2fe   :  { %953 = vst.msk [vmem:[%s2176_s10 + $0x4] sm:$0xf] %vm951_vm1, %v1310_v38  ;;  %v1498_v39 = vpop.f32.mrb[4].mxu1  ;;  %1516 = vmatprep.mubr.msk.bf16.mxu1 %vm56_vm0, %v887_v37 }
 0x2ff   :  { %v849_v40 = vadd.f32 %v1498_v39, %v2050_v26  ;;  %v840_v62 = vpop.f32.mrb[5].mxu1  ;;  %1517 = vmatmul.mubr.msk.bf16.vlgmr.msra.gmra.mrb[16].mxu1 %vm56_vm0, %v888_v35 }
 0x300   :  { %v841_v41 = vadd.f32 %v2050_v26, %v840_v62  ;;  %v1499_v20 = vpop.f32.mrb[6].mxu1 }
 0x301   :  { %v1315_v45 = vpack.c.bf16 %v849_v40, %v849_v40  ;;  %v852_v7 = vadd.f32 %v1499_v20, %v2050_v26  ;;  %v843_v46 = vpop.f32.mrb[7].mxu1 }
 0x302   :  { %v1313_v48 = vpack.c.bf16 %v841_v41, %v841_v41  ;;  %v844_v49 = vadd.f32 %v2050_v26, %v843_v46 }
 0x303   :  { %958 = vst.msk [vmem:[%s2176_s10 + $0x18] sm:$0xf] %vm951_vm1, %v1315_v45  ;;  %v890_v24 = vpack.c.bf16 %v852_v7, %v849_v40  ;;  %v1316_v50 = vpack.c.bf16 %v852_v7, %v852_v7 }
 0x304   :  { %956 = vst.msk [vmem:[%s2176_s10 + $0x10] sm:$0xf] %vm951_vm1, %v1313_v48  ;;  %v889_v53 = vpack.c.bf16 %v844_v49, %v841_v41  ;;  %v1314_v25 = vpack.c.bf16 %v844_v49, %v844_v49 }
 0x305   :  { %959 = vst.msk [vmem:[%s2176_s10 + $0x1c] sm:$0xf] %vm951_vm1, %v1316_v50 }
 0x306   :  { %957 = vst.msk [vmem:[%s2176_s10 + $0x14] sm:$0xf] %vm951_vm1, %v1314_v25  ;;  %v1502_v8 = vpop.f32.mrb[8].mxu1  ;;  %1520 = vmatprep.mubr.msk.bf16.mxu1 %vm56_vm0, %v889_v53 }
 0x307   :  { %v865_v54 = vadd.f32 %v1502_v8, %v2050_v26  ;;  %v856_v57 = vpop.f32.mrb[9].mxu1  ;;  %1521 = vmatmul.mubr.msk.bf16.gmra.mrb[20].mxu1 %vm56_vm0, %v890_v24 }
 0x308   :  { %v857_v58 = vadd.f32 %v2050_v26, %v856_v57  ;;  %v1503_v43 = vpop.f32.mrb[10].mxu1 }
 0x309   :  { %v1319_v22 = vpack.c.bf16 %v865_v54, %v865_v54  ;;  %v868_v60 = vadd.f32 %v1503_v43, %v2050_v26  ;;  %v859_v63 = vpop.f32.mrb[11].mxu1 }
 0x30a   :  { %v1317_v28 = vpack.c.bf16 %v857_v58, %v857_v58  ;;  %v860_v29 = vadd.f32 %v2050_v26, %v859_v63 }
 0x30b   :  { %962 = vst.msk [vmem:[%s2176_s10 + $0x28] sm:$0xf] %vm951_vm1, %v1319_v22  ;;  %v892_v0 = vpack.c.bf16 %v868_v60, %v865_v54  ;;  %v1320_v13 = vpack.c.bf16 %v868_v60, %v868_v60 }
 0x30c   :  { %960 = vst.msk [vmem:[%s2176_s10 + $0x20] sm:$0xf] %vm951_vm1, %v1317_v28  ;;  %v891_v51 = vpack.c.bf16 %v860_v29, %v857_v58  ;;  %v1318_v1 = vpack.c.bf16 %v860_v29, %v860_v29 }
 0x30d   :  { %963 = vst.msk [vmem:[%s2176_s10 + $0x2c] sm:$0xf] %vm951_vm1, %v1320_v13 }
 0x30e   :  { %961 = vst.msk [vmem:[%s2176_s10 + $0x24] sm:$0xf] %vm951_vm1, %v1318_v1  ;;  %v1506_v2 = vpop.f32.mrb[12].mxu1  ;;  %1524 = vmatprep.mubr.msk.bf16.mxu1 %vm56_vm0, %v891_v51 }
 0x30f   :  { %v881_v3 = vadd.f32 %v1506_v2, %v2050_v26  ;;  %v872_v34 = vpop.f32.mrb[13].mxu1  ;;  %1525 = vmatmul.mubr.msk.bf16.gmra.mrb[24].mxu1 %vm56_vm0, %v892_v0 }
 0x310   :  { %v873_v4 = vadd.f32 %v2050_v26, %v872_v34  ;;  %v1507_v5 = vpop.f32.mrb[14].mxu1 }
 0x311   :  { %v1323_v6 = vpack.c.bf16 %v881_v3, %v881_v3  ;;  %v884_v17 = vadd.f32 %v1507_v5, %v2050_v26  ;;  %v875_v9 = vpop.f32.mrb[15].mxu1 }
 0x312   :  { %v1321_v44 = vpack.c.bf16 %v873_v4, %v873_v4  ;;  %v876_v10 = vadd.f32 %v2050_v26, %v875_v9 }
 0x313   :  { %966 = vst.msk [vmem:[%s2176_s10 + $0x38] sm:$0xf] %vm951_vm1, %v1323_v6  ;;  %v894_v11 = vpack.c.bf16 %v884_v17, %v881_v3  ;;  %v1324_v42 = vpack.c.bf16 %v884_v17, %v884_v17 }
 0x314   :  { %964 = vst.msk [vmem:[%s2176_s10 + $0x30] sm:$0xf] %vm951_vm1, %v1321_v44  ;;  %v893_v14 = vpack.c.bf16 %v876_v10, %v873_v4  ;;  %v1322_v15 = vpack.c.bf16 %v876_v10, %v876_v10 }
 0x315   :  { %967 = vst.msk [vmem:[%s2176_s10 + $0x3c] sm:$0xf] %vm951_vm1, %v1324_v42 }
 0x316   :  { %965 = vst.msk [vmem:[%s2176_s10 + $0x34] sm:$0xf] %vm951_vm1, %v1322_v15  ;;  %1528 = vmatprep.mubr.msk.bf16.mxu1 %vm56_vm0, %v893_v14 }
 0x317   :  { %1529 = vmatmul.mubr.msk.bf16.gmra.mrb[28].mxu1 %vm56_vm0, %v894_v11 }
 0x3d2   :  { %v1518_v21 = vpop.f32.mrb[16].mxu1 }
 0x3d3   :  { %v1065_v19 = vpop.f32.mrb[17].mxu1  ;;  %v1074_v23 = vadd.f32 %v1518_v21, %v1280_v18 }
 0x3d4   :  { %v1519_v12 = vpop.f32.mrb[18].mxu1  ;;  %v1066_v26 = vadd.f32 %v1280_v18, %v1065_v19 }
 0x3d5   :  { %v1077_v55 = vadd.f32 %v1519_v12, %v1280_v18  ;;  %v1068_v52 = vpop.f32.mrb[19].mxu1 }
 0x3d6   :  { %v1069_v56 = vadd.f32 %v1280_v18, %v1068_v52 }
 0x3d7   :  { %v1349_v27 = vpack.c.bf16 %v1077_v55, %v1074_v23 }
 0x3d8   :  { %v1344_v47 = vpack.c.bf16 %v1069_v56, %v1066_v26 }
 0x3d9   :  { %1381 = vst [vmem:[%s2178_s11 + $0x8] sm:$0xff] %v1349_v27  }
 0x3da   :  { %1345 = vst [vmem:[%s2178_s11] sm:$0xff] %v1344_v47   ;;  %v1522_v59 = vpop.f32.mrb[20].mxu1 }
 0x3db   :  { %v1081_v30 = vpop.f32.mrb[21].mxu1  ;;  %v1090_v61 = vadd.f32 %v1522_v59, %v1280_v18 }
 0x3dc   :  { %v1523_v31 = vpop.f32.mrb[22].mxu1  ;;  %v1082_v16 = vadd.f32 %v1280_v18, %v1081_v30 }
 0x3dd   :  { %v1093_v32 = vadd.f32 %v1523_v31, %v1280_v18  ;;  %v1084_v33 = vpop.f32.mrb[23].mxu1 }
 0x3de   :  { %v1085_v35 = vadd.f32 %v1280_v18, %v1084_v33 }
 0x3df   :  { %v1359_v36 = vpack.c.bf16 %v1093_v32, %v1090_v61 }
 0x3e0   :  { %v1354_v37 = vpack.c.bf16 %v1085_v35, %v1082_v16 }
 0x3e1   :  { %1383 = vst [vmem:[%s2178_s11 + $0x18] sm:$0xff] %v1359_v36  }
 0x3e2   :  { %1382 = vst [vmem:[%s2178_s11 + $0x10] sm:$0xff] %v1354_v37   ;;  %v1526_v38 = vpop.f32.mrb[24].mxu1 }
 0x3e3   :  { %v1097_v39 = vpop.f32.mrb[25].mxu1  ;;  %v1106_v62 = vadd.f32 %v1526_v38, %v1280_v18 }
 0x3e4   :  { %v1527_v40 = vpop.f32.mrb[26].mxu1  ;;  %v1098_v45 = vadd.f32 %v1280_v18, %v1097_v39 }
 0x3e5   :  { %v1109_v41 = vadd.f32 %v1527_v40, %v1280_v18  ;;  %v1100_v20 = vpop.f32.mrb[27].mxu1 }
 0x3e6   :  { %v1101_v7 = vadd.f32 %v1280_v18, %v1100_v20 }
 0x3e7   :  { %v1369_v46 = vpack.c.bf16 %v1109_v41, %v1106_v62 }
 0x3e8   :  { %v1364_v48 = vpack.c.bf16 %v1101_v7, %v1098_v45 }
 0x3e9   :  { %1385 = vst [vmem:[%s2178_s11 + $0x28] sm:$0xff] %v1369_v46  }
 0x3ea   :  { %1384 = vst [vmem:[%s2178_s11 + $0x20] sm:$0xff] %v1364_v48   ;;  %v1530_v49 = vpop.f32.mrb[28].mxu1 }
 0x3eb   :  { %v1113_v24 = vpop.f32.mrb[29].mxu1  ;;  %v1122_v53 = vadd.f32 %v1530_v49, %v1280_v18 }
 0x3ec   :  { %v1531_v50 = vpop.f32.mrb[30].mxu1  ;;  %v1114_v54 = vadd.f32 %v1280_v18, %v1113_v24 }
 0x3ed   :  { %v1125_v25 = vadd.f32 %v1531_v50, %v1280_v18  ;;  %v1116_v8 = vpop.f32.mrb[31].mxu1 }
 0x3ee   :  { %v1117_v57 = vadd.f32 %v1280_v18, %v1116_v8 }
 0x3ef   :  { %v1379_v58 = vpack.c.bf16 %v1125_v25, %v1122_v53 }
 0x3f0   :  { %v1374_v43 = vpack.c.bf16 %v1117_v57, %v1114_v54 }
 0x3f1   :  { %1387 = vst [vmem:[%s2178_s11 + $0x38] sm:$0xff] %v1379_v58  }
 0x3f2   :  { %1386 = vst [vmem:[%s2178_s11 + $0x30] sm:$0xff] %v1374_v43  }

// kernel: gnn_policy_forward.17
= control target key start
LH: loop header
LB: loop body
LE: loop exit
PB: predicated region body
PF: predicated region fallthrough
CT: control target
= control target key end

     0   :  { %vm57_vm0 = vcmask 523264   ;;  %s2167_s0 = inlined_call_operand.vmem [shape: f32[128,64], index: 0, kind: input, shape index: {}]   ;;  %s2168_s1 = inlined_call_operand.vmem [shape: bf16[128,64], index: 1, kind: input, shape index: {}]   ;;  %s2169_s2 = inlined_call_operand.vmem [shape: f32[1,64], index: 2, kind: input, shape index: {}]   ;;  %s2170_s3 = inlined_call_operand.vmem [shape: f32[1,64], index: 3, kind: input, shape index: {}]   ;;  %s2171_s4 = inlined_call_operand.vmem [shape: bf16[128,64], index: 4, kind: input, shape index: {}]   ;;  %s2172_s5 = inlined_call_operand.vmem [shape: f32[1,64], index: 5, kind: input, shape index: {}]   ;;  %s2173_s6 = inlined_call_operand.vmem [shape: bf16[64,64], index: 6, kind: input, shape index: {}]   ;;  %s2174_s7 = inlined_call_operand.vmem [shape: f32[1,64], index: 7, kind: input, shape index: {}]   ;;  %s2175_s8 = inlined_call_operand.vmem [shape: bf16[64,64], index: 8, kind: input, shape index: {}]   ;;  %s2176_s9 = inlined_call_operand.vmem [shape: f32[1,64], index: 9, kind: input, shape index: {}]   ;;  %s2177_s10 = inlined_call_operand.hbm [shape: bf16[128,64], index: 10, kind: output, shape index: {0}]   ;;  %s2178_s11 = inlined_call_operand.vmem [shape: bf16[128,64], index: 11, kind: output, shape index: {1}]  }
   0x1   :  { %v1663_v0 = vld [vmem:[%s2167_s0] sm:$0xff]  ;;  %v1668_v1 = vld [vmem:[%s2167_s0 + $0x10] sm:$0xff]  ;;  %v1673_v2 = vld [vmem:[%s2167_s0 + $0x8] sm:$0xff] }
   0x2   :  { %v58_v3 = vsel %vm57_vm0, %v1663_v0, 0.0  ;;  %v64_v4 = vsel %vm57_vm0, %v1668_v1, 0.0  ;;  %v1682_v5 = vld [vmem:[%s2167_s0 + $0x18] sm:$0xff]  ;;  %v1687_v6 = vld [vmem:[%s2167_s0 + $0x20] sm:$0xff]  ;;  %v1692_v7 = vld [vmem:[%s2167_s0 + $0x28] sm:$0xff]  ;;  %v61_v11 = vsel %vm57_vm0, %v1673_v2, 0.0 }
   0x3   :  { %59 = vadd.xlane.f32.xlu0 %v58_v3  ;;  %65 = vadd.xlane.f32.xlu1 %v64_v4  ;;  %v1697_v8 = vld [vmem:[%s2167_s0 + $0x30] sm:$0xff]  ;;  %v1702_v9 = vld [vmem:[%s2167_s0 + $0x38] sm:$0xff]  ;;  %v1707_v10 = vld [vmem:[%s2167_s0 + $0x40] sm:$0xff]  ;;  %v67_v12 = vsel %vm57_vm0, %v1682_v5, 0.0  ;;  %v70_v16 = vsel %vm57_vm0, %v1687_v6, 0.0  ;;  %v73_v17 = vsel %vm57_vm0, %v1692_v7, 0.0 }
   0x4   :  { %v1716_v13 = vld [vmem:[%s2167_s0 + $0x48] sm:$0xff]  ;;  %v1721_v14 = vld [vmem:[%s2167_s0 + $0x50] sm:$0xff]  ;;  %v1726_v15 = vld [vmem:[%s2167_s0 + $0x58] sm:$0xff]  ;;  %v76_v18 = vsel %vm57_vm0, %v1697_v8, 0.0  ;;  %v79_v19 = vsel %vm57_vm0, %v1702_v9, 0.0  ;;  %v82_v20 = vsel %vm57_vm0, %v1707_v10, 0.0 }
   0x5   :  { %v85_v21 = vsel %vm57_vm0, %v1716_v13, 0.0  ;;  %v88_v22 = vsel %vm57_vm0, %v1721_v14, 0.0  ;;  %v91_v23 = vsel %vm57_vm0, %v1726_v15, 0.0  ;;  %v1747_v24 = vld [vmem:[%s2167_s0 + $0x60] sm:$0xff]  ;;  %v1752_v25 = vld [vmem:[%s2167_s0 + $0x68] sm:$0xff] }
   0x7   :  { %62 = vadd.xlane.f32.xlu0 %v61_v11  ;;  %68 = vadd.xlane.f32.xlu1 %v67_v12 }
   0xb   :  { %71 = vadd.xlane.f32.xlu0 %v70_v16  ;;  %74 = vadd.xlane.f32.xlu1 %v73_v17 }
   0xf   :  { %77 = vadd.xlane.f32.xlu0 %v76_v18  ;;  %80 = vadd.xlane.f32.xlu1 %v79_v19 }
  0x13   :  { %83 = vadd.xlane.f32.xlu0 %v82_v20  ;;  %86 = vadd.xlane.f32.xlu1 %v85_v21 }
  0x17   :  { %89 = vadd.xlane.f32.xlu0 %v88_v22  ;;  %92 = vadd.xlane.f32.xlu1 %v91_v23 }
  0x18   :  { %17 = vsyncpa [#allocation3], 0  ;;  %v94_v26 = vsel %vm57_vm0, %v1747_v24, 0.0  ;;  %v97_v27 = vsel %vm57_vm0, %v1752_v25, 0.0  ;;  %v1761_v28 = vld [vmem:[%s2167_s0 + $0x70] sm:$0xff]  ;;  %v1766_v29 = vld [vmem:[%s2167_s0 + $0x78] sm:$0xff] }
  0x19   :  { %v100_v30 = vsel %vm57_vm0, %v1761_v28, 0.0  ;;  %v103_v31 = vsel %vm57_vm0, %v1766_v29, 0.0  ;;  %v1517_v32 = vld [vmem:[%s2171_s4 + $0x20] sm:$0xff]   ;;  %v1518_v33 = vld [vmem:[%s2171_s4 + $0x28] sm:$0xff]   ;;  %v1519_v35 = vld [vmem:[%s2171_s4 + $0x30] sm:$0xff]   ;;  %vm952_vm1 = vcmask 519168  }
  0x1a   :  { %v1521_v34 = vld [vmem:[%s2168_s1] sm:$0xff]   ;;  %1402 = vmatprep.subr.bf16.mxu0 %v1517_v32  ;;  %v1520_v36 = vld [vmem:[%s2171_s4 + $0x38] sm:$0xff]   ;;  %v1523_v38 = vld [vmem:[%s2168_s1 + $0x8] sm:$0xff]  }
  0x1b   :  { %95 = vadd.xlane.f32.xlu0 %v94_v26  ;;  %98 = vadd.xlane.f32.xlu1 %v97_v27  ;;  %v1522_v37 = vld [vmem:[%s2171_s4] sm:$0xff]  }
  0x1c   :  { %1403 = vmatpush3.bf16.msra.mxu0 %v1517_v32  ;;  %1410 = vmatprep.mubr.msk.bf16.mxu0 %vm57_vm0, %v1521_v34 }
  0x1d   :  { %1404 = vmatprep.subr.bf16.mxu0 %v1518_v33 }
  0x1f   :  { %101 = vadd.xlane.f32.xlu0 %v100_v30  ;;  %104 = vadd.xlane.f32.xlu1 %v103_v31 }
  0x20   :  { %1405 = vmatpush3.bf16.msra.mxu0 %v1518_v33 }
  0x21   :  { %1406 = vmatprep.subr.bf16.mxu0 %v1519_v35 }
  0x24   :  { %1407 = vmatpush3.bf16.msra.mxu0 %v1519_v35 }
  0x25   :  { %1408 = vmatprep.subr.bf16.mxu0 %v1520_v36 }
  0x28   :  { %1409 = vmatpush3.bf16.msra.mxu0 %v1520_v36 }
  0x29   :  { %1426 = vmatprep.subr.bf16.mxu0 %v1522_v37 }
  0x2b   :  { %1411 = vmatmul.mubr.msk.bf16.vlgmr.msra.gmra.mrb[0].mxu0 %vm57_vm0, %v1523_v38 }
  0x2c   :  { %1427 = vmatpush3.bf16.msra.mxu0 %v1522_v37 }
  0x90   :  { %v60_v39 = vpop.xlane.xlu0 %59  ;;  %v66_v40 = vpop.xlane.xlu1 %65 }
  0x91   :  { %v107_v41 = vmul.f32 0.015625, %v60_v39  ;;  %v109_v42 = vmul.f32 0.015625, %v66_v40 }
  0x93   :  { %v1796_v43 = vsub.f32 %v1663_v0, %v107_v41  ;;  %v1799_v44 = vsub.f32 %v1668_v1, %v109_v42 }
  0x94   :  { %v63_v45 = vpop.xlane.xlu0 %62  ;;  %v69_v46 = vpop.xlane.xlu1 %68 }
  0x95   :  { %v108_v47 = vmul.f32 0.015625, %v63_v45  ;;  %v110_v48 = vmul.f32 0.015625, %v69_v46  ;;  %v139_v49 = vmul.f32 %v1796_v43, %v1796_v43  ;;  %v141_v50 = vmul.f32 %v1799_v44, %v1799_v44  ;;  %v1524_v46 = vld [vmem:[%s2168_s1 + $0x10] sm:$0xff]  }
  0x96   :  { %1414 = vmatprep.mubr.msk.bf16.mxu0 %vm57_vm0, %v1524_v46 }
  0x97   :  { %v1806_v51 = vsub.f32 %v1673_v2, %v108_v47  ;;  %v1809_v52 = vsub.f32 %v1682_v5, %v110_v48  ;;  %v155_v53 = vsel %vm57_vm0, %v139_v49, 0.0  ;;  %v161_v56 = vsel %vm57_vm0, %v141_v50, 0.0 }
  0x98   :  { %156 = vadd.xlane.f32.xlu0 %v155_v53  ;;  %v72_v54 = vpop.xlane.xlu0 %71  ;;  %v75_v55 = vpop.xlane.xlu1 %74 }
  0x99   :  { %v111_v57 = vmul.f32 0.015625, %v72_v54  ;;  %v112_v58 = vmul.f32 0.015625, %v75_v55  ;;  %v140_v59 = vmul.f32 %v1806_v51, %v1806_v51  ;;  %v142_v60 = vmul.f32 %v1809_v52, %v1809_v52 }
  0x9b   :  { %v1818_v61 = vsub.f32 %v1687_v6, %v111_v57  ;;  %v1821_v62 = vsub.f32 %v1692_v7, %v112_v58  ;;  %v158_v63 = vsel %vm57_vm0, %v140_v59, 0.0  ;;  %v164_v2 = vsel %vm57_vm0, %v142_v60, 0.0 }
  0x9c   :  { %162 = vadd.xlane.f32.xlu0 %v161_v56  ;;  %159 = vadd.xlane.f32.xlu1 %v158_v63  ;;  %v78_v0 = vpop.xlane.xlu0 %77  ;;  %v81_v1 = vpop.xlane.xlu1 %80 }
  0x9d   :  { %v113_v3 = vmul.f32 0.015625, %v78_v0  ;;  %v114_v4 = vmul.f32 0.015625, %v81_v1  ;;  %v143_v5 = vmul.f32 %v1818_v61, %v1818_v61  ;;  %v144_v6 = vmul.f32 %v1821_v62, %v1821_v62  ;;  %v1525_v1 = vld [vmem:[%s2171_s4 + $0x8] sm:$0xff]  }
  0x9e   :  { %1428 = vmatprep.subr.bf16.mxu0 %v1525_v1 }
  0x9f   :  { %v1830_v11 = vsub.f32 %v1697_v8, %v113_v3  ;;  %v1833_v7 = vsub.f32 %v1702_v9, %v114_v4  ;;  %v167_v12 = vsel %vm57_vm0, %v143_v5, 0.0  ;;  %v170_v18 = vsel %vm57_vm0, %v144_v6, 0.0  ;;  %1429 = vmatpush3.bf16.msra.mxu0 %v1525_v1  ;;  %v1528_v3 = vld [vmem:[%s2171_s4 + $0x10] sm:$0xff]   ;;  %v1532_v4 = vld [vmem:[%s2168_s1 + $0x38] sm:$0xff]   ;;  %v1533_v6 = vld [vmem:[%s2173_s6] sm:$0xff]  }
  0xa0   :  { %165 = vadd.xlane.f32.xlu1 %v164_v2  ;;  %168 = vadd.xlane.f32.xlu0 %v167_v12  ;;  %v84_v16 = vpop.xlane.xlu0 %83  ;;  %v87_v17 = vpop.xlane.xlu1 %86  ;;  %v1530_v2 = vld [vmem:[%s2168_s1 + $0x30] sm:$0xff]   ;;  %v1531_v5 = vld [vmem:[%s2171_s4 + $0x18] sm:$0xff]   ;;  %v1534_v12 = vld [vmem:[%s2173_s6 + $0x8] sm:$0xff]  }
  0xa1   :  { %v115_v19 = vmul.f32 0.015625, %v84_v16  ;;  %v116_v20 = vmul.f32 0.015625, %v87_v17  ;;  %v145_v21 = vmul.f32 %v1830_v11, %v1830_v11  ;;  %v146_v8 = vmul.f32 %v1833_v7, %v1833_v7  ;;  %1430 = vmatprep.subr.bf16.mxu0 %v1528_v3  ;;  %1450 = vmatprep.subr.bf16.mxu1 %v1533_v6 }
  0xa2   :  { %1451 = vmatpush3.bf16.msra.mxu1 %v1533_v6 }
  0xa3   :  { %v1842_v22 = vsub.f32 %v1707_v10, %v115_v19  ;;  %v1845_v9 = vsub.f32 %v1716_v13, %v116_v20  ;;  %v173_v23 = vsel %vm57_vm0, %v145_v21, 0.0  ;;  %v176_v30 = vsel %vm57_vm0, %v146_v8, 0.0  ;;  %1431 = vmatpush3.bf16.msra.mxu0 %v1528_v3  ;;  %1452 = vmatprep.subr.bf16.mxu1 %v1534_v12 }
  0xa4   :  { %171 = vadd.xlane.f32.xlu1 %v170_v18  ;;  %174 = vadd.xlane.f32.xlu0 %v173_v23  ;;  %v90_v26 = vpop.xlane.xlu0 %89  ;;  %v93_v27 = vpop.xlane.xlu1 %92 }
  0xa5   :  { %v117_v31 = vmul.f32 0.015625, %v90_v26  ;;  %v118_v32 = vmul.f32 0.015625, %v93_v27  ;;  %v147_v33 = vmul.f32 %v1842_v22, %v1842_v22  ;;  %v148_v10 = vmul.f32 %v1845_v9, %v1845_v9  ;;  %1432 = vmatprep.subr.bf16.mxu0 %v1531_v5 }
  0xa6   :  { %1453 = vmatpush3.bf16.msra.mxu1 %v1534_v12 }
  0xa7   :  { %v1854_v34 = vsub.f32 %v1721_v14, %v117_v31  ;;  %v1857_v13 = vsub.f32 %v1726_v15, %v118_v32  ;;  %v179_v35 = vsel %vm57_vm0, %v147_v33, 0.0  ;;  %v182_v38 = vsel %vm57_vm0, %v148_v10, 0.0  ;;  %1433 = vmatpush3.bf16.msra.mxu0 %v1531_v5 }
  0xa8   :  { %177 = vadd.xlane.f32.xlu1 %v176_v30  ;;  %180 = vadd.xlane.f32.xlu0 %v179_v35  ;;  %v96_v36 = vpop.xlane.xlu0 %95  ;;  %v99_v37 = vpop.xlane.xlu1 %98 }
  0xa9   :  { %v119_v39 = vmul.f32 0.015625, %v96_v36  ;;  %v120_v40 = vmul.f32 0.015625, %v99_v37  ;;  %v149_v41 = vmul.f32 %v1854_v34, %v1854_v34  ;;  %v150_v14 = vmul.f32 %v1857_v13, %v1857_v13 }
  0xab   :  { %v1866_v42 = vsub.f32 %v1747_v24, %v119_v39  ;;  %v1869_v15 = vsub.f32 %v1752_v25, %v120_v40  ;;  %v185_v45 = vsel %vm57_vm0, %v149_v41, 0.0  ;;  %v188_v49 = vsel %vm57_vm0, %v150_v14, 0.0  ;;  %v1526_v24 = vld [vmem:[%s2168_s1 + $0x18] sm:$0xff]  }
  0xac   :  { %183 = vadd.xlane.f32.xlu1 %v182_v38  ;;  %186 = vadd.xlane.f32.xlu0 %v185_v45  ;;  %v102_v47 = vpop.xlane.xlu0 %101  ;;  %v105_v48 = vpop.xlane.xlu1 %104 }
  0xad   :  { %v121_v50 = vmul.f32 0.015625, %v102_v47  ;;  %v122_v53 = vmul.f32 0.015625, %v105_v48  ;;  %v151_v25 = vmul.f32 %v1866_v42, %v1866_v42  ;;  %v152_v54 = vmul.f32 %v1869_v15, %v1869_v15  ;;  %1415 = vmatmul.mubr.msk.bf16.gmra.mrb[4].mxu0 %vm57_vm0, %v1526_v24  ;;  %v1934_v47 = vld [vmem:[%s2169_s2] ss:$0 sm:$0xff] }
  0xaf   :  { %v1886_v55 = vsub.f32 %v1761_v28, %v121_v50  ;;  %v1889_v56 = vsub.f32 %v1766_v29, %v122_v53  ;;  %v191_v57 = vsel %vm57_vm0, %v151_v25, 0.0  ;;  %v194_v58 = vsel %vm57_vm0, %v152_v54, 0.0  ;;  %v1527_v28 = vld [vmem:[%s2168_s1 + $0x20] sm:$0xff]   ;;  %v1529_v29 = vld [vmem:[%s2168_s1 + $0x28] sm:$0xff]  }
  0xb0   :  { %189 = vadd.xlane.f32.xlu1 %v188_v49  ;;  %192 = vadd.xlane.f32.xlu0 %v191_v57 }
  0xb1   :  { %v153_v59 = vmul.f32 %v1886_v55, %v1886_v55  ;;  %v154_v60 = vmul.f32 %v1889_v56, %v1889_v56  ;;  %1418 = vmatprep.mubr.msk.bf16.mxu0 %vm57_vm0, %v1527_v28 }
  0xb3   :  { %v197_v63 = vsel %vm57_vm0, %v153_v59, 0.0  ;;  %v200_v0 = vsel %vm57_vm0, %v154_v60, 0.0  ;;  %v1941_v59 = vld [vmem:[%s2170_s3] ss:$0 sm:$0xff] }
  0xb4   :  { %195 = vadd.xlane.f32.xlu1 %v194_v58  ;;  %198 = vadd.xlane.f32.xlu0 %v197_v63 }
  0xb5   :  { %1419 = vmatmul.mubr.msk.bf16.gmra.mrb[8].mxu0 %vm57_vm0, %v1529_v29 }
  0xb6   :  { %1422 = vmatprep.mubr.msk.bf16.mxu0 %vm57_vm0, %v1530_v2 }
  0xb8   :  { %201 = vadd.xlane.f32.xlu1 %v200_v0 }
  0xbd   :  { %1423 = vmatmul.mubr.msk.bf16.gmra.mrb[12].mxu0 %vm57_vm0, %v1532_v4 }
 0x125   :  { %v157_v16 = vpop.xlane.xlu0 %156 }
 0x126   :  { %v203_v17 = vmul.f32 0.015625, %v157_v16 }
 0x128   :  { %v219_v18 = vadd.f32 1e-05, %v203_v17 }
 0x129   :  { %v160_v19 = vpop.xlane.xlu1 %159  ;;  %v163_v20 = vpop.xlane.xlu0 %162 }
 0x12a   :  { %1541 = vrsqrt.f32 %v219_v18  ;;  %v204_v21 = vmul.f32 0.015625, %v160_v19  ;;  %v205_v8 = vmul.f32 0.015625, %v163_v20 }
 0x12c   :  { %v220_v23 = vadd.f32 1e-05, %v204_v21  ;;  %v221_v26 = vadd.f32 1e-05, %v205_v8 }
 0x12d   :  { %v166_v27 = vpop.xlane.xlu1 %165  ;;  %v169_v30 = vpop.xlane.xlu0 %168 }
 0x12e   :  { %1543 = vrsqrt.f32 %v220_v23  ;;  %v206_v31 = vmul.f32 0.015625, %v166_v27  ;;  %v207_v32 = vmul.f32 0.015625, %v169_v30 }
 0x12f   :  { %1545 = vrsqrt.f32 %v221_v26 }
 0x130   :  { %v222_v33 = vadd.f32 1e-05, %v206_v31  ;;  %v223_v10 = vadd.f32 1e-05, %v207_v32 }
 0x131   :  { %v172_v35 = vpop.xlane.xlu1 %171  ;;  %v175_v36 = vpop.xlane.xlu0 %174 }
 0x132   :  { %1547 = vrsqrt.f32 %v222_v33  ;;  %v208_v37 = vmul.f32 0.015625, %v172_v35  ;;  %v209_v38 = vmul.f32 0.015625, %v175_v36 }
 0x133   :  { %1549 = vrsqrt.f32 %v223_v10 }
 0x134   :  { %v1542_v39 = vpop.eup %1541  ;;  %v224_v40 = vadd.f32 1e-05, %v208_v37  ;;  %v225_v41 = vadd.f32 1e-05, %v209_v38 }
 0x135   :  { %v251_v14 = vmul.f32 %v1542_v39, %v1796_v43  ;;  %v178_v45 = vpop.xlane.xlu1 %177  ;;  %v181_v46 = vpop.xlane.xlu0 %180 }
 0x136   :  { %1551 = vrsqrt.f32 %v224_v40  ;;  %v210_v48 = vmul.f32 0.015625, %v178_v45  ;;  %v211_v49 = vmul.f32 0.015625, %v181_v46 }
 0x137   :  { %1553 = vrsqrt.f32 %v225_v41  ;;  %v273_v43 = vmul.f32 %v1934_v47, %v251_v14 }
 0x138   :  { %v1544_v24 = vpop.eup %1543  ;;  %v226_v50 = vadd.f32 1e-05, %v210_v48  ;;  %v227_v53 = vadd.f32 1e-05, %v211_v49 }
 0x139   :  { %v1546_v25 = vpop.eup %1545  ;;  %v252_v54 = vmul.f32 %v1544_v24, %v1806_v51  ;;  %v184_v57 = vpop.xlane.xlu1 %183  ;;  %v295_v12 = vadd.f32 %v1941_v59, %v273_v43 }
 0x13a   :  { %v187_v58 = vpop.xlane.xlu0 %186  ;;  %v253_v60 = vmul.f32 %v1546_v25, %v1799_v44  ;;  %1555 = vrsqrt.f32 %v226_v50  ;;  %v212_v63 = vmul.f32 0.015625, %v184_v57 }
 0x13b   :  { %v213_v28 = vmul.f32 0.015625, %v187_v58  ;;  %1557 = vrsqrt.f32 %v227_v53  ;;  %v274_v29 = vmul.f32 %v1934_v47, %v252_v54 }
 0x13c   :  { %v1548_v0 = vpop.eup %1547  ;;  %v275_v51 = vmul.f32 %v1934_v47, %v253_v60  ;;  %v228_v1 = vadd.f32 1e-05, %v212_v63 }
 0x13d   :  { %v229_v2 = vadd.f32 1e-05, %v213_v28  ;;  %v1550_v3 = vpop.eup %1549  ;;  %v254_v4 = vmul.f32 %v1548_v0, %v1809_v52  ;;  %v190_v5 = vpop.xlane.xlu1 %189  ;;  %v296_v44 = vadd.f32 %v1941_v59, %v274_v29 }
 0x13e   :  { %v193_v6 = vpop.xlane.xlu0 %192  ;;  %v255_v16 = vmul.f32 %v1550_v3, %v1818_v61  ;;  %1559 = vrsqrt.f32 %v228_v1  ;;  %v214_v17 = vmul.f32 0.015625, %v190_v5  ;;  %v297_v8 = vadd.f32 %v1941_v59, %v275_v51 }
 0x13f   :  { %v276_v18 = vmul.f32 %v1934_v47, %v254_v4  ;;  %1561 = vrsqrt.f32 %v229_v2  ;;  %v215_v19 = vmul.f32 0.015625, %v193_v6  ;;  %v311_v20 = vpack.c.bf16 %v296_v44, %v295_v12 }
 0x140   :  { %v1552_v21 = vpop.eup %1551  ;;  %v230_v23 = vadd.f32 1e-05, %v214_v17  ;;  %v277_v32 = vmul.f32 %v1934_v47, %v255_v16 }
 0x141   :  { %v1554_v52 = vpop.eup %1553  ;;  %v298_v26 = vadd.f32 %v1941_v59, %v276_v18  ;;  %v256_v27 = vmul.f32 %v1552_v21, %v1821_v62  ;;  %v231_v30 = vadd.f32 1e-05, %v215_v19  ;;  %v196_v31 = vpop.xlane.xlu1 %195  ;;  %1434 = vmatprep.mubr.msk.bf16.mxu0 %vm57_vm0, %v311_v20 }
 0x142   :  { %v199_v61 = vpop.xlane.xlu0 %198  ;;  %v257_v33 = vmul.f32 %v1554_v52, %v1830_v11  ;;  %1563 = vrsqrt.f32 %v230_v23  ;;  %v216_v10 = vmul.f32 0.015625, %v196_v31  ;;  %v299_v45 = vadd.f32 %v1941_v59, %v277_v32 }
 0x143   :  { %v217_v35 = vmul.f32 0.015625, %v199_v61  ;;  %1565 = vrsqrt.f32 %v231_v30  ;;  %v312_v36 = vpack.c.bf16 %v298_v26, %v297_v8  ;;  %v278_v37 = vmul.f32 %v1934_v47, %v256_v27  ;;  %v1536_v27 = vld [vmem:[%s2173_s6 + $0x18] sm:$0xff]  }
 0x144   :  { %v1556_v38 = vpop.eup %1555  ;;  %v232_v39 = vadd.f32 1e-05, %v216_v10  ;;  %v279_v46 = vmul.f32 %v1934_v47, %v257_v33 }
 0x145   :  { %v233_v40 = vadd.f32 1e-05, %v217_v35  ;;  %v1558_v62 = vpop.eup %1557  ;;  %v258_v41 = vmul.f32 %v1556_v38, %v1833_v7  ;;  %v202_v14 = vpop.xlane.xlu1 %201  ;;  %1435 = vmatmul.mubr.msk.bf16.vlgmr.msra.gmra.mrb[0].mxu0 %vm57_vm0, %v312_v36  ;;  %v300_v11 = vadd.f32 %v1941_v59, %v278_v37 }
 0x146   :  { %v259_v48 = vmul.f32 %v1558_v62, %v1842_v22  ;;  %1567 = vrsqrt.f32 %v232_v39  ;;  %v218_v49 = vmul.f32 0.015625, %v202_v14  ;;  %v301_v57 = vadd.f32 %v1941_v59, %v279_v46  ;;  %v1538_v46 = vld [vmem:[%s2175_s8 + $0x8] sm:$0xff]  }
 0x147   :  { %1569 = vrsqrt.f32 %v233_v40  ;;  %v313_v24 = vpack.c.bf16 %v300_v11, %v299_v45  ;;  %v280_v50 = vmul.f32 %v1934_v47, %v258_v41 }
 0x148   :  { %v1560_v53 = vpop.eup %1559  ;;  %v234_v25 = vadd.f32 1e-05, %v218_v49  ;;  %v281_v43 = vmul.f32 %v1934_v47, %v259_v48 }
 0x149   :  { %v1562_v7 = vpop.eup %1561  ;;  %v260_v54 = vmul.f32 %v1560_v53, %v1845_v9  ;;  %1438 = vmatprep.mubr.msk.bf16.mxu0 %vm57_vm0, %v313_v24  ;;  %v302_v58 = vadd.f32 %v1941_v59, %v280_v50 }
 0x14a   :  { %v261_v22 = vmul.f32 %v1562_v7, %v1854_v34  ;;  %1571 = vrsqrt.f32 %v234_v25  ;;  %v303_v9 = vadd.f32 %v1941_v59, %v281_v43 }
 0x14b   :  { %v314_v60 = vpack.c.bf16 %v302_v58, %v301_v57  ;;  %v282_v63 = vmul.f32 %v1934_v47, %v260_v54  ;;  %v1539_v54 = vld [vmem:[%s2175_s8 + $0x10] sm:$0xff]  }
 0x14c   :  { %v1564_v28 = vpop.eup %1563  ;;  %v283_v1 = vmul.f32 %v1934_v47, %v261_v22 }
 0x14d   :  { %v1566_v29 = vpop.eup %1565  ;;  %v262_v0 = vmul.f32 %v1564_v28, %v1857_v13  ;;  %1439 = vmatmul.mubr.msk.bf16.gmra.mrb[4].mxu0 %vm57_vm0, %v314_v60  ;;  %v304_v51 = vadd.f32 %v1941_v59, %v282_v63 }
 0x14e   :  { %v263_v2 = vmul.f32 %v1566_v29, %v1866_v42  ;;  %v305_v13 = vadd.f32 %v1941_v59, %v283_v1 }
 0x14f   :  { %v315_v3 = vpack.c.bf16 %v304_v51, %v303_v9  ;;  %v284_v34 = vmul.f32 %v1934_v47, %v262_v0 }
 0x150   :  { %v1568_v4 = vpop.eup %1567  ;;  %v285_v44 = vmul.f32 %v1934_v47, %v263_v2 }
 0x151   :  { %v1570_v5 = vpop.eup %1569  ;;  %v264_v6 = vmul.f32 %v1568_v4, %v1869_v15  ;;  %1442 = vmatprep.mubr.msk.bf16.mxu0 %vm57_vm0, %v315_v3  ;;  %v306_v12 = vadd.f32 %v1941_v59, %v284_v34 }
 0x152   :  { %v265_v16 = vmul.f32 %v1570_v5, %v1886_v55  ;;  %v307_v15 = vadd.f32 %v1941_v59, %v285_v44 }
 0x153   :  { %v316_v17 = vpack.c.bf16 %v306_v12, %v305_v13  ;;  %v286_v42 = vmul.f32 %v1934_v47, %v264_v6 }
 0x154   :  { %v1572_v18 = vpop.eup %1571  ;;  %v287_v21 = vmul.f32 %v1934_v47, %v265_v16 }
 0x155   :  { %v266_v19 = vmul.f32 %v1572_v18, %v1889_v56  ;;  %1443 = vmatmul.mubr.msk.bf16.gmra.mrb[8].mxu0 %vm57_vm0, %v316_v17  ;;  %v308_v20 = vadd.f32 %v1941_v59, %v286_v42  ;;  %v1535_v56 = vld [vmem:[%s2173_s6 + $0x10] sm:$0xff]  }
 0x156   :  { %v309_v55 = vadd.f32 %v1941_v59, %v287_v21  ;;  %1454 = vmatprep.subr.bf16.mxu1 %v1535_v56 }
 0x157   :  { %v317_v8 = vpack.c.bf16 %v308_v20, %v307_v15  ;;  %v288_v23 = vmul.f32 %v1934_v47, %v266_v19  ;;  %1455 = vmatpush3.bf16.msra.mxu1 %v1535_v56  ;;  %v1537_v47 = vld [vmem:[%s2175_s8] sm:$0xff]  }
 0x158   :  { %1456 = vmatprep.subr.bf16.mxu1 %v1536_v27 }
 0x159   :  { %1446 = vmatprep.mubr.msk.bf16.mxu0 %vm57_vm0, %v317_v8  ;;  %v310_v52 = vadd.f32 %v1941_v59, %v288_v23  ;;  %v2008_v59 = vld [vmem:[%s2172_s5] ss:$0 sm:$0xff] }
 0x15b   :  { %v318_v26 = vpack.c.bf16 %v310_v52, %v309_v55  ;;  %1457 = vmatpush3.bf16.msra.mxu1 %v1536_v27  ;;  %v1540_v52 = vld [vmem:[%s2175_s8 + $0x18] sm:$0xff]  }
 0x15c   :  { %1474 = vmatprep.subr.bf16.mxu1 %v1537_v47 }
 0x15d   :  { %1447 = vmatmul.mubr.msk.bf16.gmra.mrb[12].mxu0 %vm57_vm0, %v318_v26  ;;  %v2046_v26 = vld [vmem:[%s2174_s7] ss:$0 sm:$0xff]  ;;  %s1597_s7 = smov [#allocation2]  }
 0x15e   :  { %s1214_s8 = sshll.u32 %s1597_s7, 4  ;;  %s1215_s8 = int_to_ptr.vmem [resolvable:$true] %s1214_s8 }
 0x15f   :  { %s1573_s20 = scalar_lea.vmem %s1215_s8, 1024  ;;  %p1578_p1 = scmp.lt.s32.totalorder %s1215_s8, %s1215_s8 }
 0x160   :  { %p1574_p0 = scmp.ne.s32.totalorder %s1215_s8, %s1573_s20  ;;  %p1579_p2 = scmp.lt.s32.totalorder %s1573_s20, %s1573_s20 }
 0x162   :  { %p1580_p3 = por %p1579_p2, %p1578_p1 }
 0x164   :  { %p1581_p4 = pnand %p1580_p3, %p1574_p0 }
 0x218   :  { %v1436_v30 = vpop.f32.mrb[0].mxu0 }
 0x219   :  { %v690_v31 = vadd.f32 %v1436_v30, %v2008_v59  ;;  %v618_v61 = vpop.f32.mrb[1].mxu0 }
 0x21a   :  { %v688_v32 = vadd.f32 %v2008_v59, %v618_v61  ;;  %v1437_v33 = vpop.f32.mrb[2].mxu0 }
 0x21b   :  { %v691_v10 = vadd.f32 %v1437_v33, %v2008_v59  ;;  %v621_v35 = vpop.f32.mrb[3].mxu0  ;;  %v706_v37 = vmax.f32 %v690_v31, 0.0 }
 0x21c   :  { %v689_v36 = vadd.f32 %v2008_v59, %v621_v35  ;;  %v704_v39 = vmax.f32 %v688_v32, 0.0 }
 0x21d   :  { %v707_v38 = vmax.f32 %v691_v10, 0.0 }
 0x21e   :  { %v705_v40 = vmax.f32 %v689_v36, 0.0 }
 0x21f   :  { %v721_v62 = vpack.c.bf16 %v707_v38, %v706_v37 }
 0x220   :  { %v1440_v41 = vpop.f32.mrb[4].mxu0  ;;  %v720_v14 = vpack.c.bf16 %v705_v40, %v704_v39 }
 0x221   :  { %v694_v45 = vadd.f32 %v1440_v41, %v2008_v59  ;;  %v634_v11 = vpop.f32.mrb[5].mxu0 }
 0x222   :  { %v692_v48 = vadd.f32 %v2008_v59, %v634_v11  ;;  %v1441_v49 = vpop.f32.mrb[6].mxu0  ;;  %1458 = vmatprep.mubr.msk.bf16.mxu1 %vm57_vm0, %v720_v14 }
 0x223   :  { %v695_v24 = vadd.f32 %v1441_v49, %v2008_v59  ;;  %v637_v50 = vpop.f32.mrb[7].mxu0  ;;  %1459 = vmatmul.mubr.msk.bf16.vlgmr.msra.gmra.mrb[0].mxu1 %vm57_vm0, %v721_v62  ;;  %v710_v25 = vmax.f32 %v694_v45, 0.0 }
 0x224   :  { %v693_v53 = vadd.f32 %v2008_v59, %v637_v50  ;;  %1475 = vmatpush3.bf16.msra.mxu1 %v1537_v47  ;;  %v708_v57 = vmax.f32 %v692_v48, 0.0 }
 0x225   :  { %v711_v7 = vmax.f32 %v695_v24, 0.0  ;;  %1476 = vmatprep.subr.bf16.mxu1 %v1538_v46 }
 0x226   :  { %v709_v58 = vmax.f32 %v693_v53, 0.0 }
 0x227   :  { %v723_v43 = vpack.c.bf16 %v711_v7, %v710_v25 }
 0x228   :  { %v722_v22 = vpack.c.bf16 %v709_v58, %v708_v57  ;;  %v1444_v60 = vpop.f32.mrb[8].mxu0  ;;  %1477 = vmatpush3.bf16.msra.mxu1 %v1538_v46 }
 0x229   :  { %v698_v63 = vadd.f32 %v1444_v60, %v2008_v59  ;;  %v650_v28 = vpop.f32.mrb[9].mxu0  ;;  %1478 = vmatprep.subr.bf16.mxu1 %v1539_v54 }
 0x22a   :  { %v696_v29 = vadd.f32 %v2008_v59, %v650_v28  ;;  %v1445_v0 = vpop.f32.mrb[10].mxu0  ;;  %1462 = vmatprep.mubr.msk.bf16.mxu1 %vm57_vm0, %v722_v22 }
 0x22b   :  { %v699_v9 = vadd.f32 %v1445_v0, %v2008_v59  ;;  %v653_v51 = vpop.f32.mrb[11].mxu0  ;;  %1463 = vmatmul.mubr.msk.bf16.gmra.mrb[4].mxu1 %vm57_vm0, %v723_v43  ;;  %v714_v2 = vmax.f32 %v698_v63, 0.0 }
 0x22c   :  { %v697_v1 = vadd.f32 %v2008_v59, %v653_v51  ;;  %1479 = vmatpush3.bf16.msra.mxu1 %v1539_v54  ;;  %v712_v34 = vmax.f32 %v696_v29, 0.0 }
 0x22d   :  { %v715_v3 = vmax.f32 %v699_v9, 0.0  ;;  %1480 = vmatprep.subr.bf16.mxu1 %v1540_v52 }
 0x22e   :  { %v713_v4 = vmax.f32 %v697_v1, 0.0 }
 0x22f   :  { %v725_v5 = vpack.c.bf16 %v715_v3, %v714_v2 }
 0x230   :  { %v724_v6 = vpack.c.bf16 %v713_v4, %v712_v34  ;;  %v1448_v13 = vpop.f32.mrb[12].mxu0  ;;  %1481 = vmatpush3.bf16.msra.mxu1 %v1540_v52 }
 0x231   :  { %v702_v12 = vadd.f32 %v1448_v13, %v2008_v59  ;;  %v666_v44 = vpop.f32.mrb[13].mxu0 }
 0x232   :  { %v700_v16 = vadd.f32 %v2008_v59, %v666_v44  ;;  %v1449_v17 = vpop.f32.mrb[14].mxu0  ;;  %1466 = vmatprep.mubr.msk.bf16.mxu1 %vm57_vm0, %v724_v6 }
 0x233   :  { %v703_v42 = vadd.f32 %v1449_v17, %v2008_v59  ;;  %v669_v18 = vpop.f32.mrb[15].mxu0  ;;  %1467 = vmatmul.mubr.msk.bf16.gmra.mrb[8].mxu1 %vm57_vm0, %v725_v5  ;;  %v718_v15 = vmax.f32 %v702_v12, 0.0 }
 0x234   :  { %v701_v19 = vadd.f32 %v2008_v59, %v669_v18  ;;  %v716_v21 = vmax.f32 %v700_v16, 0.0 }
 0x235   :  { %v719_v20 = vmax.f32 %v703_v42, 0.0 }
 0x236   :  { %v717_v8 = vmax.f32 %v701_v19, 0.0 }
 0x237   :  { %v727_v23 = vpack.c.bf16 %v719_v20, %v718_v15 }
 0x238   :  { %v726_v55 = vpack.c.bf16 %v717_v8, %v716_v21 }
 0x23a   :  { %1470 = vmatprep.mubr.msk.bf16.mxu1 %vm57_vm0, %v726_v55 }
 0x23b   :  { %1471 = vmatmul.mubr.msk.bf16.gmra.mrb[12].mxu1 %vm57_vm0, %v727_v23 }
 0x2f6   :  { %v1460_v56 = vpop.f32.mrb[0].mxu1 }
 0x2f7   :  { %v834_v27 = vadd.f32 %v1460_v56, %v2046_v26  ;;  %v825_v47 = vpop.f32.mrb[1].mxu1 }
 0x2f8   :  { %v826_v59 = vadd.f32 %v2046_v26, %v825_v47  ;;  %v1461_v30 = vpop.f32.mrb[2].mxu1 }
 0x2f9   :  { %v1324_v31 = vpack.c.bf16 %v834_v27, %v834_v27  ;;  %v837_v61 = vadd.f32 %v1461_v30, %v2046_v26  ;;  %v828_v32 = vpop.f32.mrb[3].mxu1 }
 0x2fa   :  { %v1322_v33 = vpack.c.bf16 %v826_v59, %v826_v59  ;;  %v829_v10 = vadd.f32 %v2046_v26, %v828_v32 }
 0x2fb   :  { %955 = vst.msk [vmem:[#allocation2 + $0x8] sm:$0xf] %vm952_vm1, %v1324_v31  ;;  %v889_v35 = vpack.c.bf16 %v837_v61, %v834_v27  ;;  %v1325_v36 = vpack.c.bf16 %v837_v61, %v837_v61 }
 0x2fc   :  { %953 = vst.msk [vmem:[#allocation2] sm:$0xf] %vm952_vm1, %v1322_v33  ;;  %v888_v37 = vpack.c.bf16 %v829_v10, %v826_v59  ;;  %v1323_v38 = vpack.c.bf16 %v829_v10, %v829_v10 }
 0x2fd   :  { %956 = vst.msk [vmem:[#allocation2 + $0xc] sm:$0xf] %vm952_vm1, %v1325_v36 }
 0x2fe   :  { %954 = vst.msk [vmem:[#allocation2 + $0x4] sm:$0xf] %vm952_vm1, %v1323_v38  ;;  %v1464_v39 = vpop.f32.mrb[4].mxu1  ;;  %1482 = vmatprep.mubr.msk.bf16.mxu1 %vm57_vm0, %v888_v37 }
 0x2ff   :  { %v850_v40 = vadd.f32 %v1464_v39, %v2046_v26  ;;  %v841_v62 = vpop.f32.mrb[5].mxu1  ;;  %1483 = vmatmul.mubr.msk.bf16.vlgmr.msra.gmra.mrb[16].mxu1 %vm57_vm0, %v889_v35 }
 0x300   :  { %v842_v41 = vadd.f32 %v2046_v26, %v841_v62  ;;  %v1465_v14 = vpop.f32.mrb[6].mxu1 }
 0x301   :  { %v1328_v45 = vpack.c.bf16 %v850_v40, %v850_v40  ;;  %v853_v11 = vadd.f32 %v1465_v14, %v2046_v26  ;;  %v844_v46 = vpop.f32.mrb[7].mxu1 }
 0x302   :  { %v1326_v48 = vpack.c.bf16 %v842_v41, %v842_v41  ;;  %v845_v49 = vadd.f32 %v2046_v26, %v844_v46 }
 0x303   :  { %959 = vst.msk [vmem:[#allocation2 + $0x18] sm:$0xf] %vm952_vm1, %v1328_v45  ;;  %v891_v24 = vpack.c.bf16 %v853_v11, %v850_v40  ;;  %v1329_v50 = vpack.c.bf16 %v853_v11, %v853_v11 }
 0x304   :  { %957 = vst.msk [vmem:[#allocation2 + $0x10] sm:$0xf] %vm952_vm1, %v1326_v48  ;;  %v890_v53 = vpack.c.bf16 %v845_v49, %v842_v41  ;;  %v1327_v25 = vpack.c.bf16 %v845_v49, %v845_v49 }
 0x305   :  { %960 = vst.msk [vmem:[#allocation2 + $0x1c] sm:$0xf] %vm952_vm1, %v1329_v50 }
 0x306   :  { %958 = vst.msk [vmem:[#allocation2 + $0x14] sm:$0xf] %vm952_vm1, %v1327_v25  ;;  %v1468_v7 = vpop.f32.mrb[8].mxu1  ;;  %1486 = vmatprep.mubr.msk.bf16.mxu1 %vm57_vm0, %v890_v53 }
 0x307   :  { %v866_v54 = vadd.f32 %v1468_v7, %v2046_v26  ;;  %v857_v57 = vpop.f32.mrb[9].mxu1  ;;  %1487 = vmatmul.mubr.msk.bf16.gmra.mrb[20].mxu1 %vm57_vm0, %v891_v24 }
 0x308   :  { %v858_v58 = vadd.f32 %v2046_v26, %v857_v57  ;;  %v1469_v43 = vpop.f32.mrb[10].mxu1 }
 0x309   :  { %v1332_v22 = vpack.c.bf16 %v866_v54, %v866_v54  ;;  %v869_v60 = vadd.f32 %v1469_v43, %v2046_v26  ;;  %v860_v63 = vpop.f32.mrb[11].mxu1 }
 0x30a   :  { %v1330_v28 = vpack.c.bf16 %v858_v58, %v858_v58  ;;  %v861_v29 = vadd.f32 %v2046_v26, %v860_v63 }
 0x30b   :  { %963 = vst.msk [vmem:[#allocation2 + $0x28] sm:$0xf] %vm952_vm1, %v1332_v22  ;;  %v893_v0 = vpack.c.bf16 %v869_v60, %v866_v54  ;;  %v1333_v9 = vpack.c.bf16 %v869_v60, %v869_v60 }
 0x30c   :  { %961 = vst.msk [vmem:[#allocation2 + $0x20] sm:$0xf] %vm952_vm1, %v1330_v28  ;;  %v892_v51 = vpack.c.bf16 %v861_v29, %v858_v58  ;;  %v1331_v1 = vpack.c.bf16 %v861_v29, %v861_v29 }
 0x30d   :  { %964 = vst.msk [vmem:[#allocation2 + $0x2c] sm:$0xf] %vm952_vm1, %v1333_v9 }
 0x30e   :  { %962 = vst.msk [vmem:[#allocation2 + $0x24] sm:$0xf] %vm952_vm1, %v1331_v1  ;;  %v1472_v2 = vpop.f32.mrb[12].mxu1  ;;  %1490 = vmatprep.mubr.msk.bf16.mxu1 %vm57_vm0, %v892_v51 }
 0x30f   :  { %v882_v3 = vadd.f32 %v1472_v2, %v2046_v26  ;;  %v873_v34 = vpop.f32.mrb[13].mxu1  ;;  %1491 = vmatmul.mubr.msk.bf16.gmra.mrb[24].mxu1 %vm57_vm0, %v893_v0 }
 0x310   :  { %v874_v4 = vadd.f32 %v2046_v26, %v873_v34  ;;  %v1473_v5 = vpop.f32.mrb[14].mxu1 }
 0x311   :  { %v1336_v6 = vpack.c.bf16 %v882_v3, %v882_v3  ;;  %v885_v13 = vadd.f32 %v1473_v5, %v2046_v26  ;;  %v876_v12 = vpop.f32.mrb[15].mxu1 }
 0x312   :  { %v1334_v44 = vpack.c.bf16 %v874_v4, %v874_v4  ;;  %v877_v16 = vadd.f32 %v2046_v26, %v876_v12 }
 0x313   :  { %967 = vst.msk [vmem:[#allocation2 + $0x38] sm:$0xf] %vm952_vm1, %v1336_v6  ;;  %v895_v17 = vpack.c.bf16 %v885_v13, %v882_v3  ;;  %v1337_v42 = vpack.c.bf16 %v885_v13, %v885_v13 }
 0x314   :  { %965 = vst.msk [vmem:[#allocation2 + $0x30] sm:$0xf] %vm952_vm1, %v1334_v44  ;;  %v894_v18 = vpack.c.bf16 %v877_v16, %v874_v4  ;;  %v1335_v19 = vpack.c.bf16 %v877_v16, %v877_v16 }
 0x315   :  { %968 = vst.msk [vmem:[#allocation2 + $0x3c] sm:$0xf] %vm952_vm1, %v1337_v42 }
 0x316   :  { %966 = vst.msk [vmem:[#allocation2 + $0x34] sm:$0xf] %vm952_vm1, %v1335_v19  ;;  %1494 = vmatprep.mubr.msk.bf16.mxu1 %vm57_vm0, %v894_v18 }
 0x317   :  { %1495 = vmatmul.mubr.msk.bf16.gmra.mrb[28].mxu1 %vm57_vm0, %v895_v17 }
 0x318   :  { %1584 = shalt.err (!%p1581_p4)
}
 0x319   :  { %s1585_s23 = scalar_lea.hbm %s2177_s10, 1024 }
 0x31a   :  { %p1586_p5 = scmp.ne.s32.totalorder %s2177_s10, %s1585_s23  ;;  %p1589_p6 = scmp.lt.u32.totalorder %s1585_s23, %s2177_s10 }
 0x31c   :  { %p1591_p7 = pnand %p1589_p6, %p1586_p5 }
 0x31e   :  { %1594 = shalt.err (!%p1591_p7)
}
 0x31f   :  { %s1598_s26 = smov 64   ;;  %s1599_s27 = smov 4   ;;  %v1293_v15 = vld [vmem:[%s2176_s9] ss:$0 sm:$0xff] }
 0x320   :  { %1220 = dma.vmem_to_hbm [thread:$0]  %s1215_s8, 1024, %s2177_s10, [#allocation3], %s1598_s26, %s1598_s26, %s1599_s27  }
 0x3d2   :  { %v1484_v20 = vpop.f32.mrb[16].mxu1 }
 0x3d3   :  { %v1075_v21 = vadd.f32 %v1484_v20, %v1293_v15  ;;  %v1066_v8 = vpop.f32.mrb[17].mxu1 }
 0x3d4   :  { %v1067_v23 = vadd.f32 %v1293_v15, %v1066_v8  ;;  %v1485_v55 = vpop.f32.mrb[18].mxu1 }
 0x3d5   :  { %v1340_v52 = vpack.c.bf16 %v1075_v21, %v1075_v21  ;;  %v1078_v26 = vadd.f32 %v1485_v55, %v1293_v15  ;;  %v1069_v56 = vpop.f32.mrb[19].mxu1 }
 0x3d6   :  { %v1338_v27 = vpack.c.bf16 %v1067_v23, %v1067_v23  ;;  %v1070_v47 = vadd.f32 %v1293_v15, %v1069_v56 }
 0x3d7   :  { %1195 = vst.msk [vmem:[%s2178_s11 + $0x8] sm:$0xf] %vm952_vm1, %v1340_v52  ;;  %v1341_v59 = vpack.c.bf16 %v1078_v26, %v1078_v26 }
 0x3d8   :  { %1193 = vst.msk [vmem:[%s2178_s11] sm:$0xf] %vm952_vm1, %v1338_v27  ;;  %v1339_v30 = vpack.c.bf16 %v1070_v47, %v1070_v47 }
 0x3d9   :  { %1196 = vst.msk [vmem:[%s2178_s11 + $0xc] sm:$0xf] %vm952_vm1, %v1341_v59 }
 0x3da   :  { %1194 = vst.msk [vmem:[%s2178_s11 + $0x4] sm:$0xf] %vm952_vm1, %v1339_v30  ;;  %v1488_v31 = vpop.f32.mrb[20].mxu1 }
 0x3db   :  { %v1091_v61 = vadd.f32 %v1488_v31, %v1293_v15  ;;  %v1082_v32 = vpop.f32.mrb[21].mxu1 }
 0x3dc   :  { %v1083_v33 = vadd.f32 %v1293_v15, %v1082_v32  ;;  %v1489_v10 = vpop.f32.mrb[22].mxu1 }
 0x3dd   :  { %v1344_v35 = vpack.c.bf16 %v1091_v61, %v1091_v61  ;;  %v1094_v36 = vadd.f32 %v1489_v10, %v1293_v15  ;;  %v1085_v37 = vpop.f32.mrb[23].mxu1 }
 0x3de   :  { %v1342_v38 = vpack.c.bf16 %v1083_v33, %v1083_v33  ;;  %v1086_v39 = vadd.f32 %v1293_v15, %v1085_v37 }
 0x3df   :  { %1199 = vst.msk [vmem:[%s2178_s11 + $0x18] sm:$0xf] %vm952_vm1, %v1344_v35  ;;  %v1345_v40 = vpack.c.bf16 %v1094_v36, %v1094_v36 }
 0x3e0   :  { %1197 = vst.msk [vmem:[%s2178_s11 + $0x10] sm:$0xf] %vm952_vm1, %v1342_v38  ;;  %v1343_v62 = vpack.c.bf16 %v1086_v39, %v1086_v39 }
 0x3e1   :  { %1200 = vst.msk [vmem:[%s2178_s11 + $0x1c] sm:$0xf] %vm952_vm1, %v1345_v40 }
 0x3e2   :  { %1198 = vst.msk [vmem:[%s2178_s11 + $0x14] sm:$0xf] %vm952_vm1, %v1343_v62  ;;  %v1492_v41 = vpop.f32.mrb[24].mxu1 }
 0x3e3   :  { %v1107_v14 = vadd.f32 %v1492_v41, %v1293_v15  ;;  %v1098_v45 = vpop.f32.mrb[25].mxu1 }
 0x3e4   :  { %v1099_v11 = vadd.f32 %v1293_v15, %v1098_v45  ;;  %v1493_v46 = vpop.f32.mrb[26].mxu1 }
 0x3e5   :  { %v1348_v48 = vpack.c.bf16 %v1107_v14, %v1107_v14  ;;  %v1110_v49 = vadd.f32 %v1493_v46, %v1293_v15  ;;  %v1101_v24 = vpop.f32.mrb[27].mxu1 }
 0x3e6   :  { %v1346_v50 = vpack.c.bf16 %v1099_v11, %v1099_v11  ;;  %v1102_v53 = vadd.f32 %v1293_v15, %v1101_v24 }
 0x3e7   :  { %1203 = vst.msk [vmem:[%s2178_s11 + $0x28] sm:$0xf] %vm952_vm1, %v1348_v48  ;;  %v1349_v25 = vpack.c.bf16 %v1110_v49, %v1110_v49 }
 0x3e8   :  { %1201 = vst.msk [vmem:[%s2178_s11 + $0x20] sm:$0xf] %vm952_vm1, %v1346_v50  ;;  %v1347_v7 = vpack.c.bf16 %v1102_v53, %v1102_v53 }
 0x3e9   :  { %1204 = vst.msk [vmem:[%s2178_s11 + $0x2c] sm:$0xf] %vm952_vm1, %v1349_v25 }
 0x3ea   :  { %1202 = vst.msk [vmem:[%s2178_s11 + $0x24] sm:$0xf] %vm952_vm1, %v1347_v7  ;;  %v1496_v54 = vpop.f32.mrb[28].mxu1 }
 0x3eb   :  { %v1123_v57 = vadd.f32 %v1496_v54, %v1293_v15  ;;  %v1114_v58 = vpop.f32.mrb[29].mxu1 }
 0x3ec   :  { %v1115_v43 = vadd.f32 %v1293_v15, %v1114_v58  ;;  %v1497_v22 = vpop.f32.mrb[30].mxu1 }
 0x3ed   :  { %v1352_v60 = vpack.c.bf16 %v1123_v57, %v1123_v57  ;;  %v1126_v63 = vadd.f32 %v1497_v22, %v1293_v15  ;;  %v1117_v28 = vpop.f32.mrb[31].mxu1 }
 0x3ee   :  { %v1350_v29 = vpack.c.bf16 %v1115_v43, %v1115_v43  ;;  %v1118_v0 = vadd.f32 %v1293_v15, %v1117_v28 }
 0x3ef   :  { %1207 = vst.msk [vmem:[%s2178_s11 + $0x38] sm:$0xf] %vm952_vm1, %v1352_v60  ;;  %v1353_v9 = vpack.c.bf16 %v1126_v63, %v1126_v63 }
 0x3f0   :  { %1205 = vst.msk [vmem:[%s2178_s11 + $0x30] sm:$0xf] %vm952_vm1, %v1350_v29  ;;  %v1351_v51 = vpack.c.bf16 %v1118_v0, %v1118_v0 }
 0x3f1   :  { %1208 = vst.msk [vmem:[%s2178_s11 + $0x3c] sm:$0xf] %vm952_vm1, %v1353_v9 }
 0x3f2   :  { %1206 = vst.msk [vmem:[%s2178_s11 + $0x34] sm:$0xf] %vm952_vm1, %v1351_v51 }
 0x3f3   :  { %1595 = dma.done.wait [#allocation3], 1024  }
 0x3f4   :  { %1596 = vsyncadd [#allocation3], 4294966272 }
 0x3f5   :  { %1228 = vsyncpa [#allocation3], 1 }

// kernel: gnn_policy_forward.19
= control target key start
LH: loop header
LB: loop body
LE: loop exit
PB: predicated region body
PF: predicated region fallthrough
CT: control target
= control target key end

     0   :  { %vm57_vm0 = vcmask 523264   ;;  %s2115_s0 = inlined_call_operand.vmem [shape: f32[128,64], index: 0, kind: input, shape index: {}]   ;;  %s2116_s4 = inlined_call_operand.vmem [shape: bf16[128,64], index: 4, kind: input, shape index: {}]   ;;  %s2117_s1 = inlined_call_operand.vmem [shape: bf16[128,64], index: 1, kind: input, shape index: {}]   ;;  %s2118_s6 = inlined_call_operand.vmem [shape: bf16[64,64], index: 6, kind: input, shape index: {}]   ;;  %s2119_s2 = inlined_call_operand.vmem [shape: f32[1,64], index: 2, kind: input, shape index: {}]   ;;  %s2120_s3 = inlined_call_operand.vmem [shape: f32[1,64], index: 3, kind: input, shape index: {}]   ;;  %s2121_s8 = inlined_call_operand.vmem [shape: bf16[64,64], index: 8, kind: input, shape index: {}]   ;;  %s2122_s5 = inlined_call_operand.vmem [shape: f32[1,64], index: 5, kind: input, shape index: {}]   ;;  %s2123_s10 = inlined_call_operand.vmem [shape: bf16[64,128], index: 10, kind: input, shape index: {}]   ;;  %s2124_s7 = inlined_call_operand.vmem [shape: f32[1,64], index: 7, kind: input, shape index: {}]   ;;  %s2125_s9 = inlined_call_operand.vmem [shape: f32[1,64], index: 9, kind: input, shape index: {}]   ;;  %s2126_s11 = inlined_call_operand.vmem [shape: f32[128,128], index: 11, kind: output, shape index: {}]  }
   0x1   :  { %v39_v0 = vld [vmem:[%s2115_s0] sm:$0xff]  ;;  %v41_v1 = vld [vmem:[%s2115_s0 + $0x10] sm:$0xff]  ;;  %v1659_v2 = vld [vmem:[%s2115_s0 + $0x8] sm:$0xff] }
   0x2   :  { %v58_v3 = vsel %vm57_vm0, %v39_v0, 0.0  ;;  %v64_v4 = vsel %vm57_vm0, %v41_v1, 0.0  ;;  %v42_v5 = vld [vmem:[%s2115_s0 + $0x18] sm:$0xff]  ;;  %v61_v6 = vsel %vm57_vm0, %v1659_v2, 0.0  ;;  %v1672_v8 = vld [vmem:[%s2115_s0 + $0x20] sm:$0xff]  ;;  %v1677_v9 = vld [vmem:[%s2115_s0 + $0x28] sm:$0xff] }
   0x3   :  { %59 = vadd.xlane.f32.xlu0 %v58_v3  ;;  %65 = vadd.xlane.f32.xlu1 %v64_v4  ;;  %v67_v7 = vsel %vm57_vm0, %v42_v5, 0.0  ;;  %v70_v10 = vsel %vm57_vm0, %v1672_v8, 0.0  ;;  %v73_v11 = vsel %vm57_vm0, %v1677_v9, 0.0  ;;  %v1686_v12 = vld [vmem:[%s2115_s0 + $0x30] sm:$0xff]  ;;  %v1691_v13 = vld [vmem:[%s2115_s0 + $0x38] sm:$0xff]  ;;  %v1700_v16 = vld [vmem:[%s2115_s0 + $0x40] sm:$0xff] }
   0x4   :  { %v76_v14 = vsel %vm57_vm0, %v1686_v12, 0.0  ;;  %v79_v15 = vsel %vm57_vm0, %v1691_v13, 0.0  ;;  %v1705_v17 = vld [vmem:[%s2115_s0 + $0x48] sm:$0xff]  ;;  %v82_v18 = vsel %vm57_vm0, %v1700_v16, 0.0  ;;  %v1714_v20 = vld [vmem:[%s2115_s0 + $0x50] sm:$0xff]  ;;  %v1719_v21 = vld [vmem:[%s2115_s0 + $0x58] sm:$0xff] }
   0x5   :  { %v85_v19 = vsel %vm57_vm0, %v1705_v17, 0.0  ;;  %v88_v22 = vsel %vm57_vm0, %v1714_v20, 0.0  ;;  %v91_v23 = vsel %vm57_vm0, %v1719_v21, 0.0  ;;  %v1728_v24 = vld [vmem:[%s2115_s0 + $0x60] sm:$0xff]  ;;  %v1733_v25 = vld [vmem:[%s2115_s0 + $0x68] sm:$0xff]  ;;  %v1742_v28 = vld [vmem:[%s2115_s0 + $0x70] sm:$0xff] }
   0x6   :  { %v94_v26 = vsel %vm57_vm0, %v1728_v24, 0.0  ;;  %v97_v27 = vsel %vm57_vm0, %v1733_v25, 0.0  ;;  %v1747_v29 = vld [vmem:[%s2115_s0 + $0x78] sm:$0xff]  ;;  %v100_v30 = vsel %vm57_vm0, %v1742_v28, 0.0  ;;  %v1530_v32 = vld [vmem:[%s2116_s4 + $0x20] sm:$0xff]  }
   0x7   :  { %62 = vadd.xlane.f32.xlu0 %v61_v6  ;;  %68 = vadd.xlane.f32.xlu1 %v67_v7  ;;  %v103_v31 = vsel %vm57_vm0, %v1747_v29, 0.0 }
   0x8   :  { %1386 = vmatprep.subr.bf16.mxu0 %v1530_v32  ;;  %1506 = vmatprep.subr.bf16.mxu1 %v1530_v32 }
   0x9   :  { %1387 = vmatpush3.bf16.msra.mxu0 %v1530_v32  ;;  %1510 = vmatpush3.bf16.msra.mxu1 %v1530_v32 }
   0xb   :  { %71 = vadd.xlane.f32.xlu0 %v70_v10  ;;  %74 = vadd.xlane.f32.xlu1 %v73_v11 }
   0xf   :  { %77 = vadd.xlane.f32.xlu0 %v76_v14  ;;  %80 = vadd.xlane.f32.xlu1 %v79_v15 }
  0x13   :  { %83 = vadd.xlane.f32.xlu0 %v82_v18  ;;  %86 = vadd.xlane.f32.xlu1 %v85_v19 }
  0x17   :  { %89 = vadd.xlane.f32.xlu0 %v88_v22  ;;  %92 = vadd.xlane.f32.xlu1 %v91_v23 }
  0x1b   :  { %95 = vadd.xlane.f32.xlu0 %v94_v26  ;;  %98 = vadd.xlane.f32.xlu1 %v97_v27 }
  0x1f   :  { %101 = vadd.xlane.f32.xlu0 %v100_v30  ;;  %104 = vadd.xlane.f32.xlu1 %v103_v31  ;;  %v1531_v30 = vld [vmem:[%s2116_s4 + $0x28] sm:$0xff]  }
  0x20   :  { %1388 = vmatprep.subr.bf16.mxu0 %v1531_v30  ;;  %1507 = vmatprep.subr.bf16.mxu1 %v1531_v30 }
  0x21   :  { %1389 = vmatpush3.bf16.msra.mxu0 %v1531_v30  ;;  %1511 = vmatpush3.bf16.msra.mxu1 %v1531_v30 }
  0x90   :  { %v60_v33 = vpop.xlane.xlu0 %59  ;;  %v66_v34 = vpop.xlane.xlu1 %65 }
  0x91   :  { %v107_v35 = vmul.f32 0.015625, %v60_v33  ;;  %v109_v36 = vmul.f32 0.015625, %v66_v34 }
  0x93   :  { %v1756_v37 = vsub.f32 %v39_v0, %v107_v35  ;;  %v1758_v38 = vsub.f32 %v41_v1, %v109_v36 }
  0x94   :  { %v63_v39 = vpop.xlane.xlu0 %62  ;;  %v69_v40 = vpop.xlane.xlu1 %68 }
  0x95   :  { %v108_v41 = vmul.f32 0.015625, %v63_v39  ;;  %v110_v42 = vmul.f32 0.015625, %v69_v40  ;;  %v139_v43 = vmul.f32 %v1756_v37, %v1756_v37  ;;  %v141_v44 = vmul.f32 %v1758_v38, %v1758_v38 }
  0x97   :  { %v1765_v45 = vsub.f32 %v1659_v2, %v108_v41  ;;  %v1767_v46 = vsub.f32 %v42_v5, %v110_v42  ;;  %v155_v47 = vsel %vm57_vm0, %v139_v43, 0.0  ;;  %v161_v50 = vsel %vm57_vm0, %v141_v44, 0.0  ;;  %v1532_v44 = vld [vmem:[%s2116_s4 + $0x30] sm:$0xff]  }
  0x98   :  { %156 = vadd.xlane.f32.xlu0 %v155_v47  ;;  %v72_v48 = vpop.xlane.xlu0 %71  ;;  %v75_v49 = vpop.xlane.xlu1 %74  ;;  %1390 = vmatprep.subr.bf16.mxu0 %v1532_v44 }
  0x99   :  { %v111_v51 = vmul.f32 0.015625, %v72_v48  ;;  %v112_v52 = vmul.f32 0.015625, %v75_v49  ;;  %v140_v53 = vmul.f32 %v1765_v45, %v1765_v45  ;;  %v142_v54 = vmul.f32 %v1767_v46, %v1767_v46  ;;  %1508 = vmatprep.subr.bf16.mxu1 %v1532_v44  ;;  %1391 = vmatpush3.bf16.msra.mxu0 %v1532_v44 }
  0x9a   :  { %1512 = vmatpush3.bf16.msra.mxu1 %v1532_v44 }
  0x9b   :  { %v1776_v55 = vsub.f32 %v1672_v8, %v111_v51  ;;  %v1779_v56 = vsub.f32 %v1677_v9, %v112_v52  ;;  %v158_v57 = vsel %vm57_vm0, %v140_v53, 0.0  ;;  %v164_v60 = vsel %vm57_vm0, %v142_v54, 0.0  ;;  %v1533_v52 = vld [vmem:[%s2116_s4 + $0x38] sm:$0xff]  }
  0x9c   :  { %162 = vadd.xlane.f32.xlu0 %v161_v50  ;;  %159 = vadd.xlane.f32.xlu1 %v158_v57  ;;  %v78_v58 = vpop.xlane.xlu0 %77  ;;  %v81_v59 = vpop.xlane.xlu1 %80  ;;  %v1534_v57 = vld [vmem:[%s2117_s1] sm:$0xff]  }
  0x9d   :  { %v113_v61 = vmul.f32 0.015625, %v78_v58  ;;  %v114_v62 = vmul.f32 0.015625, %v81_v59  ;;  %v143_v63 = vmul.f32 %v1776_v55, %v1776_v55  ;;  %v144_v0 = vmul.f32 %v1779_v56, %v1779_v56  ;;  %1392 = vmatprep.subr.bf16.mxu0 %v1533_v52  ;;  %1509 = vmatprep.subr.bf16.mxu1 %v1533_v52  ;;  %v1535_v58 = vld [vmem:[%s2116_s4] sm:$0xff]  }
  0x9e   :  { %1393 = vmatpush3.bf16.msra.mxu0 %v1533_v52  ;;  %1513 = vmatpush3.bf16.msra.mxu1 %v1533_v52 }
  0x9f   :  { %v1788_v1 = vsub.f32 %v1686_v12, %v113_v61  ;;  %v1791_v2 = vsub.f32 %v1691_v13, %v114_v62  ;;  %v167_v3 = vsel %vm57_vm0, %v143_v63, 0.0  ;;  %v170_v6 = vsel %vm57_vm0, %v144_v0, 0.0  ;;  %1394 = vmatprep.mubr.msk.bf16.mxu0 %vm57_vm0, %v1534_v57  ;;  %1410 = vmatprep.subr.bf16.mxu0 %v1535_v58  ;;  %v1537_v61 = vld [vmem:[%s2116_s4 + $0x8] sm:$0xff]   ;;  %v1538_v62 = vld [vmem:[%s2117_s1 + $0x10] sm:$0xff]   ;;  %v1540_v0 = vld [vmem:[%s2117_s1 + $0x18] sm:$0xff]  }
  0xa0   :  { %165 = vadd.xlane.f32.xlu1 %v164_v60  ;;  %168 = vadd.xlane.f32.xlu0 %v167_v3  ;;  %v84_v4 = vpop.xlane.xlu0 %83  ;;  %v87_v5 = vpop.xlane.xlu1 %86  ;;  %v1536_v60 = vld [vmem:[%s2117_s1 + $0x8] sm:$0xff]   ;;  %v1539_v63 = vld [vmem:[%s2116_s4 + $0x10] sm:$0xff]   ;;  %v1541_v3 = vld [vmem:[%s2116_s4 + $0x18] sm:$0xff]  }
  0xa1   :  { %v115_v7 = vmul.f32 0.015625, %v84_v4  ;;  %v116_v8 = vmul.f32 0.015625, %v87_v5  ;;  %v145_v9 = vmul.f32 %v1788_v1, %v1788_v1  ;;  %v146_v10 = vmul.f32 %v1791_v2, %v1791_v2  ;;  %1395 = vmatmul.mubr.msk.bf16.vlgmr.msra.gmra.mrb[0].mxu0 %vm57_vm0, %v1536_v60  ;;  %v1542_v4 = vld [vmem:[%s2117_s1 + $0x20] sm:$0xff]   ;;  %v1543_v5 = vld [vmem:[%s2117_s1 + $0x28] sm:$0xff]  }
  0xa2   :  { %1411 = vmatpush3.bf16.msra.mxu0 %v1535_v58  ;;  %1398 = vmatprep.mubr.msk.bf16.mxu0 %vm57_vm0, %v1538_v62 }
  0xa3   :  { %v1800_v11 = vsub.f32 %v1700_v16, %v115_v7  ;;  %v1803_v12 = vsub.f32 %v1705_v17, %v116_v8  ;;  %v173_v13 = vsel %vm57_vm0, %v145_v9, 0.0  ;;  %v176_v18 = vsel %vm57_vm0, %v146_v10, 0.0  ;;  %1412 = vmatprep.subr.bf16.mxu0 %v1537_v61  ;;  %1402 = vmatprep.mubr.msk.bf16.mxu1 %vm57_vm0, %v1542_v4  ;;  %v1545_v7 = vld [vmem:[%s2117_s1 + $0x38] sm:$0xff]   ;;  %v1546_v8 = vld [vmem:[%s2118_s6] sm:$0xff]   ;;  %v1547_v9 = vld [vmem:[%s2118_s6 + $0x8] sm:$0xff]  }
  0xa4   :  { %171 = vadd.xlane.f32.xlu1 %v170_v6  ;;  %174 = vadd.xlane.f32.xlu0 %v173_v13  ;;  %v90_v14 = vpop.xlane.xlu0 %89  ;;  %v93_v15 = vpop.xlane.xlu1 %92  ;;  %v1544_v6 = vld [vmem:[%s2117_s1 + $0x30] sm:$0xff]  }
  0xa5   :  { %v117_v19 = vmul.f32 0.015625, %v90_v14  ;;  %v118_v22 = vmul.f32 0.015625, %v93_v15  ;;  %v147_v23 = vmul.f32 %v1800_v11, %v1800_v11  ;;  %v148_v16 = vmul.f32 %v1803_v12, %v1803_v12  ;;  %1403 = vmatmul.mubr.msk.bf16.vlgmr.msra.gmra.mrb[0].mxu1 %vm57_vm0, %v1543_v5  ;;  %1434 = vmatprep.subr.bf16.mxu1 %v1546_v8 }
  0xa6   :  { %1413 = vmatpush3.bf16.msra.mxu0 %v1537_v61  ;;  %1406 = vmatprep.mubr.msk.bf16.mxu1 %vm57_vm0, %v1544_v6 }
  0xa7   :  { %v1812_v26 = vsub.f32 %v1714_v20, %v117_v19  ;;  %v1815_v17 = vsub.f32 %v1719_v21, %v118_v22  ;;  %v179_v27 = vsel %vm57_vm0, %v147_v23, 0.0  ;;  %v182_v33 = vsel %vm57_vm0, %v148_v16, 0.0  ;;  %1414 = vmatprep.subr.bf16.mxu0 %v1539_v63  ;;  %1435 = vmatpush3.bf16.msra.mxu1 %v1546_v8 }
  0xa8   :  { %177 = vadd.xlane.f32.xlu1 %v176_v18  ;;  %180 = vadd.xlane.f32.xlu0 %v179_v27  ;;  %v96_v31 = vpop.xlane.xlu0 %95  ;;  %v99_v32 = vpop.xlane.xlu1 %98 }
  0xa9   :  { %v119_v34 = vmul.f32 0.015625, %v96_v31  ;;  %v120_v35 = vmul.f32 0.015625, %v99_v32  ;;  %v149_v20 = vmul.f32 %v1812_v26, %v1812_v26  ;;  %v150_v21 = vmul.f32 %v1815_v17, %v1815_v17  ;;  %1399 = vmatmul.mubr.msk.bf16.gmra.mrb[4].mxu0 %vm57_vm0, %v1540_v0  ;;  %1436 = vmatprep.subr.bf16.mxu1 %v1547_v9 }
  0xaa   :  { %1415 = vmatpush3.bf16.msra.mxu0 %v1539_v63 }
  0xab   :  { %v1827_v36 = vsub.f32 %v1728_v24, %v119_v34  ;;  %v1830_v39 = vsub.f32 %v1733_v25, %v120_v35  ;;  %v185_v40 = vsel %vm57_vm0, %v149_v20, 0.0  ;;  %v188_v43 = vsel %vm57_vm0, %v150_v21, 0.0  ;;  %1416 = vmatprep.subr.bf16.mxu0 %v1541_v3  ;;  %1437 = vmatpush3.bf16.msra.mxu1 %v1547_v9 }
  0xac   :  { %183 = vadd.xlane.f32.xlu1 %v182_v33  ;;  %186 = vadd.xlane.f32.xlu0 %v185_v40  ;;  %v102_v41 = vpop.xlane.xlu0 %101  ;;  %v105_v42 = vpop.xlane.xlu1 %104 }
  0xad   :  { %v121_v47 = vmul.f32 0.015625, %v102_v41  ;;  %v122_v48 = vmul.f32 0.015625, %v105_v42  ;;  %v151_v24 = vmul.f32 %v1827_v36, %v1827_v36  ;;  %v152_v25 = vmul.f32 %v1830_v39, %v1830_v39  ;;  %1407 = vmatmul.mubr.msk.bf16.gmra.mrb[4].mxu1 %vm57_vm0, %v1545_v7 }
  0xae   :  { %1417 = vmatpush3.bf16.msra.mxu0 %v1541_v3 }
  0xaf   :  { %v1842_v49 = vsub.f32 %v1742_v28, %v121_v47  ;;  %v1845_v50 = vsub.f32 %v1747_v29, %v122_v48  ;;  %v191_v51 = vsel %vm57_vm0, %v151_v24, 0.0  ;;  %v194_v53 = vsel %vm57_vm0, %v152_v25, 0.0  ;;  %v1912_v24 = vld [vmem:[%s2119_s2] ss:$0 sm:$0xff] }
  0xb0   :  { %189 = vadd.xlane.f32.xlu1 %v188_v43  ;;  %192 = vadd.xlane.f32.xlu0 %v191_v51 }
  0xb1   :  { %v153_v54 = vmul.f32 %v1842_v49, %v1842_v49  ;;  %v154_v28 = vmul.f32 %v1845_v50, %v1845_v50 }
  0xb3   :  { %v197_v29 = vsel %vm57_vm0, %v153_v54, 0.0  ;;  %v200_v59 = vsel %vm57_vm0, %v154_v28, 0.0 }
  0xb4   :  { %195 = vadd.xlane.f32.xlu1 %v194_v53  ;;  %198 = vadd.xlane.f32.xlu0 %v197_v29 }
  0xb8   :  { %201 = vadd.xlane.f32.xlu1 %v200_v59  ;;  %v1919_v59 = vld [vmem:[%s2120_s3] ss:$0 sm:$0xff] }
 0x125   :  { %v157_v10 = vpop.xlane.xlu0 %156 }
 0x126   :  { %v203_v13 = vmul.f32 0.015625, %v157_v10 }
 0x128   :  { %v219_v14 = vadd.f32 1e-05, %v203_v13 }
 0x129   :  { %v160_v15 = vpop.xlane.xlu1 %159  ;;  %v163_v18 = vpop.xlane.xlu0 %162 }
 0x12a   :  { %1558 = vrsqrt.f32 %v219_v14  ;;  %v204_v19 = vmul.f32 0.015625, %v160_v15  ;;  %v205_v22 = vmul.f32 0.015625, %v163_v18 }
 0x12c   :  { %v220_v23 = vadd.f32 1e-05, %v204_v19  ;;  %v221_v16 = vadd.f32 1e-05, %v205_v22 }
 0x12d   :  { %v166_v27 = vpop.xlane.xlu1 %165  ;;  %v169_v30 = vpop.xlane.xlu0 %168 }
 0x12e   :  { %1560 = vrsqrt.f32 %v220_v23  ;;  %v206_v31 = vmul.f32 0.015625, %v166_v27  ;;  %v207_v32 = vmul.f32 0.015625, %v169_v30 }
 0x12f   :  { %1562 = vrsqrt.f32 %v221_v16 }
 0x130   :  { %v222_v33 = vadd.f32 1e-05, %v206_v31  ;;  %v223_v34 = vadd.f32 1e-05, %v207_v32 }
 0x131   :  { %v172_v35 = vpop.xlane.xlu1 %171  ;;  %v175_v20 = vpop.xlane.xlu0 %174 }
 0x132   :  { %1564 = vrsqrt.f32 %v222_v33  ;;  %v208_v21 = vmul.f32 0.015625, %v172_v35  ;;  %v209_v40 = vmul.f32 0.015625, %v175_v20 }
 0x133   :  { %1566 = vrsqrt.f32 %v223_v34 }
 0x134   :  { %v1559_v41 = vpop.eup %1558  ;;  %v224_v42 = vadd.f32 1e-05, %v208_v21  ;;  %v225_v43 = vadd.f32 1e-05, %v209_v40 }
 0x135   :  { %v251_v44 = vmul.f32 %v1559_v41, %v1756_v37  ;;  %v178_v47 = vpop.xlane.xlu1 %177  ;;  %v181_v48 = vpop.xlane.xlu0 %180 }
 0x136   :  { %1568 = vrsqrt.f32 %v224_v42  ;;  %v210_v25 = vmul.f32 0.015625, %v178_v47  ;;  %v211_v51 = vmul.f32 0.015625, %v181_v48 }
 0x137   :  { %1570 = vrsqrt.f32 %v225_v43  ;;  %v273_v37 = vmul.f32 %v1912_v24, %v251_v44 }
 0x138   :  { %v1561_v52 = vpop.eup %1560  ;;  %v226_v53 = vadd.f32 1e-05, %v210_v25  ;;  %v227_v54 = vadd.f32 1e-05, %v211_v51 }
 0x139   :  { %v1563_v28 = vpop.eup %1562  ;;  %v252_v29 = vmul.f32 %v1561_v52, %v1765_v45  ;;  %v184_v57 = vpop.xlane.xlu1 %183  ;;  %v295_v9 = vadd.f32 %v1919_v59, %v273_v37 }
 0x13a   :  { %v187_v58 = vpop.xlane.xlu0 %186  ;;  %v253_v60 = vmul.f32 %v1563_v28, %v1758_v38  ;;  %1572 = vrsqrt.f32 %v226_v53  ;;  %v212_v61 = vmul.f32 0.015625, %v184_v57 }
 0x13b   :  { %v213_v62 = vmul.f32 0.015625, %v187_v58  ;;  %1574 = vrsqrt.f32 %v227_v54  ;;  %v274_v63 = vmul.f32 %v1912_v24, %v252_v29 }
 0x13c   :  { %v1565_v0 = vpop.eup %1564  ;;  %v275_v45 = vmul.f32 %v1912_v24, %v253_v60  ;;  %v228_v3 = vadd.f32 1e-05, %v212_v61 }
 0x13d   :  { %v229_v4 = vadd.f32 1e-05, %v213_v62  ;;  %v1567_v5 = vpop.eup %1566  ;;  %v254_v6 = vmul.f32 %v1565_v0, %v1767_v46  ;;  %v190_v7 = vpop.xlane.xlu1 %189  ;;  %v296_v38 = vadd.f32 %v1919_v59, %v274_v63 }
 0x13e   :  { %v193_v8 = vpop.xlane.xlu0 %192  ;;  %v255_v10 = vmul.f32 %v1567_v5, %v1776_v55  ;;  %1576 = vrsqrt.f32 %v228_v3  ;;  %v214_v13 = vmul.f32 0.015625, %v190_v7  ;;  %v297_v22 = vadd.f32 %v1919_v59, %v275_v45 }
 0x13f   :  { %v276_v14 = vmul.f32 %v1912_v24, %v254_v6  ;;  %1578 = vrsqrt.f32 %v229_v4  ;;  %v215_v15 = vmul.f32 0.015625, %v193_v8  ;;  %v311_v18 = vpack.c.bf16 %v296_v38, %v295_v9 }
 0x140   :  { %v1569_v19 = vpop.eup %1568  ;;  %v230_v23 = vadd.f32 1e-05, %v214_v13  ;;  %v277_v32 = vmul.f32 %v1912_v24, %v255_v10 }
 0x141   :  { %v1571_v46 = vpop.eup %1570  ;;  %v298_v16 = vadd.f32 %v1919_v59, %v276_v14  ;;  %v256_v27 = vmul.f32 %v1569_v19, %v1779_v56  ;;  %v231_v30 = vadd.f32 1e-05, %v215_v15  ;;  %v196_v31 = vpop.xlane.xlu1 %195  ;;  %1418 = vmatprep.mubr.msk.bf16.mxu0 %vm57_vm0, %v311_v18 }
 0x142   :  { %v199_v55 = vpop.xlane.xlu0 %198  ;;  %v257_v33 = vmul.f32 %v1571_v46, %v1788_v1  ;;  %1580 = vrsqrt.f32 %v230_v23  ;;  %v216_v34 = vmul.f32 0.015625, %v196_v31  ;;  %v299_v47 = vadd.f32 %v1919_v59, %v277_v32 }
 0x143   :  { %v217_v35 = vmul.f32 0.015625, %v199_v55  ;;  %1582 = vrsqrt.f32 %v231_v30  ;;  %v312_v20 = vpack.c.bf16 %v298_v16, %v297_v22  ;;  %v278_v21 = vmul.f32 %v1912_v24, %v256_v27  ;;  %v1549_v27 = vld [vmem:[%s2118_s6 + $0x18] sm:$0xff]  }
 0x144   :  { %v1573_v40 = vpop.eup %1572  ;;  %v232_v41 = vadd.f32 1e-05, %v216_v34  ;;  %v279_v48 = vmul.f32 %v1912_v24, %v257_v33 }
 0x145   :  { %v233_v42 = vadd.f32 1e-05, %v217_v35  ;;  %v1575_v56 = vpop.eup %1574  ;;  %v258_v43 = vmul.f32 %v1573_v40, %v1791_v2  ;;  %v202_v44 = vpop.xlane.xlu1 %201  ;;  %1419 = vmatmul.mubr.msk.bf16.vlgmr.msra.gmra.mrb[0].mxu0 %vm57_vm0, %v312_v20  ;;  %v300_v1 = vadd.f32 %v1919_v59, %v278_v21  ;;  %v1550_v35 = vld [vmem:[%s2121_s8] sm:$0xff]  }
 0x146   :  { %v259_v25 = vmul.f32 %v1575_v56, %v1800_v11  ;;  %1584 = vrsqrt.f32 %v232_v41  ;;  %v218_v51 = vmul.f32 0.015625, %v202_v44  ;;  %v301_v57 = vadd.f32 %v1919_v59, %v279_v48  ;;  %v1994_v20 = vld [vmem:[%s2122_s5] ss:$0 sm:$0xff] }
 0x147   :  { %1586 = vrsqrt.f32 %v233_v42  ;;  %v313_v52 = vpack.c.bf16 %v300_v1, %v299_v47  ;;  %v280_v53 = vmul.f32 %v1912_v24, %v258_v43 }
 0x148   :  { %v1577_v54 = vpop.eup %1576  ;;  %v234_v28 = vadd.f32 1e-05, %v218_v51  ;;  %v281_v37 = vmul.f32 %v1912_v24, %v259_v25 }
 0x149   :  { %v1579_v2 = vpop.eup %1578  ;;  %v260_v29 = vmul.f32 %v1577_v54, %v1803_v12  ;;  %1422 = vmatprep.mubr.msk.bf16.mxu0 %vm57_vm0, %v313_v52  ;;  %v302_v58 = vadd.f32 %v1919_v59, %v280_v53 }
 0x14a   :  { %v261_v11 = vmul.f32 %v1579_v2, %v1812_v26  ;;  %1588 = vrsqrt.f32 %v234_v28  ;;  %v303_v12 = vadd.f32 %v1919_v59, %v281_v37 }
 0x14b   :  { %v314_v60 = vpack.c.bf16 %v302_v58, %v301_v57  ;;  %v282_v61 = vmul.f32 %v1912_v24, %v260_v29  ;;  %v1551_v29 = vld [vmem:[%s2121_s8 + $0x8] sm:$0xff]  }
 0x14c   :  { %v1581_v62 = vpop.eup %1580  ;;  %v283_v3 = vmul.f32 %v1912_v24, %v261_v11 }
 0x14d   :  { %v1583_v63 = vpop.eup %1582  ;;  %v262_v0 = vmul.f32 %v1581_v62, %v1815_v17  ;;  %1423 = vmatmul.mubr.msk.bf16.gmra.mrb[4].mxu0 %vm57_vm0, %v314_v60  ;;  %v304_v45 = vadd.f32 %v1919_v59, %v282_v61 }
 0x14e   :  { %v263_v4 = vmul.f32 %v1583_v63, %v1827_v36  ;;  %v305_v17 = vadd.f32 %v1919_v59, %v283_v3  ;;  %v1552_v63 = vld [vmem:[%s2121_s8 + $0x10] sm:$0xff]  }
 0x14f   :  { %v315_v5 = vpack.c.bf16 %v304_v45, %v303_v12  ;;  %v284_v26 = vmul.f32 %v1912_v24, %v262_v0 }
 0x150   :  { %v1585_v6 = vpop.eup %1584  ;;  %v285_v38 = vmul.f32 %v1912_v24, %v263_v4 }
 0x151   :  { %v1587_v7 = vpop.eup %1586  ;;  %v264_v8 = vmul.f32 %v1585_v6, %v1830_v39  ;;  %1426 = vmatprep.mubr.msk.bf16.mxu0 %vm57_vm0, %v315_v5  ;;  %v306_v9 = vadd.f32 %v1919_v59, %v284_v26 }
 0x152   :  { %v265_v10 = vmul.f32 %v1587_v7, %v1842_v49  ;;  %v307_v39 = vadd.f32 %v1919_v59, %v285_v38 }
 0x153   :  { %v316_v13 = vpack.c.bf16 %v306_v9, %v305_v17  ;;  %v286_v36 = vmul.f32 %v1912_v24, %v264_v8 }
 0x154   :  { %v1589_v14 = vpop.eup %1588  ;;  %v287_v19 = vmul.f32 %v1912_v24, %v265_v10 }
 0x155   :  { %v266_v15 = vmul.f32 %v1589_v14, %v1845_v50  ;;  %1427 = vmatmul.mubr.msk.bf16.gmra.mrb[8].mxu0 %vm57_vm0, %v316_v13  ;;  %v308_v18 = vadd.f32 %v1919_v59, %v286_v36  ;;  %v1548_v50 = vld [vmem:[%s2118_s6 + $0x10] sm:$0xff]  }
 0x156   :  { %v309_v49 = vadd.f32 %v1919_v59, %v287_v19  ;;  %1438 = vmatprep.subr.bf16.mxu1 %v1548_v50 }
 0x157   :  { %v317_v22 = vpack.c.bf16 %v308_v18, %v307_v39  ;;  %v288_v23 = vmul.f32 %v1912_v24, %v266_v15  ;;  %1439 = vmatpush3.bf16.msra.mxu1 %v1548_v50 }
 0x158   :  { %1440 = vmatprep.subr.bf16.mxu1 %v1549_v27 }
 0x159   :  { %1430 = vmatprep.mubr.msk.bf16.mxu0 %vm57_vm0, %v317_v22  ;;  %v310_v46 = vadd.f32 %v1919_v59, %v288_v23 }
 0x15b   :  { %v318_v16 = vpack.c.bf16 %v310_v46, %v309_v49  ;;  %1441 = vmatpush3.bf16.msra.mxu1 %v1549_v27 }
 0x15c   :  { %1458 = vmatprep.subr.bf16.mxu1 %v1550_v35 }
 0x15d   :  { %1431 = vmatmul.mubr.msk.bf16.gmra.mrb[12].mxu0 %vm57_vm0, %v318_v16 }
 0x178   :  { %v1404_v24 = vpop.f32.mrb[0].mxu1 }
 0x179   :  { %v505_v30 = vpop.f32.mrb[1].mxu1 }
 0x17a   :  { %v1405_v31 = vpop.f32.mrb[2].mxu1 }
 0x17b   :  { %v508_v55 = vpop.f32.mrb[3].mxu1 }
 0x180   :  { %v1980_v59 = vpop.f32.mrb[4].mxu1 }
 0x181   :  { %v1982_v32 = vpop.f32.mrb[5].mxu1 }
 0x182   :  { %v1984_v33 = vpop.f32.mrb[6].mxu1 }
 0x183   :  { %v1986_v34 = vpop.f32.mrb[7].mxu1 }
 0x218   :  { %v1420_v21 = vpop.f32.mrb[0].mxu0 }
 0x219   :  { %v690_v40 = vadd.f32 %v1420_v21, %v1994_v20  ;;  %v618_v41 = vpop.f32.mrb[1].mxu0 }
 0x21a   :  { %v688_v42 = vadd.f32 %v1994_v20, %v618_v41  ;;  %v1421_v56 = vpop.f32.mrb[2].mxu0 }
 0x21b   :  { %v691_v43 = vadd.f32 %v1421_v56, %v1994_v20  ;;  %v621_v44 = vpop.f32.mrb[3].mxu0  ;;  %v706_v1 = vmax.f32 %v690_v40, 0.0 }
 0x21c   :  { %v689_v47 = vadd.f32 %v1994_v20, %v621_v44  ;;  %v704_v25 = vmax.f32 %v688_v42, 0.0 }
 0x21d   :  { %v707_v48 = vmax.f32 %v691_v43, 0.0  ;;  %v1556_v43 = vld [vmem:[%s2123_s10 + $0x10] sm:$0xff]  }
 0x21e   :  { %v705_v51 = vmax.f32 %v689_v47, 0.0  ;;  %v1288_v47 = vld [vmem:[%s2124_s7] ss:$0 sm:$0xff] }
 0x21f   :  { %v721_v52 = vpack.c.bf16 %v707_v48, %v706_v1 }
 0x220   :  { %v720_v53 = vpack.c.bf16 %v705_v51, %v704_v25  ;;  %v1424_v54 = vpop.f32.mrb[4].mxu0 }
 0x221   :  { %v694_v28 = vadd.f32 %v1424_v54, %v1994_v20  ;;  %v634_v2 = vpop.f32.mrb[5].mxu0 }
 0x222   :  { %v692_v57 = vadd.f32 %v1994_v20, %v634_v2  ;;  %v1425_v58 = vpop.f32.mrb[6].mxu0  ;;  %1442 = vmatprep.mubr.msk.bf16.mxu1 %vm57_vm0, %v720_v53 }
 0x223   :  { %v695_v37 = vadd.f32 %v1425_v58, %v1994_v20  ;;  %v637_v11 = vpop.f32.mrb[7].mxu0  ;;  %1443 = vmatmul.mubr.msk.bf16.vlgmr.msra.gmra.mrb[8].mxu1 %vm57_vm0, %v721_v52  ;;  %v710_v61 = vmax.f32 %v694_v28, 0.0 }
 0x224   :  { %v693_v60 = vadd.f32 %v1994_v20, %v637_v11  ;;  %1459 = vmatpush3.bf16.msra.mxu1 %v1550_v35  ;;  %v708_v0 = vmax.f32 %v692_v57, 0.0 }
 0x225   :  { %v711_v62 = vmax.f32 %v695_v37, 0.0  ;;  %1460 = vmatprep.subr.bf16.mxu1 %v1551_v29 }
 0x226   :  { %v709_v12 = vmax.f32 %v693_v60, 0.0 }
 0x227   :  { %v723_v45 = vpack.c.bf16 %v711_v62, %v710_v61 }
 0x228   :  { %v722_v3 = vpack.c.bf16 %v709_v12, %v708_v0  ;;  %v1428_v4 = vpop.f32.mrb[8].mxu0  ;;  %1461 = vmatpush3.bf16.msra.mxu1 %v1551_v29 }
 0x229   :  { %v659_v5 = vadd.f32 %v1428_v4, %v1404_v24  ;;  %v650_v26 = vpop.f32.mrb[9].mxu0  ;;  %1462 = vmatprep.subr.bf16.mxu1 %v1552_v63 }
 0x22a   :  { %v651_v6 = vadd.f32 %v650_v26, %v505_v30  ;;  %v1429_v7 = vpop.f32.mrb[10].mxu0  ;;  %1446 = vmatprep.mubr.msk.bf16.mxu1 %vm57_vm0, %v722_v3 }
 0x22b   :  { %v698_v8 = vadd.f32 %v1994_v20, %v659_v5  ;;  %v662_v17 = vadd.f32 %v1429_v7, %v1405_v31  ;;  %v653_v9 = vpop.f32.mrb[11].mxu0  ;;  %1447 = vmatmul.mubr.msk.bf16.gmra.mrb[12].mxu1 %vm57_vm0, %v723_v45 }
 0x22c   :  { %v696_v38 = vadd.f32 %v1994_v20, %v651_v6  ;;  %v654_v10 = vadd.f32 %v653_v9, %v508_v55  ;;  %1463 = vmatpush3.bf16.msra.mxu1 %v1552_v63 }
 0x22d   :  { %v699_v13 = vadd.f32 %v1994_v20, %v662_v17  ;;  %v714_v14 = vmax.f32 %v698_v8, 0.0 }
 0x22e   :  { %v697_v36 = vadd.f32 %v1994_v20, %v654_v10  ;;  %v712_v39 = vmax.f32 %v696_v38, 0.0 }
 0x22f   :  { %v715_v15 = vmax.f32 %v699_v13, 0.0 }
 0x230   :  { %v713_v18 = vmax.f32 %v697_v36, 0.0  ;;  %v1432_v19 = vpop.f32.mrb[12].mxu0 }
 0x231   :  { %v725_v22 = vpack.c.bf16 %v715_v15, %v714_v14  ;;  %v675_v23 = vadd.f32 %v1432_v19, %v1980_v59  ;;  %v666_v49 = vpop.f32.mrb[13].mxu0 }
 0x232   :  { %v724_v46 = vpack.c.bf16 %v713_v18, %v712_v39  ;;  %v667_v16 = vadd.f32 %v666_v49, %v1982_v32  ;;  %v1433_v50 = vpop.f32.mrb[14].mxu0 }
 0x233   :  { %v702_v27 = vadd.f32 %v1994_v20, %v675_v23  ;;  %v678_v24 = vadd.f32 %v1433_v50, %v1984_v33  ;;  %v669_v30 = vpop.f32.mrb[15].mxu0  ;;  %v1553_v33 = vld [vmem:[%s2121_s8 + $0x18] sm:$0xff]   ;;  %v1301_v23 = vld [vmem:[%s2125_s9] ss:$0 sm:$0xff] }
 0x234   :  { %v700_v31 = vadd.f32 %v1994_v20, %v667_v16  ;;  %v670_v55 = vadd.f32 %v669_v30, %v1986_v34  ;;  %1450 = vmatprep.mubr.msk.bf16.mxu1 %vm57_vm0, %v724_v46  ;;  %1464 = vmatprep.subr.bf16.mxu1 %v1553_v33  ;;  %v1554_v34 = vld [vmem:[%s2123_s10] sm:$0xff]  }
 0x235   :  { %v703_v35 = vadd.f32 %v1994_v20, %v678_v24  ;;  %1451 = vmatmul.mubr.msk.bf16.gmra.mrb[16].mxu1 %vm57_vm0, %v725_v22  ;;  %v718_v21 = vmax.f32 %v702_v27, 0.0  ;;  %1482 = vmatprep.subr.bf16.mxu0 %v1554_v34  ;;  %v1557_v22 = vld [vmem:[%s2123_s10 + $0x18] sm:$0xff]  }
 0x236   :  { %v701_v59 = vadd.f32 %v1994_v20, %v670_v55  ;;  %v716_v40 = vmax.f32 %v700_v31, 0.0  ;;  %1465 = vmatpush3.bf16.msra.mxu1 %v1553_v33  ;;  %v1555_v20 = vld [vmem:[%s2123_s10 + $0x8] sm:$0xff]   ;;  %1483 = vmatpush3.bf16.msra.mxu0 %v1554_v34 }
 0x237   :  { %v719_v32 = vmax.f32 %v703_v35, 0.0  ;;  %1484 = vmatprep.subr.bf16.mxu0 %v1555_v20 }
 0x238   :  { %v717_v41 = vmax.f32 %v701_v59, 0.0 }
 0x239   :  { %v727_v42 = vpack.c.bf16 %v719_v32, %v718_v21 }
 0x23a   :  { %v726_v56 = vpack.c.bf16 %v717_v41, %v716_v40  ;;  %1485 = vmatpush3.bf16.msra.mxu0 %v1555_v20 }
 0x23b   :  { %1486 = vmatprep.subr.bf16.mxu0 %v1556_v43 }
 0x23c   :  { %1454 = vmatprep.mubr.msk.bf16.mxu1 %vm57_vm0, %v726_v56 }
 0x23d   :  { %1455 = vmatmul.mubr.msk.bf16.gmra.mrb[20].mxu1 %vm57_vm0, %v727_v42 }
 0x23e   :  { %1487 = vmatpush3.bf16.msra.mxu0 %v1556_v43 }
 0x23f   :  { %1488 = vmatprep.subr.bf16.mxu0 %v1557_v22 }
 0x242   :  { %1489 = vmatpush3.bf16.msra.mxu0 %v1557_v22 }
 0x2f6   :  { %v1444_v44 = vpop.f32.mrb[8].mxu1 }
 0x2f7   :  { %v825_v1 = vpop.f32.mrb[9].mxu1  ;;  %v834_v25 = vadd.f32 %v1444_v44, %v1288_v47 }
 0x2f8   :  { %v1445_v48 = vpop.f32.mrb[10].mxu1  ;;  %v826_v53 = vadd.f32 %v1288_v47, %v825_v1 }
 0x2f9   :  { %v837_v51 = vadd.f32 %v1445_v48, %v1288_v47  ;;  %v828_v52 = vpop.f32.mrb[11].mxu1 }
 0x2fa   :  { %v829_v54 = vadd.f32 %v1288_v47, %v828_v52 }
 0x2fb   :  { %v889_v28 = vpack.c.bf16 %v837_v51, %v834_v25 }
 0x2fc   :  { %v888_v2 = vpack.c.bf16 %v829_v54, %v826_v53 }
 0x2fe   :  { %v1448_v29 = vpop.f32.mrb[12].mxu1  ;;  %1466 = vmatprep.mubr.msk.bf16.mxu1 %vm57_vm0, %v888_v2 }
 0x2ff   :  { %v841_v57 = vpop.f32.mrb[13].mxu1  ;;  %1467 = vmatmul.mubr.msk.bf16.vlgmr.msra.gmra.mrb[24].mxu1 %vm57_vm0, %v889_v28  ;;  %v850_v37 = vadd.f32 %v1448_v29, %v1288_v47 }
 0x300   :  { %v1449_v58 = vpop.f32.mrb[14].mxu1  ;;  %v842_v61 = vadd.f32 %v1288_v47, %v841_v57 }
 0x301   :  { %v853_v11 = vadd.f32 %v1449_v58, %v1288_v47  ;;  %v844_v60 = vpop.f32.mrb[15].mxu1 }
 0x302   :  { %v845_v62 = vadd.f32 %v1288_v47, %v844_v60 }
 0x303   :  { %v891_v63 = vpack.c.bf16 %v853_v11, %v850_v37 }
 0x304   :  { %v890_v0 = vpack.c.bf16 %v845_v62, %v842_v61 }
 0x306   :  { %1470 = vmatprep.mubr.msk.bf16.mxu1 %vm57_vm0, %v890_v0 }
 0x307   :  { %1471 = vmatmul.mubr.msk.bf16.gmra.mrb[28].mxu1 %vm57_vm0, %v891_v63 }
 0x308   :  { %v1452_v12 = vpop.f32.mrb[16].mxu1 }
 0x309   :  { %v857_v45 = vpop.f32.mrb[17].mxu1  ;;  %v866_v4 = vadd.f32 %v1452_v12, %v1288_v47 }
 0x30a   :  { %v1453_v3 = vpop.f32.mrb[18].mxu1  ;;  %v858_v6 = vadd.f32 %v1288_v47, %v857_v45 }
 0x30b   :  { %v869_v5 = vadd.f32 %v1453_v3, %v1288_v47  ;;  %v860_v26 = vpop.f32.mrb[19].mxu1 }
 0x30c   :  { %v861_v7 = vadd.f32 %v1288_v47, %v860_v26 }
 0x30d   :  { %v893_v8 = vpack.c.bf16 %v869_v5, %v866_v4 }
 0x30e   :  { %v892_v17 = vpack.c.bf16 %v861_v7, %v858_v6 }
 0x310   :  { %v1456_v9 = vpop.f32.mrb[20].mxu1  ;;  %1474 = vmatprep.mubr.msk.bf16.mxu1 %vm57_vm0, %v892_v17 }
 0x311   :  { %v873_v38 = vpop.f32.mrb[21].mxu1  ;;  %1475 = vmatmul.mubr.msk.bf16.gmra.mrb[32].mxu1 %vm57_vm0, %v893_v8  ;;  %v882_v13 = vadd.f32 %v1456_v9, %v1288_v47 }
 0x312   :  { %v1457_v10 = vpop.f32.mrb[22].mxu1  ;;  %v874_v15 = vadd.f32 %v1288_v47, %v873_v38 }
 0x313   :  { %v885_v36 = vadd.f32 %v1457_v10, %v1288_v47  ;;  %v876_v14 = vpop.f32.mrb[23].mxu1 }
 0x314   :  { %v877_v39 = vadd.f32 %v1288_v47, %v876_v14 }
 0x315   :  { %v895_v18 = vpack.c.bf16 %v885_v36, %v882_v13 }
 0x316   :  { %v894_v19 = vpack.c.bf16 %v877_v39, %v874_v15 }
 0x318   :  { %1478 = vmatprep.mubr.msk.bf16.mxu1 %vm57_vm0, %v894_v19 }
 0x319   :  { %1479 = vmatmul.mubr.msk.bf16.gmra.mrb[36].mxu1 %vm57_vm0, %v895_v18 }
 0x3d2   :  { %v1468_v49 = vpop.f32.mrb[24].mxu1 }
 0x3d3   :  { %v1002_v46 = vadd.f32 %v1468_v49, %v1301_v23  ;;  %v993_v16 = vpop.f32.mrb[25].mxu1 }
 0x3d4   :  { %v994_v50 = vadd.f32 %v1301_v23, %v993_v16  ;;  %v1469_v27 = vpop.f32.mrb[26].mxu1 }
 0x3d5   :  { %v1005_v24 = vadd.f32 %v1469_v27, %v1301_v23  ;;  %v996_v30 = vpop.f32.mrb[27].mxu1  ;;  %v1058_v55 = vmax.f32 %v1002_v46, 0.0 }
 0x3d6   :  { %v997_v31 = vadd.f32 %v1301_v23, %v996_v30  ;;  %v1056_v59 = vmax.f32 %v994_v50, 0.0 }
 0x3d7   :  { %v1059_v35 = vmax.f32 %v1005_v24, 0.0 }
 0x3d8   :  { %v1057_v21 = vmax.f32 %v997_v31, 0.0 }
 0x3d9   :  { %v1073_v32 = vpack.c.bf16 %v1059_v35, %v1058_v55 }
 0x3da   :  { %v1072_v40 = vpack.c.bf16 %v1057_v21, %v1056_v59  ;;  %v1472_v41 = vpop.f32.mrb[28].mxu1 }
 0x3db   :  { %v1018_v42 = vadd.f32 %v1472_v41, %v1301_v23  ;;  %v1009_v56 = vpop.f32.mrb[29].mxu1 }
 0x3dc   :  { %v1010_v33 = vadd.f32 %v1301_v23, %v1009_v56  ;;  %v1473_v34 = vpop.f32.mrb[30].mxu1  ;;  %1490 = vmatprep.mubr.msk.bf16.mxu0 %vm57_vm0, %v1072_v40 }
 0x3dd   :  { %v1021_v20 = vadd.f32 %v1473_v34, %v1301_v23  ;;  %v1012_v43 = vpop.f32.mrb[31].mxu1  ;;  %1491 = vmatmul.mubr.msk.bf16.vlgmr.msra.gmra.mrb[16].mxu0 %vm57_vm0, %v1073_v32  ;;  %v1062_v47 = vmax.f32 %v1018_v42, 0.0 }
 0x3de   :  { %v1013_v44 = vadd.f32 %v1301_v23, %v1012_v43  ;;  %v1060_v48 = vmax.f32 %v1010_v33, 0.0 }
 0x3df   :  { %v1063_v1 = vmax.f32 %v1021_v20, 0.0 }
 0x3e0   :  { %v1061_v25 = vmax.f32 %v1013_v44, 0.0 }
 0x3e1   :  { %v1075_v51 = vpack.c.bf16 %v1063_v1, %v1062_v47 }
 0x3e2   :  { %v1074_v52 = vpack.c.bf16 %v1061_v25, %v1060_v48 }
 0x3e4   :  { %v1476_v53 = vpop.f32.mrb[32].mxu1  ;;  %1494 = vmatprep.mubr.msk.bf16.mxu0 %vm57_vm0, %v1074_v52 }
 0x3e5   :  { %v1034_v54 = vadd.f32 %v1476_v53, %v1301_v23  ;;  %v1025_v28 = vpop.f32.mrb[33].mxu1  ;;  %1495 = vmatmul.mubr.msk.bf16.gmra.mrb[20].mxu0 %vm57_vm0, %v1075_v51 }
 0x3e6   :  { %v1026_v2 = vadd.f32 %v1301_v23, %v1025_v28  ;;  %v1477_v29 = vpop.f32.mrb[34].mxu1 }
 0x3e7   :  { %v1037_v57 = vadd.f32 %v1477_v29, %v1301_v23  ;;  %v1028_v58 = vpop.f32.mrb[35].mxu1  ;;  %v1066_v11 = vmax.f32 %v1034_v54, 0.0 }
 0x3e8   :  { %v1029_v37 = vadd.f32 %v1301_v23, %v1028_v58  ;;  %v1064_v61 = vmax.f32 %v1026_v2, 0.0 }
 0x3e9   :  { %v1067_v60 = vmax.f32 %v1037_v57, 0.0 }
 0x3ea   :  { %v1065_v62 = vmax.f32 %v1029_v37, 0.0 }
 0x3eb   :  { %v1077_v63 = vpack.c.bf16 %v1067_v60, %v1066_v11 }
 0x3ec   :  { %v1076_v0 = vpack.c.bf16 %v1065_v62, %v1064_v61  ;;  %v1480_v12 = vpop.f32.mrb[36].mxu1 }
 0x3ed   :  { %v1050_v45 = vadd.f32 %v1480_v12, %v1301_v23  ;;  %v1041_v3 = vpop.f32.mrb[37].mxu1 }
 0x3ee   :  { %v1042_v4 = vadd.f32 %v1301_v23, %v1041_v3  ;;  %v1481_v5 = vpop.f32.mrb[38].mxu1  ;;  %1498 = vmatprep.mubr.msk.bf16.mxu0 %vm57_vm0, %v1076_v0 }
 0x3ef   :  { %v1053_v26 = vadd.f32 %v1481_v5, %v1301_v23  ;;  %v1044_v6 = vpop.f32.mrb[39].mxu1  ;;  %1499 = vmatmul.mubr.msk.bf16.gmra.mrb[24].mxu0 %vm57_vm0, %v1077_v63  ;;  %v1070_v8 = vmax.f32 %v1050_v45, 0.0 }
 0x3f0   :  { %v1045_v7 = vadd.f32 %v1301_v23, %v1044_v6  ;;  %v1068_v9 = vmax.f32 %v1042_v4, 0.0 }
 0x3f1   :  { %v1071_v17 = vmax.f32 %v1053_v26, 0.0 }
 0x3f2   :  { %v1069_v38 = vmax.f32 %v1045_v7, 0.0 }
 0x3f3   :  { %v1079_v10 = vpack.c.bf16 %v1071_v17, %v1070_v8 }
 0x3f4   :  { %v1078_v13 = vpack.c.bf16 %v1069_v38, %v1068_v9 }
 0x3f6   :  { %1502 = vmatprep.mubr.msk.bf16.mxu0 %vm57_vm0, %v1078_v13 }
 0x3f7   :  { %1503 = vmatmul.mubr.msk.bf16.gmra.mrb[28].mxu0 %vm57_vm0, %v1079_v10 }
 0x4b0   :  { %v1492_v36 = vpop.f32.mrb[16].mxu0 }
 0x4b1   :  { %1235 = vst [vmem:[%s2126_s11 + $0x10] sm:$0xff] %v1492_v36  ;;  %v1170_v14 = vpop.f32.mrb[17].mxu0 }
 0x4b2   :  { %1233 = vst [vmem:[%s2126_s11] sm:$0xff] %v1170_v14  ;;  %v1493_v15 = vpop.f32.mrb[18].mxu0 }
 0x4b3   :  { %1236 = vst [vmem:[%s2126_s11 + $0x18] sm:$0xff] %v1493_v15  ;;  %v1173_v39 = vpop.f32.mrb[19].mxu0 }
 0x4b4   :  { %1234 = vst [vmem:[%s2126_s11 + $0x8] sm:$0xff] %v1173_v39 }
 0x4b8   :  { %v1496_v18 = vpop.f32.mrb[20].mxu0 }
 0x4b9   :  { %1239 = vst [vmem:[%s2126_s11 + $0x30] sm:$0xff] %v1496_v18  ;;  %v1186_v19 = vpop.f32.mrb[21].mxu0 }
 0x4ba   :  { %1237 = vst [vmem:[%s2126_s11 + $0x20] sm:$0xff] %v1186_v19  ;;  %v1497_v22 = vpop.f32.mrb[22].mxu0 }
 0x4bb   :  { %1240 = vst [vmem:[%s2126_s11 + $0x38] sm:$0xff] %v1497_v22  ;;  %v1189_v23 = vpop.f32.mrb[23].mxu0 }
 0x4bc   :  { %1238 = vst [vmem:[%s2126_s11 + $0x28] sm:$0xff] %v1189_v23 }
 0x4c2   :  { %v1500_v49 = vpop.f32.mrb[24].mxu0 }
 0x4c3   :  { %1243 = vst [vmem:[%s2126_s11 + $0x50] sm:$0xff] %v1500_v49  ;;  %v1202_v46 = vpop.f32.mrb[25].mxu0 }
 0x4c4   :  { %1241 = vst [vmem:[%s2126_s11 + $0x40] sm:$0xff] %v1202_v46  ;;  %v1501_v16 = vpop.f32.mrb[26].mxu0 }
 0x4c5   :  { %1244 = vst [vmem:[%s2126_s11 + $0x58] sm:$0xff] %v1501_v16  ;;  %v1205_v50 = vpop.f32.mrb[27].mxu0 }
 0x4c6   :  { %1242 = vst [vmem:[%s2126_s11 + $0x48] sm:$0xff] %v1205_v50 }
 0x4ca   :  { %v1504_v27 = vpop.f32.mrb[28].mxu0 }
 0x4cb   :  { %1247 = vst [vmem:[%s2126_s11 + $0x70] sm:$0xff] %v1504_v27  ;;  %v1218_v24 = vpop.f32.mrb[29].mxu0 }
 0x4cc   :  { %1245 = vst [vmem:[%s2126_s11 + $0x60] sm:$0xff] %v1218_v24  ;;  %v1505_v30 = vpop.f32.mrb[30].mxu0 }
 0x4cd   :  { %1248 = vst [vmem:[%s2126_s11 + $0x78] sm:$0xff] %v1505_v30  ;;  %v1221_v31 = vpop.f32.mrb[31].mxu0 }
 0x4ce   :  { %1246 = vst [vmem:[%s2126_s11 + $0x68] sm:$0xff] %v1221_v31 }

</bundles_post_ra>
